<compile_context>
chip_gen: v7x
topology: tpu7x:2x2x1
jax: 0.10.0
libtpu: 0.0.40
codegen_flags: <defaults>
</compile_context>

<pallas_src>
import math
from functools import partial

import jax
import jax.numpy as jnp
from jax import lax
from jax.experimental import pallas as pl
from jax.experimental.pallas import tpu as pltpu

NUM_HEADS = 8
VMEM_LIMIT = 32 << 20          # fits largest branch single-buffered; < 64 MiB v7x

_NN = (((1,), (0,)), ((), ()))     # a(M,K) @ b(K,N)
_NT = (((1,), (1,)), ((), ()))     # a(M,K) @ b(N,K)^T


def _mm(a, b, dims=_NN):
    return lax.dot_general(a, b, dims, preferred_element_type=jnp.float32)


# ----------------------------------------------------------------------------
# In-kernel building blocks
# ----------------------------------------------------------------------------
def _mha_heads(qp, kp, vp, wo, bo, *, batch, lq, lk, nh):
    """Multi-head cross attention on batch-folded activations.

    qp : (batch*lq, E) f32  query projection (softmax scale folded in)
    kp : (batch*lk, E) f32  key projection
    vp : (batch*lk, E) f32  value projection
    wo : (E, E)        bf16 output projection weight (unpadded)
    bo : (1, E)        f32
    """
    e = qp.shape[1]
    hd = e // nh
    acc = None
    for h in range(nh):                                   # static unroll (8 heads)
        lo = h * hd
        qh = qp[:, lo:lo + hd].astype(jnp.bfloat16)
        kh = kp[:, lo:lo + hd].astype(jnp.bfloat16)
        vh = vp[:, lo:lo + hd].astype(jnp.bfloat16)
        ctx_rows = []
        for b in range(batch):                            # static unroll (tiny B)
            qb = qh[b * lq:(b + 1) * lq]
            kb = kh[b * lk:(b + 1) * lk]
            vb = vh[b * lk:(b + 1) * lk]
            s = _mm(qb, kb, _NT)                          # (lq, lk) f32
            s = s - jnp.max(s, axis=-1, keepdims=True)
            p = jnp.exp(s)
            p = p * pl.reciprocal(jnp.sum(p, axis=-1, keepdims=True), approx=True)
            ctx_rows.append(_mm(p.astype(jnp.bfloat16), vb))      # (lq, hd) f32
        ctx_h = jnp.concatenate(ctx_rows, axis=0).astype(jnp.bfloat16)  # (batch*lq, hd)
        contrib = _mm(ctx_h, wo[lo:lo + hd, :])           # per-head wo accumulation
        acc = contrib if acc is None else acc + contrib
    return acc + bo                                       # (batch*lq, E) f32


def _attention_stream(qp, kv, wkv_ref, bkv_ref, wo_ref, bo_ref, *,
                      batch, lq, lk, nh):
    """One cross-attention stream; k == v so the kv projection is fused."""
    e = wo_ref.shape[1]
    kvp = _mm(kv, wkv_ref[...]) + bkv_ref[...]            # (batch*lk, 2E): k | v
    return _mha_heads(qp, kvp[:, :e], kvp[:, e:], wo_ref[...], bo_ref[...],
                      batch=batch, lq=lq, lk=lk, nh=nh)


def _ffn_residual(x, w1_ref, b1_ref, w2_ref, b2_ref):
    h = _mm(x.astype(jnp.bfloat16), w1_ref[...]) + b1_ref[...]
    h = jnp.maximum(h, 0.0)
    y = _mm(h.astype(jnp.bfloat16), w2_ref[...]) + b2_ref[...]
    return x + y


def _base_fused_kernel(q_ref, feat_ref, lw_ref, lb_ref,
                       wq_ref, bq_ref, wkv_ref, bkv_ref, wo_ref, bo_ref,
                       w1_ref, b1_ref, w2_ref, b2_ref, o_ref,
                       *, batch, lq, lk, nh):
    q = q_ref[...]                                        # (batch*lq, E)  bf16
    feat = feat_ref[...]                                  # (batch*lk, C)  bf16
    kv = (_mm(feat, lw_ref[...]) + lb_ref[...]).astype(jnp.bfloat16)   # (batch*lk, E)
    qp = _mm(q, wq_ref[...]) + bq_ref[...]                # (batch*lq, E) f32
    attn = _attention_stream(qp, kv, wkv_ref, bkv_ref, wo_ref, bo_ref,
                             batch=batch, lq=lq, lk=lk, nh=nh)
    o_ref[...] = _ffn_residual(attn, w1_ref, b1_ref, w2_ref, b2_ref)


def _fusion_fused_kernel(q_ref, feat_ref, lw_ref, lb_ref, wq_ref, bq_ref,
                         wkv1_ref, bkv1_ref, wo1_ref, bo1_ref,
                         wkv2_ref, bkv2_ref, wo2_ref, bo2_ref,
                         w1_ref, b1_ref, w2_ref, b2_ref, o_ref,
                         *, batch, lq, lk, nh):
    e = wo1_ref.shape[1]
    q = q_ref[...]                                        # (batch*lq, E)           bf16
    feat = feat_ref[...]                                  # (2*batch*lk, C): f1|f2  bf16
    kv = (_mm(feat, lw_ref[...]) + lb_ref[...]).astype(jnp.bfloat16)
    kv1 = kv[:batch * lk]
    kv2 = kv[batch * lk:]
    qp = _mm(q, wq_ref[...]) + bq_ref[...]                # (batch*lq, 2E): s1 | s2
    a1 = _attention_stream(qp[:, :e], kv1, wkv1_ref, bkv1_ref, wo1_ref, bo1_ref,
                           batch=batch, lq=lq, lk=lk, nh=nh)
    a2 = _attention_stream(qp[:, e:], kv2, wkv2_ref, bkv2_ref, wo2_ref, bo2_ref,
                           batch=batch, lq=lq, lk=lk, nh=nh)
    o_ref[...] = _ffn_residual(a1 + a2, w1_ref, b1_ref, w2_ref, b2_ref)


# ----------------------------------------------------------------------------
# Wrapper-side layout plumbing (offline, one-time)
# ----------------------------------------------------------------------------
def _flatten_nchw(x):
    # (B, C, H, W) -> .view(B, C, H*W).permute(0, 2, 1) -> (B, L, C)
    B, C, H, W = x.shape
    return x.reshape(B, C, H * W).transpose(0, 2, 1)


def _flatten_tokens(x):
    # (B, C, H, W) -> batch-folded token matrix (B*H*W, C)
    B, C, H, W = x.shape
    return _flatten_nchw(x).reshape(B * H * W, C)


def _prep_mha_params(p, E):
    hd = E // NUM_HEADS
    scale = 1.0 / math.sqrt(hd)
    return dict(
        wq=(p["wq"] * scale).astype(jnp.bfloat16),                         # fold scale
        bq=(p["bq"] * scale).reshape(1, E).astype(jnp.float32),
        wkv=jnp.concatenate([p["wk"], p["wv"]], axis=1).astype(jnp.bfloat16),
        bkv=jnp.concatenate([p["bk"], p["bv"]]).reshape(1, 2 * E).astype(jnp.float32),
        wo=p["wo"].astype(jnp.bfloat16),
        bo=p["bo"].reshape(1, E).astype(jnp.float32))


def _prep_ffn_params(p):
    return dict(w1=p["w1"].astype(jnp.bfloat16),
                b1=p["b1"].reshape(1, -1).astype(jnp.float32),
                w2=p["w2"].astype(jnp.bfloat16),
                b2=p["b2"].reshape(1, -1).astype(jnp.float32))


def _vmem_spec():
    # Full-array VMEM residency; grid=() -> single DMA per operand, no
    # double-buffering of constant weights.
    return pl.BlockSpec(memory_space=pltpu.MemorySpace.VMEM)


# ----------------------------------------------------------------------------
# Branch entry points (mask_feature_fusion hook semantics)
# ----------------------------------------------------------------------------
def base_cross_attention_fuse(out_nchw, feat_nchw, lin_w, lin_b, attn_params):
    """down1 / mid / up1 branches: linear_transform + BaseCrossAttention, fused."""
    B, E, H, W = out_nchw.shape
    C = feat_nchw.shape[1]
    Lq = H * W
    Lk = feat_nchw.shape[2] * feat_nchw.shape[3]

    q = _flatten_tokens(out_nchw).astype(jnp.bfloat16)        # (B*Lq, E)
    feat = _flatten_tokens(feat_nchw).astype(jnp.bfloat16)    # (B*Lk, C)
    mha = _prep_mha_params(attn_params["mha1"], E)
    ffn = _prep_ffn_params(attn_params["ffn"])
    lw = lin_w.astype(jnp.bfloat16)
    lb = lin_b.reshape(1, E).astype(jnp.float32)

    vspec = _vmem_spec()
    fused = pl.pallas_call(
        partial(_base_fused_kernel, batch=B, lq=Lq, lk=Lk, nh=NUM_HEADS),
        out_shape=jax.ShapeDtypeStruct((B * Lq, E), jnp.float32),
        in_specs=[vspec] * 14,
        out_specs=vspec,
        compiler_params=pltpu.CompilerParams(vmem_limit_bytes=VMEM_LIMIT),
    )(q, feat, lw, lb,
      mha["wq"], mha["bq"], mha["wkv"], mha["bkv"], mha["wo"], mha["bo"],
      ffn["w1"], ffn["b1"], ffn["w2"], ffn["b2"])
    # PyTorch does `.view(b, e, w, h)` on the contiguous (B, L, E) tensor: a
    # raw reshape, NOT a permute back — reproduced exactly (bug-compatible).
    return fused.reshape(B, E, H, W)


def fusion_cross_attention_fuse(out_nchw, feat1_nchw, feat2_nchw,
                                lin_w, lin_b, attn_params):
    """down2 / up2 branches: linear_transform + CrossAttentionFusion, fused."""
    B, E, H, W = out_nchw.shape
    C = feat1_nchw.shape[1]
    Lq = H * W
    Lk = feat1_nchw.shape[2] * feat1_nchw.shape[3]

    q = _flatten_tokens(out_nchw).astype(jnp.bfloat16)        # (B*Lq, E)
    feat = jnp.concatenate([_flatten_tokens(feat1_nchw),
                            _flatten_tokens(feat2_nchw)],
                           axis=0).astype(jnp.bfloat16)       # (2*B*Lk, C)
    m1 = _prep_mha_params(attn_params["mha1"], E)
    m2 = _prep_mha_params(attn_params["mha2"], E)
    wq = jnp.concatenate([m1["wq"], m2["wq"]], axis=1)        # shared q -> one proj
    bq = jnp.concatenate([m1["bq"], m2["bq"]], axis=1)
    ffn = _prep_ffn_params(attn_params["ffn"])
    lw = lin_w.astype(jnp.bfloat16)
    lb = lin_b.reshape(1, E).astype(jnp.float32)

    vspec = _vmem_spec()
    fused = pl.pallas_call(
        partial(_fusion_fused_kernel, batch=B, lq=Lq, lk=Lk, nh=NUM_HEADS),
        out_shape=jax.ShapeDtypeStruct((B * Lq, E), jnp.float32),
        in_specs=[vspec] * 18,
        out_specs=vspec,
        compiler_params=pltpu.CompilerParams(vmem_limit_bytes=VMEM_LIMIT),
    )(q, feat, lw, lb, wq, bq,
      m1["wkv"], m1["bkv"], m1["wo"], m1["bo"],
      m2["wkv"], m2["bkv"], m2["wo"], m2["bo"],
      ffn["w1"], ffn["b1"], ffn["w2"], ffn["b2"])
    return fused.reshape(B, E, H, W)


# ----------------------------------------------------------------------------
# Pure-JAX reference (mirrors the kernel's bf16-in / f32-accumulate math)
# ----------------------------------------------------------------------------
def _ref_mha(q, kv, p, E):
    bf = jnp.bfloat16
    hd = E // NUM_HEADS
    scale = 1.0 / math.sqrt(hd)
    mm = lambda a, w: jnp.dot(a.astype(bf), w.astype(bf),
                              preferred_element_type=jnp.float32)
    qp = mm(q, p["wq"] * scale) + p["bq"] * scale
    kp = mm(kv, p["wk"]) + p["bk"]
    vp = mm(kv, p["wv"]) + p["bv"]
    outs = []
    for h in range(NUM_HEADS):
        sl = slice(h * hd, (h + 1) * hd)
        s = jnp.dot(qp[:, sl].astype(bf), kp[:, sl].astype(bf).T,
                    preferred_element_type=jnp.float32)
        s = s - jnp.max(s, axis=-1, keepdims=True)
        pr = jnp.exp(s)
        pr = pr / jnp.sum(pr, axis=-1, keepdims=True)
        outs.append(jnp.dot(pr.astype(bf), vp[:, sl].astype(bf),
                            preferred_element_type=jnp.float32))
    return mm(jnp.concatenate(outs, axis=-1), p["wo"]) + p["bo"]


def _ref_ffn_residual(x, p):
    bf = jnp.bfloat16
    h = jnp.dot(x.astype(bf), p["w1"].astype(bf),
                preferred_element_type=jnp.float32) + p["b1"]
    h = jnp.maximum(h, 0.0)
    y = jnp.dot(h.astype(bf), p["w2"].astype(bf),
                preferred_element_type=jnp.float32) + p["b2"]
    return x + y


def _ref_linear(feat_nchw, lin_w, lin_b):
    bf = jnp.bfloat16
    f = _flatten_nchw(feat_nchw)
    return jnp.einsum("blc,ce->ble", f.astype(bf), lin_w.astype(bf),
                      preferred_element_type=jnp.float32) + lin_b


def _ref_base(out_nchw, feat_nchw, lin_w, lin_b, params):
    B, E, H, W = out_nchw.shape
    q = _flatten_nchw(out_nchw)
    kv = _ref_linear(feat_nchw, lin_w, lin_b)
    attn = jax.vmap(lambda qb, kb: _ref_mha(qb, kb, params["mha1"], E))(q, kv)
    out = jax.vmap(lambda xb: _ref_ffn_residual(xb, params["ffn"]))(attn)
    return out.reshape(B, E, H, W)


def _ref_fusion(out_nchw, f1_nchw, f2_nchw, lin_w, lin_b, params):
    B, E, H, W = out_nchw.shape
    q = _flatten_nchw(out_nchw)
    kv1 = _ref_linear(f1_nchw, lin_w, lin_b)
    kv2 = _ref_linear(f2_nchw, lin_w, lin_b)
    a1 = jax.vmap(lambda qb, kb: _ref_mha(qb, kb, params["mha1"], E))(q, kv1)
    a2 = jax.vmap(lambda qb, kb: _ref_mha(qb, kb, params["mha2"], E))(q, kv2)
    out = jax.vmap(lambda xb: _ref_ffn_residual(xb, params["ffn"]))(a1 + a2)
    return out.reshape(B, E, H, W)


def _rel_err(x, ref):
    return float(jnp.max(jnp.abs(x - ref)) / (jnp.max(jnp.abs(ref)) + 1e-8))


# ----------------------------------------------------------------------------
# Deterministic parameter init
# ----------------------------------------------------------------------------
def _init_lin(key, fan_in, fan_out):
    kw, kb = jax.random.split(key)
    w = jax.random.normal(kw, (fan_in, fan_out), jnp.float32) * 0.02
    b = jax.random.normal(kb, (fan_out,), jnp.float32) * 0.02
    return w, b


def _init_mha(key, E):
    ks = jax.random.split(key, 4)
    wq, bq = _init_lin(ks[0], E, E)
    wk, bk = _init_lin(ks[1], E, E)
    wv, bv = _init_lin(ks[2], E, E)
    wo, bo = _init_lin(ks[3], E, E)
    return dict(wq=wq, bq=bq, wk=wk, bk=bk, wv=wv, bv=bv, wo=wo, bo=bo)


def _init_attn_block(key, E, hidden=256, fusion=False):
    ks = jax.random.split(key, 4)
    params = {"mha1": _init_mha(ks[0], E)}
    if fusion:
        params["mha2"] = _init_mha(ks[1], E)
    w1, b1 = _init_lin(ks[2], E, hidden)
    w2, b2 = _init_lin(ks[3], hidden, E)
    params["ffn"] = dict(w1=w1, b1=b1, w2=w2, b2=b2)
    return params


# ----------------------------------------------------------------------------
if __name__ == "__main__":
    key = jax.random.PRNGKey(0)
    keys = jax.random.split(key, 16)

    B = 2
    FEAT_C = 2048          # ResNet152 layer4.2.conv3 output channels
    fh = fw = 4            # small synthetic spatial size for extractor features

    # TODO(synk): ResNet152 extractor + pretrained weight load are not
    # reproducible in a Pallas kernel; synthetic features stand in here.
    feat1 = jax.random.normal(keys[0], (B, FEAT_C, fh, fw), jnp.float32)
    feat2 = jax.random.normal(keys[1], (B, FEAT_C, fh, fw), jnp.float32)

    # ---- down1: BaseCrossAttention, embed_dim=320 (head_dim=40) ------------
    E1, H1, W1 = 320, 8, 8
    out_down1 = jax.random.normal(keys[2], (B, E1, H1, W1), jnp.float32)
    lin1_w, lin1_b = _init_lin(keys[3], FEAT_C, E1)       # linear_transform1
    attn_down1 = _init_attn_block(keys[4], E1, hidden=256, fusion=False)

    fused1 = jax.block_until_ready(
        base_cross_attention_fuse(out_down1, feat1, lin1_w, lin1_b, attn_down1))
    assert fused1.shape == (B, E1, H1, W1)
    ref1 = jax.block_until_ready(_ref_base(out_down1, feat1, lin1_w, lin1_b, attn_down1))
    e1 = _rel_err(fused1, ref1)
    assert e1 < 2e-2, f"base branch (E=320) mismatch: rel err {e1}"

    # ---- down2: CrossAttentionFusion, embed_dim=640 (head_dim=80) ----------
    E2, H2, W2 = 640, 4, 4
    out_down2 = jax.random.normal(keys[5], (B, E2, H2, W2), jnp.float32)
    lin2_w, lin2_b = _init_lin(keys[6], FEAT_C, E2)       # linear_transform2
    attn_down2 = _init_attn_block(keys[7], E2, hidden=256, fusion=True)

    fused2 = jax.block_until_ready(
        fusion_cross_attention_fuse(out_down2, feat1, feat2,
                                    lin2_w, lin2_b, attn_down2))
    assert fused2.shape == (B, E2, H2, W2)
    ref2 = jax.block_until_ready(
        _ref_fusion(out_down2, feat1, feat2, lin2_w, lin2_b, attn_down2))
    e2 = _rel_err(fused2, ref2)
    assert e2 < 2e-2, f"fusion branch (E=640) mismatch: rel err {e2}"

    # ---- mid: BaseCrossAttention, embed_dim=1280 (head_dim=160 > 128) ------
    # Exercised to show the unpadded path handles the larger-E branches.
    E3, H3, W3 = 1280, 4, 4
    out_mid = jax.random.normal(keys[8], (B, E3, H3, W3), jnp.float32)
    lin3_w, lin3_b = _init_lin(keys[9], FEAT_C, E3)       # linear_transform3
    attn_mid = _init_attn_block(keys[10], E3, hidden=256, fusion=False)

    fused3 = jax.block_until_ready(
        base_cross_attention_fuse(out_mid, feat2, lin3_w, lin3_b, attn_mid))
    assert fused3.shape == (B, E3, H3, W3)
    ref3 = jax.block_until_ready(_ref_base(out_mid, feat2, lin3_w, lin3_b, attn_mid))
    e3 = _rel_err(fused3, ref3)
    assert e3 < 2e-2, f"base branch (E=1280) mismatch: rel err {e3}"

    # TODO(synk): the surrounding UNet2DConditionModel denoising forward (the
    # `self.unet(...).sample` call) is a full pretrained diffusion UNet and is
    # not translated; only the hook's fusion compute is implemented above.

    print("KERNEL_OK")
</pallas_src>

<mosaic_0001>
module attributes {stable_mosaic.version = 11 : i64} {
  func.func @_base_fused_kernel(%arg0: memref<128x320xbf16, #tpu.memory_space<vmem>>, %arg1: memref<32x2048xbf16, #tpu.memory_space<vmem>>, %arg2: memref<2048x320xbf16, #tpu.memory_space<vmem>>, %arg3: memref<1x320xf32, #tpu.memory_space<vmem>>, %arg4: memref<320x320xbf16, #tpu.memory_space<vmem>>, %arg5: memref<1x320xf32, #tpu.memory_space<vmem>>, %arg6: memref<320x640xbf16, #tpu.memory_space<vmem>>, %arg7: memref<1x640xf32, #tpu.memory_space<vmem>>, %arg8: memref<320x320xbf16, #tpu.memory_space<vmem>>, %arg9: memref<1x320xf32, #tpu.memory_space<vmem>>, %arg10: memref<320x256xbf16, #tpu.memory_space<vmem>>, %arg11: memref<1x256xf32, #tpu.memory_space<vmem>>, %arg12: memref<256x320xbf16, #tpu.memory_space<vmem>>, %arg13: memref<1x320xf32, #tpu.memory_space<vmem>>, %arg14: memref<128x320xf32, #tpu.memory_space<vmem>>) attributes {dimension_semantics = [], scalar_prefetch = 0 : i64, scratch_operands = 0 : i64, tpu.core_type = #tpu.core_type<tc>} {
    %c0 = arith.constant 0 : index
    %c0_0 = arith.constant 0 : index
    %0 = vector.load %arg0[%c0, %c0_0] : memref<128x320xbf16, #tpu.memory_space<vmem>>, vector<128x320xbf16>
    %c0_1 = arith.constant 0 : index
    %c0_2 = arith.constant 0 : index
    %1 = vector.load %arg1[%c0_1, %c0_2] : memref<32x2048xbf16, #tpu.memory_space<vmem>>, vector<32x2048xbf16>
    %c0_3 = arith.constant 0 : index
    %c0_4 = arith.constant 0 : index
    %2 = vector.load %arg2[%c0_3, %c0_4] : memref<2048x320xbf16, #tpu.memory_space<vmem>>, vector<2048x320xbf16>
    %cst = arith.constant dense<0.000000e+00> : vector<32x320xf32>
    %3 = tpu.matmul %1, %2, %cst {dimension_numbers = #tpu.dot_dimension_numbers<[1], [0], [0], [1], [0, 0, 1, 1], [], []>} : vector<32x2048xbf16>, vector<2048x320xbf16>, vector<32x320xf32> -> vector<32x320xf32>
    %c0_5 = arith.constant 0 : index
    %c0_6 = arith.constant 0 : index
    %4 = vector.load %arg3[%c0_5, %c0_6] : memref<1x320xf32, #tpu.memory_space<vmem>>, vector<1x320xf32>
    %5 = vector.broadcast %4 : vector<1x320xf32> to vector<32x320xf32>
    %6 = arith.addf %3, %5 : vector<32x320xf32>
    %7 = arith.truncf %6 : vector<32x320xf32> to vector<32x320xbf16>
    %c0_7 = arith.constant 0 : index
    %c0_8 = arith.constant 0 : index
    %8 = vector.load %arg4[%c0_7, %c0_8] : memref<320x320xbf16, #tpu.memory_space<vmem>>, vector<320x320xbf16>
    %cst_9 = arith.constant dense<0.000000e+00> : vector<128x320xf32>
    %9 = tpu.matmul %0, %8, %cst_9 {dimension_numbers = #tpu.dot_dimension_numbers<[1], [0], [0], [1], [0, 0, 1, 1], [], []>} : vector<128x320xbf16>, vector<320x320xbf16>, vector<128x320xf32> -> vector<128x320xf32>
    %c0_10 = arith.constant 0 : index
    %c0_11 = arith.constant 0 : index
    %10 = vector.load %arg5[%c0_10, %c0_11] : memref<1x320xf32, #tpu.memory_space<vmem>>, vector<1x320xf32>
    %11 = vector.broadcast %10 : vector<1x320xf32> to vector<128x320xf32>
    %12 = arith.addf %9, %11 : vector<128x320xf32>
    %c0_12 = arith.constant 0 : index
    %c0_13 = arith.constant 0 : index
    %13 = vector.load %arg6[%c0_12, %c0_13] : memref<320x640xbf16, #tpu.memory_space<vmem>>, vector<320x640xbf16>
    %cst_14 = arith.constant dense<0.000000e+00> : vector<32x640xf32>
    %14 = tpu.matmul %7, %13, %cst_14 {dimension_numbers = #tpu.dot_dimension_numbers<[1], [0], [0], [1], [0, 0, 1, 1], [], []>} : vector<32x320xbf16>, vector<320x640xbf16>, vector<32x640xf32> -> vector<32x640xf32>
    %c0_15 = arith.constant 0 : index
    %c0_16 = arith.constant 0 : index
    %15 = vector.load %arg7[%c0_15, %c0_16] : memref<1x640xf32, #tpu.memory_space<vmem>>, vector<1x640xf32>
    %16 = vector.broadcast %15 : vector<1x640xf32> to vector<32x640xf32>
    %17 = arith.addf %14, %16 : vector<32x640xf32>
    %18 = vector.extract_strided_slice %17 {offsets = [0, 0], sizes = [32, 320], strides = [1, 1]} : vector<32x640xf32> to vector<32x320xf32>
    %19 = vector.extract_strided_slice %17 {offsets = [0, 320], sizes = [32, 320], strides = [1, 1]} : vector<32x640xf32> to vector<32x320xf32>
    %c0_17 = arith.constant 0 : index
    %c0_18 = arith.constant 0 : index
    %20 = vector.load %arg8[%c0_17, %c0_18] : memref<320x320xbf16, #tpu.memory_space<vmem>>, vector<320x320xbf16>
    %c0_19 = arith.constant 0 : index
    %c0_20 = arith.constant 0 : index
    %21 = vector.load %arg9[%c0_19, %c0_20] : memref<1x320xf32, #tpu.memory_space<vmem>>, vector<1x320xf32>
    %22 = vector.extract_strided_slice %12 {offsets = [0, 0], sizes = [128, 40], strides = [1, 1]} : vector<128x320xf32> to vector<128x40xf32>
    %23 = arith.truncf %22 : vector<128x40xf32> to vector<128x40xbf16>
    %24 = vector.extract_strided_slice %18 {offsets = [0, 0], sizes = [32, 40], strides = [1, 1]} : vector<32x320xf32> to vector<32x40xf32>
    %25 = arith.truncf %24 : vector<32x40xf32> to vector<32x40xbf16>
    %26 = vector.extract_strided_slice %19 {offsets = [0, 0], sizes = [32, 40], strides = [1, 1]} : vector<32x320xf32> to vector<32x40xf32>
    %27 = arith.truncf %26 : vector<32x40xf32> to vector<32x40xbf16>
    %28 = vector.extract_strided_slice %23 {offsets = [0, 0], sizes = [64, 40], strides = [1, 1]} : vector<128x40xbf16> to vector<64x40xbf16>
    %29 = vector.extract_strided_slice %25 {offsets = [0, 0], sizes = [16, 40], strides = [1, 1]} : vector<32x40xbf16> to vector<16x40xbf16>
    %30 = vector.extract_strided_slice %27 {offsets = [0, 0], sizes = [16, 40], strides = [1, 1]} : vector<32x40xbf16> to vector<16x40xbf16>
    %cst_21 = arith.constant dense<0.000000e+00> : vector<64x16xf32>
    %31 = tpu.matmul %28, %29, %cst_21 {dimension_numbers = #tpu.dot_dimension_numbers<[1], [1], [0], [0], [0, 0, 1, 0], [], []>} : vector<64x40xbf16>, vector<16x40xbf16>, vector<64x16xf32> -> vector<64x16xf32>
    %cst_22 = arith.constant dense<0xFF800000> : vector<64xf32>
    %32 = vector.multi_reduction <maximumf>, %31, %cst_22 [1] : vector<64x16xf32> to vector<64xf32>
    %33 = vector.shape_cast %32 : vector<64xf32> to vector<64x1xf32>
    %34 = vector.broadcast %33 : vector<64x1xf32> to vector<64x16xf32>
    %35 = arith.subf %31, %34 : vector<64x16xf32>
    %36 = math.exp %35 : vector<64x16xf32>
    %cst_23 = arith.constant dense<0.000000e+00> : vector<64xf32>
    %37 = vector.multi_reduction <add>, %36, %cst_23 [1] : vector<64x16xf32> to vector<64xf32>
    %38 = vector.shape_cast %37 : vector<64xf32> to vector<64x1xf32>
    %39 = tpu.reciprocal %38 {approx = true} : vector<64x1xf32> -> vector<64x1xf32>
    %40 = vector.broadcast %39 : vector<64x1xf32> to vector<64x16xf32>
    %41 = arith.mulf %36, %40 : vector<64x16xf32>
    %42 = arith.truncf %41 : vector<64x16xf32> to vector<64x16xbf16>
    %cst_24 = arith.constant dense<0.000000e+00> : vector<64x40xf32>
    %43 = tpu.matmul %42, %30, %cst_24 {dimension_numbers = #tpu.dot_dimension_numbers<[1], [0], [0], [1], [0, 0, 1, 1], [], []>} : vector<64x16xbf16>, vector<16x40xbf16>, vector<64x40xf32> -> vector<64x40xf32>
    %44 = vector.extract_strided_slice %23 {offsets = [64, 0], sizes = [64, 40], strides = [1, 1]} : vector<128x40xbf16> to vector<64x40xbf16>
    %45 = vector.extract_strided_slice %25 {offsets = [16, 0], sizes = [16, 40], strides = [1, 1]} : vector<32x40xbf16> to vector<16x40xbf16>
    %46 = vector.extract_strided_slice %27 {offsets = [16, 0], sizes = [16, 40], strides = [1, 1]} : vector<32x40xbf16> to vector<16x40xbf16>
    %cst_25 = arith.constant dense<0.000000e+00> : vector<64x16xf32>
    %47 = tpu.matmul %44, %45, %cst_25 {dimension_numbers = #tpu.dot_dimension_numbers<[1], [1], [0], [0], [0, 0, 1, 0], [], []>} : vector<64x40xbf16>, vector<16x40xbf16>, vector<64x16xf32> -> vector<64x16xf32>
    %cst_26 = arith.constant dense<0xFF800000> : vector<64xf32>
    %48 = vector.multi_reduction <maximumf>, %47, %cst_26 [1] : vector<64x16xf32> to vector<64xf32>
    %49 = vector.shape_cast %48 : vector<64xf32> to vector<64x1xf32>
    %50 = vector.broadcast %49 : vector<64x1xf32> to vector<64x16xf32>
    %51 = arith.subf %47, %50 : vector<64x16xf32>
    %52 = math.exp %51 : vector<64x16xf32>
    %cst_27 = arith.constant dense<0.000000e+00> : vector<64xf32>
    %53 = vector.multi_reduction <add>, %52, %cst_27 [1] : vector<64x16xf32> to vector<64xf32>
    %54 = vector.shape_cast %53 : vector<64xf32> to vector<64x1xf32>
    %55 = tpu.reciprocal %54 {approx = true} : vector<64x1xf32> -> vector<64x1xf32>
    %56 = vector.broadcast %55 : vector<64x1xf32> to vector<64x16xf32>
    %57 = arith.mulf %52, %56 : vector<64x16xf32>
    %58 = arith.truncf %57 : vector<64x16xf32> to vector<64x16xbf16>
    %cst_28 = arith.constant dense<0.000000e+00> : vector<64x40xf32>
    %59 = tpu.matmul %58, %46, %cst_28 {dimension_numbers = #tpu.dot_dimension_numbers<[1], [0], [0], [1], [0, 0, 1, 1], [], []>} : vector<64x16xbf16>, vector<16x40xbf16>, vector<64x40xf32> -> vector<64x40xf32>
    %60 = tpu.concatenate %43, %59 in 0 : vector<64x40xf32>, vector<64x40xf32> -> vector<128x40xf32>
    %61 = arith.truncf %60 : vector<128x40xf32> to vector<128x40xbf16>
    %62 = vector.extract_strided_slice %20 {offsets = [0, 0], sizes = [40, 320], strides = [1, 1]} : vector<320x320xbf16> to vector<40x320xbf16>
    %cst_29 = arith.constant dense<0.000000e+00> : vector<128x320xf32>
    %63 = tpu.matmul %61, %62, %cst_29 {dimension_numbers = #tpu.dot_dimension_numbers<[1], [0], [0], [1], [0, 0, 1, 1], [], []>} : vector<128x40xbf16>, vector<40x320xbf16>, vector<128x320xf32> -> vector<128x320xf32>
    %64 = vector.extract_strided_slice %12 {offsets = [0, 40], sizes = [128, 40], strides = [1, 1]} : vector<128x320xf32> to vector<128x40xf32>
    %65 = arith.truncf %64 : vector<128x40xf32> to vector<128x40xbf16>
    %66 = vector.extract_strided_slice %18 {offsets = [0, 40], sizes = [32, 40], strides = [1, 1]} : vector<32x320xf32> to vector<32x40xf32>
    %67 = arith.truncf %66 : vector<32x40xf32> to vector<32x40xbf16>
    %68 = vector.extract_strided_slice %19 {offsets = [0, 40], sizes = [32, 40], strides = [1, 1]} : vector<32x320xf32> to vector<32x40xf32>
    %69 = arith.truncf %68 : vector<32x40xf32> to vector<32x40xbf16>
    %70 = vector.extract_strided_slice %65 {offsets = [0, 0], sizes = [64, 40], strides = [1, 1]} : vector<128x40xbf16> to vector<64x40xbf16>
    %71 = vector.extract_strided_slice %67 {offsets = [0, 0], sizes = [16, 40], strides = [1, 1]} : vector<32x40xbf16> to vector<16x40xbf16>
    %72 = vector.extract_strided_slice %69 {offsets = [0, 0], sizes = [16, 40], strides = [1, 1]} : vector<32x40xbf16> to vector<16x40xbf16>
    %cst_30 = arith.constant dense<0.000000e+00> : vector<64x16xf32>
    %73 = tpu.matmul %70, %71, %cst_30 {dimension_numbers = #tpu.dot_dimension_numbers<[1], [1], [0], [0], [0, 0, 1, 0], [], []>} : vector<64x40xbf16>, vector<16x40xbf16>, vector<64x16xf32> -> vector<64x16xf32>
    %cst_31 = arith.constant dense<0xFF800000> : vector<64xf32>
    %74 = vector.multi_reduction <maximumf>, %73, %cst_31 [1] : vector<64x16xf32> to vector<64xf32>
    %75 = vector.shape_cast %74 : vector<64xf32> to vector<64x1xf32>
    %76 = vector.broadcast %75 : vector<64x1xf32> to vector<64x16xf32>
    %77 = arith.subf %73, %76 : vector<64x16xf32>
    %78 = math.exp %77 : vector<64x16xf32>
    %cst_32 = arith.constant dense<0.000000e+00> : vector<64xf32>
    %79 = vector.multi_reduction <add>, %78, %cst_32 [1] : vector<64x16xf32> to vector<64xf32>
    %80 = vector.shape_cast %79 : vector<64xf32> to vector<64x1xf32>
    %81 = tpu.reciprocal %80 {approx = true} : vector<64x1xf32> -> vector<64x1xf32>
    %82 = vector.broadcast %81 : vector<64x1xf32> to vector<64x16xf32>
    %83 = arith.mulf %78, %82 : vector<64x16xf32>
    %84 = arith.truncf %83 : vector<64x16xf32> to vector<64x16xbf16>
    %cst_33 = arith.constant dense<0.000000e+00> : vector<64x40xf32>
    %85 = tpu.matmul %84, %72, %cst_33 {dimension_numbers = #tpu.dot_dimension_numbers<[1], [0], [0], [1], [0, 0, 1, 1], [], []>} : vector<64x16xbf16>, vector<16x40xbf16>, vector<64x40xf32> -> vector<64x40xf32>
    %86 = vector.extract_strided_slice %65 {offsets = [64, 0], sizes = [64, 40], strides = [1, 1]} : vector<128x40xbf16> to vector<64x40xbf16>
    %87 = vector.extract_strided_slice %67 {offsets = [16, 0], sizes = [16, 40], strides = [1, 1]} : vector<32x40xbf16> to vector<16x40xbf16>
    %88 = vector.extract_strided_slice %69 {offsets = [16, 0], sizes = [16, 40], strides = [1, 1]} : vector<32x40xbf16> to vector<16x40xbf16>
    %cst_34 = arith.constant dense<0.000000e+00> : vector<64x16xf32>
    %89 = tpu.matmul %86, %87, %cst_34 {dimension_numbers = #tpu.dot_dimension_numbers<[1], [1], [0], [0], [0, 0, 1, 0], [], []>} : vector<64x40xbf16>, vector<16x40xbf16>, vector<64x16xf32> -> vector<64x16xf32>
    %cst_35 = arith.constant dense<0xFF800000> : vector<64xf32>
    %90 = vector.multi_reduction <maximumf>, %89, %cst_35 [1] : vector<64x16xf32> to vector<64xf32>
    %91 = vector.shape_cast %90 : vector<64xf32> to vector<64x1xf32>
    %92 = vector.broadcast %91 : vector<64x1xf32> to vector<64x16xf32>
    %93 = arith.subf %89, %92 : vector<64x16xf32>
    %94 = math.exp %93 : vector<64x16xf32>
    %cst_36 = arith.constant dense<0.000000e+00> : vector<64xf32>
    %95 = vector.multi_reduction <add>, %94, %cst_36 [1] : vector<64x16xf32> to vector<64xf32>
    %96 = vector.shape_cast %95 : vector<64xf32> to vector<64x1xf32>
    %97 = tpu.reciprocal %96 {approx = true} : vector<64x1xf32> -> vector<64x1xf32>
    %98 = vector.broadcast %97 : vector<64x1xf32> to vector<64x16xf32>
    %99 = arith.mulf %94, %98 : vector<64x16xf32>
    %100 = arith.truncf %99 : vector<64x16xf32> to vector<64x16xbf16>
    %cst_37 = arith.constant dense<0.000000e+00> : vector<64x40xf32>
    %101 = tpu.matmul %100, %88, %cst_37 {dimension_numbers = #tpu.dot_dimension_numbers<[1], [0], [0], [1], [0, 0, 1, 1], [], []>} : vector<64x16xbf16>, vector<16x40xbf16>, vector<64x40xf32> -> vector<64x40xf32>
    %102 = tpu.concatenate %85, %101 in 0 : vector<64x40xf32>, vector<64x40xf32> -> vector<128x40xf32>
    %103 = arith.truncf %102 : vector<128x40xf32> to vector<128x40xbf16>
    %104 = vector.extract_strided_slice %20 {offsets = [40, 0], sizes = [40, 320], strides = [1, 1]} : vector<320x320xbf16> to vector<40x320xbf16>
    %cst_38 = arith.constant dense<0.000000e+00> : vector<128x320xf32>
    %105 = tpu.matmul %103, %104, %cst_38 {dimension_numbers = #tpu.dot_dimension_numbers<[1], [0], [0], [1], [0, 0, 1, 1], [], []>} : vector<128x40xbf16>, vector<40x320xbf16>, vector<128x320xf32> -> vector<128x320xf32>
    %106 = arith.addf %63, %105 : vector<128x320xf32>
    %107 = vector.extract_strided_slice %12 {offsets = [0, 80], sizes = [128, 40], strides = [1, 1]} : vector<128x320xf32> to vector<128x40xf32>
    %108 = arith.truncf %107 : vector<128x40xf32> to vector<128x40xbf16>
    %109 = vector.extract_strided_slice %18 {offsets = [0, 80], sizes = [32, 40], strides = [1, 1]} : vector<32x320xf32> to vector<32x40xf32>
    %110 = arith.truncf %109 : vector<32x40xf32> to vector<32x40xbf16>
    %111 = vector.extract_strided_slice %19 {offsets = [0, 80], sizes = [32, 40], strides = [1, 1]} : vector<32x320xf32> to vector<32x40xf32>
    %112 = arith.truncf %111 : vector<32x40xf32> to vector<32x40xbf16>
    %113 = vector.extract_strided_slice %108 {offsets = [0, 0], sizes = [64, 40], strides = [1, 1]} : vector<128x40xbf16> to vector<64x40xbf16>
    %114 = vector.extract_strided_slice %110 {offsets = [0, 0], sizes = [16, 40], strides = [1, 1]} : vector<32x40xbf16> to vector<16x40xbf16>
    %115 = vector.extract_strided_slice %112 {offsets = [0, 0], sizes = [16, 40], strides = [1, 1]} : vector<32x40xbf16> to vector<16x40xbf16>
    %cst_39 = arith.constant dense<0.000000e+00> : vector<64x16xf32>
    %116 = tpu.matmul %113, %114, %cst_39 {dimension_numbers = #tpu.dot_dimension_numbers<[1], [1], [0], [0], [0, 0, 1, 0], [], []>} : vector<64x40xbf16>, vector<16x40xbf16>, vector<64x16xf32> -> vector<64x16xf32>
    %cst_40 = arith.constant dense<0xFF800000> : vector<64xf32>
    %117 = vector.multi_reduction <maximumf>, %116, %cst_40 [1] : vector<64x16xf32> to vector<64xf32>
    %118 = vector.shape_cast %117 : vector<64xf32> to vector<64x1xf32>
    %119 = vector.broadcast %118 : vector<64x1xf32> to vector<64x16xf32>
    %120 = arith.subf %116, %119 : vector<64x16xf32>
    %121 = math.exp %120 : vector<64x16xf32>
    %cst_41 = arith.constant dense<0.000000e+00> : vector<64xf32>
    %122 = vector.multi_reduction <add>, %121, %cst_41 [1] : vector<64x16xf32> to vector<64xf32>
    %123 = vector.shape_cast %122 : vector<64xf32> to vector<64x1xf32>
    %124 = tpu.reciprocal %123 {approx = true} : vector<64x1xf32> -> vector<64x1xf32>
    %125 = vector.broadcast %124 : vector<64x1xf32> to vector<64x16xf32>
    %126 = arith.mulf %121, %125 : vector<64x16xf32>
    %127 = arith.truncf %126 : vector<64x16xf32> to vector<64x16xbf16>
    %cst_42 = arith.constant dense<0.000000e+00> : vector<64x40xf32>
    %128 = tpu.matmul %127, %115, %cst_42 {dimension_numbers = #tpu.dot_dimension_numbers<[1], [0], [0], [1], [0, 0, 1, 1], [], []>} : vector<64x16xbf16>, vector<16x40xbf16>, vector<64x40xf32> -> vector<64x40xf32>
    %129 = vector.extract_strided_slice %108 {offsets = [64, 0], sizes = [64, 40], strides = [1, 1]} : vector<128x40xbf16> to vector<64x40xbf16>
    %130 = vector.extract_strided_slice %110 {offsets = [16, 0], sizes = [16, 40], strides = [1, 1]} : vector<32x40xbf16> to vector<16x40xbf16>
    %131 = vector.extract_strided_slice %112 {offsets = [16, 0], sizes = [16, 40], strides = [1, 1]} : vector<32x40xbf16> to vector<16x40xbf16>
    %cst_43 = arith.constant dense<0.000000e+00> : vector<64x16xf32>
    %132 = tpu.matmul %129, %130, %cst_43 {dimension_numbers = #tpu.dot_dimension_numbers<[1], [1], [0], [0], [0, 0, 1, 0], [], []>} : vector<64x40xbf16>, vector<16x40xbf16>, vector<64x16xf32> -> vector<64x16xf32>
    %cst_44 = arith.constant dense<0xFF800000> : vector<64xf32>
    %133 = vector.multi_reduction <maximumf>, %132, %cst_44 [1] : vector<64x16xf32> to vector<64xf32>
    %134 = vector.shape_cast %133 : vector<64xf32> to vector<64x1xf32>
    %135 = vector.broadcast %134 : vector<64x1xf32> to vector<64x16xf32>
    %136 = arith.subf %132, %135 : vector<64x16xf32>
    %137 = math.exp %136 : vector<64x16xf32>
    %cst_45 = arith.constant dense<0.000000e+00> : vector<64xf32>
    %138 = vector.multi_reduction <add>, %137, %cst_45 [1] : vector<64x16xf32> to vector<64xf32>
    %139 = vector.shape_cast %138 : vector<64xf32> to vector<64x1xf32>
    %140 = tpu.reciprocal %139 {approx = true} : vector<64x1xf32> -> vector<64x1xf32>
    %141 = vector.broadcast %140 : vector<64x1xf32> to vector<64x16xf32>
    %142 = arith.mulf %137, %141 : vector<64x16xf32>
    %143 = arith.truncf %142 : vector<64x16xf32> to vector<64x16xbf16>
    %cst_46 = arith.constant dense<0.000000e+00> : vector<64x40xf32>
    %144 = tpu.matmul %143, %131, %cst_46 {dimension_numbers = #tpu.dot_dimension_numbers<[1], [0], [0], [1], [0, 0, 1, 1], [], []>} : vector<64x16xbf16>, vector<16x40xbf16>, vector<64x40xf32> -> vector<64x40xf32>
    %145 = tpu.concatenate %128, %144 in 0 : vector<64x40xf32>, vector<64x40xf32> -> vector<128x40xf32>
    %146 = arith.truncf %145 : vector<128x40xf32> to vector<128x40xbf16>
    %147 = vector.extract_strided_slice %20 {offsets = [80, 0], sizes = [40, 320], strides = [1, 1]} : vector<320x320xbf16> to vector<40x320xbf16>
    %cst_47 = arith.constant dense<0.000000e+00> : vector<128x320xf32>
    %148 = tpu.matmul %146, %147, %cst_47 {dimension_numbers = #tpu.dot_dimension_numbers<[1], [0], [0], [1], [0, 0, 1, 1], [], []>} : vector<128x40xbf16>, vector<40x320xbf16>, vector<128x320xf32> -> vector<128x320xf32>
    %149 = arith.addf %106, %148 : vector<128x320xf32>
    %150 = vector.extract_strided_slice %12 {offsets = [0, 120], sizes = [128, 40], strides = [1, 1]} : vector<128x320xf32> to vector<128x40xf32>
    %151 = arith.truncf %150 : vector<128x40xf32> to vector<128x40xbf16>
    %152 = vector.extract_strided_slice %18 {offsets = [0, 120], sizes = [32, 40], strides = [1, 1]} : vector<32x320xf32> to vector<32x40xf32>
    %153 = arith.truncf %152 : vector<32x40xf32> to vector<32x40xbf16>
    %154 = vector.extract_strided_slice %19 {offsets = [0, 120], sizes = [32, 40], strides = [1, 1]} : vector<32x320xf32> to vector<32x40xf32>
    %155 = arith.truncf %154 : vector<32x40xf32> to vector<32x40xbf16>
    %156 = vector.extract_strided_slice %151 {offsets = [0, 0], sizes = [64, 40], strides = [1, 1]} : vector<128x40xbf16> to vector<64x40xbf16>
    %157 = vector.extract_strided_slice %153 {offsets = [0, 0], sizes = [16, 40], strides = [1, 1]} : vector<32x40xbf16> to vector<16x40xbf16>
    %158 = vector.extract_strided_slice %155 {offsets = [0, 0], sizes = [16, 40], strides = [1, 1]} : vector<32x40xbf16> to vector<16x40xbf16>
    %cst_48 = arith.constant dense<0.000000e+00> : vector<64x16xf32>
    %159 = tpu.matmul %156, %157, %cst_48 {dimension_numbers = #tpu.dot_dimension_numbers<[1], [1], [0], [0], [0, 0, 1, 0], [], []>} : vector<64x40xbf16>, vector<16x40xbf16>, vector<64x16xf32> -> vector<64x16xf32>
    %cst_49 = arith.constant dense<0xFF800000> : vector<64xf32>
    %160 = vector.multi_reduction <maximumf>, %159, %cst_49 [1] : vector<64x16xf32> to vector<64xf32>
    %161 = vector.shape_cast %160 : vector<64xf32> to vector<64x1xf32>
    %162 = vector.broadcast %161 : vector<64x1xf32> to vector<64x16xf32>
    %163 = arith.subf %159, %162 : vector<64x16xf32>
    %164 = math.exp %163 : vector<64x16xf32>
    %cst_50 = arith.constant dense<0.000000e+00> : vector<64xf32>
    %165 = vector.multi_reduction <add>, %164, %cst_50 [1] : vector<64x16xf32> to vector<64xf32>
    %166 = vector.shape_cast %165 : vector<64xf32> to vector<64x1xf32>
    %167 = tpu.reciprocal %166 {approx = true} : vector<64x1xf32> -> vector<64x1xf32>
    %168 = vector.broadcast %167 : vector<64x1xf32> to vector<64x16xf32>
    %169 = arith.mulf %164, %168 : vector<64x16xf32>
    %170 = arith.truncf %169 : vector<64x16xf32> to vector<64x16xbf16>
    %cst_51 = arith.constant dense<0.000000e+00> : vector<64x40xf32>
    %171 = tpu.matmul %170, %158, %cst_51 {dimension_numbers = #tpu.dot_dimension_numbers<[1], [0], [0], [1], [0, 0, 1, 1], [], []>} : vector<64x16xbf16>, vector<16x40xbf16>, vector<64x40xf32> -> vector<64x40xf32>
    %172 = vector.extract_strided_slice %151 {offsets = [64, 0], sizes = [64, 40], strides = [1, 1]} : vector<128x40xbf16> to vector<64x40xbf16>
    %173 = vector.extract_strided_slice %153 {offsets = [16, 0], sizes = [16, 40], strides = [1, 1]} : vector<32x40xbf16> to vector<16x40xbf16>
    %174 = vector.extract_strided_slice %155 {offsets = [16, 0], sizes = [16, 40], strides = [1, 1]} : vector<32x40xbf16> to vector<16x40xbf16>
    %cst_52 = arith.constant dense<0.000000e+00> : vector<64x16xf32>
    %175 = tpu.matmul %172, %173, %cst_52 {dimension_numbers = #tpu.dot_dimension_numbers<[1], [1], [0], [0], [0, 0, 1, 0], [], []>} : vector<64x40xbf16>, vector<16x40xbf16>, vector<64x16xf32> -> vector<64x16xf32>
    %cst_53 = arith.constant dense<0xFF800000> : vector<64xf32>
    %176 = vector.multi_reduction <maximumf>, %175, %cst_53 [1] : vector<64x16xf32> to vector<64xf32>
    %177 = vector.shape_cast %176 : vector<64xf32> to vector<64x1xf32>
    %178 = vector.broadcast %177 : vector<64x1xf32> to vector<64x16xf32>
    %179 = arith.subf %175, %178 : vector<64x16xf32>
    %180 = math.exp %179 : vector<64x16xf32>
    %cst_54 = arith.constant dense<0.000000e+00> : vector<64xf32>
    %181 = vector.multi_reduction <add>, %180, %cst_54 [1] : vector<64x16xf32> to vector<64xf32>
    %182 = vector.shape_cast %181 : vector<64xf32> to vector<64x1xf32>
    %183 = tpu.reciprocal %182 {approx = true} : vector<64x1xf32> -> vector<64x1xf32>
    %184 = vector.broadcast %183 : vector<64x1xf32> to vector<64x16xf32>
    %185 = arith.mulf %180, %184 : vector<64x16xf32>
    %186 = arith.truncf %185 : vector<64x16xf32> to vector<64x16xbf16>
    %cst_55 = arith.constant dense<0.000000e+00> : vector<64x40xf32>
    %187 = tpu.matmul %186, %174, %cst_55 {dimension_numbers = #tpu.dot_dimension_numbers<[1], [0], [0], [1], [0, 0, 1, 1], [], []>} : vector<64x16xbf16>, vector<16x40xbf16>, vector<64x40xf32> -> vector<64x40xf32>
    %188 = tpu.concatenate %171, %187 in 0 : vector<64x40xf32>, vector<64x40xf32> -> vector<128x40xf32>
    %189 = arith.truncf %188 : vector<128x40xf32> to vector<128x40xbf16>
    %190 = vector.extract_strided_slice %20 {offsets = [120, 0], sizes = [40, 320], strides = [1, 1]} : vector<320x320xbf16> to vector<40x320xbf16>
    %cst_56 = arith.constant dense<0.000000e+00> : vector<128x320xf32>
    %191 = tpu.matmul %189, %190, %cst_56 {dimension_numbers = #tpu.dot_dimension_numbers<[1], [0], [0], [1], [0, 0, 1, 1], [], []>} : vector<128x40xbf16>, vector<40x320xbf16>, vector<128x320xf32> -> vector<128x320xf32>
    %192 = arith.addf %149, %191 : vector<128x320xf32>
    %193 = vector.extract_strided_slice %12 {offsets = [0, 160], sizes = [128, 40], strides = [1, 1]} : vector<128x320xf32> to vector<128x40xf32>
    %194 = arith.truncf %193 : vector<128x40xf32> to vector<128x40xbf16>
    %195 = vector.extract_strided_slice %18 {offsets = [0, 160], sizes = [32, 40], strides = [1, 1]} : vector<32x320xf32> to vector<32x40xf32>
    %196 = arith.truncf %195 : vector<32x40xf32> to vector<32x40xbf16>
    %197 = vector.extract_strided_slice %19 {offsets = [0, 160], sizes = [32, 40], strides = [1, 1]} : vector<32x320xf32> to vector<32x40xf32>
    %198 = arith.truncf %197 : vector<32x40xf32> to vector<32x40xbf16>
    %199 = vector.extract_strided_slice %194 {offsets = [0, 0], sizes = [64, 40], strides = [1, 1]} : vector<128x40xbf16> to vector<64x40xbf16>
    %200 = vector.extract_strided_slice %196 {offsets = [0, 0], sizes = [16, 40], strides = [1, 1]} : vector<32x40xbf16> to vector<16x40xbf16>
    %201 = vector.extract_strided_slice %198 {offsets = [0, 0], sizes = [16, 40], strides = [1, 1]} : vector<32x40xbf16> to vector<16x40xbf16>
    %cst_57 = arith.constant dense<0.000000e+00> : vector<64x16xf32>
    %202 = tpu.matmul %199, %200, %cst_57 {dimension_numbers = #tpu.dot_dimension_numbers<[1], [1], [0], [0], [0, 0, 1, 0], [], []>} : vector<64x40xbf16>, vector<16x40xbf16>, vector<64x16xf32> -> vector<64x16xf32>
    %cst_58 = arith.constant dense<0xFF800000> : vector<64xf32>
    %203 = vector.multi_reduction <maximumf>, %202, %cst_58 [1] : vector<64x16xf32> to vector<64xf32>
    %204 = vector.shape_cast %203 : vector<64xf32> to vector<64x1xf32>
    %205 = vector.broadcast %204 : vector<64x1xf32> to vector<64x16xf32>
    %206 = arith.subf %202, %205 : vector<64x16xf32>
    %207 = math.exp %206 : vector<64x16xf32>
    %cst_59 = arith.constant dense<0.000000e+00> : vector<64xf32>
    %208 = vector.multi_reduction <add>, %207, %cst_59 [1] : vector<64x16xf32> to vector<64xf32>
    %209 = vector.shape_cast %208 : vector<64xf32> to vector<64x1xf32>
    %210 = tpu.reciprocal %209 {approx = true} : vector<64x1xf32> -> vector<64x1xf32>
    %211 = vector.broadcast %210 : vector<64x1xf32> to vector<64x16xf32>
    %212 = arith.mulf %207, %211 : vector<64x16xf32>
    %213 = arith.truncf %212 : vector<64x16xf32> to vector<64x16xbf16>
    %cst_60 = arith.constant dense<0.000000e+00> : vector<64x40xf32>
    %214 = tpu.matmul %213, %201, %cst_60 {dimension_numbers = #tpu.dot_dimension_numbers<[1], [0], [0], [1], [0, 0, 1, 1], [], []>} : vector<64x16xbf16>, vector<16x40xbf16>, vector<64x40xf32> -> vector<64x40xf32>
    %215 = vector.extract_strided_slice %194 {offsets = [64, 0], sizes = [64, 40], strides = [1, 1]} : vector<128x40xbf16> to vector<64x40xbf16>
    %216 = vector.extract_strided_slice %196 {offsets = [16, 0], sizes = [16, 40], strides = [1, 1]} : vector<32x40xbf16> to vector<16x40xbf16>
    %217 = vector.extract_strided_slice %198 {offsets = [16, 0], sizes = [16, 40], strides = [1, 1]} : vector<32x40xbf16> to vector<16x40xbf16>
    %cst_61 = arith.constant dense<0.000000e+00> : vector<64x16xf32>
    %218 = tpu.matmul %215, %216, %cst_61 {dimension_numbers = #tpu.dot_dimension_numbers<[1], [1], [0], [0], [0, 0, 1, 0], [], []>} : vector<64x40xbf16>, vector<16x40xbf16>, vector<64x16xf32> -> vector<64x16xf32>
    %cst_62 = arith.constant dense<0xFF800000> : vector<64xf32>
    %219 = vector.multi_reduction <maximumf>, %218, %cst_62 [1] : vector<64x16xf32> to vector<64xf32>
    %220 = vector.shape_cast %219 : vector<64xf32> to vector<64x1xf32>
    %221 = vector.broadcast %220 : vector<64x1xf32> to vector<64x16xf32>
    %222 = arith.subf %218, %221 : vector<64x16xf32>
    %223 = math.exp %222 : vector<64x16xf32>
    %cst_63 = arith.constant dense<0.000000e+00> : vector<64xf32>
    %224 = vector.multi_reduction <add>, %223, %cst_63 [1] : vector<64x16xf32> to vector<64xf32>
    %225 = vector.shape_cast %224 : vector<64xf32> to vector<64x1xf32>
    %226 = tpu.reciprocal %225 {approx = true} : vector<64x1xf32> -> vector<64x1xf32>
    %227 = vector.broadcast %226 : vector<64x1xf32> to vector<64x16xf32>
    %228 = arith.mulf %223, %227 : vector<64x16xf32>
    %229 = arith.truncf %228 : vector<64x16xf32> to vector<64x16xbf16>
    %cst_64 = arith.constant dense<0.000000e+00> : vector<64x40xf32>
    %230 = tpu.matmul %229, %217, %cst_64 {dimension_numbers = #tpu.dot_dimension_numbers<[1], [0], [0], [1], [0, 0, 1, 1], [], []>} : vector<64x16xbf16>, vector<16x40xbf16>, vector<64x40xf32> -> vector<64x40xf32>
    %231 = tpu.concatenate %214, %230 in 0 : vector<64x40xf32>, vector<64x40xf32> -> vector<128x40xf32>
    %232 = arith.truncf %231 : vector<128x40xf32> to vector<128x40xbf16>
    %233 = vector.extract_strided_slice %20 {offsets = [160, 0], sizes = [40, 320], strides = [1, 1]} : vector<320x320xbf16> to vector<40x320xbf16>
    %cst_65 = arith.constant dense<0.000000e+00> : vector<128x320xf32>
    %234 = tpu.matmul %232, %233, %cst_65 {dimension_numbers = #tpu.dot_dimension_numbers<[1], [0], [0], [1], [0, 0, 1, 1], [], []>} : vector<128x40xbf16>, vector<40x320xbf16>, vector<128x320xf32> -> vector<128x320xf32>
    %235 = arith.addf %192, %234 : vector<128x320xf32>
    %236 = vector.extract_strided_slice %12 {offsets = [0, 200], sizes = [128, 40], strides = [1, 1]} : vector<128x320xf32> to vector<128x40xf32>
    %237 = arith.truncf %236 : vector<128x40xf32> to vector<128x40xbf16>
    %238 = vector.extract_strided_slice %18 {offsets = [0, 200], sizes = [32, 40], strides = [1, 1]} : vector<32x320xf32> to vector<32x40xf32>
    %239 = arith.truncf %238 : vector<32x40xf32> to vector<32x40xbf16>
    %240 = vector.extract_strided_slice %19 {offsets = [0, 200], sizes = [32, 40], strides = [1, 1]} : vector<32x320xf32> to vector<32x40xf32>
    %241 = arith.truncf %240 : vector<32x40xf32> to vector<32x40xbf16>
    %242 = vector.extract_strided_slice %237 {offsets = [0, 0], sizes = [64, 40], strides = [1, 1]} : vector<128x40xbf16> to vector<64x40xbf16>
    %243 = vector.extract_strided_slice %239 {offsets = [0, 0], sizes = [16, 40], strides = [1, 1]} : vector<32x40xbf16> to vector<16x40xbf16>
    %244 = vector.extract_strided_slice %241 {offsets = [0, 0], sizes = [16, 40], strides = [1, 1]} : vector<32x40xbf16> to vector<16x40xbf16>
    %cst_66 = arith.constant dense<0.000000e+00> : vector<64x16xf32>
    %245 = tpu.matmul %242, %243, %cst_66 {dimension_numbers = #tpu.dot_dimension_numbers<[1], [1], [0], [0], [0, 0, 1, 0], [], []>} : vector<64x40xbf16>, vector<16x40xbf16>, vector<64x16xf32> -> vector<64x16xf32>
    %cst_67 = arith.constant dense<0xFF800000> : vector<64xf32>
    %246 = vector.multi_reduction <maximumf>, %245, %cst_67 [1] : vector<64x16xf32> to vector<64xf32>
    %247 = vector.shape_cast %246 : vector<64xf32> to vector<64x1xf32>
    %248 = vector.broadcast %247 : vector<64x1xf32> to vector<64x16xf32>
    %249 = arith.subf %245, %248 : vector<64x16xf32>
    %250 = math.exp %249 : vector<64x16xf32>
    %cst_68 = arith.constant dense<0.000000e+00> : vector<64xf32>
    %251 = vector.multi_reduction <add>, %250, %cst_68 [1] : vector<64x16xf32> to vector<64xf32>
    %252 = vector.shape_cast %251 : vector<64xf32> to vector<64x1xf32>
    %253 = tpu.reciprocal %252 {approx = true} : vector<64x1xf32> -> vector<64x1xf32>
    %254 = vector.broadcast %253 : vector<64x1xf32> to vector<64x16xf32>
    %255 = arith.mulf %250, %254 : vector<64x16xf32>
    %256 = arith.truncf %255 : vector<64x16xf32> to vector<64x16xbf16>
    %cst_69 = arith.constant dense<0.000000e+00> : vector<64x40xf32>
    %257 = tpu.matmul %256, %244, %cst_69 {dimension_numbers = #tpu.dot_dimension_numbers<[1], [0], [0], [1], [0, 0, 1, 1], [], []>} : vector<64x16xbf16>, vector<16x40xbf16>, vector<64x40xf32> -> vector<64x40xf32>
    %258 = vector.extract_strided_slice %237 {offsets = [64, 0], sizes = [64, 40], strides = [1, 1]} : vector<128x40xbf16> to vector<64x40xbf16>
    %259 = vector.extract_strided_slice %239 {offsets = [16, 0], sizes = [16, 40], strides = [1, 1]} : vector<32x40xbf16> to vector<16x40xbf16>
    %260 = vector.extract_strided_slice %241 {offsets = [16, 0], sizes = [16, 40], strides = [1, 1]} : vector<32x40xbf16> to vector<16x40xbf16>
    %cst_70 = arith.constant dense<0.000000e+00> : vector<64x16xf32>
    %261 = tpu.matmul %258, %259, %cst_70 {dimension_numbers = #tpu.dot_dimension_numbers<[1], [1], [0], [0], [0, 0, 1, 0], [], []>} : vector<64x40xbf16>, vector<16x40xbf16>, vector<64x16xf32> -> vector<64x16xf32>
    %cst_71 = arith.constant dense<0xFF800000> : vector<64xf32>
    %262 = vector.multi_reduction <maximumf>, %261, %cst_71 [1] : vector<64x16xf32> to vector<64xf32>
    %263 = vector.shape_cast %262 : vector<64xf32> to vector<64x1xf32>
    %264 = vector.broadcast %263 : vector<64x1xf32> to vector<64x16xf32>
    %265 = arith.subf %261, %264 : vector<64x16xf32>
    %266 = math.exp %265 : vector<64x16xf32>
    %cst_72 = arith.constant dense<0.000000e+00> : vector<64xf32>
    %267 = vector.multi_reduction <add>, %266, %cst_72 [1] : vector<64x16xf32> to vector<64xf32>
    %268 = vector.shape_cast %267 : vector<64xf32> to vector<64x1xf32>
    %269 = tpu.reciprocal %268 {approx = true} : vector<64x1xf32> -> vector<64x1xf32>
    %270 = vector.broadcast %269 : vector<64x1xf32> to vector<64x16xf32>
    %271 = arith.mulf %266, %270 : vector<64x16xf32>
    %272 = arith.truncf %271 : vector<64x16xf32> to vector<64x16xbf16>
    %cst_73 = arith.constant dense<0.000000e+00> : vector<64x40xf32>
    %273 = tpu.matmul %272, %260, %cst_73 {dimension_numbers = #tpu.dot_dimension_numbers<[1], [0], [0], [1], [0, 0, 1, 1], [], []>} : vector<64x16xbf16>, vector<16x40xbf16>, vector<64x40xf32> -> vector<64x40xf32>
    %274 = tpu.concatenate %257, %273 in 0 : vector<64x40xf32>, vector<64x40xf32> -> vector<128x40xf32>
    %275 = arith.truncf %274 : vector<128x40xf32> to vector<128x40xbf16>
    %276 = vector.extract_strided_slice %20 {offsets = [200, 0], sizes = [40, 320], strides = [1, 1]} : vector<320x320xbf16> to vector<40x320xbf16>
    %cst_74 = arith.constant dense<0.000000e+00> : vector<128x320xf32>
    %277 = tpu.matmul %275, %276, %cst_74 {dimension_numbers = #tpu.dot_dimension_numbers<[1], [0], [0], [1], [0, 0, 1, 1], [], []>} : vector<128x40xbf16>, vector<40x320xbf16>, vector<128x320xf32> -> vector<128x320xf32>
    %278 = arith.addf %235, %277 : vector<128x320xf32>
    %279 = vector.extract_strided_slice %12 {offsets = [0, 240], sizes = [128, 40], strides = [1, 1]} : vector<128x320xf32> to vector<128x40xf32>
    %280 = arith.truncf %279 : vector<128x40xf32> to vector<128x40xbf16>
    %281 = vector.extract_strided_slice %18 {offsets = [0, 240], sizes = [32, 40], strides = [1, 1]} : vector<32x320xf32> to vector<32x40xf32>
    %282 = arith.truncf %281 : vector<32x40xf32> to vector<32x40xbf16>
    %283 = vector.extract_strided_slice %19 {offsets = [0, 240], sizes = [32, 40], strides = [1, 1]} : vector<32x320xf32> to vector<32x40xf32>
    %284 = arith.truncf %283 : vector<32x40xf32> to vector<32x40xbf16>
    %285 = vector.extract_strided_slice %280 {offsets = [0, 0], sizes = [64, 40], strides = [1, 1]} : vector<128x40xbf16> to vector<64x40xbf16>
    %286 = vector.extract_strided_slice %282 {offsets = [0, 0], sizes = [16, 40], strides = [1, 1]} : vector<32x40xbf16> to vector<16x40xbf16>
    %287 = vector.extract_strided_slice %284 {offsets = [0, 0], sizes = [16, 40], strides = [1, 1]} : vector<32x40xbf16> to vector<16x40xbf16>
    %cst_75 = arith.constant dense<0.000000e+00> : vector<64x16xf32>
    %288 = tpu.matmul %285, %286, %cst_75 {dimension_numbers = #tpu.dot_dimension_numbers<[1], [1], [0], [0], [0, 0, 1, 0], [], []>} : vector<64x40xbf16>, vector<16x40xbf16>, vector<64x16xf32> -> vector<64x16xf32>
    %cst_76 = arith.constant dense<0xFF800000> : vector<64xf32>
    %289 = vector.multi_reduction <maximumf>, %288, %cst_76 [1] : vector<64x16xf32> to vector<64xf32>
    %290 = vector.shape_cast %289 : vector<64xf32> to vector<64x1xf32>
    %291 = vector.broadcast %290 : vector<64x1xf32> to vector<64x16xf32>
    %292 = arith.subf %288, %291 : vector<64x16xf32>
    %293 = math.exp %292 : vector<64x16xf32>
    %cst_77 = arith.constant dense<0.000000e+00> : vector<64xf32>
    %294 = vector.multi_reduction <add>, %293, %cst_77 [1] : vector<64x16xf32> to vector<64xf32>
    %295 = vector.shape_cast %294 : vector<64xf32> to vector<64x1xf32>
    %296 = tpu.reciprocal %295 {approx = true} : vector<64x1xf32> -> vector<64x1xf32>
    %297 = vector.broadcast %296 : vector<64x1xf32> to vector<64x16xf32>
    %298 = arith.mulf %293, %297 : vector<64x16xf32>
    %299 = arith.truncf %298 : vector<64x16xf32> to vector<64x16xbf16>
    %cst_78 = arith.constant dense<0.000000e+00> : vector<64x40xf32>
    %300 = tpu.matmul %299, %287, %cst_78 {dimension_numbers = #tpu.dot_dimension_numbers<[1], [0], [0], [1], [0, 0, 1, 1], [], []>} : vector<64x16xbf16>, vector<16x40xbf16>, vector<64x40xf32> -> vector<64x40xf32>
    %301 = vector.extract_strided_slice %280 {offsets = [64, 0], sizes = [64, 40], strides = [1, 1]} : vector<128x40xbf16> to vector<64x40xbf16>
    %302 = vector.extract_strided_slice %282 {offsets = [16, 0], sizes = [16, 40], strides = [1, 1]} : vector<32x40xbf16> to vector<16x40xbf16>
    %303 = vector.extract_strided_slice %284 {offsets = [16, 0], sizes = [16, 40], strides = [1, 1]} : vector<32x40xbf16> to vector<16x40xbf16>
    %cst_79 = arith.constant dense<0.000000e+00> : vector<64x16xf32>
    %304 = tpu.matmul %301, %302, %cst_79 {dimension_numbers = #tpu.dot_dimension_numbers<[1], [1], [0], [0], [0, 0, 1, 0], [], []>} : vector<64x40xbf16>, vector<16x40xbf16>, vector<64x16xf32> -> vector<64x16xf32>
    %cst_80 = arith.constant dense<0xFF800000> : vector<64xf32>
    %305 = vector.multi_reduction <maximumf>, %304, %cst_80 [1] : vector<64x16xf32> to vector<64xf32>
    %306 = vector.shape_cast %305 : vector<64xf32> to vector<64x1xf32>
    %307 = vector.broadcast %306 : vector<64x1xf32> to vector<64x16xf32>
    %308 = arith.subf %304, %307 : vector<64x16xf32>
    %309 = math.exp %308 : vector<64x16xf32>
    %cst_81 = arith.constant dense<0.000000e+00> : vector<64xf32>
    %310 = vector.multi_reduction <add>, %309, %cst_81 [1] : vector<64x16xf32> to vector<64xf32>
    %311 = vector.shape_cast %310 : vector<64xf32> to vector<64x1xf32>
    %312 = tpu.reciprocal %311 {approx = true} : vector<64x1xf32> -> vector<64x1xf32>
    %313 = vector.broadcast %312 : vector<64x1xf32> to vector<64x16xf32>
    %314 = arith.mulf %309, %313 : vector<64x16xf32>
    %315 = arith.truncf %314 : vector<64x16xf32> to vector<64x16xbf16>
    %cst_82 = arith.constant dense<0.000000e+00> : vector<64x40xf32>
    %316 = tpu.matmul %315, %303, %cst_82 {dimension_numbers = #tpu.dot_dimension_numbers<[1], [0], [0], [1], [0, 0, 1, 1], [], []>} : vector<64x16xbf16>, vector<16x40xbf16>, vector<64x40xf32> -> vector<64x40xf32>
    %317 = tpu.concatenate %300, %316 in 0 : vector<64x40xf32>, vector<64x40xf32> -> vector<128x40xf32>
    %318 = arith.truncf %317 : vector<128x40xf32> to vector<128x40xbf16>
    %319 = vector.extract_strided_slice %20 {offsets = [240, 0], sizes = [40, 320], strides = [1, 1]} : vector<320x320xbf16> to vector<40x320xbf16>
    %cst_83 = arith.constant dense<0.000000e+00> : vector<128x320xf32>
    %320 = tpu.matmul %318, %319, %cst_83 {dimension_numbers = #tpu.dot_dimension_numbers<[1], [0], [0], [1], [0, 0, 1, 1], [], []>} : vector<128x40xbf16>, vector<40x320xbf16>, vector<128x320xf32> -> vector<128x320xf32>
    %321 = arith.addf %278, %320 : vector<128x320xf32>
    %322 = vector.extract_strided_slice %12 {offsets = [0, 280], sizes = [128, 40], strides = [1, 1]} : vector<128x320xf32> to vector<128x40xf32>
    %323 = arith.truncf %322 : vector<128x40xf32> to vector<128x40xbf16>
    %324 = vector.extract_strided_slice %18 {offsets = [0, 280], sizes = [32, 40], strides = [1, 1]} : vector<32x320xf32> to vector<32x40xf32>
    %325 = arith.truncf %324 : vector<32x40xf32> to vector<32x40xbf16>
    %326 = vector.extract_strided_slice %19 {offsets = [0, 280], sizes = [32, 40], strides = [1, 1]} : vector<32x320xf32> to vector<32x40xf32>
    %327 = arith.truncf %326 : vector<32x40xf32> to vector<32x40xbf16>
    %328 = vector.extract_strided_slice %323 {offsets = [0, 0], sizes = [64, 40], strides = [1, 1]} : vector<128x40xbf16> to vector<64x40xbf16>
    %329 = vector.extract_strided_slice %325 {offsets = [0, 0], sizes = [16, 40], strides = [1, 1]} : vector<32x40xbf16> to vector<16x40xbf16>
    %330 = vector.extract_strided_slice %327 {offsets = [0, 0], sizes = [16, 40], strides = [1, 1]} : vector<32x40xbf16> to vector<16x40xbf16>
    %cst_84 = arith.constant dense<0.000000e+00> : vector<64x16xf32>
    %331 = tpu.matmul %328, %329, %cst_84 {dimension_numbers = #tpu.dot_dimension_numbers<[1], [1], [0], [0], [0, 0, 1, 0], [], []>} : vector<64x40xbf16>, vector<16x40xbf16>, vector<64x16xf32> -> vector<64x16xf32>
    %cst_85 = arith.constant dense<0xFF800000> : vector<64xf32>
    %332 = vector.multi_reduction <maximumf>, %331, %cst_85 [1] : vector<64x16xf32> to vector<64xf32>
    %333 = vector.shape_cast %332 : vector<64xf32> to vector<64x1xf32>
    %334 = vector.broadcast %333 : vector<64x1xf32> to vector<64x16xf32>
    %335 = arith.subf %331, %334 : vector<64x16xf32>
    %336 = math.exp %335 : vector<64x16xf32>
    %cst_86 = arith.constant dense<0.000000e+00> : vector<64xf32>
    %337 = vector.multi_reduction <add>, %336, %cst_86 [1] : vector<64x16xf32> to vector<64xf32>
    %338 = vector.shape_cast %337 : vector<64xf32> to vector<64x1xf32>
    %339 = tpu.reciprocal %338 {approx = true} : vector<64x1xf32> -> vector<64x1xf32>
    %340 = vector.broadcast %339 : vector<64x1xf32> to vector<64x16xf32>
    %341 = arith.mulf %336, %340 : vector<64x16xf32>
    %342 = arith.truncf %341 : vector<64x16xf32> to vector<64x16xbf16>
    %cst_87 = arith.constant dense<0.000000e+00> : vector<64x40xf32>
    %343 = tpu.matmul %342, %330, %cst_87 {dimension_numbers = #tpu.dot_dimension_numbers<[1], [0], [0], [1], [0, 0, 1, 1], [], []>} : vector<64x16xbf16>, vector<16x40xbf16>, vector<64x40xf32> -> vector<64x40xf32>
    %344 = vector.extract_strided_slice %323 {offsets = [64, 0], sizes = [64, 40], strides = [1, 1]} : vector<128x40xbf16> to vector<64x40xbf16>
    %345 = vector.extract_strided_slice %325 {offsets = [16, 0], sizes = [16, 40], strides = [1, 1]} : vector<32x40xbf16> to vector<16x40xbf16>
    %346 = vector.extract_strided_slice %327 {offsets = [16, 0], sizes = [16, 40], strides = [1, 1]} : vector<32x40xbf16> to vector<16x40xbf16>
    %cst_88 = arith.constant dense<0.000000e+00> : vector<64x16xf32>
    %347 = tpu.matmul %344, %345, %cst_88 {dimension_numbers = #tpu.dot_dimension_numbers<[1], [1], [0], [0], [0, 0, 1, 0], [], []>} : vector<64x40xbf16>, vector<16x40xbf16>, vector<64x16xf32> -> vector<64x16xf32>
    %cst_89 = arith.constant dense<0xFF800000> : vector<64xf32>
    %348 = vector.multi_reduction <maximumf>, %347, %cst_89 [1] : vector<64x16xf32> to vector<64xf32>
    %349 = vector.shape_cast %348 : vector<64xf32> to vector<64x1xf32>
    %350 = vector.broadcast %349 : vector<64x1xf32> to vector<64x16xf32>
    %351 = arith.subf %347, %350 : vector<64x16xf32>
    %352 = math.exp %351 : vector<64x16xf32>
    %cst_90 = arith.constant dense<0.000000e+00> : vector<64xf32>
    %353 = vector.multi_reduction <add>, %352, %cst_90 [1] : vector<64x16xf32> to vector<64xf32>
    %354 = vector.shape_cast %353 : vector<64xf32> to vector<64x1xf32>
    %355 = tpu.reciprocal %354 {approx = true} : vector<64x1xf32> -> vector<64x1xf32>
    %356 = vector.broadcast %355 : vector<64x1xf32> to vector<64x16xf32>
    %357 = arith.mulf %352, %356 : vector<64x16xf32>
    %358 = arith.truncf %357 : vector<64x16xf32> to vector<64x16xbf16>
    %cst_91 = arith.constant dense<0.000000e+00> : vector<64x40xf32>
    %359 = tpu.matmul %358, %346, %cst_91 {dimension_numbers = #tpu.dot_dimension_numbers<[1], [0], [0], [1], [0, 0, 1, 1], [], []>} : vector<64x16xbf16>, vector<16x40xbf16>, vector<64x40xf32> -> vector<64x40xf32>
    %360 = tpu.concatenate %343, %359 in 0 : vector<64x40xf32>, vector<64x40xf32> -> vector<128x40xf32>
    %361 = arith.truncf %360 : vector<128x40xf32> to vector<128x40xbf16>
    %362 = vector.extract_strided_slice %20 {offsets = [280, 0], sizes = [40, 320], strides = [1, 1]} : vector<320x320xbf16> to vector<40x320xbf16>
    %cst_92 = arith.constant dense<0.000000e+00> : vector<128x320xf32>
    %363 = tpu.matmul %361, %362, %cst_92 {dimension_numbers = #tpu.dot_dimension_numbers<[1], [0], [0], [1], [0, 0, 1, 1], [], []>} : vector<128x40xbf16>, vector<40x320xbf16>, vector<128x320xf32> -> vector<128x320xf32>
    %364 = arith.addf %321, %363 : vector<128x320xf32>
    %365 = vector.broadcast %21 : vector<1x320xf32> to vector<128x320xf32>
    %366 = arith.addf %364, %365 : vector<128x320xf32>
    %367 = arith.truncf %366 : vector<128x320xf32> to vector<128x320xbf16>
    %c0_93 = arith.constant 0 : index
    %c0_94 = arith.constant 0 : index
    %368 = vector.load %arg10[%c0_93, %c0_94] : memref<320x256xbf16, #tpu.memory_space<vmem>>, vector<320x256xbf16>
    %cst_95 = arith.constant dense<0.000000e+00> : vector<128x256xf32>
    %369 = tpu.matmul %367, %368, %cst_95 {dimension_numbers = #tpu.dot_dimension_numbers<[1], [0], [0], [1], [0, 0, 1, 1], [], []>} : vector<128x320xbf16>, vector<320x256xbf16>, vector<128x256xf32> -> vector<128x256xf32>
    %c0_96 = arith.constant 0 : index
    %c0_97 = arith.constant 0 : index
    %370 = vector.load %arg11[%c0_96, %c0_97] : memref<1x256xf32, #tpu.memory_space<vmem>>, vector<1x256xf32>
    %371 = vector.broadcast %370 : vector<1x256xf32> to vector<128x256xf32>
    %372 = arith.addf %369, %371 : vector<128x256xf32>
    %cst_98 = arith.constant 0.000000e+00 : f32
    %373 = vector.broadcast %cst_98 : f32 to vector<128x256xf32>
    %374 = arith.maximumf %372, %373 : vector<128x256xf32>
    %375 = arith.truncf %374 : vector<128x256xf32> to vector<128x256xbf16>
    %c0_99 = arith.constant 0 : index
    %c0_100 = arith.constant 0 : index
    %376 = vector.load %arg12[%c0_99, %c0_100] : memref<256x320xbf16, #tpu.memory_space<vmem>>, vector<256x320xbf16>
    %cst_101 = arith.constant dense<0.000000e+00> : vector<128x320xf32>
    %377 = tpu.matmul %375, %376, %cst_101 {dimension_numbers = #tpu.dot_dimension_numbers<[1], [0], [0], [1], [0, 0, 1, 1], [], []>} : vector<128x256xbf16>, vector<256x320xbf16>, vector<128x320xf32> -> vector<128x320xf32>
    %c0_102 = arith.constant 0 : index
    %c0_103 = arith.constant 0 : index
    %378 = vector.load %arg13[%c0_102, %c0_103] : memref<1x320xf32, #tpu.memory_space<vmem>>, vector<1x320xf32>
    %379 = vector.broadcast %378 : vector<1x320xf32> to vector<128x320xf32>
    %380 = arith.addf %377, %379 : vector<128x320xf32>
    %381 = arith.addf %366, %380 : vector<128x320xf32>
    %c0_104 = arith.constant 0 : index
    %c0_105 = arith.constant 0 : index
    %382 = vector.load %arg14[%c0_104, %c0_105] : memref<128x320xf32, #tpu.memory_space<vmem>>, vector<128x320xf32>
    tpu.vector_store %arg14[%c0_104, %c0_105], %381 {strides = array<i32>} : memref<128x320xf32, #tpu.memory_space<vmem>>, vector<128x320xf32>,
    return
  }
}

</mosaic_0001>

<bundles_post_ra>
// kernel: tpu_custom_call.1
= control target key start
LH: loop header
LB: loop body
LE: loop exit
PB: predicated region body
PF: predicated region fallthrough
CT: control target
= control target key end

     0   :  { %vm4208_vm0 = vcmask 523264   ;;  %vm5729_vm1 = vcmask 326656   ;;  %vm5810_vm2 = vcmask 130048   ;;  %s18262_s28 = smov 48   ;;  %vm6439_vm3 = vcmask 195584   ;;  %s18263_s20 = smov 112   ;;  %s23456_s2 = inlined_call_operand.vmem [shape: bf16[2048,320], index: 2, kind: input, shape index: {}]   ;;  %s23457_s1 = inlined_call_operand.vmem [shape: bf16[32,2048], index: 1, kind: input, shape index: {}]   ;;  %s23458_s4 = inlined_call_operand.vmem [shape: bf16[320,320], index: 4, kind: input, shape index: {}]   ;;  %s23459_s3 = inlined_call_operand.vmem [shape: f32[1,320], index: 3, kind: input, shape index: {}]   ;;  %s23460_s0 = inlined_call_operand.vmem [shape: bf16[128,320], index: 0, kind: input, shape index: {}]   ;;  %s23461_s6 = inlined_call_operand.vmem [shape: bf16[320,640], index: 6, kind: input, shape index: {}]   ;;  %s23462_s5 = inlined_call_operand.vmem [shape: f32[1,320], index: 5, kind: input, shape index: {}]   ;;  %s23463_s7 = inlined_call_operand.vmem [shape: f32[1,640], index: 7, kind: input, shape index: {}]   ;;  %s23464_s8 = inlined_call_operand.vmem [shape: bf16[320,320], index: 8, kind: input, shape index: {}]   ;;  %s23465_s10 = inlined_call_operand.vmem [shape: bf16[320,256], index: 10, kind: input, shape index: {}]   ;;  %s23466_s9 = inlined_call_operand.vmem [shape: f32[1,320], index: 9, kind: input, shape index: {}]   ;;  %s23467_s12 = inlined_call_operand.vmem [shape: bf16[256,320], index: 12, kind: input, shape index: {}]   ;;  %s23468_s11 = inlined_call_operand.vmem [shape: f32[1,256], index: 11, kind: input, shape index: {}]   ;;  %s23469_s13 = inlined_call_operand.vmem [shape: f32[1,320], index: 13, kind: input, shape index: {}]   ;;  %s23470_s14 = inlined_call_operand.vmem [shape: f32[128,320], index: 14, kind: output, shape index: {}]  }
   0x1   :  { %v16769_v0 = vld [vmem:[%s23456_s2 + $0x4] ss:$12 sps:$4 sm:$0xff]   ;;  %v16771_v1 = vld [vmem:[%s23456_s2] ss:$12 sps:$4 sm:$0xff]   ;;  %v16772_v2 = vld [vmem:[%s23456_s2 + $0x1c] ss:$12 sps:$4 sm:$0xff]  }
   0x2   :  { %2849 = vmatprep.subr.bf16.mxu0 %v16769_v0  ;;  %v16774_v3 = vld [vmem:[%s23456_s2 + $0x18] ss:$12 sps:$4 sm:$0xff]   ;;  %v16775_v4 = vld [vmem:[%s23456_s2 + $0x34] ss:$12 sps:$4 sm:$0xff]   ;;  %v16777_v5 = vld [vmem:[%s23456_s2 + $0x30] ss:$12 sps:$4 sm:$0xff]  }
   0x3   :  { %2850 = vmatpush1.bf16.msra.mxu0 %v16771_v1  ;;  %v16778_v6 = vld [vmem:[%s23456_s2 + $0x4c] ss:$12 sps:$4 sm:$0xff]   ;;  %v16780_v7 = vld [vmem:[%s23456_s2 + $0x48] ss:$12 sps:$4 sm:$0xff]   ;;  %v16781_v8 = vld [vmem:[%s23456_s2 + $0x64] ss:$12 sps:$4 sm:$0xff]  }
   0x4   :  { %2851 = vmatprep.subr.bf16.mxu0 %v16772_v2  ;;  %v16783_v9 = vld [vmem:[%s23456_s2 + $0x60] ss:$12 sps:$4 sm:$0xff]   ;;  %v16784_v10 = vld [vmem:[%s23456_s2 + $0x7c] ss:$12 sps:$4 sm:$0xff]   ;;  %v16786_v11 = vld [vmem:[%s23456_s2 + $0x78] ss:$12 sps:$4 sm:$0xff]  }
   0x5   :  { %v16787_v12 = vld [vmem:[%s23456_s2 + $0x94] ss:$12 sps:$4 sm:$0xff]   ;;  %v16789_v14 = vld [vmem:[%s23456_s2 + $0x90] ss:$12 sps:$4 sm:$0xff]   ;;  %v16790_v16 = vld [vmem:[%s23456_s2 + $0xac] ss:$12 sps:$4 sm:$0xff]  }
   0x6   :  { %v16814_v13 = vld [vmem:[%s23456_s2 + $0xc8] ss:$12 sps:$4 sm:$0xff]   ;;  %v16819_v17 = vld [vmem:[%s23456_s2 + $0xe0] ss:$12 sps:$4 sm:$0xff]   ;;  %v16793_v22 = vld [vmem:[%s23456_s2 + $0xc4] ss:$12 sps:$4 sm:$0xff]  }
   0x7   :  { %2852 = vmatpush1.bf16.msra.mxu0 %v16774_v3  ;;  %14991 = vmatprep.subr.bf16.mxu1 %v16814_v13  ;;  %v16817_v15 = vld [vmem:[%s23456_s2 + $0x8] ss:$12 sps:$4 sm:$0xff]   ;;  %v80_v18 = vld [vmem:[%s23457_s1] sm:$0xff]  ;;  %v16829_v27 = vld [vmem:[%s23456_s2 + $0x110] ss:$12 sps:$4 sm:$0xff]   ;;  %vm6862_vm4 = vcmask 1043456  }
   0x8   :  { %2853 = vmatprep.subr.bf16.mxu0 %v16775_v4  ;;  %14992 = vmatpush3.bf16.msra.mxu1 %v16817_v15  ;;  %v88_v19 = vld [vmem:[%s23457_s1 + $0x40] sm:$0xff]  ;;  %v16792_v20 = vld [vmem:[%s23456_s2 + $0xa8] ss:$12 sps:$4 sm:$0xff]   ;;  %v16833_v29 = vld [vmem:[%s23456_s2 + $0x50] ss:$12 sps:$4 sm:$0xff]   ;;  %vm8258_vm5 = vcmask 64512  }
   0x9   :  { %v13938_v21 = vcombine.high %v80_v18, %v88_v19  ;;  %14993 = vmatprep.subr.bf16.mxu1 %v16819_v17  ;;  %v16823_v23 = vld [vmem:[%s23456_s2 + $0x20] ss:$12 sps:$4 sm:$0xff]   ;;  %v16824_v24 = vld [vmem:[%s23456_s2 + $0xf8] ss:$12 sps:$4 sm:$0xff]   ;;  %v16796_v28 = vld [vmem:[%s23456_s2 + $0xdc] ss:$12 sps:$4 sm:$0xff]   ;;  %v13937_v50 = vcombine.low %v80_v18, %v88_v19 }
   0xa   :  { %v16795_v25 = vld [vmem:[%s23456_s2 + $0xc0] ss:$12 sps:$4 sm:$0xff]   ;;  %v16828_v26 = vld [vmem:[%s23456_s2 + $0x38] ss:$12 sps:$4 sm:$0xff]   ;;  %v16834_v30 = vld [vmem:[%s23456_s2 + $0x128] ss:$12 sps:$4 sm:$0xff]  }
   0xb   :  { %2854 = vmatpush1.bf16.msra.mxu0 %v16777_v5  ;;  %2881 = vmatprep.mubr.bf16.mxu0 %v13938_v21  ;;  %v16798_v31 = vld [vmem:[%s23456_s2 + $0xd8] ss:$12 sps:$4 sm:$0xff]   ;;  %v16799_v32 = vld [vmem:[%s23456_s2 + $0xf4] ss:$12 sps:$4 sm:$0xff]   ;;  %v16801_v35 = vld [vmem:[%s23456_s2 + $0xf0] ss:$12 sps:$4 sm:$0xff]  }
   0xc   :  { %2855 = vmatprep.subr.bf16.mxu0 %v16778_v6  ;;  %3305 = vmatprep.mubr.bf16.mxu1 %v13938_v21  ;;  %v16838_v33 = vld [vmem:[%s23456_s2 + $0x68] ss:$12 sps:$4 sm:$0xff]   ;;  %v16839_v34 = vld [vmem:[%s23456_s2 + $0x140] ss:$12 sps:$4 sm:$0xff]   ;;  %v16844_v38 = vld [vmem:[%s23456_s2 + $0x158] ss:$12 sps:$4 sm:$0xff]  }
   0xd   :  { %14994 = vmatpush3.bf16.msra.mxu1 %v16823_v23  ;;  %v16802_v36 = vld [vmem:[%s23456_s2 + $0x10c] ss:$12 sps:$4 sm:$0xff]   ;;  %v16804_v39 = vld [vmem:[%s23456_s2 + $0x108] ss:$12 sps:$4 sm:$0xff]   ;;  %v16805_v40 = vld [vmem:[%s23456_s2 + $0x124] ss:$12 sps:$4 sm:$0xff]  }
   0xe   :  { %14995 = vmatprep.subr.bf16.mxu1 %v16824_v24  ;;  %v16843_v37 = vld [vmem:[%s23456_s2 + $0x80] ss:$12 sps:$4 sm:$0xff]   ;;  %v16848_v41 = vld [vmem:[%s23456_s2 + $0x98] ss:$12 sps:$4 sm:$0xff]   ;;  %v16849_v42 = vld [vmem:[%s23456_s2 + $0x170] ss:$12 sps:$4 sm:$0xff]  }
   0xf   :  { %2856 = vmatpush1.bf16.msra.mxu0 %v16780_v7  ;;  %v16807_v43 = vld [vmem:[%s23456_s2 + $0x120] ss:$12 sps:$4 sm:$0xff]   ;;  %v16808_v44 = vld [vmem:[%s23456_s2 + $0x13c] ss:$12 sps:$4 sm:$0xff]   ;;  %v16810_v47 = vld [vmem:[%s23456_s2 + $0x138] ss:$12 sps:$4 sm:$0xff]  }
  0x10   :  { %2857 = vmatprep.subr.bf16.mxu0 %v16781_v8  ;;  %v16853_v45 = vld [vmem:[%s23456_s2 + $0xb0] ss:$12 sps:$4 sm:$0xff]   ;;  %v16854_v46 = vld [vmem:[%s23456_s2 + $0x248] ss:$12 sps:$4 sm:$0xff]   ;;  %v16859_v51 = vld [vmem:[%s23456_s2 + $0x260] ss:$12 sps:$4 sm:$0xff]  }
  0x11   :  { %14996 = vmatpush3.bf16.msra.mxu1 %v16828_v26  ;;  %v16811_v48 = vld [vmem:[%s23456_s2 + $0x154] ss:$12 sps:$4 sm:$0xff]   ;;  %v16813_v52 = vld [vmem:[%s23456_s2 + $0x150] ss:$12 sps:$4 sm:$0xff]   ;;  %v16815_v53 = vld [vmem:[%s23456_s2 + $0x16c] ss:$12 sps:$4 sm:$0xff]  }
  0x12   :  { %14997 = vmatprep.subr.bf16.mxu1 %v16829_v27  ;;  %v16858_v49 = vld [vmem:[%s23456_s2 + $0x188] ss:$12 sps:$4 sm:$0xff]   ;;  %v16863_v54 = vld [vmem:[%s23456_s2 + $0x1a0] ss:$12 sps:$4 sm:$0xff]   ;;  %v16864_v55 = vld [vmem:[%s23456_s2 + $0x278] ss:$12 sps:$4 sm:$0xff]  }
  0x13   :  { %2858 = vmatpush1.bf16.msra.mxu0 %v16783_v9  ;;  %v16818_v56 = vld [vmem:[%s23456_s2 + $0x168] ss:$12 sps:$4 sm:$0xff]   ;;  %v16822_v57 = vld [vmem:[%s23456_s2 + $0x184] ss:$12 sps:$4 sm:$0xff]   ;;  %v16820_v60 = vld [vmem:[%s23456_s2 + $0x180] ss:$12 sps:$4 sm:$0xff]  }
  0x14   :  { %2859 = vmatprep.subr.bf16.mxu0 %v16784_v10  ;;  %v16868_v58 = vld [vmem:[%s23456_s2 + $0x1b8] ss:$12 sps:$4 sm:$0xff]   ;;  %v16869_v59 = vld [vmem:[%s23456_s2 + $0x290] ss:$12 sps:$4 sm:$0xff]   ;;  %v16874_v63 = vld [vmem:[%s23456_s2 + $0x2a8] ss:$12 sps:$4 sm:$0xff]  }
  0x15   :  { %14998 = vmatpush3.bf16.msra.mxu1 %v16833_v29  ;;  %v16827_v61 = vld [vmem:[%s23456_s2 + $0x19c] ss:$12 sps:$4 sm:$0xff]   ;;  %v16825_v0 = vld [vmem:[%s23456_s2 + $0x198] ss:$12 sps:$4 sm:$0xff]   ;;  %v16832_v3 = vld [vmem:[%s23456_s2 + $0x1b4] ss:$12 sps:$4 sm:$0xff]  }
  0x16   :  { %14999 = vmatprep.subr.bf16.mxu1 %v16834_v30  ;;  %v16873_v62 = vld [vmem:[%s23456_s2 + $0x1d0] ss:$12 sps:$4 sm:$0xff]   ;;  %v96_v1 = vld [vmem:[%s23457_s1 + $0x80] sm:$0xff]  ;;  %v16878_v6 = vld [vmem:[%s23456_s2 + $0x1e8] ss:$12 sps:$4 sm:$0xff]   ;;  %s18265_s15 = smov 72  }
  0x17   :  { %2860 = vmatpush1.bf16.msra.mxu0 %v16786_v11  ;;  %v104_v2 = vld [vmem:[%s23457_s1 + $0xc0] sm:$0xff]  ;;  %v16830_v8 = vld [vmem:[%s23456_s2 + $0x1b0] ss:$12 sps:$4 sm:$0xff]   ;;  %v16837_v9 = vld [vmem:[%s23456_s2 + $0x1cc] ss:$12 sps:$4 sm:$0xff]   ;;  %s18266_s16 = smov 96  }
  0x18   :  { %2861 = vmatprep.subr.bf16.mxu0 %v16787_v12  ;;  %v13954_v4 = vcombine.high %v96_v1, %v104_v2  ;;  %v13953_v5 = vcombine.low %v96_v1, %v104_v2  ;;  %v16879_v7 = vld [vmem:[%s23456_s2 + $0x2c0] ss:$12 sps:$4 sm:$0xff]   ;;  %v16835_v10 = vld [vmem:[%s23456_s2 + $0x1c8] ss:$12 sps:$4 sm:$0xff]   ;;  %v16884_v12 = vld [vmem:[%s23456_s2 + $0x2d8] ss:$12 sps:$4 sm:$0xff]  }
  0x19   :  { %15000 = vmatpush3.bf16.msra.mxu1 %v16838_v33  ;;  %v16883_v11 = vld [vmem:[%s23456_s2 + $0x200] ss:$12 sps:$4 sm:$0xff]   ;;  %v16842_v15 = vld [vmem:[%s23456_s2 + $0x1e4] ss:$12 sps:$4 sm:$0xff]   ;;  %v16898_v26 = vld [vmem:[%s23456_s2 + $0x308] ss:$12 sps:$4 sm:$0xff]  }
  0x1a   :  { %15001 = vmatprep.subr.bf16.mxu1 %v16839_v34  ;;  %v81_v13 = vld [vmem:[%s23457_s1 + $0x8] sm:$0xff]  ;;  %v16888_v17 = vld [vmem:[%s23456_s2 + $0x218] ss:$12 sps:$4 sm:$0xff]   ;;  %v16889_v18 = vld [vmem:[%s23456_s2 + $0x2f0] ss:$12 sps:$4 sm:$0xff]   ;;  %s18267_s27 = smov 32  }
  0x1b   :  { %2862 = vmatpush1.bf16.msra.mxu0 %v16789_v14  ;;  %v89_v14 = vld [vmem:[%s23457_s1 + $0x48] sm:$0xff]  ;;  %v16893_v21 = vld [vmem:[%s23456_s2 + $0x230] ss:$12 sps:$4 sm:$0xff]   ;;  %v16845_v23 = vld [vmem:[%s23456_s2 + $0x1f8] ss:$12 sps:$4 sm:$0xff]   ;;  %vm9331_vm6 = vcmask 261120  }
  0x1c   :  { %2863 = vmatprep.subr.bf16.mxu0 %v16790_v16  ;;  %v13940_v16 = vcombine.high %v81_v13, %v89_v14  ;;  %v16840_v19 = vld [vmem:[%s23456_s2 + $0x1e0] ss:$12 sps:$4 sm:$0xff]   ;;  %v16862_v33 = vld [vmem:[%s23456_s2 + $0x244] ss:$12 sps:$4 sm:$0xff]   ;;  %v16938_v2 = vld [vmem:[%s23456_s2 + $0x488] ss:$12 sps:$4 sm:$0xff]  }
  0x1d   :  { %15002 = vmatpush3.bf16.msra.mxu1 %v16843_v37  ;;  %v16852_v24 = vld [vmem:[%s23456_s2 + $0x214] ss:$12 sps:$4 sm:$0xff]   ;;  %v16857_v29 = vld [vmem:[%s23456_s2 + $0x22c] ss:$12 sps:$4 sm:$0xff]   ;;  %s18268_s30 = smov 56   ;;  %s18270_s24 = smov 16  }
  0x1e   :  { %15003 = vmatprep.subr.bf16.mxu1 %v16844_v38  ;;  %v16899_v27 = vld [vmem:[%s23456_s2 + $0x3e0] ss:$12 sps:$4 sm:$0xff]   ;;  %v16908_v34 = vld [vmem:[%s23456_s2 + $0x338] ss:$12 sps:$4 sm:$0xff]   ;;  %s18272_s21 = smov 104  }
  0x1f   :  { %2864 = vmatpush1.bf16.msra.mxu0 %v16792_v20  ;;  %v16847_v20 = vld [vmem:[%s23456_s2 + $0x1fc] ss:$12 sps:$4 sm:$0xff]   ;;  %v16903_v30 = vld [vmem:[%s23456_s2 + $0x320] ss:$12 sps:$4 sm:$0xff]  }
  0x20   :  { %2865 = vmatprep.subr.bf16.mxu0 %v16793_v22  ;;  %v16894_v22 = vld [vmem:[%s23456_s2 + $0x3c8] ss:$12 sps:$4 sm:$0xff]  }
  0x21   :  { %15004 = vmatpush3.bf16.msra.mxu1 %v16848_v41  ;;  %v97_v37 = vld [vmem:[%s23457_s1 + $0x88] sm:$0xff] }
  0x22   :  { %15005 = vmatprep.subr.bf16.mxu1 %v16849_v42  ;;  %v105_v38 = vld [vmem:[%s23457_s1 + $0xc8] sm:$0xff]  ;;  %v16913_v42 = vld [vmem:[%s23456_s2 + $0x350] ss:$12 sps:$4 sm:$0xff]  }
  0x23   :  { %2866 = vmatpush1.bf16.msra.mxu0 %v16795_v25  ;;  %v18601_v25 = vcombine.low %v81_v13, %v89_v14  ;;  %v18648_v41 = vcombine.low %v97_v37, %v105_v38  ;;  %v16948_v14 = vld [vmem:[%s23456_s2 + $0x4b8] ss:$12 sps:$4 sm:$0xff]  }
  0x24   :  { %2867 = vmatprep.subr.bf16.mxu0 %v16796_v28  ;;  %v16850_v28 = vld [vmem:[%s23456_s2 + $0x210] ss:$12 sps:$4 sm:$0xff]  }
  0x25   :  { %15006 = vmatpush3.bf16.msra.mxu1 %v16853_v45  ;;  %v16872_v45 = vld [vmem:[%s23456_s2 + $0x274] ss:$12 sps:$4 sm:$0xff]  }
  0x26   :  { %15019 = vmatprep.subr.bf16.mxu1 %v16854_v46  ;;  %v16870_v46 = vld [vmem:[%s23456_s2 + $0x270] ss:$12 sps:$4 sm:$0xff]  }
  0x27   :  { %2868 = vmatpush1.bf16.msra.mxu0 %v16798_v31  ;;  %v16904_v31 = vld [vmem:[%s23456_s2 + $0x3f8] ss:$12 sps:$4 sm:$0xff]  }
  0x28   :  { %2869 = vmatprep.subr.bf16.mxu0 %v16799_v32  ;;  %3306 = vmatmul.mubr.bf16.vlgmr.msra.gmra.mrb[0].mxu1 %v13937_v50  ;;  %v16855_v32 = vld [vmem:[%s23456_s2 + $0x228] ss:$12 sps:$4 sm:$0xff]  }
  0x29   :  { %15020 = vmatpush3.bf16.msra.mxu1 %v16858_v49  ;;  %3313 = vmatprep.mubr.bf16.mxu1 %v13954_v4  ;;  %v82_v49 = vld [vmem:[%s23457_s1 + $0x10] sm:$0xff] }
  0x2a   :  { %15021 = vmatprep.subr.bf16.mxu1 %v16859_v51  ;;  %v16877_v51 = vld [vmem:[%s23456_s2 + $0x28c] ss:$12 sps:$4 sm:$0xff]  }
  0x2b   :  { %2870 = vmatpush1.bf16.msra.mxu0 %v16801_v35  ;;  %v16909_v35 = vld [vmem:[%s23456_s2 + $0x410] ss:$12 sps:$4 sm:$0xff]  }
  0x2c   :  { %2871 = vmatprep.subr.bf16.mxu0 %v16802_v36  ;;  %v16860_v36 = vld [vmem:[%s23456_s2 + $0x240] ss:$12 sps:$4 sm:$0xff]  }
  0x2d   :  { %15022 = vmatpush3.bf16.msra.mxu1 %v16863_v54  ;;  %v16924_v54 = vld [vmem:[%s23456_s2 + $0x458] ss:$12 sps:$4 sm:$0xff]  }
  0x2e   :  { %15023 = vmatprep.subr.bf16.mxu1 %v16864_v55  ;;  %v16875_v55 = vld [vmem:[%s23456_s2 + $0x288] ss:$12 sps:$4 sm:$0xff]  }
  0x2f   :  { %2872 = vmatpush1.bf16.msra.mxu0 %v16804_v39  ;;  %v16867_v39 = vld [vmem:[%s23456_s2 + $0x25c] ss:$12 sps:$4 sm:$0xff]  }
  0x30   :  { %2873 = vmatprep.subr.bf16.mxu0 %v16805_v40  ;;  %3314 = vmatmul.mubr.bf16.gmra.mrb[4].mxu1 %v13953_v5  ;;  %v18646_v40 = vcombine.high %v97_v37, %v105_v38  ;;  %v16973_v37 = vld [vmem:[%s23456_s2 + $0x530] ss:$12 sps:$4 sm:$0xff]   ;;  %v16974_v38 = vld [vmem:[%s23456_s2 + $0x6c8] ss:$12 sps:$4 sm:$0xff]  }
  0x31   :  { %15024 = vmatpush3.bf16.msra.mxu1 %v16868_v58  ;;  %3354 = vmatprep.mubr.bf16.mxu1 %v13940_v16  ;;  %v16929_v58 = vld [vmem:[%s23456_s2 + $0x470] ss:$12 sps:$4 sm:$0xff]  }
  0x32   :  { %15025 = vmatprep.subr.bf16.mxu1 %v16869_v59  ;;  %v16880_v59 = vld [vmem:[%s23456_s2 + $0x2a0] ss:$12 sps:$4 sm:$0xff]  }
  0x33   :  { %2874 = vmatpush1.bf16.msra.mxu0 %v16807_v43  ;;  %v16914_v43 = vld [vmem:[%s23456_s2 + $0x428] ss:$12 sps:$4 sm:$0xff]  }
  0x34   :  { %2875 = vmatprep.subr.bf16.mxu0 %v16808_v44  ;;  %v16865_v44 = vld [vmem:[%s23456_s2 + $0x258] ss:$12 sps:$4 sm:$0xff]  }
  0x35   :  { %15026 = vmatpush3.bf16.msra.mxu1 %v16873_v62  ;;  %v16934_v62 = vld [vmem:[%s23456_s2 + $0x548] ss:$12 sps:$4 sm:$0xff]  }
  0x36   :  { %15027 = vmatprep.subr.bf16.mxu1 %v16874_v63  ;;  %v16885_v63 = vld [vmem:[%s23456_s2 + $0x2b8] ss:$12 sps:$4 sm:$0xff]  }
  0x37   :  { %2876 = vmatpush1.bf16.msra.mxu0 %v16810_v47  ;;  %v16918_v47 = vld [vmem:[%s23456_s2 + $0x368] ss:$12 sps:$4 sm:$0xff]  }
  0x38   :  { %2877 = vmatprep.subr.bf16.mxu0 %v16811_v48  ;;  %v16919_v48 = vld [vmem:[%s23456_s2 + $0x440] ss:$12 sps:$4 sm:$0xff]  }
  0x39   :  { %15028 = vmatpush3.bf16.msra.mxu1 %v16878_v6  ;;  %v16943_v6 = vld [vmem:[%s23456_s2 + $0x4a0] ss:$12 sps:$4 sm:$0xff]  }
  0x3a   :  { %15029 = vmatprep.subr.bf16.mxu1 %v16879_v7  ;;  %v16944_v7 = vld [vmem:[%s23456_s2 + $0x578] ss:$12 sps:$4 sm:$0xff]  }
  0x3b   :  { %2878 = vmatpush1.bf16.msra.mxu0 %v16813_v52 }
  0x3c   :  { %2879 = vmatprep.subr.bf16.mxu0 %v16815_v53  ;;  %v16923_v53 = vld [vmem:[%s23456_s2 + $0x380] ss:$12 sps:$4 sm:$0xff]  }
  0x3d   :  { %15030 = vmatpush3.bf16.msra.mxu1 %v16883_v11  ;;  %v16902_v11 = vld [vmem:[%s23456_s2 + $0x304] ss:$12 sps:$4 sm:$0xff]  }
  0x3e   :  { %15031 = vmatprep.subr.bf16.mxu1 %v16884_v12 }
  0x3f   :  { %2880 = vmatpush1.bf16.msra.mxu0 %v16818_v56  ;;  %v16882_v56 = vld [vmem:[%s23456_s2 + $0x2a4] ss:$12 sps:$4 sm:$0xff]  }
  0x40   :  { %2902 = vmatprep.subr.bf16.mxu0 %v16822_v57  ;;  %v16928_v57 = vld [vmem:[%s23456_s2 + $0x398] ss:$12 sps:$4 sm:$0xff]  }
  0x41   :  { %15032 = vmatpush3.bf16.msra.mxu1 %v16888_v17  ;;  %v16907_v17 = vld [vmem:[%s23456_s2 + $0x31c] ss:$12 sps:$4 sm:$0xff]  }
  0x42   :  { %2882 = vmatmul.mubr.bf16.vlgmr.msra.gmra.mrb[0].mxu0 %v13937_v50  ;;  %15033 = vmatprep.subr.bf16.mxu1 %v16889_v18  ;;  %v90_v50 = vld [vmem:[%s23457_s1 + $0x50] sm:$0xff]  ;;  %v16905_v18 = vld [vmem:[%s23456_s2 + $0x318] ss:$12 sps:$4 sm:$0xff]  }
  0x43   :  { %2903 = vmatpush1.bf16.msra.mxu0 %v16820_v60  ;;  %2891 = vmatprep.mubr.bf16.mxu0 %v13954_v4  ;;  %v18682_v52 = vcombine.high %v82_v49, %v90_v50  ;;  %v16887_v60 = vld [vmem:[%s23456_s2 + $0x2bc] ss:$12 sps:$4 sm:$0xff]   ;;  %v18721_v1 = vcombine.low %v82_v49, %v90_v50  ;;  %v16983_v49 = vld [vmem:[%s23456_s2 + $0x620] ss:$12 sps:$4 sm:$0xff]   ;;  %v16984_v50 = vld [vmem:[%s23456_s2 + $0x6f8] ss:$12 sps:$4 sm:$0xff]  }
  0x44   :  { %2904 = vmatprep.subr.bf16.mxu0 %v16827_v61  ;;  %v16933_v61 = vld [vmem:[%s23456_s2 + $0x3b0] ss:$12 sps:$4 sm:$0xff]  }
  0x45   :  { %15034 = vmatpush3.bf16.msra.mxu1 %v16893_v21  ;;  %v16890_v4 = vld [vmem:[%s23456_s2 + $0x2d0] ss:$12 sps:$4 sm:$0xff]  }
  0x46   :  { %15047 = vmatprep.subr.bf16.mxu1 %v16894_v22  ;;  %v83_v21 = vld [vmem:[%s23457_s1 + $0x18] sm:$0xff] }
  0x47   :  { %2905 = vmatpush1.bf16.msra.mxu0 %v16825_v0  ;;  %v16892_v0 = vld [vmem:[%s23456_s2 + $0x2d4] ss:$12 sps:$4 sm:$0xff]   ;;  %v91_v22 = vld [vmem:[%s23457_s1 + $0x58] sm:$0xff] }
  0x48   :  { %2906 = vmatprep.subr.bf16.mxu0 %v16832_v3  ;;  %3355 = vmatmul.mubr.bf16.vlgmr.msra.gmra.mrb[8].mxu1 %v18601_v25  ;;  %v16939_v3 = vld [vmem:[%s23456_s2 + $0x560] ss:$12 sps:$4 sm:$0xff]  }
  0x49   :  { %15048 = vmatpush3.bf16.msra.mxu1 %v16898_v26  ;;  %3362 = vmatprep.mubr.bf16.mxu1 %v18646_v40  ;;  %v16959_v26 = vld [vmem:[%s23456_s2 + $0x5c0] ss:$12 sps:$4 sm:$0xff]  }
  0x4a   :  { %2892 = vmatmul.mubr.bf16.gmra.mrb[4].mxu0 %v13953_v5  ;;  %15049 = vmatprep.subr.bf16.mxu1 %v16899_v27  ;;  %v16897_v5 = vld [vmem:[%s23456_s2 + $0x2ec] ss:$12 sps:$4 sm:$0xff]   ;;  %v16910_v27 = vld [vmem:[%s23456_s2 + $0x330] ss:$12 sps:$4 sm:$0xff]  }
  0x4b   :  { %2907 = vmatpush1.bf16.msra.mxu0 %v16830_v8  ;;  %2934 = vmatprep.mubr.bf16.mxu0 %v13940_v16  ;;  %v16895_v8 = vld [vmem:[%s23456_s2 + $0x2e8] ss:$12 sps:$4 sm:$0xff]   ;;  %v16900_v16 = vld [vmem:[%s23456_s2 + $0x300] ss:$12 sps:$4 sm:$0xff]  }
  0x4c   :  { %2908 = vmatprep.subr.bf16.mxu0 %v16837_v9  ;;  %v98_v9 = vld [vmem:[%s23457_s1 + $0x90] sm:$0xff] }
  0x4d   :  { %15050 = vmatpush3.bf16.msra.mxu1 %v16903_v30  ;;  %v16964_v30 = vld [vmem:[%s23456_s2 + $0x5d8] ss:$12 sps:$4 sm:$0xff]  }
  0x4e   :  { %15051 = vmatprep.subr.bf16.mxu1 %v16904_v31  ;;  %v16915_v31 = vld [vmem:[%s23456_s2 + $0x348] ss:$12 sps:$4 sm:$0xff]  }
  0x4f   :  { %2909 = vmatpush1.bf16.msra.mxu0 %v16835_v10  ;;  %v106_v10 = vld [vmem:[%s23457_s1 + $0xd0] sm:$0xff] }
  0x50   :  { %2910 = vmatprep.subr.bf16.mxu0 %v16842_v15  ;;  %3363 = vmatmul.mubr.bf16.gmra.mrb[12].mxu1 %v18648_v41  ;;  %v18754_v12 = vcombine.high %v98_v9, %v106_v10  ;;  %v18756_v13 = vcombine.low %v98_v9, %v106_v10  ;;  %v16949_v15 = vld [vmem:[%s23456_s2 + $0x590] ss:$12 sps:$4 sm:$0xff]   ;;  %v17008_v10 = vld [vmem:[%s23456_s2 + $0x698] ss:$12 sps:$4 sm:$0xff]  }
  0x51   :  { %15052 = vmatpush3.bf16.msra.mxu1 %v16908_v34  ;;  %3403 = vmatprep.mubr.bf16.mxu1 %v18682_v52  ;;  %v16969_v34 = vld [vmem:[%s23456_s2 + $0x5f0] ss:$12 sps:$4 sm:$0xff]  }
  0x52   :  { %15053 = vmatprep.subr.bf16.mxu1 %v16909_v35  ;;  %v16920_v35 = vld [vmem:[%s23456_s2 + $0x360] ss:$12 sps:$4 sm:$0xff]   ;;  %v16962_v9 = vld [vmem:[%s23456_s2 + $0x424] ss:$12 sps:$4 sm:$0xff]  }
  0x53   :  { %2911 = vmatpush1.bf16.msra.mxu0 %v16840_v19  ;;  %v16953_v19 = vld [vmem:[%s23456_s2 + $0x4d0] ss:$12 sps:$4 sm:$0xff]  }
  0x54   :  { %2912 = vmatprep.subr.bf16.mxu0 %v16847_v20  ;;  %v16954_v20 = vld [vmem:[%s23456_s2 + $0x5a8] ss:$12 sps:$4 sm:$0xff]  }
  0x55   :  { %15054 = vmatpush3.bf16.msra.mxu1 %v16913_v42  ;;  %v16978_v42 = vld [vmem:[%s23456_s2 + $0x608] ss:$12 sps:$4 sm:$0xff]  }
  0x56   :  { %15055 = vmatprep.subr.bf16.mxu1 %v16914_v43  ;;  %v16979_v43 = vld [vmem:[%s23456_s2 + $0x6e0] ss:$12 sps:$4 sm:$0xff]  }
  0x57   :  { %2913 = vmatpush1.bf16.msra.mxu0 %v16845_v23  ;;  %v16912_v23 = vld [vmem:[%s23456_s2 + $0x334] ss:$12 sps:$4 sm:$0xff]  }
  0x58   :  { %2914 = vmatprep.subr.bf16.mxu0 %v16852_v24  ;;  %v18792_v24 = vcombine.high %v83_v21, %v91_v22 }
  0x59   :  { %15056 = vmatpush3.bf16.msra.mxu1 %v16918_v47  ;;  %v16937_v47 = vld [vmem:[%s23456_s2 + $0x3ac] ss:$12 sps:$4 sm:$0xff]  }
  0x5a   :  { %15057 = vmatprep.subr.bf16.mxu1 %v16919_v48 }
  0x5b   :  { %2915 = vmatpush1.bf16.msra.mxu0 %v16850_v28  ;;  %v16917_v28 = vld [vmem:[%s23456_s2 + $0x34c] ss:$12 sps:$4 sm:$0xff]  }
  0x5c   :  { %2916 = vmatprep.subr.bf16.mxu0 %v16857_v29  ;;  %v16963_v29 = vld [vmem:[%s23456_s2 + $0x500] ss:$12 sps:$4 sm:$0xff]  }
  0x5d   :  { %15058 = vmatpush3.bf16.msra.mxu1 %v16923_v53 }
  0x5e   :  { %15059 = vmatprep.subr.bf16.mxu1 %v16924_v54  ;;  %v16940_v54 = vld [vmem:[%s23456_s2 + $0x3c0] ss:$12 sps:$4 sm:$0xff]  }
  0x5f   :  { %2917 = vmatpush1.bf16.msra.mxu0 %v16855_v32  ;;  %v16922_v32 = vld [vmem:[%s23456_s2 + $0x364] ss:$12 sps:$4 sm:$0xff]  }
  0x60   :  { %2918 = vmatprep.subr.bf16.mxu0 %v16862_v33  ;;  %v16968_v33 = vld [vmem:[%s23456_s2 + $0x518] ss:$12 sps:$4 sm:$0xff]  }
  0x61   :  { %15060 = vmatpush3.bf16.msra.mxu1 %v16928_v57  ;;  %v84_v57 = vld [vmem:[%s23457_s1 + $0x20] sm:$0xff] }
  0x62   :  { %15061 = vmatprep.subr.bf16.mxu1 %v16929_v58  ;;  %v92_v58 = vld [vmem:[%s23457_s1 + $0x60] sm:$0xff] }
  0x63   :  { %2919 = vmatpush1.bf16.msra.mxu0 %v16860_v36  ;;  %v16927_v36 = vld [vmem:[%s23456_s2 + $0x37c] ss:$12 sps:$4 sm:$0xff]  }
  0x64   :  { %2920 = vmatprep.subr.bf16.mxu0 %v16867_v39  ;;  %v16925_v39 = vld [vmem:[%s23456_s2 + $0x378] ss:$12 sps:$4 sm:$0xff]  }
  0x65   :  { %15062 = vmatpush3.bf16.msra.mxu1 %v16933_v61  ;;  %v16993_v61 = vld [vmem:[%s23456_s2 + $0x650] ss:$12 sps:$4 sm:$0xff]  }
  0x66   :  { %15075 = vmatprep.subr.bf16.mxu1 %v16934_v62  ;;  %v16994_v62 = vld [vmem:[%s23456_s2 + $0x728] ss:$12 sps:$4 sm:$0xff]  }
  0x67   :  { %2921 = vmatpush1.bf16.msra.mxu0 %v16865_v44  ;;  %v16930_v44 = vld [vmem:[%s23456_s2 + $0x390] ss:$12 sps:$4 sm:$0xff]  }
  0x68   :  { %2922 = vmatprep.subr.bf16.mxu0 %v16872_v45  ;;  %3404 = vmatmul.mubr.bf16.vlgmr.msra.gmra.mrb[16].mxu1 %v18721_v1  ;;  %v99_v45 = vld [vmem:[%s23457_s1 + $0x98] sm:$0xff] }
  0x69   :  { %15076 = vmatpush3.bf16.msra.mxu1 %v16938_v2  ;;  %3411 = vmatprep.mubr.bf16.mxu1 %v18754_v12  ;;  %v16998_v2 = vld [vmem:[%s23456_s2 + $0x668] ss:$12 sps:$4 sm:$0xff]  }
  0x6a   :  { %15077 = vmatprep.subr.bf16.mxu1 %v16939_v3  ;;  %v16999_v3 = vld [vmem:[%s23456_s2 + $0x740] ss:$12 sps:$4 sm:$0xff]  }
  0x6b   :  { %2923 = vmatpush1.bf16.msra.mxu0 %v16870_v46  ;;  %v107_v46 = vld [vmem:[%s23457_s1 + $0xd8] sm:$0xff] }
  0x6c   :  { %2924 = vmatprep.subr.bf16.mxu0 %v16877_v51  ;;  %v18866_v48 = vcombine.high %v99_v45, %v107_v46  ;;  %v16935_v51 = vld [vmem:[%s23456_s2 + $0x3a8] ss:$12 sps:$4 sm:$0xff]   ;;  %v18881_v53 = vcombine.low %v99_v45, %v107_v46  ;;  %v17039_v46 = vld [vmem:[%s23456_s2 + $0x8c0] ss:$12 sps:$4 sm:$0xff]  }
  0x6d   :  { %15078 = vmatpush3.bf16.msra.mxu1 %v16943_v6  ;;  %v17003_v6 = vld [vmem:[%s23456_s2 + $0x680] ss:$12 sps:$4 sm:$0xff]  }
  0x6e   :  { %15079 = vmatprep.subr.bf16.mxu1 %v16944_v7  ;;  %v17004_v7 = vld [vmem:[%s23456_s2 + $0x758] ss:$12 sps:$4 sm:$0xff]   ;;  %v16992_v45 = vld [vmem:[%s23456_s2 + $0x4b4] ss:$12 sps:$4 sm:$0xff]  }
  0x6f   :  { %2925 = vmatpush1.bf16.msra.mxu0 %v16875_v55  ;;  %v16988_v55 = vld [vmem:[%s23456_s2 + $0x638] ss:$12 sps:$4 sm:$0xff]  }
  0x70   :  { %2926 = vmatprep.subr.bf16.mxu0 %v16882_v56  ;;  %3412 = vmatmul.mubr.bf16.gmra.mrb[20].mxu1 %v18756_v13  ;;  %v16989_v56 = vld [vmem:[%s23456_s2 + $0x710] ss:$12 sps:$4 sm:$0xff]  }
  0x71   :  { %15080 = vmatpush3.bf16.msra.mxu1 %v16948_v14  ;;  %3452 = vmatprep.mubr.bf16.mxu1 %v18792_v24  ;;  %v16960_v14 = vld [vmem:[%s23456_s2 + $0x420] ss:$12 sps:$4 sm:$0xff]  }
  0x72   :  { %15081 = vmatprep.subr.bf16.mxu1 %v16949_v15  ;;  %v16967_v15 = vld [vmem:[%s23456_s2 + $0x43c] ss:$12 sps:$4 sm:$0xff]  }
  0x73   :  { %2927 = vmatpush1.bf16.msra.mxu0 %v16880_v59  ;;  %v16947_v59 = vld [vmem:[%s23456_s2 + $0x3dc] ss:$12 sps:$4 sm:$0xff]  }
  0x74   :  { %2928 = vmatprep.subr.bf16.mxu0 %v16887_v60  ;;  %v18902_v60 = vcombine.high %v84_v57, %v92_v58 }
  0x75   :  { %15082 = vmatpush3.bf16.msra.mxu1 %v16953_v19  ;;  %v100_v19 = vld [vmem:[%s23457_s1 + $0xa0] sm:$0xff] }
  0x76   :  { %15083 = vmatprep.subr.bf16.mxu1 %v16954_v20  ;;  %v108_v20 = vld [vmem:[%s23457_s1 + $0xe0] sm:$0xff] }
  0x77   :  { %2929 = vmatpush1.bf16.msra.mxu0 %v16885_v63  ;;  %v16945_v63 = vld [vmem:[%s23456_s2 + $0x3d8] ss:$12 sps:$4 sm:$0xff]  }
  0x78   :  { %2930 = vmatprep.subr.bf16.mxu0 %v16892_v0  ;;  %v16952_v0 = vld [vmem:[%s23456_s2 + $0x3f4] ss:$12 sps:$4 sm:$0xff]  }
  0x7b   :  { %2931 = vmatpush1.bf16.msra.mxu0 %v16890_v4  ;;  %v16950_v4 = vld [vmem:[%s23456_s2 + $0x3f0] ss:$12 sps:$4 sm:$0xff]  }
  0x7c   :  { %2932 = vmatprep.subr.bf16.mxu0 %v16897_v5  ;;  %v16957_v5 = vld [vmem:[%s23456_s2 + $0x40c] ss:$12 sps:$4 sm:$0xff]  }
  0x7f   :  { %2933 = vmatpush1.bf16.msra.mxu0 %v16895_v8  ;;  %v16955_v8 = vld [vmem:[%s23456_s2 + $0x408] ss:$12 sps:$4 sm:$0xff]  }
  0x80   :  { %2955 = vmatprep.subr.bf16.mxu0 %v16902_v11  ;;  %v17009_v11 = vld [vmem:[%s23456_s2 + $0x770] ss:$12 sps:$4 sm:$0xff]  }
  0x82   :  { %2935 = vmatmul.mubr.bf16.vlgmr.msra.gmra.mrb[0].mxu0 %v18601_v25  ;;  %v16958_v25 = vld [vmem:[%s23456_s2 + $0x4e8] ss:$12 sps:$4 sm:$0xff]  }
  0x83   :  { %2956 = vmatpush1.bf16.msra.mxu0 %v16900_v16  ;;  %2944 = vmatprep.mubr.bf16.mxu0 %v18646_v40  ;;  %v16932_v40 = vld [vmem:[%s23456_s2 + $0x394] ss:$12 sps:$4 sm:$0xff]   ;;  %v17013_v16 = vld [vmem:[%s23456_s2 + $0x6b0] ss:$12 sps:$4 sm:$0xff]  }
  0x84   :  { %2957 = vmatprep.subr.bf16.mxu0 %v16907_v17  ;;  %15084 = vmatpush3.bf16.msra.mxu1 %v16958_v25  ;;  %v17014_v17 = vld [vmem:[%s23456_s2 + $0x848] ss:$12 sps:$4 sm:$0xff]   ;;  %v18976_v25 = vcombine.high %v100_v19, %v108_v20 }
  0x85   :  { %15085 = vmatprep.subr.bf16.mxu1 %v16959_v26  ;;  %v17019_v26 = vld [vmem:[%s23456_s2 + $0x860] ss:$12 sps:$4 sm:$0xff]  }
  0x87   :  { %2958 = vmatpush1.bf16.msra.mxu0 %v16905_v18  ;;  %v16965_v18 = vld [vmem:[%s23456_s2 + $0x438] ss:$12 sps:$4 sm:$0xff]  }
  0x88   :  { %2959 = vmatprep.subr.bf16.mxu0 %v16912_v23  ;;  %15086 = vmatpush3.bf16.msra.mxu1 %v16963_v29  ;;  %v17018_v23 = vld [vmem:[%s23456_s2 + $0x788] ss:$12 sps:$4 sm:$0xff]  }
  0x89   :  { %15087 = vmatprep.subr.bf16.mxu1 %v16964_v30  ;;  %v16975_v29 = vld [vmem:[%s23456_s2 + $0x468] ss:$12 sps:$4 sm:$0xff]   ;;  %v17023_v30 = vld [vmem:[%s23456_s2 + $0x7a0] ss:$12 sps:$4 sm:$0xff]  }
  0x8a   :  { %2945 = vmatmul.mubr.bf16.gmra.mrb[4].mxu0 %v18648_v41  ;;  %v18845_v41 = vcombine.low %v83_v21, %v91_v22  ;;  %v16972_v21 = vld [vmem:[%s23456_s2 + $0x454] ss:$12 sps:$4 sm:$0xff]   ;;  %v18971_v22 = vcombine.low %v84_v57, %v92_v58  ;;  %v101_v58 = vld [vmem:[%s23457_s1 + $0xa8] sm:$0xff] }
  0x8b   :  { %2960 = vmatpush1.bf16.msra.mxu0 %v16910_v27  ;;  %2987 = vmatprep.mubr.bf16.mxu0 %v18682_v52  ;;  %v16942_v52 = vld [vmem:[%s23456_s2 + $0x3c4] ss:$12 sps:$4 sm:$0xff]   ;;  %v17054_v57 = vld [vmem:[%s23456_s2 + $0x9c8] ss:$12 sps:$4 sm:$0xff]  }
  0x8c   :  { %2961 = vmatprep.subr.bf16.mxu0 %v16917_v28  ;;  %15088 = vmatpush3.bf16.msra.mxu1 %v16968_v33  ;;  %v16970_v27 = vld [vmem:[%s23456_s2 + $0x450] ss:$12 sps:$4 sm:$0xff]   ;;  %v16977_v28 = vld [vmem:[%s23456_s2 + $0x46c] ss:$12 sps:$4 sm:$0xff]  }
  0x8d   :  { %15089 = vmatprep.subr.bf16.mxu1 %v16969_v34  ;;  %v93_v33 = vld [vmem:[%s23457_s1 + $0x68] sm:$0xff]  ;;  %v16982_v34 = vld [vmem:[%s23456_s2 + $0x484] ss:$12 sps:$4 sm:$0xff]  }
  0x8f   :  { %2962 = vmatpush1.bf16.msra.mxu0 %v16915_v31  ;;  %v17024_v31 = vld [vmem:[%s23456_s2 + $0x878] ss:$12 sps:$4 sm:$0xff]  }
  0x90   :  { %2963 = vmatprep.subr.bf16.mxu0 %v16922_v32  ;;  %15090 = vmatpush3.bf16.msra.mxu1 %v16973_v37  ;;  %v19001_v32 = vld [vmem:[%s23457_s1 + $0x28] sm:$0xff] }
  0x91   :  { %15103 = vmatprep.subr.bf16.mxu1 %v16974_v38  ;;  %v19015_v37 = vcombine.high %v19001_v32, %v93_v33  ;;  %v17029_v38 = vld [vmem:[%s23456_s2 + $0x890] ss:$12 sps:$4 sm:$0xff]  }
  0x93   :  { %2964 = vmatpush1.bf16.msra.mxu0 %v16920_v35  ;;  %3453 = vmatmul.mubr.bf16.vlgmr.msra.gmra.mrb[24].mxu1 %v18845_v41  ;;  %v19009_v35 = vcombine.low %v100_v19, %v108_v20  ;;  %v17027_v19 = vld [vmem:[%s23456_s2 + $0x55c] ss:$12 sps:$4 sm:$0xff]  }
  0x94   :  { %2965 = vmatprep.subr.bf16.mxu0 %v16927_v36  ;;  %15104 = vmatpush3.bf16.msra.mxu1 %v16978_v42  ;;  %v17028_v36 = vld [vmem:[%s23456_s2 + $0x7b8] ss:$12 sps:$4 sm:$0xff]   ;;  %v17033_v42 = vld [vmem:[%s23456_s2 + $0x7d0] ss:$12 sps:$4 sm:$0xff]  }
  0x95   :  { %15105 = vmatprep.subr.bf16.mxu1 %v16979_v43  ;;  %3460 = vmatprep.mubr.bf16.mxu1 %v18866_v48  ;;  %v17034_v43 = vld [vmem:[%s23456_s2 + $0x8a8] ss:$12 sps:$4 sm:$0xff]   ;;  %v17073_v20 = vld [vmem:[%s23456_s2 + $0x950] ss:$12 sps:$4 sm:$0xff]  }
  0x97   :  { %2966 = vmatpush1.bf16.msra.mxu0 %v16925_v39  ;;  %v16980_v39 = vld [vmem:[%s23456_s2 + $0x480] ss:$12 sps:$4 sm:$0xff]  }
  0x98   :  { %2967 = vmatprep.subr.bf16.mxu0 %v16932_v40  ;;  %15106 = vmatpush3.bf16.msra.mxu1 %v16983_v49  ;;  %v16987_v40 = vld [vmem:[%s23456_s2 + $0x49c] ss:$12 sps:$4 sm:$0xff]   ;;  %v17043_v49 = vld [vmem:[%s23456_s2 + $0x800] ss:$12 sps:$4 sm:$0xff]  }
  0x99   :  { %15107 = vmatprep.subr.bf16.mxu1 %v16984_v50  ;;  %v17044_v50 = vld [vmem:[%s23456_s2 + $0x8d8] ss:$12 sps:$4 sm:$0xff]  }
  0x9b   :  { %2968 = vmatpush1.bf16.msra.mxu0 %v16930_v44  ;;  %3461 = vmatmul.mubr.bf16.gmra.mrb[28].mxu1 %v18881_v53  ;;  %v16985_v44 = vld [vmem:[%s23456_s2 + $0x498] ss:$12 sps:$4 sm:$0xff]  }
  0x9c   :  { %2969 = vmatprep.subr.bf16.mxu0 %v16937_v47  ;;  %15108 = vmatpush3.bf16.msra.mxu1 %v16988_v55  ;;  %v16997_v47 = vld [vmem:[%s23456_s2 + $0x4cc] ss:$12 sps:$4 sm:$0xff]   ;;  %v17007_v55 = vld [vmem:[%s23456_s2 + $0x4fc] ss:$12 sps:$4 sm:$0xff]  }
  0x9d   :  { %15109 = vmatprep.subr.bf16.mxu1 %v16989_v56  ;;  %3501 = vmatprep.mubr.bf16.mxu1 %v18902_v60  ;;  %v17053_v56 = vld [vmem:[%s23456_s2 + $0x830] ss:$12 sps:$4 sm:$0xff]  }
  0x9f   :  { %2970 = vmatpush1.bf16.msra.mxu0 %v16935_v51  ;;  %v16995_v51 = vld [vmem:[%s23456_s2 + $0x4c8] ss:$12 sps:$4 sm:$0xff]  }
  0xa0   :  { %2971 = vmatprep.subr.bf16.mxu0 %v16942_v52  ;;  %15110 = vmatpush3.bf16.msra.mxu1 %v16993_v61  ;;  %v17002_v52 = vld [vmem:[%s23456_s2 + $0x4e4] ss:$12 sps:$4 sm:$0xff]  }
  0xa1   :  { %15111 = vmatprep.subr.bf16.mxu1 %v16994_v62  ;;  %v17005_v61 = vld [vmem:[%s23456_s2 + $0x4f8] ss:$12 sps:$4 sm:$0xff]   ;;  %v17012_v62 = vld [vmem:[%s23456_s2 + $0x514] ss:$12 sps:$4 sm:$0xff]  }
  0xa3   :  { %2972 = vmatpush1.bf16.msra.mxu0 %v16940_v54  ;;  %v17048_v54 = vld [vmem:[%s23456_s2 + $0x818] ss:$12 sps:$4 sm:$0xff]  }
  0xa4   :  { %2973 = vmatprep.subr.bf16.mxu0 %v16947_v59  ;;  %15112 = vmatpush3.bf16.msra.mxu1 %v16998_v2  ;;  %v109_v59 = vld [vmem:[%s23457_s1 + $0xe8] sm:$0xff] }
  0xa5   :  { %15113 = vmatprep.subr.bf16.mxu1 %v16999_v3  ;;  %v19104_v2 = vcombine.high %v101_v58, %v109_v59  ;;  %v17010_v3 = vld [vmem:[%s23456_s2 + $0x510] ss:$12 sps:$4 sm:$0xff]  }
  0xa7   :  { %2974 = vmatpush1.bf16.msra.mxu0 %v16945_v63  ;;  %v19099_v63 = vcombine.low %v19001_v32, %v93_v33  ;;  %v17084_v32 = vld [vmem:[%s23456_s2 + $0xa58] ss:$12 sps:$4 sm:$0xff]   ;;  %v17035_v33 = vld [vmem:[%s23456_s2 + $0x588] ss:$12 sps:$4 sm:$0xff]  }
  0xa8   :  { %2975 = vmatprep.subr.bf16.mxu0 %v16952_v0  ;;  %15114 = vmatpush3.bf16.msra.mxu1 %v17003_v6  ;;  %v17058_v0 = vld [vmem:[%s23456_s2 + $0x908] ss:$12 sps:$4 sm:$0xff]   ;;  %v17063_v6 = vld [vmem:[%s23456_s2 + $0x920] ss:$12 sps:$4 sm:$0xff]  }
  0xa9   :  { %15115 = vmatprep.subr.bf16.mxu1 %v17004_v7  ;;  %v17064_v7 = vld [vmem:[%s23456_s2 + $0x9f8] ss:$12 sps:$4 sm:$0xff]  }
  0xab   :  { %2976 = vmatpush1.bf16.msra.mxu0 %v16950_v4  ;;  %v17059_v4 = vld [vmem:[%s23456_s2 + $0x9e0] ss:$12 sps:$4 sm:$0xff]  }
  0xac   :  { %2977 = vmatprep.subr.bf16.mxu0 %v16957_v5  ;;  %15116 = vmatpush3.bf16.msra.mxu1 %v17008_v10  ;;  %v17017_v5 = vld [vmem:[%s23456_s2 + $0x52c] ss:$12 sps:$4 sm:$0xff]   ;;  %v17015_v10 = vld [vmem:[%s23456_s2 + $0x528] ss:$12 sps:$4 sm:$0xff]  }
  0xad   :  { %15117 = vmatprep.subr.bf16.mxu1 %v17009_v11  ;;  %v17022_v11 = vld [vmem:[%s23456_s2 + $0x544] ss:$12 sps:$4 sm:$0xff]  }
  0xaf   :  { %2978 = vmatpush1.bf16.msra.mxu0 %v16955_v8  ;;  %v86_v8 = vld [vmem:[%s23457_s1 + $0x30] sm:$0xff] }
  0xb0   :  { %2979 = vmatprep.subr.bf16.mxu0 %v16962_v9  ;;  %15118 = vmatpush3.bf16.msra.mxu1 %v17013_v16  ;;  %v94_v9 = vld [vmem:[%s23457_s1 + $0x70] sm:$0xff] }
  0xb1   :  { %15131 = vmatprep.subr.bf16.mxu1 %v17014_v17  ;;  %v19140_v16 = vcombine.high %v86_v8, %v94_v9  ;;  %v17069_v17 = vld [vmem:[%s23456_s2 + $0xa10] ss:$12 sps:$4 sm:$0xff]  }
  0xb3   :  { %2980 = vmatpush1.bf16.msra.mxu0 %v16960_v14  ;;  %3502 = vmatmul.mubr.bf16.vlgmr.msra.gmra.mrb[32].mxu1 %v18971_v22  ;;  %v19135_v14 = vcombine.low %v101_v58, %v109_v59  ;;  %v17108_v59 = vld [vmem:[%s23456_s2 + $0xab8] ss:$12 sps:$4 sm:$0xff]  }
  0xb4   :  { %2981 = vmatprep.subr.bf16.mxu0 %v16967_v15  ;;  %15132 = vmatpush3.bf16.msra.mxu1 %v17018_v23  ;;  %v17068_v15 = vld [vmem:[%s23456_s2 + $0x938] ss:$12 sps:$4 sm:$0xff]  }
  0xb5   :  { %3509 = vmatprep.mubr.bf16.mxu1 %v18976_v25  ;;  %15133 = vmatprep.subr.bf16.mxu1 %v17019_v26  ;;  %v17025_v23 = vld [vmem:[%s23456_s2 + $0x558] ss:$12 sps:$4 sm:$0xff]   ;;  %v17032_v26 = vld [vmem:[%s23456_s2 + $0x574] ss:$12 sps:$4 sm:$0xff]  }
  0xb7   :  { %2982 = vmatpush1.bf16.msra.mxu0 %v16965_v18  ;;  %v17020_v18 = vld [vmem:[%s23456_s2 + $0x540] ss:$12 sps:$4 sm:$0xff]  }
  0xb8   :  { %2983 = vmatprep.subr.bf16.mxu0 %v16972_v21  ;;  %15134 = vmatpush3.bf16.msra.mxu1 %v17023_v30  ;;  %v17074_v21 = vld [vmem:[%s23456_s2 + $0xa28] ss:$12 sps:$4 sm:$0xff]   ;;  %v17037_v30 = vld [vmem:[%s23456_s2 + $0x58c] ss:$12 sps:$4 sm:$0xff]  }
  0xb9   :  { %15135 = vmatprep.subr.bf16.mxu1 %v17024_v31  ;;  %v17083_v31 = vld [vmem:[%s23456_s2 + $0x980] ss:$12 sps:$4 sm:$0xff]  }
  0xbb   :  { %2984 = vmatpush1.bf16.msra.mxu0 %v16970_v27  ;;  %3510 = vmatmul.mubr.bf16.gmra.mrb[36].mxu1 %v19009_v35  ;;  %v17078_v27 = vld [vmem:[%s23456_s2 + $0x968] ss:$12 sps:$4 sm:$0xff]  }
  0xbc   :  { %2985 = vmatprep.subr.bf16.mxu0 %v16977_v28  ;;  %15136 = vmatpush3.bf16.msra.mxu1 %v17028_v36  ;;  %v17079_v28 = vld [vmem:[%s23456_s2 + $0xa40] ss:$12 sps:$4 sm:$0xff]   ;;  %v17088_v36 = vld [vmem:[%s23456_s2 + $0x998] ss:$12 sps:$4 sm:$0xff]  }
  0xbd   :  { %3550 = vmatprep.mubr.bf16.mxu1 %v19015_v37  ;;  %15137 = vmatprep.subr.bf16.mxu1 %v17029_v38  ;;  %v17089_v38 = vld [vmem:[%s23456_s2 + $0xa70] ss:$12 sps:$4 sm:$0xff]  }
  0xbf   :  { %2986 = vmatpush1.bf16.msra.mxu0 %v16975_v29  ;;  %v17030_v29 = vld [vmem:[%s23456_s2 + $0x570] ss:$12 sps:$4 sm:$0xff]  }
  0xc0   :  { %3008 = vmatprep.subr.bf16.mxu0 %v16982_v34  ;;  %15138 = vmatpush3.bf16.msra.mxu1 %v17033_v42  ;;  %v17042_v34 = vld [vmem:[%s23456_s2 + $0x5a4] ss:$12 sps:$4 sm:$0xff]  }
  0xc1   :  { %15139 = vmatprep.subr.bf16.mxu1 %v17034_v43  ;;  %v17093_v42 = vld [vmem:[%s23456_s2 + $0x9b0] ss:$12 sps:$4 sm:$0xff]   ;;  %v17094_v43 = vld [vmem:[%s23456_s2 + $0xb48] ss:$12 sps:$4 sm:$0xff]  }
  0xc2   :  { %2988 = vmatmul.mubr.bf16.vlgmr.msra.gmra.mrb[0].mxu0 %v18721_v1  ;;  %v17038_v1 = vld [vmem:[%s23456_s2 + $0x7e8] ss:$12 sps:$4 sm:$0xff]  }
  0xc3   :  { %3009 = vmatpush1.bf16.msra.mxu0 %v16980_v39  ;;  %2997 = vmatprep.mubr.bf16.mxu0 %v18754_v12  ;;  %v16990_v12 = vld [vmem:[%s23456_s2 + $0x4b0] ss:$12 sps:$4 sm:$0xff]   ;;  %v17040_v39 = vld [vmem:[%s23456_s2 + $0x5a0] ss:$12 sps:$4 sm:$0xff]  }
  0xc4   :  { %3010 = vmatprep.subr.bf16.mxu0 %v16987_v40  ;;  %15140 = vmatpush3.bf16.msra.mxu1 %v17038_v1  ;;  %v17047_v40 = vld [vmem:[%s23456_s2 + $0x5bc] ss:$12 sps:$4 sm:$0xff]   ;;  %v17045_v1 = vld [vmem:[%s23456_s2 + $0x5b8] ss:$12 sps:$4 sm:$0xff]  }
  0xc5   :  { %15141 = vmatprep.subr.bf16.mxu1 %v17039_v46  ;;  %v17052_v46 = vld [vmem:[%s23456_s2 + $0x5d4] ss:$12 sps:$4 sm:$0xff]  }
  0xc7   :  { %3011 = vmatpush1.bf16.msra.mxu0 %v16985_v44  ;;  %v102_v44 = vld [vmem:[%s23457_s1 + $0xb0] sm:$0xff] }
  0xc8   :  { %3012 = vmatprep.subr.bf16.mxu0 %v16992_v45  ;;  %15142 = vmatpush3.bf16.msra.mxu1 %v17043_v49  ;;  %v110_v45 = vld [vmem:[%s23457_s1 + $0xf0] sm:$0xff] }
  0xc9   :  { %15143 = vmatprep.subr.bf16.mxu1 %v17044_v50  ;;  %v19224_v49 = vcombine.high %v102_v44, %v110_v45  ;;  %v17099_v50 = vld [vmem:[%s23456_s2 + $0xb60] ss:$12 sps:$4 sm:$0xff]   ;;  %v19257_v58 = vcombine.low %v102_v44, %v110_v45  ;;  %v17105_v44 = vld [vmem:[%s23456_s2 + $0x6d8] ss:$12 sps:$4 sm:$0xff]  }
  0xca   :  { %2998 = vmatmul.mubr.bf16.gmra.mrb[4].mxu0 %v18756_v13  ;;  %v17049_v13 = vld [vmem:[%s23456_s2 + $0x8f0] ss:$12 sps:$4 sm:$0xff]   ;;  %v17112_v45 = vld [vmem:[%s23456_s2 + $0x6f4] ss:$12 sps:$4 sm:$0xff]  }
  0xcb   :  { %3013 = vmatpush1.bf16.msra.mxu0 %v16990_v12  ;;  %3040 = vmatprep.mubr.bf16.mxu0 %v18792_v24  ;;  %v17000_v24 = vld [vmem:[%s23456_s2 + $0x4e0] ss:$12 sps:$4 sm:$0xff]   ;;  %v19219_v12 = vcombine.low %v86_v8, %v94_v9 }
  0xcc   :  { %3014 = vmatprep.subr.bf16.mxu0 %v16997_v47  ;;  %15144 = vmatpush3.bf16.msra.mxu1 %v17048_v54  ;;  %v17098_v47 = vld [vmem:[%s23456_s2 + $0xa88] ss:$12 sps:$4 sm:$0xff]   ;;  %v17103_v54 = vld [vmem:[%s23456_s2 + $0xaa0] ss:$12 sps:$4 sm:$0xff]  }
  0xcd   :  { %15145 = vmatprep.subr.bf16.mxu1 %v17049_v13  ;;  %v17104_v13 = vld [vmem:[%s23456_s2 + $0xb78] ss:$12 sps:$4 sm:$0xff]   ;;  %v17119_v8 = vld [vmem:[%s23456_s2 + $0xbc0] ss:$12 sps:$4 sm:$0xff]  }
  0xce   :  { %v17077_v9 = vld [vmem:[%s23456_s2 + $0x64c] ss:$12 sps:$4 sm:$0xff]  }
  0xcf   :  { %3015 = vmatpush1.bf16.msra.mxu0 %v16995_v51  ;;  %v17050_v51 = vld [vmem:[%s23456_s2 + $0x5d0] ss:$12 sps:$4 sm:$0xff]  }
  0xd0   :  { %3016 = vmatprep.subr.bf16.mxu0 %v17002_v52  ;;  %15146 = vmatpush3.bf16.msra.mxu1 %v17053_v56  ;;  %v17057_v52 = vld [vmem:[%s23456_s2 + $0x5ec] ss:$12 sps:$4 sm:$0xff]   ;;  %v17055_v56 = vld [vmem:[%s23456_s2 + $0x5e8] ss:$12 sps:$4 sm:$0xff]  }
  0xd1   :  { %15159 = vmatprep.subr.bf16.mxu1 %v17054_v57  ;;  %v17062_v57 = vld [vmem:[%s23456_s2 + $0x604] ss:$12 sps:$4 sm:$0xff]  }
  0xd3   :  { %3017 = vmatpush1.bf16.msra.mxu0 %v17000_v24  ;;  %3551 = vmatmul.mubr.bf16.vlgmr.msra.gmra.mrb[40].mxu1 %v19099_v63  ;;  %v19246_v24 = vld [vmem:[%s23457_s1 + $0x38] sm:$0xff] }
  0xd4   :  { %3018 = vmatprep.subr.bf16.mxu0 %v17007_v55  ;;  %15160 = vmatpush3.bf16.msra.mxu1 %v17058_v0  ;;  %v95_v55 = vld [vmem:[%s23457_s1 + $0x78] sm:$0xff]  ;;  %v17060_v0 = vld [vmem:[%s23456_s2 + $0x600] ss:$12 sps:$4 sm:$0xff]  }
  0xd5   :  { %3558 = vmatprep.mubr.bf16.mxu1 %v19104_v2  ;;  %15161 = vmatprep.subr.bf16.mxu1 %v17059_v4  ;;  %v17113_v4 = vld [vmem:[%s23456_s2 + $0xad0] ss:$12 sps:$4 sm:$0xff]  }
  0xd7   :  { %3019 = vmatpush1.bf16.msra.mxu0 %v17005_v61  ;;  %v19263_v61 = vcombine.high %v19246_v24, %v95_v55 }
  0xd8   :  { %3020 = vmatprep.subr.bf16.mxu0 %v17012_v62  ;;  %15162 = vmatpush3.bf16.msra.mxu1 %v17063_v6  ;;  %v17109_v62 = vld [vmem:[%s23456_s2 + $0xb90] ss:$12 sps:$4 sm:$0xff]   ;;  %v17065_v6 = vld [vmem:[%s23456_s2 + $0x618] ss:$12 sps:$4 sm:$0xff]  }
  0xd9   :  { %15163 = vmatprep.subr.bf16.mxu1 %v17064_v7  ;;  %v17072_v7 = vld [vmem:[%s23456_s2 + $0x634] ss:$12 sps:$4 sm:$0xff]  }
  0xdb   :  { %3021 = vmatpush1.bf16.msra.mxu0 %v17010_v3  ;;  %3559 = vmatmul.mubr.bf16.gmra.mrb[44].mxu1 %v19135_v14  ;;  %v17067_v3 = vld [vmem:[%s23456_s2 + $0x61c] ss:$12 sps:$4 sm:$0xff]  }
  0xdc   :  { %3022 = vmatprep.subr.bf16.mxu0 %v17017_v5  ;;  %15164 = vmatpush3.bf16.msra.mxu1 %v17068_v15  ;;  %v17114_v5 = vld [vmem:[%s23456_s2 + $0xba8] ss:$12 sps:$4 sm:$0xff]  }
  0xdd   :  { %3599 = vmatprep.mubr.bf16.mxu1 %v19140_v16  ;;  %15165 = vmatprep.subr.bf16.mxu1 %v17069_v17  ;;  %v17075_v15 = vld [vmem:[%s23456_s2 + $0x648] ss:$12 sps:$4 sm:$0xff]   ;;  %v17082_v17 = vld [vmem:[%s23456_s2 + $0x664] ss:$12 sps:$4 sm:$0xff]  }
  0xdf   :  { %3023 = vmatpush1.bf16.msra.mxu0 %v17015_v10  ;;  %v17123_v10 = vld [vmem:[%s23456_s2 + $0xb00] ss:$12 sps:$4 sm:$0xff]  }
  0xe0   :  { %3024 = vmatprep.subr.bf16.mxu0 %v17022_v11  ;;  %15166 = vmatpush3.bf16.msra.mxu1 %v17073_v20  ;;  %v17124_v11 = vld [vmem:[%s23456_s2 + $0xbd8] ss:$12 sps:$4 sm:$0xff]   ;;  %v17133_v20 = vld [vmem:[%s23456_s2 + $0xb30] ss:$12 sps:$4 sm:$0xff]  }
  0xe1   :  { %15167 = vmatprep.subr.bf16.mxu1 %v17074_v21  ;;  %v103_v21 = vld [vmem:[%s23457_s1 + $0xb8] sm:$0xff] }
  0xe3   :  { %3025 = vmatpush1.bf16.msra.mxu0 %v17020_v18  ;;  %v17128_v18 = vld [vmem:[%s23456_s2 + $0xb18] ss:$12 sps:$4 sm:$0xff]  }
  0xe4   :  { %3026 = vmatprep.subr.bf16.mxu0 %v17027_v19  ;;  %15168 = vmatpush3.bf16.msra.mxu1 %v17078_v27  ;;  %v17129_v19 = vld [vmem:[%s23456_s2 + $0xbf0] ss:$12 sps:$4 sm:$0xff]   ;;  %v17092_v27 = vld [vmem:[%s23456_s2 + $0x694] ss:$12 sps:$4 sm:$0xff]  }
  0xe5   :  { %15169 = vmatprep.subr.bf16.mxu1 %v17079_v28  ;;  %v19344_v28 = vcombine.low %v19246_v24, %v95_v55  ;;  %v17235_v24 = vld [vmem:[%s23458_s4 + $0x64] ss:$12 sps:$4 sm:$0xff]   ;;  %v17233_v55 = vld [vmem:[%s23458_s4 + $0x60] ss:$12 sps:$4 sm:$0xff]  }
  0xe7   :  { %3027 = vmatpush1.bf16.msra.mxu0 %v17025_v23  ;;  %v111_v23 = vld [vmem:[%s23457_s1 + $0xf8] sm:$0xff] }
  0xe8   :  { %3028 = vmatprep.subr.bf16.mxu0 %v17032_v26  ;;  %15170 = vmatpush3.bf16.msra.mxu1 %v17083_v31  ;;  %v17085_v26 = vld [vmem:[%s23456_s2 + $0x678] ss:$12 sps:$4 sm:$0xff]  }
  0xe9   :  { %15171 = vmatprep.subr.bf16.mxu1 %v17084_v32  ;;  %v17097_v31 = vld [vmem:[%s23456_s2 + $0x6ac] ss:$12 sps:$4 sm:$0xff]   ;;  %v17095_v32 = vld [vmem:[%s23456_s2 + $0x6a8] ss:$12 sps:$4 sm:$0xff]  }
  0xeb   :  { %3029 = vmatpush1.bf16.msra.mxu0 %v17030_v29  ;;  %v19346_v29 = vcombine.high %v103_v21, %v111_v23 }
  0xec   :  { %3030 = vmatprep.subr.bf16.mxu0 %v17037_v30  ;;  %15172 = vmatpush3.bf16.msra.mxu1 %v17088_v36  ;;  %v17090_v30 = vld [vmem:[%s23456_s2 + $0x690] ss:$12 sps:$4 sm:$0xff]  }
  0xed   :  { %15173 = vmatprep.subr.bf16.mxu1 %v17089_v38  ;;  %v17211_v36 = vld [vmem:[%s23458_s4 + $0x4] ss:$12 sps:$4 sm:$0xff]   ;;  %v17209_v38 = vld [vmem:[%s23458_s4] ss:$12 sps:$4 sm:$0xff]  }
  0xef   :  { %3031 = vmatpush1.bf16.msra.mxu0 %v17035_v33  ;;  %v17102_v33 = vld [vmem:[%s23456_s2 + $0x6c4] ss:$12 sps:$4 sm:$0xff]  }
  0xf0   :  { %3032 = vmatprep.subr.bf16.mxu0 %v17042_v34  ;;  %15174 = vmatpush3.bf16.msra.mxu1 %v17093_v42  ;;  %v19362_v34 = vcombine.low %v103_v21, %v111_v23  ;;  %v17217_v42 = vld [vmem:[%s23458_s4 + $0x1c] ss:$12 sps:$4 sm:$0xff]   ;;  %v17277_v23 = vld [vmem:[%s23458_s4 + $0x10c] ss:$12 sps:$4 sm:$0xff]  }
  0xf1   :  { %15187 = vmatprep.subr.bf16.mxu1 %v17094_v43  ;;  %v17215_v43 = vld [vmem:[%s23458_s4 + $0x18] ss:$12 sps:$4 sm:$0xff]   ;;  %v17143_v21 = vld [vmem:[%s23456_s2 + $0x7b0] ss:$12 sps:$4 sm:$0xff]  }
  0xf3   :  { %3033 = vmatpush1.bf16.msra.mxu0 %v17040_v39  ;;  %3600 = vmatmul.mubr.bf16.vlgmr.msra.gmra.mrb[48].mxu1 %v19219_v12  ;;  %v17100_v39 = vld [vmem:[%s23456_s2 + $0x6c0] ss:$12 sps:$4 sm:$0xff]  }
  0xf4   :  { %3034 = vmatprep.subr.bf16.mxu0 %v17047_v40  ;;  %15188 = vmatpush3.bf16.msra.mxu1 %v17098_v47  ;;  %v17107_v40 = vld [vmem:[%s23456_s2 + $0x6dc] ss:$12 sps:$4 sm:$0xff]  }
  0xf5   :  { %3607 = vmatprep.mubr.bf16.mxu1 %v19224_v49  ;;  %15189 = vmatprep.subr.bf16.mxu1 %v17099_v50  ;;  %v17110_v47 = vld [vmem:[%s23456_s2 + $0x6f0] ss:$12 sps:$4 sm:$0xff]   ;;  %v17117_v50 = vld [vmem:[%s23456_s2 + $0x70c] ss:$12 sps:$4 sm:$0xff]  }
  0xf7   :  { %3035 = vmatpush1.bf16.msra.mxu0 %v17045_v1  ;;  %v17223_v1 = vld [vmem:[%s23458_s4 + $0x34] ss:$12 sps:$4 sm:$0xff]  }
  0xf8   :  { %3036 = vmatprep.subr.bf16.mxu0 %v17052_v46  ;;  %15190 = vmatpush3.bf16.msra.mxu1 %v17103_v54  ;;  %v17221_v46 = vld [vmem:[%s23458_s4 + $0x30] ss:$12 sps:$4 sm:$0xff]   ;;  %v17115_v54 = vld [vmem:[%s23456_s2 + $0x708] ss:$12 sps:$4 sm:$0xff]  }
  0xf9   :  { %15191 = vmatprep.subr.bf16.mxu1 %v17104_v13  ;;  %v17122_v13 = vld [vmem:[%s23456_s2 + $0x724] ss:$12 sps:$4 sm:$0xff]  }
  0xfb   :  { %3037 = vmatpush1.bf16.msra.mxu0 %v17050_v51  ;;  %3608 = vmatmul.mubr.bf16.gmra.mrb[52].mxu1 %v19257_v58  ;;  %v17229_v51 = vld [vmem:[%s23458_s4 + $0x4c] ss:$12 sps:$4 sm:$0xff]  }
  0xfc   :  { %3038 = vmatprep.subr.bf16.mxu0 %v17057_v52  ;;  %15192 = vmatpush3.bf16.msra.mxu1 %v17108_v59  ;;  %v17227_v52 = vld [vmem:[%s23458_s4 + $0x48] ss:$12 sps:$4 sm:$0xff]  }
  0xfd   :  { %3648 = vmatprep.mubr.bf16.mxu1 %v19263_v61  ;;  %15193 = vmatprep.subr.bf16.mxu1 %v17109_v62  ;;  %v17241_v59 = vld [vmem:[%s23458_s4 + $0x7c] ss:$12 sps:$4 sm:$0xff]   ;;  %v17239_v62 = vld [vmem:[%s23458_s4 + $0x78] ss:$12 sps:$4 sm:$0xff]  }
  0xff   :  { %3039 = vmatpush1.bf16.msra.mxu0 %v17055_v56  ;;  %v17120_v56 = vld [vmem:[%s23456_s2 + $0x720] ss:$12 sps:$4 sm:$0xff]  }
 0x100   :  { %3061 = vmatprep.subr.bf16.mxu0 %v17062_v57  ;;  %15194 = vmatpush3.bf16.msra.mxu1 %v17113_v4  ;;  %v17127_v57 = vld [vmem:[%s23456_s2 + $0x73c] ss:$12 sps:$4 sm:$0xff]   ;;  %v17247_v4 = vld [vmem:[%s23458_s4 + $0x94] ss:$12 sps:$4 sm:$0xff]  }
 0x101   :  { %15195 = vmatprep.subr.bf16.mxu1 %v17114_v5  ;;  %v17245_v5 = vld [vmem:[%s23458_s4 + $0x90] ss:$12 sps:$4 sm:$0xff]  }
 0x102   :  { %3041 = vmatmul.mubr.bf16.vlgmr.msra.gmra.mrb[0].mxu0 %v18845_v41  ;;  %v17118_v41 = vld [vmem:[%s23456_s2 + $0xae8] ss:$12 sps:$4 sm:$0xff]  }
 0x103   :  { %3062 = vmatpush1.bf16.msra.mxu0 %v17060_v0  ;;  %3050 = vmatprep.mubr.bf16.mxu0 %v18866_v48  ;;  %v17070_v48 = vld [vmem:[%s23456_s2 + $0x630] ss:$12 sps:$4 sm:$0xff]   ;;  %v17125_v0 = vld [vmem:[%s23456_s2 + $0x738] ss:$12 sps:$4 sm:$0xff]  }
 0x104   :  { %3063 = vmatprep.subr.bf16.mxu0 %v17067_v3  ;;  %15196 = vmatpush3.bf16.msra.mxu1 %v17118_v41  ;;  %v17132_v3 = vld [vmem:[%s23456_s2 + $0x754] ss:$12 sps:$4 sm:$0xff]   ;;  %v17253_v41 = vld [vmem:[%s23458_s4 + $0xac] ss:$12 sps:$4 sm:$0xff]  }
 0x105   :  { %15197 = vmatprep.subr.bf16.mxu1 %v17119_v8  ;;  %v17251_v8 = vld [vmem:[%s23458_s4 + $0xa8] ss:$12 sps:$4 sm:$0xff]  }
 0x107   :  { %3064 = vmatpush1.bf16.msra.mxu0 %v17065_v6  ;;  %v17130_v6 = vld [vmem:[%s23456_s2 + $0x750] ss:$12 sps:$4 sm:$0xff]  }
 0x108   :  { %3065 = vmatprep.subr.bf16.mxu0 %v17072_v7  ;;  %15198 = vmatpush3.bf16.msra.mxu1 %v17123_v10  ;;  %v17136_v7 = vld [vmem:[%s23456_s2 + $0x76c] ss:$12 sps:$4 sm:$0xff]   ;;  %v17259_v10 = vld [vmem:[%s23458_s4 + $0xc4] ss:$12 sps:$4 sm:$0xff]  }
 0x109   :  { %15199 = vmatprep.subr.bf16.mxu1 %v17124_v11  ;;  %v17257_v11 = vld [vmem:[%s23458_s4 + $0xc0] ss:$12 sps:$4 sm:$0xff]  }
 0x10a   :  { %3051 = vmatmul.mubr.bf16.gmra.mrb[4].mxu0 %v18881_v53  ;;  %v17080_v53 = vld [vmem:[%s23456_s2 + $0x660] ss:$12 sps:$4 sm:$0xff]  }
 0x10b   :  { %3066 = vmatpush1.bf16.msra.mxu0 %v17070_v48  ;;  %3093 = vmatprep.mubr.bf16.mxu0 %v18902_v60  ;;  %v17087_v60 = vld [vmem:[%s23456_s2 + $0x67c] ss:$12 sps:$4 sm:$0xff]  }
 0x10c   :  { %3067 = vmatprep.subr.bf16.mxu0 %v17077_v9  ;;  %15200 = vmatpush3.bf16.msra.mxu1 %v17128_v18  ;;  %v17134_v48 = vld [vmem:[%s23456_s2 + $0x768] ss:$12 sps:$4 sm:$0xff]   ;;  %v17139_v9 = vld [vmem:[%s23456_s2 + $0x784] ss:$12 sps:$4 sm:$0xff]  }
 0x10d   :  { %15201 = vmatprep.subr.bf16.mxu1 %v17129_v19  ;;  %v17265_v18 = vld [vmem:[%s23458_s4 + $0xdc] ss:$12 sps:$4 sm:$0xff]   ;;  %v17140_v19 = vld [vmem:[%s23456_s2 + $0x798] ss:$12 sps:$4 sm:$0xff]  }
 0x10f   :  { %3068 = vmatpush1.bf16.msra.mxu0 %v17075_v15  ;;  %v17137_v15 = vld [vmem:[%s23456_s2 + $0x780] ss:$12 sps:$4 sm:$0xff]  }
 0x110   :  { %3069 = vmatprep.subr.bf16.mxu0 %v17082_v17  ;;  %15202 = vmatpush3.bf16.msra.mxu1 %v17133_v20  ;;  %v17142_v17 = vld [vmem:[%s23456_s2 + $0x79c] ss:$12 sps:$4 sm:$0xff]  }
 0x111   :  { %4233 = vmatprep.subr.bf16.mxu1 %v17211_v36  ;;  %v17269_v20 = vld [vmem:[%s23458_s4 + $0xf0] ss:$12 sps:$4 sm:$0xff]   ;;  %v17287_v36 = vld [vmem:[%s23458_s4 + $0x138] ss:$12 sps:$4 sm:$0xff]  }
 0x113   :  { %3070 = vmatpush1.bf16.msra.mxu0 %v17080_v53  ;;  %3649 = vmatmul.mubr.bf16.vlgmr.msra.gmra.mrb[56].mxu1 %v19344_v28  ;;  %v17263_v53 = vld [vmem:[%s23458_s4 + $0xd8] ss:$12 sps:$4 sm:$0xff]  }
 0x114   :  { %3071 = vmatprep.subr.bf16.mxu0 %v17087_v60  ;;  %3656 = vmatprep.mubr.bf16.mxu1 %v19346_v29  ;;  %v17145_v60 = vld [vmem:[%s23456_s2 + $0x7b4] ss:$12 sps:$4 sm:$0xff]  }
 0x115   :  { %4234 = vmatpush1.bf16.msra.mxu1 %v17209_v38  ;;  %v17152_v38 = vld [vmem:[%s23456_s2 + $0x7f8] ss:$12 sps:$4 sm:$0xff]  }
 0x116   :  { %4235 = vmatprep.subr.bf16.mxu1 %v17217_v42  ;;  %v17293_v42 = vld [vmem:[%s23458_s4 + $0x150] ss:$12 sps:$4 sm:$0xff]  }
 0x117   :  { %3072 = vmatpush1.bf16.msra.mxu0 %v17085_v26  ;;  %v17275_v26 = vld [vmem:[%s23458_s4 + $0x108] ss:$12 sps:$4 sm:$0xff]  }
 0x118   :  { %3073 = vmatprep.subr.bf16.mxu0 %v17092_v27  ;;  %v17146_v27 = vld [vmem:[%s23456_s2 + $0x7c8] ss:$12 sps:$4 sm:$0xff]  }
 0x119   :  { %4236 = vmatpush1.bf16.msra.mxu1 %v17215_v43  ;;  %v17155_v43 = vld [vmem:[%s23456_s2 + $0x810] ss:$12 sps:$4 sm:$0xff]  }
 0x11a   :  { %4237 = vmatprep.subr.bf16.mxu1 %v17223_v1  ;;  %v17160_v1 = vld [vmem:[%s23456_s2 + $0x82c] ss:$12 sps:$4 sm:$0xff]  }
 0x11b   :  { %3074 = vmatpush1.bf16.msra.mxu0 %v17090_v30  ;;  %3657 = vmatmul.mubr.bf16.gmra.mrb[60].mxu1 %v19362_v34  ;;  %v17151_v30 = vld [vmem:[%s23456_s2 + $0x7e4] ss:$12 sps:$4 sm:$0xff]  }
 0x11c   :  { %3075 = vmatprep.subr.bf16.mxu0 %v17097_v31  ;;  %v17281_v31 = vld [vmem:[%s23458_s4 + $0x120] ss:$12 sps:$4 sm:$0xff]  }
 0x11d   :  { %4238 = vmatpush1.bf16.msra.mxu1 %v17221_v46 }
 0x11e   :  { %4239 = vmatprep.subr.bf16.mxu1 %v17229_v51 }
 0x11f   :  { %3076 = vmatpush1.bf16.msra.mxu0 %v17095_v32  ;;  %v17149_v32 = vld [vmem:[%s23456_s2 + $0x7e0] ss:$12 sps:$4 sm:$0xff]  }
 0x120   :  { %3077 = vmatprep.subr.bf16.mxu0 %v17102_v33  ;;  %v17289_v33 = vld [vmem:[%s23458_s4 + $0x13c] ss:$12 sps:$4 sm:$0xff]  }
 0x121   :  { %4240 = vmatpush1.bf16.msra.mxu1 %v17227_v52  ;;  %v17301_v52 = vld [vmem:[%s23458_s4 + $0x16c] ss:$12 sps:$4 sm:$0xff]  }
 0x122   :  { %4241 = vmatprep.subr.bf16.mxu1 %v17235_v24  ;;  %v17158_v24 = vld [vmem:[%s23456_s2 + $0x828] ss:$12 sps:$4 sm:$0xff]  }
 0x123   :  { %3078 = vmatpush1.bf16.msra.mxu0 %v17100_v39  ;;  %v17157_v39 = vld [vmem:[%s23456_s2 + $0x814] ss:$12 sps:$4 sm:$0xff]  }
 0x124   :  { %3079 = vmatprep.subr.bf16.mxu0 %v17107_v40  ;;  %v17295_v40 = vld [vmem:[%s23458_s4 + $0x154] ss:$12 sps:$4 sm:$0xff]  }
 0x125   :  { %4242 = vmatpush1.bf16.msra.mxu1 %v17233_v55  ;;  %v17163_v55 = vld [vmem:[%s23456_s2 + $0x844] ss:$12 sps:$4 sm:$0xff]  }
 0x126   :  { %4243 = vmatprep.subr.bf16.mxu1 %v17241_v59 }
 0x127   :  { %3080 = vmatpush1.bf16.msra.mxu0 %v17105_v44  ;;  %v15007_v44 = vpop.f32.mrb[0].mxu1 }
 0x128   :  { %3081 = vmatprep.subr.bf16.mxu0 %v17112_v45  ;;  %v626_v45 = vlaneseq  ;;  %v15008_v46 = vpop.f32.mrb[1].mxu1 }
 0x129   :  { %4244 = vmatpush1.bf16.msra.mxu1 %v17239_v62  ;;  %v15010_v51 = vpop.f32.mrb[2].mxu1 }
 0x12a   :  { %4245 = vmatprep.subr.bf16.mxu1 %v17247_v4 }
 0x12b   :  { %3082 = vmatpush1.bf16.msra.mxu0 %v17110_v47  ;;  %v19549_v47 = vshrl.u32 %v626_v45, 7 }
 0x12c   :  { %3083 = vmatprep.subr.bf16.mxu0 %v17117_v50  ;;  %v15009_v50 = vadd.f32 %v15008_v46, %v15007_v44  ;;  %v17170_v46 = vld [vmem:[%s23456_s2 + $0x888] ss:$12 sps:$4 sm:$0xff]  }
 0x12d   :  { %4246 = vmatpush1.bf16.msra.mxu1 %v17245_v5  ;;  %v19578_v5 = vld [vmem:[%s23460_s0 + $0x4] ss:$12 sps:$4 sm:$0xff]  }
 0x12e   :  { %4247 = vmatprep.subr.bf16.mxu1 %v17253_v41  ;;  %v17161_v41 = vld [vmem:[%s23456_s2 + $0x840] ss:$12 sps:$4 sm:$0xff]   ;;  %4265 = vmatprep.mubr.bf16.mxu1 %v19578_v5 }
 0x12f   :  { %3084 = vmatpush1.bf16.msra.mxu0 %v17115_v54  ;;  %v624_v54 = vld [vmem:[%s23459_s3] sm:$0x7] }
 0x130   :  { %3085 = vmatprep.subr.bf16.mxu0 %v17122_v13  ;;  %v17299_v13 = vld [vmem:[%s23458_s4 + $0x168] ss:$12 sps:$4 sm:$0xff]  }
 0x131   :  { %4248 = vmatpush1.bf16.msra.mxu1 %v17251_v8  ;;  %v17166_v8 = vld [vmem:[%s23456_s2 + $0x85c] ss:$12 sps:$4 sm:$0xff]  }
 0x132   :  { %4249 = vmatprep.subr.bf16.mxu1 %v17259_v10 }
 0x133   :  { %3086 = vmatpush1.bf16.msra.mxu0 %v17120_v56  ;;  %v19567_v56 = vsub.s32 2, %v19549_v47 }
 0x134   :  { %3087 = vmatprep.subr.bf16.mxu0 %v17127_v57  ;;  %v15011_v57 = vpop.f32.mrb[3].mxu1 }
 0x135   :  { %4250 = vmatpush1.bf16.msra.mxu1 %v17257_v11  ;;  %23521 = vst [vmem:[#allocation2_spill] sm:$0xff] %v19567_v56  ;;  %v15012_v59 = vadd.f32 %v15011_v57, %v15010_v51  ;;  %v15013_v62 = vpop.f32.mrb[4].mxu1  ;;  %v19626_v57 = vld [vmem:[%s23460_s0 + $0x30] ss:$12 sps:$4 sm:$0xff]  }
 0x136   :  { %4251 = vmatprep.subr.bf16.mxu1 %v17265_v18  ;;  %v15014_v4 = vpop.f32.mrb[5].mxu1 }
 0x137   :  { %3088 = vmatpush1.bf16.msra.mxu0 %v17125_v0  ;;  %v19572_v0 = vld [vmem:[%s23460_s0] ss:$12 sps:$4 sm:$0xff]  }
 0x138   :  { %3089 = vmatprep.subr.bf16.mxu0 %v17132_v3  ;;  %v637_v3 = vrot.slane %v624_v54, %v19567_v56 }
 0x139   :  { %4252 = vmatpush1.bf16.msra.mxu1 %v17263_v53 }
 0x13b   :  { %3090 = vmatpush1.bf16.msra.mxu0 %v17130_v6  ;;  %v15015_v6 = vadd.f32 %v15014_v4, %v15013_v62  ;;  %v17173_v4 = vld [vmem:[%s23456_s2 + $0x8a0] ss:$12 sps:$4 sm:$0xff]  }
 0x13c   :  { %3091 = vmatprep.subr.bf16.mxu0 %v17136_v7  ;;  %v15016_v7 = vpop.f32.mrb[6].mxu1 }
 0x13f   :  { %3092 = vmatpush1.bf16.msra.mxu0 %v17134_v48  ;;  %v15017_v48 = vpop.f32.mrb[7].mxu1 }
 0x140   :  { %3114 = vmatprep.subr.bf16.mxu0 %v17139_v9  ;;  %v3308_v9 = vadd.f32 %v15009_v50, %v637_v3  ;;  %v15018_v10 = vadd.f32 %v15017_v48, %v15016_v7  ;;  %v15035_v11 = vpop.f32.mrb[8].mxu1  ;;  %v17175_v50 = vld [vmem:[%s23456_s2 + $0x8a4] ss:$12 sps:$4 sm:$0xff]   ;;  %v17178_v7 = vld [vmem:[%s23456_s2 + $0x8bc] ss:$12 sps:$4 sm:$0xff]  }
 0x142   :  { %3094 = vmatmul.mubr.bf16.vlgmr.msra.gmra.mrb[0].mxu0 %v18971_v22  ;;  %v17271_v22 = vld [vmem:[%s23458_s4 + $0xf4] ss:$12 sps:$4 sm:$0xff]  }
 0x143   :  { %3115 = vmatpush1.bf16.msra.mxu0 %v17137_v15  ;;  %3103 = vmatprep.mubr.bf16.mxu0 %v18976_v25  ;;  %v17148_v25 = vld [vmem:[%s23456_s2 + $0x7cc] ss:$12 sps:$4 sm:$0xff]   ;;  %v15036_v15 = vpop.f32.mrb[9].mxu1 }
 0x144   :  { %3116 = vmatprep.subr.bf16.mxu0 %v17142_v17  ;;  %4253 = vmatprep.subr.bf16.mxu1 %v17271_v22  ;;  %v3311_v17 = vadd.f32 %v15012_v59, %v637_v3  ;;  %v15037_v18 = vadd.f32 %v15036_v15, %v15035_v11  ;;  %v15038_v53 = vpop.f32.mrb[10].mxu1 }
 0x145   :  { %4254 = vmatpush1.bf16.msra.mxu1 %v17269_v20  ;;  %v15039_v22 = vpop.f32.mrb[11].mxu1  ;;  %v3316_v20 = vadd.f32 %v15015_v6, %v637_v3 }
 0x146   :  { %4255 = vmatprep.subr.bf16.mxu1 %v17277_v23  ;;  %v15041_v23 = vpop.f32.mrb[12].mxu1 }
 0x147   :  { %3117 = vmatpush1.bf16.msra.mxu0 %v17140_v19  ;;  %v17164_v19 = vld [vmem:[%s23456_s2 + $0x858] ss:$12 sps:$4 sm:$0xff]  }
 0x148   :  { %3118 = vmatprep.subr.bf16.mxu0 %v17145_v60  ;;  %v17169_v60 = vld [vmem:[%s23456_s2 + $0x874] ss:$12 sps:$4 sm:$0xff]  }
 0x149   :  { %4256 = vmatpush1.bf16.msra.mxu1 %v17275_v26  ;;  %v19597_v26 = vld [vmem:[%s23460_s0 + $0x1c] ss:$12 sps:$4 sm:$0xff]  }
 0x14a   :  { %3104 = vmatmul.mubr.bf16.gmra.mrb[4].mxu0 %v19009_v35  ;;  %v17283_v35 = vld [vmem:[%s23458_s4 + $0x124] ss:$12 sps:$4 sm:$0xff]  }
 0x14b   :  { %3119 = vmatpush1.bf16.msra.mxu0 %v17143_v21  ;;  %3146 = vmatprep.mubr.bf16.mxu0 %v19015_v37  ;;  %v17154_v37 = vld [vmem:[%s23456_s2 + $0x7fc] ss:$12 sps:$4 sm:$0xff]   ;;  %v3357_v21 = vadd.f32 %v15037_v18, %v3308_v9 }
 0x14c   :  { %3120 = vmatprep.subr.bf16.mxu0 %v17148_v25  ;;  %4257 = vmatprep.subr.bf16.mxu1 %v17283_v35  ;;  %v15040_v25 = vadd.f32 %v15039_v22, %v15038_v53  ;;  %v3319_v35 = vadd.f32 %v15018_v10, %v637_v3  ;;  %v17181_v53 = vld [vmem:[%s23456_s2 + $0x8d4] ss:$12 sps:$4 sm:$0xff]  }
 0x14d   :  { %4258 = vmatpush1.bf16.msra.mxu1 %v17281_v31 }
 0x14e   :  { %4259 = vmatprep.subr.bf16.mxu1 %v17289_v33  ;;  %v3360_v31 = vadd.f32 %v15040_v25, %v3311_v17  ;;  %v17167_v33 = vld [vmem:[%s23456_s2 + $0x870] ss:$12 sps:$4 sm:$0xff]   ;;  %v17176_v17 = vld [vmem:[%s23456_s2 + $0x8b8] ss:$12 sps:$4 sm:$0xff]   ;;  %v19652_v25 = vld [vmem:[%s23460_s0 + $0x48] ss:$12 sps:$4 sm:$0xff]  }
 0x14f   :  { %3121 = vmatpush1.bf16.msra.mxu0 %v17146_v27  ;;  %v15042_v27 = vpop.f32.mrb[13].mxu1 }
 0x150   :  { %3122 = vmatprep.subr.bf16.mxu0 %v17151_v30  ;;  %v19602_v30 = vld [vmem:[%s23460_s0 + $0x18] ss:$12 sps:$4 sm:$0xff]  }
 0x151   :  { %4260 = vmatpush1.bf16.msra.mxu1 %v17287_v36  ;;  %v17172_v36 = vld [vmem:[%s23456_s2 + $0x88c] ss:$12 sps:$4 sm:$0xff]  }
 0x152   :  { %4261 = vmatprep.subr.bf16.mxu1 %v17295_v40 }
 0x153   :  { %3123 = vmatpush1.bf16.msra.mxu0 %v17149_v32  ;;  %v15043_v32 = vadd.f32 %v15042_v27, %v15041_v23 }
 0x154   :  { %3124 = vmatprep.subr.bf16.mxu0 %v17154_v37  ;;  %v15044_v37 = vpop.f32.mrb[14].mxu1 }
 0x155   :  { %4262 = vmatpush1.bf16.msra.mxu1 %v17293_v42 }
 0x156   :  { %4263 = vmatprep.subr.bf16.mxu1 %v17301_v52 }
 0x157   :  { %3125 = vmatpush1.bf16.msra.mxu0 %v17152_v38  ;;  %v15045_v38 = vpop.f32.mrb[15].mxu1 }
 0x158   :  { %3126 = vmatprep.subr.bf16.mxu0 %v17157_v39  ;;  %v3365_v39 = vadd.f32 %v15043_v32, %v3316_v20  ;;  %v15046_v40 = vadd.f32 %v15045_v38, %v15044_v37  ;;  %v15063_v42 = vpop.f32.mrb[16].mxu1  ;;  %v19647_v20 = vld [vmem:[%s23460_s0 + $0x4c] ss:$12 sps:$4 sm:$0xff]  }
 0x159   :  { %4264 = vmatpush1.bf16.msra.mxu1 %v17299_v13  ;;  %v17184_v37 = vld [vmem:[%s23456_s2 + $0x8ec] ss:$12 sps:$4 sm:$0xff]  }
 0x15a   :  { %v3368_v44 = vadd.f32 %v15046_v40, %v3319_v35  ;;  %v17187_v40 = vld [vmem:[%s23456_s2 + $0x904] ss:$12 sps:$4 sm:$0xff]  }
 0x15b   :  { %3127 = vmatpush1.bf16.msra.mxu0 %v17155_v43  ;;  %v15064_v43 = vpop.f32.mrb[17].mxu1 }
 0x15c   :  { %3128 = vmatprep.subr.bf16.mxu0 %v17160_v1  ;;  %4266 = vmatmul.mubr.bf16.vlgmr.msra.gmra.mrb[64].mxu1 %v19572_v0  ;;  %v15065_v45 = vadd.f32 %v15064_v43, %v15063_v42  ;;  %v15066_v1 = vpop.f32.mrb[18].mxu1  ;;  %v19677_v42 = vld [vmem:[%s23460_s0 + $0x64] ss:$12 sps:$4 sm:$0xff]   ;;  %v19682_v43 = vld [vmem:[%s23460_s0 + $0x60] ss:$12 sps:$4 sm:$0xff]  }
 0x15d   :  { %4275 = vmatprep.mubr.bf16.mxu1 %v19597_v26  ;;  %v15067_v51 = vpop.f32.mrb[19].mxu1 }
 0x15e   :  { %v3406_v52 = vadd.f32 %v15065_v45, %v3357_v21  ;;  %v15068_v54 = vadd.f32 %v15067_v51, %v15066_v1  ;;  %v15069_v13 = vpop.f32.mrb[20].mxu1  ;;  %v17190_v45 = vld [vmem:[%s23456_s2 + $0x91c] ss:$12 sps:$4 sm:$0xff]  }
 0x15f   :  { %3129 = vmatpush1.bf16.msra.mxu0 %v17158_v24  ;;  %v19621_v24 = vld [vmem:[%s23460_s0 + $0x34] ss:$12 sps:$4 sm:$0xff]   ;;  %v19696_v1 = vld [vmem:[%s23460_s0 + $0x7c] ss:$12 sps:$4 sm:$0xff]  }
 0x160   :  { %3130 = vmatprep.subr.bf16.mxu0 %v17163_v55  ;;  %v15070_v55 = vpop.f32.mrb[21].mxu1  ;;  %v3409_v59 = vadd.f32 %v15068_v54, %v3360_v31  ;;  %v17179_v31 = vld [vmem:[%s23456_s2 + $0x8d0] ss:$12 sps:$4 sm:$0xff]   ;;  %v19725_v54 = vld [vmem:[%s23460_s0 + $0x94] ss:$12 sps:$4 sm:$0xff]  }
 0x161   :  { %v15071_v62 = vadd.f32 %v15070_v55, %v15069_v13  ;;  %v15072_v3 = vpop.f32.mrb[22].mxu1  ;;  %v17191_v51 = vld [vmem:[%s23456_s2 + $0x930] ss:$12 sps:$4 sm:$0xff]   ;;  %v17350_v13 = vld [vmem:[%s23458_s4 + $0x180] ss:$12 sps:$4 sm:$0xff]  }
 0x162   :  { %v15073_v6 = vpop.f32.mrb[23].mxu1  ;;  %v17199_v55 = vld [vmem:[%s23456_s2 + $0x964] ss:$12 sps:$4 sm:$0xff]  }
 0x163   :  { %3131 = vmatpush1.bf16.msra.mxu0 %v17161_v41  ;;  %v3414_v41 = vadd.f32 %v15071_v62, %v3365_v39  ;;  %v17182_v39 = vld [vmem:[%s23456_s2 + $0x8e8] ss:$12 sps:$4 sm:$0xff]  }
 0x164   :  { %3132 = vmatprep.subr.bf16.mxu0 %v17166_v8  ;;  %4276 = vmatmul.mubr.bf16.gmra.mrb[68].mxu1 %v19602_v30  ;;  %v15074_v8 = vadd.f32 %v15073_v6, %v15072_v3  ;;  %v19741_v3 = vld [vmem:[%s23460_s0 + $0x90] ss:$12 sps:$4 sm:$0xff]  }
 0x165   :  { %4285 = vmatprep.mubr.bf16.mxu1 %v19621_v24 }
 0x166   :  { %v15091_v48 = vpop.f32.mrb[24].mxu1  ;;  %v3417_v10 = vadd.f32 %v15074_v8, %v3368_v44  ;;  %v17185_v44 = vld [vmem:[%s23456_s2 + $0x900] ss:$12 sps:$4 sm:$0xff]   ;;  %v17353_v8 = vld [vmem:[%s23458_s4 + $0x198] ss:$12 sps:$4 sm:$0xff]  }
 0x167   :  { %3133 = vmatpush1.bf16.msra.mxu0 %v17164_v19  ;;  %v15092_v9 = vpop.f32.mrb[25].mxu1 }
 0x168   :  { %3134 = vmatprep.subr.bf16.mxu0 %v17169_v60  ;;  %v15093_v11 = vadd.f32 %v15092_v9, %v15091_v48  ;;  %v15094_v15 = vpop.f32.mrb[26].mxu1  ;;  %v17197_v48 = vld [vmem:[%s23456_s2 + $0x960] ss:$12 sps:$4 sm:$0xff]  }
 0x169   :  { %v15095_v18 = vpop.f32.mrb[27].mxu1 }
 0x16a   :  { %v19642_v19 = vadd.f32 %v15093_v11, %v3406_v52  ;;  %v15096_v60 = vadd.f32 %v15095_v18, %v15094_v15  ;;  %v17194_v52 = vld [vmem:[%s23456_s2 + $0x948] ss:$12 sps:$4 sm:$0xff]   ;;  %v17359_v18 = vld [vmem:[%s23458_s4 + $0x1b0] ss:$12 sps:$4 sm:$0xff]  }
 0x16b   :  { %3135 = vmatpush1.bf16.msra.mxu0 %v17167_v33  ;;  %v17361_v11 = vld [vmem:[%s23458_s4 + $0x1b4] ss:$12 sps:$4 sm:$0xff]   ;;  %v17202_v15 = vld [vmem:[%s23456_s2 + $0x97c] ss:$12 sps:$4 sm:$0xff]  }
 0x16c   :  { %3136 = vmatprep.subr.bf16.mxu0 %v17172_v36  ;;  %4286 = vmatmul.mubr.bf16.gmra.mrb[72].mxu1 %v19626_v57  ;;  %v19654_v23 = vadd.f32 %v15096_v60, %v3409_v59  ;;  %v17364_v60 = vld [vmem:[%s23458_s4 + $0x1cc] ss:$12 sps:$4 sm:$0xff]  }
 0x16d   :  { %4295 = vmatprep.mubr.bf16.mxu1 %v19647_v20 }
 0x16e   :  { %v15097_v22 = vpop.f32.mrb[28].mxu1 }
 0x16f   :  { %3137 = vmatpush1.bf16.msra.mxu0 %v17170_v46  ;;  %v15098_v21 = vpop.f32.mrb[29].mxu1  ;;  %v17188_v46 = vld [vmem:[%s23456_s2 + $0x918] ss:$12 sps:$4 sm:$0xff]  }
 0x170   :  { %3138 = vmatprep.subr.bf16.mxu0 %v17175_v50  ;;  %v15099_v27 = vadd.f32 %v15098_v21, %v15097_v22  ;;  %v15100_v35 = vpop.f32.mrb[30].mxu1  ;;  %v17193_v50 = vld [vmem:[%s23456_s2 + $0x934] ss:$12 sps:$4 sm:$0xff]  }
 0x171   :  { %v15101_v32 = vpop.f32.mrb[31].mxu1  ;;  %v17205_v22 = vld [vmem:[%s23456_s2 + $0x994] ss:$12 sps:$4 sm:$0xff]  }
 0x172   :  { %v19663_v33 = vadd.f32 %v15099_v27, %v3414_v41  ;;  %v15102_v36 = vadd.f32 %v15101_v32, %v15100_v35  ;;  %v17362_v32 = vld [vmem:[%s23458_s4 + $0x1c8] ss:$12 sps:$4 sm:$0xff]  }
 0x173   :  { %3139 = vmatpush1.bf16.msra.mxu0 %v17173_v4  ;;  %v17355_v4 = vld [vmem:[%s23458_s4 + $0x19c] ss:$12 sps:$4 sm:$0xff]  }
 0x174   :  { %3140 = vmatprep.subr.bf16.mxu0 %v17178_v7  ;;  %4296 = vmatmul.mubr.bf16.gmra.mrb[76].mxu1 %v19652_v25  ;;  %v19666_v38 = vadd.f32 %v15102_v36, %v3417_v10  ;;  %v19749_v7 = vld [vmem:[%s23460_s0 + $0xac] ss:$12 sps:$4 sm:$0xff]  }
 0x175   :  { %4305 = vmatprep.mubr.bf16.mxu1 %v19677_v42 }
 0x177   :  { %3141 = vmatpush1.bf16.msra.mxu0 %v17176_v17 }
 0x178   :  { %3142 = vmatprep.subr.bf16.mxu0 %v17181_v53  ;;  %v17200_v53 = vld [vmem:[%s23456_s2 + $0x978] ss:$12 sps:$4 sm:$0xff]  }
 0x17b   :  { %3143 = vmatpush1.bf16.msra.mxu0 %v17179_v31 }
 0x17c   :  { %3144 = vmatprep.subr.bf16.mxu0 %v17184_v37  ;;  %4306 = vmatmul.mubr.bf16.gmra.mrb[80].mxu1 %v19682_v43  ;;  %v17203_v37 = vld [vmem:[%s23456_s2 + $0x990] ss:$12 sps:$4 sm:$0xff]  }
 0x17d   :  { %4315 = vmatprep.mubr.bf16.mxu1 %v19696_v1 }
 0x17f   :  { %3145 = vmatpush1.bf16.msra.mxu0 %v17182_v39 }
 0x180   :  { %3167 = vmatprep.subr.bf16.mxu0 %v17187_v40  ;;  %v17370_v40 = vld [vmem:[%s23458_s4 + $0xc8] ss:$12 sps:$4 sm:$0xff]  }
 0x182   :  { %3147 = vmatmul.mubr.bf16.vlgmr.msra.gmra.mrb[0].mxu0 %v19099_v63  ;;  %v19709_v63 = vld [vmem:[%s23460_s0 + $0x78] ss:$12 sps:$4 sm:$0xff]  }
 0x183   :  { %3168 = vmatpush1.bf16.msra.mxu0 %v17185_v44  ;;  %3156 = vmatprep.mubr.bf16.mxu0 %v19104_v2  ;;  %v17196_v2 = vld [vmem:[%s23456_s2 + $0x94c] ss:$12 sps:$4 sm:$0xff]  }
 0x184   :  { %3169 = vmatprep.subr.bf16.mxu0 %v17190_v45  ;;  %4316 = vmatmul.mubr.bf16.gmra.mrb[84].mxu1 %v19709_v63  ;;  %v17208_v44 = vld [vmem:[%s23456_s2 + $0x9ac] ss:$12 sps:$4 sm:$0xff]   ;;  %v17206_v45 = vld [vmem:[%s23456_s2 + $0x9a8] ss:$12 sps:$4 sm:$0xff]  }
 0x185   :  { %4325 = vmatprep.mubr.bf16.mxu1 %v19725_v54 }
 0x186   :  { %v15119_v59 = vpop.f32.mrb[32].mxu1 }
 0x187   :  { %3170 = vmatpush1.bf16.msra.mxu0 %v17188_v46  ;;  %v15120_v62 = vpop.f32.mrb[33].mxu1  ;;  %v23471_v46 = vmov 0  }
 0x188   :  { %3171 = vmatprep.subr.bf16.mxu0 %v17193_v50  ;;  %v15121_v6 = vadd.f32 %v15120_v62, %v15119_v59  ;;  %v17214_v50 = vld [vmem:[%s23456_s2 + $0x9c4] ss:$12 sps:$4 sm:$0xff]   ;;  %v17373_v59 = vld [vmem:[%s23458_s4 + $0x20] ss:$12 sps:$4 sm:$0xff]  }
 0x189   :  { %v19846_v62 = vld [vmem:[%s23460_s0 + $0x20] ss:$12 sps:$4 sm:$0xff]  }
 0x18a   :  { %3157 = vmatmul.mubr.bf16.gmra.mrb[4].mxu0 %v19135_v14  ;;  %v17352_v14 = vld [vmem:[%s23458_s4 + $0x184] ss:$12 sps:$4 sm:$0xff]   ;;  %v19758_v9 = vadd.f32 %v15121_v6, %v19642_v19 }
 0x18b   :  { %3172 = vmatpush1.bf16.msra.mxu0 %v17191_v51  ;;  %3199 = vmatprep.mubr.bf16.mxu0 %v19140_v16  ;;  %v15122_v16 = vpop.f32.mrb[34].mxu1  ;;  %v19817_v51 = vld [vmem:[%s23460_s0 + $0x8] ss:$12 sps:$4 sm:$0xff]   ;;  %v17224_v6 = vld [vmem:[%s23456_s2 + $0x9f0] ss:$12 sps:$4 sm:$0xff]  }
 0x18c   :  { %3173 = vmatprep.subr.bf16.mxu0 %v17196_v2  ;;  %4346 = vmatprep.subr.bf16.mxu1 %v17352_v14  ;;  %v15123_v41 = vpop.f32.mrb[35].mxu1  ;;  %v17372_v2 = vld [vmem:[%s23458_s4 + $0xe0] ss:$12 sps:$4 sm:$0xff]  }
 0x18d   :  { %4347 = vmatpush1.bf16.msra.mxu1 %v17350_v13  ;;  %v15124_v10 = vadd.f32 %v15123_v41, %v15122_v16  ;;  %v17220_v13 = vld [vmem:[%s23456_s2 + $0x9dc] ss:$12 sps:$4 sm:$0xff]   ;;  %v17226_v14 = vld [vmem:[%s23456_s2 + $0x9f4] ss:$12 sps:$4 sm:$0xff]   ;;  %v17376_v16 = vld [vmem:[%s23458_s4 + $0x38] ss:$12 sps:$4 sm:$0xff]  }
 0x18e   :  { %4348 = vmatprep.subr.bf16.mxu1 %v17355_v4  ;;  %4326 = vmatmul.mubr.bf16.gmra.mrb[88].mxu1 %v19741_v3  ;;  %v15125_v19 = vpop.f32.mrb[36].mxu1  ;;  %v17375_v4 = vld [vmem:[%s23458_s4 + $0xf8] ss:$12 sps:$4 sm:$0xff]  }
 0x18f   :  { %3174 = vmatpush1.bf16.msra.mxu0 %v17194_v52  ;;  %v19768_v17 = vadd.f32 %v15124_v10, %v19654_v23  ;;  %4335 = vmatprep.mubr.bf16.mxu1 %v19749_v7  ;;  %v15126_v21 = vpop.f32.mrb[37].mxu1  ;;  %v19786_v23 = vld [vmem:[%s23460_s0 + $0xa8] ss:$12 sps:$4 sm:$0xff]   ;;  %v17212_v52 = vld [vmem:[%s23456_s2 + $0x9c0] ss:$12 sps:$4 sm:$0xff]  }
 0x190   :  { %3175 = vmatprep.subr.bf16.mxu0 %v17199_v55  ;;  %v15127_v27 = vadd.f32 %v15126_v21, %v15125_v19  ;;  %v15128_v35 = vpop.f32.mrb[38].mxu1  ;;  %v17218_v55 = vld [vmem:[%s23456_s2 + $0x9d8] ss:$12 sps:$4 sm:$0xff]   ;;  %v17378_v10 = vld [vmem:[%s23458_s4 + $0x50] ss:$12 sps:$4 sm:$0xff]  }
 0x191   :  { %4349 = vmatpush1.bf16.msra.mxu1 %v17353_v8  ;;  %v15129_v31 = vpop.f32.mrb[39].mxu1  ;;  %v17232_v41 = vld [vmem:[%s23456_s2 + $0xa0c] ss:$12 sps:$4 sm:$0xff]   ;;  %v17377_v8 = vld [vmem:[%s23458_s4 + $0x110] ss:$12 sps:$4 sm:$0xff]  }
 0x192   :  { %4350 = vmatprep.subr.bf16.mxu1 %v17361_v11  ;;  %v19795_v36 = vadd.f32 %v15127_v27, %v19663_v33  ;;  %v15130_v39 = vadd.f32 %v15129_v31, %v15128_v35  ;;  %v17238_v11 = vld [vmem:[%s23456_s2 + $0xa24] ss:$12 sps:$4 sm:$0xff]   ;;  %v17381_v27 = vld [vmem:[%s23458_s4 + $0x68] ss:$12 sps:$4 sm:$0xff]  }
 0x193   :  { %3176 = vmatpush1.bf16.msra.mxu0 %v17197_v48  ;;  %v17230_v48 = vld [vmem:[%s23456_s2 + $0xa08] ss:$12 sps:$4 sm:$0xff]  }
 0x194   :  { %3177 = vmatprep.subr.bf16.mxu0 %v17202_v15  ;;  %v19808_v33 = vadd.f32 %v15130_v39, %v19666_v38  ;;  %v17371_v38 = vld [vmem:[%s23458_s4 + $0x8] ss:$12 sps:$4 sm:$0xff]   ;;  %v19878_v15 = vld [vmem:[%s23460_s0 + $0x38] ss:$12 sps:$4 sm:$0xff]  }
 0x195   :  { %4351 = vmatpush1.bf16.msra.mxu1 %v17359_v18  ;;  %v17380_v18 = vld [vmem:[%s23458_s4 + $0x128] ss:$12 sps:$4 sm:$0xff]  }
 0x196   :  { %4352 = vmatprep.subr.bf16.mxu1 %v17364_v60  ;;  %4336 = vmatmul.mubr.bf16.gmra.mrb[92].mxu1 %v19786_v23  ;;  %v17236_v60 = vld [vmem:[%s23456_s2 + $0xa20] ss:$12 sps:$4 sm:$0xff]   ;;  %v17244_v35 = vld [vmem:[%s23456_s2 + $0xa3c] ss:$12 sps:$4 sm:$0xff]  }
 0x197   :  { %3178 = vmatpush1.bf16.msra.mxu0 %v17200_v53  ;;  %4378 = vmatprep.mubr.bf16.mxu1 %v23471_v46 }
 0x198   :  { %3179 = vmatprep.subr.bf16.mxu0 %v17205_v22 }
 0x199   :  { %4353 = vmatpush1.bf16.msra.mxu1 %v17362_v32  ;;  %v17382_v32 = vld [vmem:[%s23458_s4 + $0x140] ss:$12 sps:$4 sm:$0xff]  }
 0x19a   :  { %15215 = vmatprep.subr.bf16.mxu1 %v17370_v40  ;;  %v17242_v40 = vld [vmem:[%s23456_s2 + $0xa38] ss:$12 sps:$4 sm:$0xff]  }
 0x19b   :  { %3180 = vmatpush1.bf16.msra.mxu0 %v17203_v37 }
 0x19c   :  { %3181 = vmatprep.subr.bf16.mxu0 %v17208_v44 }
 0x19e   :  { %14437 = vmatmul.mubr.msk.bf16.vlgmr.msra.gmra.mrb[64].mxu1 %vm4208_vm0, %v19817_v51 }
 0x19f   :  { %3182 = vmatpush1.bf16.msra.mxu0 %v17206_v45  ;;  %4388 = vmatprep.mubr.bf16.mxu1 %v23471_v46  ;;  %v17250_v45 = vld [vmem:[%s23456_s2 + $0xa54] ss:$12 sps:$4 sm:$0xff]  }
 0x1a0   :  { %3183 = vmatprep.subr.bf16.mxu0 %v17214_v50  ;;  %15216 = vmatpush3.bf16.msra.mxu1 %v17371_v38  ;;  %v19916_v50 = vld [vmem:[%s23460_s0 + $0x50] ss:$12 sps:$4 sm:$0xff]  }
 0x1a1   :  { %15217 = vmatprep.subr.bf16.mxu1 %v17372_v2 }
 0x1a3   :  { %3184 = vmatpush1.bf16.msra.mxu0 %v17212_v52  ;;  %v17248_v52 = vld [vmem:[%s23456_s2 + $0xa50] ss:$12 sps:$4 sm:$0xff]  }
 0x1a4   :  { %3185 = vmatprep.subr.bf16.mxu0 %v17220_v13  ;;  %15218 = vmatpush3.bf16.msra.mxu1 %v17373_v59  ;;  %v17386_v59 = vld [vmem:[%s23458_s4 + $0x98] ss:$12 sps:$4 sm:$0xff]  }
 0x1a5   :  { %15219 = vmatprep.subr.bf16.mxu1 %v17375_v4 }
 0x1a6   :  { %14438 = vmatmul.mubr.msk.bf16.gmra.mrb[68].mxu1 %vm4208_vm0, %v19846_v62  ;;  %v15147_v53 = vpop.f32.mrb[40].mxu1 }
 0x1a7   :  { %3186 = vmatpush1.bf16.msra.mxu0 %v17218_v55  ;;  %4398 = vmatprep.mubr.bf16.mxu1 %v23471_v46  ;;  %v15148_v19 = vpop.f32.mrb[41].mxu1 }
 0x1a8   :  { %3187 = vmatprep.subr.bf16.mxu0 %v17226_v14  ;;  %15220 = vmatpush3.bf16.msra.mxu1 %v17376_v16  ;;  %v15149_v22 = vadd.f32 %v15148_v19, %v15147_v53  ;;  %v15150_v21 = vpop.f32.mrb[42].mxu1  ;;  %v17256_v14 = vld [vmem:[%s23456_s2 + $0xa6c] ss:$12 sps:$4 sm:$0xff]   ;;  %v17268_v53 = vld [vmem:[%s23456_s2 + $0xa9c] ss:$12 sps:$4 sm:$0xff]  }
 0x1a9   :  { %15221 = vmatprep.subr.bf16.mxu1 %v17377_v8  ;;  %v15151_v31 = vpop.f32.mrb[43].mxu1  ;;  %v17254_v8 = vld [vmem:[%s23456_s2 + $0xa68] ss:$12 sps:$4 sm:$0xff]   ;;  %v17266_v19 = vld [vmem:[%s23456_s2 + $0xa98] ss:$12 sps:$4 sm:$0xff]  }
 0x1aa   :  { %v19896_v37 = vadd.f32 %v15149_v22, %v19758_v9  ;;  %v15152_v39 = vadd.f32 %v15151_v31, %v15150_v21  ;;  %v17383_v9 = vld [vmem:[%s23458_s4 + $0x80] ss:$12 sps:$4 sm:$0xff]   ;;  %v17272_v21 = vld [vmem:[%s23456_s2 + $0xab0] ss:$12 sps:$4 sm:$0xff]  }
 0x1ab   :  { %3188 = vmatpush1.bf16.msra.mxu0 %v17224_v6  ;;  %v17387_v6 = vld [vmem:[%s23458_s4 + $0x170] ss:$12 sps:$4 sm:$0xff]   ;;  %v19981_v22 = vld [vmem:[%s23460_s0 + $0x80] ss:$12 sps:$4 sm:$0xff]  }
 0x1ac   :  { %3189 = vmatprep.subr.bf16.mxu0 %v17232_v41  ;;  %15222 = vmatpush3.bf16.msra.mxu1 %v17378_v10  ;;  %v19904_v44 = vadd.f32 %v15152_v39, %v19768_v17  ;;  %v17385_v17 = vld [vmem:[%s23458_s4 + $0x158] ss:$12 sps:$4 sm:$0xff]  }
 0x1ad   :  { %15223 = vmatprep.subr.bf16.mxu1 %v17380_v18  ;;  %v17262_v10 = vld [vmem:[%s23456_s2 + $0xa84] ss:$12 sps:$4 sm:$0xff]   ;;  %v17260_v18 = vld [vmem:[%s23456_s2 + $0xa80] ss:$12 sps:$4 sm:$0xff]  }
 0x1ae   :  { %14439 = vmatmul.mubr.msk.bf16.gmra.mrb[72].mxu1 %vm4208_vm0, %v19878_v15  ;;  %v15153_v38 = vpop.f32.mrb[44].mxu1 }
 0x1af   :  { %3190 = vmatpush1.bf16.msra.mxu0 %v17230_v48  ;;  %4408 = vmatprep.mubr.bf16.mxu1 %v23471_v46  ;;  %v15154_v2 = vpop.f32.mrb[45].mxu1 }
 0x1b0   :  { %3191 = vmatprep.subr.bf16.mxu0 %v17238_v11  ;;  %15224 = vmatpush3.bf16.msra.mxu1 %v17381_v27  ;;  %v15155_v13 = vadd.f32 %v15154_v2, %v15153_v38  ;;  %v15156_v55 = vpop.f32.mrb[46].mxu1  ;;  %v19954_v11 = vld [vmem:[%s23460_s0 + $0x68] ss:$12 sps:$4 sm:$0xff]  }
 0x1b1   :  { %15225 = vmatprep.subr.bf16.mxu1 %v17382_v32  ;;  %v15157_v4 = vpop.f32.mrb[47].mxu1  ;;  %v17278_v27 = vld [vmem:[%s23456_s2 + $0xac8] ss:$12 sps:$4 sm:$0xff]  }
 0x1b2   :  { %v19934_v16 = vadd.f32 %v15155_v13, %v19795_v36  ;;  %v15158_v41 = vadd.f32 %v15157_v4, %v15156_v55  ;;  %v17388_v36 = vld [vmem:[%s23458_s4 + $0xb0] ss:$12 sps:$4 sm:$0xff]  }
 0x1b3   :  { %3192 = vmatpush1.bf16.msra.mxu0 %v17236_v60  ;;  %v17274_v60 = vld [vmem:[%s23456_s2 + $0xab4] ss:$12 sps:$4 sm:$0xff]  }
 0x1b4   :  { %3193 = vmatprep.subr.bf16.mxu0 %v17244_v35  ;;  %15226 = vmatpush3.bf16.msra.mxu1 %v17383_v9  ;;  %v19942_v48 = vadd.f32 %v15158_v41, %v19808_v33  ;;  %v19959_v33 = vld [vmem:[%s23458_s4 + $0x188] ss:$12 sps:$4 sm:$0xff]   ;;  %v20003_v35 = vld [vmem:[%s23460_s0 + $0x98] ss:$12 sps:$4 sm:$0xff]   ;;  %v17284_v9 = vld [vmem:[%s23456_s2 + $0xae0] ss:$12 sps:$4 sm:$0xff]  }
 0x1b5   :  { %15227 = vmatprep.subr.bf16.mxu1 %v17385_v17 }
 0x1b6   :  { %14440 = vmatmul.mubr.msk.bf16.gmra.mrb[76].mxu1 %vm4208_vm0, %v19916_v50 }
 0x1b7   :  { %3194 = vmatpush1.bf16.msra.mxu0 %v17242_v40  ;;  %4418 = vmatprep.mubr.bf16.mxu1 %v23471_v46 }
 0x1b8   :  { %3195 = vmatprep.subr.bf16.mxu0 %v17250_v45  ;;  %15228 = vmatpush3.bf16.msra.mxu1 %v17386_v59 }
 0x1b9   :  { %15229 = vmatprep.subr.bf16.mxu1 %v17387_v6 }
 0x1bb   :  { %3196 = vmatpush1.bf16.msra.mxu0 %v17248_v52  ;;  %v17298_v52 = vld [vmem:[%s23456_s2 + $0xb14] ss:$12 sps:$4 sm:$0xff]  }
 0x1bc   :  { %3197 = vmatprep.subr.bf16.mxu0 %v17256_v14  ;;  %15230 = vmatpush3.bf16.msra.mxu1 %v17388_v36 }
 0x1bd   :  { %15637 = vmatprep.subr.bf16.mxu1 %v19959_v33 }
 0x1be   :  { %14441 = vmatmul.mubr.msk.bf16.gmra.mrb[80].mxu1 %vm4208_vm0, %v19954_v11 }
 0x1bf   :  { %3198 = vmatpush1.bf16.msra.mxu0 %v17254_v8  ;;  %4428 = vmatprep.mubr.bf16.mxu1 %v23471_v46  ;;  %v17304_v8 = vld [vmem:[%s23456_s2 + $0xb2c] ss:$12 sps:$4 sm:$0xff]  }
 0x1c0   :  { %3220 = vmatprep.subr.bf16.mxu0 %v17262_v10  ;;  %v17310_v10 = vld [vmem:[%s23456_s2 + $0xb44] ss:$12 sps:$4 sm:$0xff]  }
 0x1c2   :  { %3200 = vmatmul.mubr.bf16.vlgmr.msra.gmra.mrb[0].mxu0 %v19219_v12  ;;  %v17280_v12 = vld [vmem:[%s23456_s2 + $0xacc] ss:$12 sps:$4 sm:$0xff]  }
 0x1c3   :  { %3221 = vmatpush1.bf16.msra.mxu0 %v17260_v18  ;;  %3209 = vmatprep.mubr.bf16.mxu0 %v19224_v49  ;;  %v17286_v49 = vld [vmem:[%s23456_s2 + $0xae4] ss:$12 sps:$4 sm:$0xff]   ;;  %v17390_v18 = vld [vmem:[%s23458_s4 + $0x1a0] ss:$12 sps:$4 sm:$0xff]  }
 0x1c4   :  { %3222 = vmatprep.subr.bf16.mxu0 %v17268_v53  ;;  %v17391_v53 = vld [vmem:[%s23458_s4 + $0x1b8] ss:$12 sps:$4 sm:$0xff]  }
 0x1c6   :  { %14442 = vmatmul.mubr.msk.bf16.gmra.mrb[84].mxu1 %vm4208_vm0, %v19981_v22  ;;  %v15175_v31 = vpop.f32.mrb[48].mxu1 }
 0x1c7   :  { %3223 = vmatpush1.bf16.msra.mxu0 %v17266_v19  ;;  %4438 = vmatprep.mubr.bf16.mxu1 %v23471_v46  ;;  %v15176_v32 = vpop.f32.mrb[49].mxu1  ;;  %v17311_v19 = vld [vmem:[%s23456_s2 + $0xb58] ss:$12 sps:$4 sm:$0xff]  }
 0x1c8   :  { %3224 = vmatprep.subr.bf16.mxu0 %v17274_v60  ;;  %v15177_v39 = vadd.f32 %v15176_v32, %v15175_v31  ;;  %v15178_v40 = vpop.f32.mrb[50].mxu1  ;;  %v17319_v60 = vld [vmem:[%s23456_s2 + $0xb74] ss:$12 sps:$4 sm:$0xff]  }
 0x1c9   :  { %v15179_v45 = vpop.f32.mrb[51].mxu1 }
 0x1ca   :  { %3210 = vmatmul.mubr.bf16.gmra.mrb[4].mxu0 %v19257_v58  ;;  %v17292_v58 = vld [vmem:[%s23456_s2 + $0xafc] ss:$12 sps:$4 sm:$0xff]   ;;  %v20013_v17 = vadd.f32 %v15177_v39, %v19896_v37  ;;  %v15180_v38 = vadd.f32 %v15179_v45, %v15178_v40  ;;  %v17326_v39 = vld [vmem:[%s23456_s2 + $0xba0] ss:$12 sps:$4 sm:$0xff]  }
 0x1cb   :  { %3225 = vmatpush1.bf16.msra.mxu0 %v17272_v21  ;;  %3252 = vmatprep.mubr.bf16.mxu0 %v19263_v61  ;;  %v17290_v61 = vld [vmem:[%s23456_s2 + $0xaf8] ss:$12 sps:$4 sm:$0xff]   ;;  %v20030_v37 = vld [vmem:[%s23460_s0 + $0xb0] ss:$12 sps:$4 sm:$0xff]   ;;  %v17398_v21 = vld [vmem:[%s23461_s6 + $0xc] ss:$20 sps:$4 sm:$0xff]  }
 0x1cc   :  { %3226 = vmatprep.subr.bf16.mxu0 %v17280_v12  ;;  %v20021_v2 = vadd.f32 %v15180_v38, %v19904_v44  ;;  %v17296_v44 = vld [vmem:[%s23456_s2 + $0xb10] ss:$12 sps:$4 sm:$0xff]   ;;  %v17320_v12 = vld [vmem:[%s23456_s2 + $0xb88] ss:$12 sps:$4 sm:$0xff]   ;;  %v17329_v38 = vld [vmem:[%s23456_s2 + $0xbb8] ss:$12 sps:$4 sm:$0xff]  }
 0x1cd   :  { %s18269_s0 = smov 120  }
 0x1ce   :  { %14443 = vmatmul.mubr.msk.bf16.gmra.mrb[88].mxu1 %vm4208_vm0, %v20003_v35  ;;  %v15181_v13 = vpop.f32.mrb[52].mxu1 }
 0x1cf   :  { %3227 = vmatpush1.bf16.msra.mxu0 %v17278_v27  ;;  %4448 = vmatprep.mubr.bf16.mxu1 %v23471_v46  ;;  %v15182_v55 = vpop.f32.mrb[53].mxu1 }
 0x1d0   :  { %3228 = vmatprep.subr.bf16.mxu0 %v17286_v49  ;;  %v15183_v59 = vadd.f32 %v15182_v55, %v15181_v13  ;;  %v15184_v14 = vpop.f32.mrb[54].mxu1  ;;  %v17328_v49 = vld [vmem:[%s23456_s2 + $0xba4] ss:$12 sps:$4 sm:$0xff]  }
 0x1d1   :  { %v15185_v4 = vpop.f32.mrb[55].mxu1 }
 0x1d2   :  { %v20036_v6 = vadd.f32 %v15183_v59, %v19934_v16  ;;  %v15186_v41 = vadd.f32 %v15185_v4, %v15184_v14  ;;  %v17302_v16 = vld [vmem:[%s23456_s2 + $0xb28] ss:$12 sps:$4 sm:$0xff]   ;;  %v17340_v4 = vld [vmem:[%s23456_s2 + $0xbec] ss:$12 sps:$4 sm:$0xff]  }
 0x1d3   :  { %3229 = vmatpush1.bf16.msra.mxu0 %v17284_v9 }
 0x1d4   :  { %3230 = vmatprep.subr.bf16.mxu0 %v17292_v58  ;;  %v20044_v36 = vadd.f32 %v15186_v41, %v19942_v48  ;;  %v17308_v48 = vld [vmem:[%s23456_s2 + $0xb40] ss:$12 sps:$4 sm:$0xff]   ;;  %v17331_v58 = vld [vmem:[%s23456_s2 + $0xbbc] ss:$12 sps:$4 sm:$0xff]  }
 0x1d5   :  { %v17338_v41 = vld [vmem:[%s23456_s2 + $0xbe8] ss:$12 sps:$4 sm:$0xff]  }
 0x1d6   :  { %14444 = vmatmul.mubr.msk.bf16.gmra.mrb[92].mxu1 %vm4208_vm0, %v20030_v37 }
 0x1d7   :  { %3231 = vmatpush1.bf16.msra.mxu0 %v17290_v61  ;;  %4491 = vmatprep.mubr.bf16.mxu1 %v19578_v5  ;;  %v17313_v5 = vld [vmem:[%s23456_s2 + $0xb5c] ss:$12 sps:$4 sm:$0xff]  }
 0x1d8   :  { %3232 = vmatprep.subr.bf16.mxu0 %v17298_v52  ;;  %v17337_v52 = vld [vmem:[%s23456_s2 + $0xbd4] ss:$12 sps:$4 sm:$0xff]  }
 0x1db   :  { %3233 = vmatpush1.bf16.msra.mxu0 %v17296_v44 }
 0x1dc   :  { %3234 = vmatprep.subr.bf16.mxu0 %v17304_v8 }
 0x1de   :  { %4492 = vmatmul.mubr.bf16.vlgmr.msra.gmra.mrb[96].mxu1 %v19572_v0  ;;  %v17392_v0 = vld [vmem:[%s23458_s4 + $0x1d0] ss:$12 sps:$4 sm:$0xff]  }
 0x1df   :  { %3235 = vmatpush1.bf16.msra.mxu0 %v17302_v16  ;;  %4499 = vmatprep.mubr.bf16.mxu1 %v19597_v26  ;;  %v17317_v26 = vld [vmem:[%s23456_s2 + $0xb70] ss:$12 sps:$4 sm:$0xff]  }
 0x1e0   :  { %3236 = vmatprep.subr.bf16.mxu0 %v17310_v10  ;;  %15638 = vmatpush3.bf16.msra.mxu1 %v19959_v33  ;;  %v17322_v33 = vld [vmem:[%s23456_s2 + $0xb8c] ss:$12 sps:$4 sm:$0xff]   ;;  %v17405_v16 = vld [vmem:[%s23461_s6 + $0x50] ss:$20 sps:$4 sm:$0xff]   ;;  %v17431_v10 = vld [vmem:[%s23461_s6 + $0xf4] ss:$20 sps:$4 sm:$0xff]  }
 0x1e1   :  { %15639 = vmatprep.subr.bf16.mxu1 %v17390_v18 }
 0x1e3   :  { %3237 = vmatpush1.bf16.msra.mxu0 %v17308_v48  ;;  %v17443_v48 = vld [vmem:[%s23461_s6 + $0x144] ss:$20 sps:$4 sm:$0xff]  }
 0x1e4   :  { %3238 = vmatprep.subr.bf16.mxu0 %v17313_v5  ;;  %15640 = vmatpush3.bf16.msra.mxu1 %v17390_v18  ;;  %v17435_v18 = vld [vmem:[%s23461_s6 + $0x118] ss:$20 sps:$4 sm:$0xff]   ;;  %v17404_v5 = vld [vmem:[%s23461_s6 + $0x34] ss:$20 sps:$4 sm:$0xff]  }
 0x1e5   :  { %15641 = vmatprep.subr.bf16.mxu1 %v17391_v53 }
 0x1e6   :  { %4500 = vmatmul.mubr.bf16.gmra.mrb[100].mxu1 %v19602_v30  ;;  %v15203_v27 = vpop.f32.mrb[56].mxu1 }
 0x1e7   :  { %3239 = vmatpush1.bf16.msra.mxu0 %v17311_v19  ;;  %4507 = vmatprep.mubr.bf16.mxu1 %v19621_v24  ;;  %v15204_v30 = vpop.f32.mrb[57].mxu1  ;;  %v17402_v19 = vld [vmem:[%s23461_s6 + $0x30] ss:$20 sps:$4 sm:$0xff]  }
 0x1e8   :  { %3240 = vmatprep.subr.bf16.mxu0 %v17319_v60  ;;  %15642 = vmatpush3.bf16.msra.mxu1 %v17391_v53  ;;  %v15205_v31 = vadd.f32 %v15204_v30, %v15203_v27  ;;  %v15206_v24 = vpop.f32.mrb[58].mxu1  ;;  %v17449_v53 = vld [vmem:[%s23461_s6 + $0x16c] ss:$20 sps:$4 sm:$0xff]   ;;  %v17410_v60 = vld [vmem:[%s23461_s6 + $0x5c] ss:$20 sps:$4 sm:$0xff]  }
 0x1e9   :  { %15643 = vmatprep.subr.bf16.mxu1 %v17392_v0  ;;  %v15207_v32 = vpop.f32.mrb[59].mxu1  ;;  %v17422_v27 = vld [vmem:[%s23461_s6 + $0xac] ss:$20 sps:$4 sm:$0xff]   ;;  %v17428_v30 = vld [vmem:[%s23461_s6 + $0xd4] ss:$20 sps:$4 sm:$0xff]  }
 0x1ea   :  { %v3651_v40 = vadd.f32 %v15205_v31, %v20013_v17  ;;  %v15208_v9 = vadd.f32 %v15207_v32, %v15206_v24  ;;  %v17465_v31 = vld [vmem:[%s23461_s6 + $0x1e0] ss:$20 sps:$4 sm:$0xff]   ;;  %v17426_v32 = vld [vmem:[%s23461_s6 + $0xd0] ss:$20 sps:$4 sm:$0xff]  }
 0x1eb   :  { %3241 = vmatpush1.bf16.msra.mxu0 %v17317_v26  ;;  %v17416_v26 = vld [vmem:[%s23461_s6 + $0x84] ss:$20 sps:$4 sm:$0xff]   ;;  %v17473_v24 = vld [vmem:[%s23461_s6 + $0x20c] ss:$20 sps:$4 sm:$0xff]  }
 0x1ec   :  { %3242 = vmatprep.subr.bf16.mxu0 %v17322_v33  ;;  %15644 = vmatpush3.bf16.msra.mxu1 %v17392_v0  ;;  %v3654_v45 = vadd.f32 %v15208_v9, %v20021_v2  ;;  %v17455_v0 = vld [vmem:[%s23461_s6 + $0x194] ss:$20 sps:$4 sm:$0xff]   ;;  %v17453_v33 = vld [vmem:[%s23461_s6 + $0x190] ss:$20 sps:$4 sm:$0xff]  }
 0x1ed   :  { %5432 = vmatprep.subr.bf16.mxu1 %v17398_v21  ;;  %v17461_v21 = vld [vmem:[%s23461_s6 + $0x1bc] ss:$20 sps:$4 sm:$0xff]   ;;  %v17438_v9 = vld [vmem:[%s23461_s6 + $0x120] ss:$20 sps:$4 sm:$0xff]  }
 0x1ee   :  { %4508 = vmatmul.mubr.bf16.gmra.mrb[104].mxu1 %v19626_v57  ;;  %v20107_v61 = vpack.c.bf16 %v3654_v45, %v3651_v40  ;;  %v15209_v17 = vpop.f32.mrb[60].mxu1  ;;  %v17432_v40 = vld [vmem:[%s23461_s6 + $0xf8] ss:$20 sps:$4 sm:$0xff]   ;;  %v17444_v45 = vld [vmem:[%s23461_s6 + $0x148] ss:$20 sps:$4 sm:$0xff]  }
 0x1ef   :  { %3243 = vmatpush1.bf16.msra.mxu0 %v17320_v12  ;;  %4515 = vmatprep.mubr.bf16.mxu1 %v19647_v20  ;;  %v15210_v13 = vpop.f32.mrb[61].mxu1  ;;  %v17335_v20 = vld [vmem:[%s23456_s2 + $0xbd0] ss:$12 sps:$4 sm:$0xff]   ;;  %v17414_v12 = vld [vmem:[%s23461_s6 + $0x80] ss:$20 sps:$4 sm:$0xff]  }
 0x1f0   :  { %3244 = vmatprep.subr.bf16.mxu0 %v17328_v49  ;;  %v15211_v55 = vadd.f32 %v15210_v13, %v15209_v17  ;;  %v15212_v57 = vpop.f32.mrb[62].mxu1  ;;  %v17467_v49 = vld [vmem:[%s23461_s6 + $0x1e4] ss:$20 sps:$4 sm:$0xff]   ;;  %v17458_v17 = vld [vmem:[%s23461_s6 + $0x19c] ss:$20 sps:$4 sm:$0xff]  }
 0x1f1   :  { %v15213_v59 = vpop.f32.mrb[63].mxu1  ;;  %v17464_v13 = vld [vmem:[%s23461_s6 + $0x1c4] ss:$20 sps:$4 sm:$0xff]  }
 0x1f2   :  { %v3659_v2 = vadd.f32 %v15211_v55, %v20036_v6  ;;  %v15214_v14 = vadd.f32 %v15213_v59, %v15212_v57  ;;  %v17395_v6 = vld [vmem:[%s23461_s6 + $0x4] ss:$20 sps:$4 sm:$0xff]   ;;  %v17462_v55 = vld [vmem:[%s23461_s6 + $0x1c0] ss:$20 sps:$4 sm:$0xff]   ;;  %v17468_v59 = vld [vmem:[%s23461_s6 + $0x1e8] ss:$20 sps:$4 sm:$0xff]  }
 0x1f3   :  { %3245 = vmatpush1.bf16.msra.mxu0 %v17326_v39  ;;  %v17434_v39 = vld [vmem:[%s23461_s6 + $0xfc] ss:$20 sps:$4 sm:$0xff]   ;;  %v17470_v57 = vld [vmem:[%s23461_s6 + $0x1ec] ss:$20 sps:$4 sm:$0xff]  }
 0x1f4   :  { %3246 = vmatprep.subr.bf16.mxu0 %v17331_v58  ;;  %v3662_v44 = vadd.f32 %v15214_v14, %v20044_v36  ;;  %v17399_v36 = vld [vmem:[%s23461_s6 + $0x28] ss:$20 sps:$4 sm:$0xff]   ;;  %v17446_v58 = vld [vmem:[%s23461_s6 + $0x14c] ss:$20 sps:$4 sm:$0xff]  }
 0x1f5   :  { %v17479_v14 = vld [vmem:[%s23461_s6 + $0x234] ss:$20 sps:$4 sm:$0xff]  }
 0x1f6   :  { %4516 = vmatmul.mubr.bf16.gmra.mrb[108].mxu1 %v19652_v25  ;;  %v20125_v8 = vpack.c.bf16 %v3662_v44, %v3659_v2  ;;  %v17393_v25 = vld [vmem:[%s23461_s6] ss:$20 sps:$4 sm:$0xff]   ;;  %v17474_v2 = vld [vmem:[%s23461_s6 + $0x210] ss:$20 sps:$4 sm:$0xff]  }
 0x1f7   :  { %3247 = vmatpush1.bf16.msra.mxu0 %v17329_v38  ;;  %4523 = vmatprep.mubr.bf16.mxu1 %v19677_v42  ;;  %v17401_v42 = vld [vmem:[%s23461_s6 + $0x2c] ss:$20 sps:$4 sm:$0xff]   ;;  %v17450_v38 = vld [vmem:[%s23461_s6 + $0x170] ss:$20 sps:$4 sm:$0xff]  }
 0x1f8   :  { %3248 = vmatprep.subr.bf16.mxu0 %v17337_v52  ;;  %v17456_v52 = vld [vmem:[%s23461_s6 + $0x198] ss:$20 sps:$4 sm:$0xff]   ;;  %v17482_v44 = vld [vmem:[%s23461_s6 + $0x23c] ss:$20 sps:$4 sm:$0xff]  }
 0x1fb   :  { %3249 = vmatpush1.bf16.msra.mxu0 %v17335_v20  ;;  %v17476_v20 = vld [vmem:[%s23461_s6 + $0x214] ss:$20 sps:$4 sm:$0xff]  }
 0x1fc   :  { %3250 = vmatprep.subr.bf16.mxu0 %v17340_v4  ;;  %v17477_v4 = vld [vmem:[%s23461_s6 + $0x230] ss:$20 sps:$4 sm:$0xff]  }
 0x1fe   :  { %4524 = vmatmul.mubr.bf16.gmra.mrb[112].mxu1 %v19682_v43  ;;  %v17407_v43 = vld [vmem:[%s23461_s6 + $0x54] ss:$20 sps:$4 sm:$0xff]  }
 0x1ff   :  { %3251 = vmatpush1.bf16.msra.mxu0 %v17338_v41  ;;  %4531 = vmatprep.mubr.bf16.mxu1 %v19696_v1  ;;  %v17419_v1 = vld [vmem:[%s23461_s6 + $0xa4] ss:$20 sps:$4 sm:$0xff]  }
 0x200   :  { %5326 = vmatprep.subr.bf16.mxu0 %v17395_v6  ;;  %v17480_v41 = vld [vmem:[%s23461_s6 + $0x238] ss:$20 sps:$4 sm:$0xff]   ;;  %v17485_v6 = vld [vmem:[%s23461_s6 + $0x25c] ss:$20 sps:$4 sm:$0xff]  }
 0x202   :  { %3253 = vmatmul.mubr.bf16.vlgmr.msra.gmra.mrb[0].mxu0 %v19344_v28  ;;  %v17413_v28 = vld [vmem:[%s23461_s6 + $0x7c] ss:$20 sps:$4 sm:$0xff]  }
 0x203   :  { %3262 = vmatprep.mubr.bf16.mxu0 %v19346_v29  ;;  %5327 = vmatpush1.bf16.msra.mxu0 %v17393_v25  ;;  %v17411_v29 = vld [vmem:[%s23461_s6 + $0x78] ss:$20 sps:$4 sm:$0xff]  }
 0x204   :  { %5328 = vmatprep.subr.bf16.mxu0 %v17401_v42  ;;  %v17483_v25 = vld [vmem:[%s23461_s6 + $0x258] ss:$20 sps:$4 sm:$0xff]  }
 0x205   :  { %v17488_v42 = vld [vmem:[%s23461_s6 + $0x264] ss:$20 sps:$4 sm:$0xff]  }
 0x206   :  { %4532 = vmatmul.mubr.bf16.gmra.mrb[116].mxu1 %v19709_v63  ;;  %v17417_v63 = vld [vmem:[%s23461_s6 + $0xa0] ss:$20 sps:$4 sm:$0xff]  }
 0x207   :  { %5329 = vmatpush1.bf16.msra.mxu0 %v17399_v36  ;;  %4539 = vmatprep.mubr.bf16.mxu1 %v19725_v54  ;;  %v17423_v54 = vld [vmem:[%s23461_s6 + $0xc8] ss:$20 sps:$4 sm:$0xff]   ;;  %v17486_v36 = vld [vmem:[%s23461_s6 + $0x260] ss:$20 sps:$4 sm:$0xff]  }
 0x208   :  { %5330 = vmatprep.subr.bf16.mxu0 %v17407_v43  ;;  %v17491_v43 = vld [vmem:[%s23461_s6 + $0x284] ss:$20 sps:$4 sm:$0xff]  }
 0x20a   :  { %3263 = vmatmul.mubr.bf16.gmra.mrb[4].mxu0 %v19362_v34  ;;  %v17425_v34 = vld [vmem:[%s23461_s6 + $0xcc] ss:$20 sps:$4 sm:$0xff]  }
 0x20b   :  { %5331 = vmatpush1.bf16.msra.mxu0 %v17405_v16  ;;  %v17494_v16 = vld [vmem:[%s23461_s6 + $0x28c] ss:$20 sps:$4 sm:$0xff]  }
 0x20c   :  { %5332 = vmatprep.subr.bf16.mxu0 %v17413_v28  ;;  %v20349_v28 = vsub.s32 0, %v19549_v47 }
 0x20e   :  { %4540 = vmatmul.mubr.bf16.gmra.mrb[120].mxu1 %v19741_v3  ;;  %v17429_v3 = vld [vmem:[%s23461_s6 + $0xf0] ss:$20 sps:$4 sm:$0xff]   ;;  %23522 = vst [vmem:[#allocation3_spill] sm:$0xff] %v20349_v28 }
 0x20f   :  { %5333 = vmatpush1.bf16.msra.mxu0 %v17411_v29  ;;  %4547 = vmatprep.mubr.bf16.mxu1 %v19749_v7  ;;  %v17437_v7 = vld [vmem:[%s23461_s6 + $0x11c] ss:$20 sps:$4 sm:$0xff]   ;;  %v20352_v29 = vsub.s32 1, %v19549_v47 }
 0x210   :  { %5334 = vmatprep.subr.bf16.mxu0 %v17419_v1 }
 0x211   :  { %23523 = vst [vmem:[#allocation4_spill] sm:$0xff] %v20352_v29 }
 0x213   :  { %5335 = vmatpush1.bf16.msra.mxu0 %v17417_v63  ;;  %v20357_v63 = vld [vmem:[%s23462_s5] sm:$0x7]  ;;  %s18259_s5 = smov 88  }
 0x214   :  { %5336 = vmatprep.subr.bf16.mxu0 %v17425_v34 }
 0x216   :  { %4548 = vmatmul.mubr.bf16.gmra.mrb[124].mxu1 %v19786_v23  ;;  %v17396_v23 = vld [vmem:[%s23461_s6 + $0x8] ss:$20 sps:$4 sm:$0xff]  }
 0x217   :  { %5337 = vmatpush1.bf16.msra.mxu0 %v17423_v54  ;;  %15645 = vmatprep.mubr.msk.bf16.mxu1 %vm4208_vm0, %v19817_v51  ;;  %v17441_v51 = vld [vmem:[%s23461_s6 + $0x140] ss:$20 sps:$4 sm:$0xff]   ;;  %v20361_v54 = vrot.slane %v20357_v63, %v20349_v28 }
 0x218   :  { %5338 = vmatprep.subr.bf16.mxu0 %v17431_v10  ;;  %v20365_v10 = vrot.slane %v20357_v63, %v20352_v29 }
 0x21b   :  { %5339 = vmatpush1.bf16.msra.mxu0 %v17429_v3 }
 0x21c   :  { %5340 = vmatprep.subr.bf16.mxu0 %v17437_v7 }
 0x21e   :  { %15646 = vmatmul.mubr.msk.bf16.vlgmr.msra.gmra.mrb[128].mxu1 %vm4208_vm0, %v19846_v62  ;;  %v17447_v62 = vld [vmem:[%s23461_s6 + $0x168] ss:$20 sps:$4 sm:$0xff]  }
 0x21f   :  { %5341 = vmatpush1.bf16.msra.mxu0 %v17435_v18  ;;  %5433 = vmatpush1.bf16.msra.mxu1 %v17396_v23 }
 0x220   :  { %5342 = vmatprep.subr.bf16.mxu0 %v17443_v48  ;;  %15649 = vmatprep.mubr.msk.bf16.mxu1 %vm4208_vm0, %v19878_v15  ;;  %v17408_v15 = vld [vmem:[%s23461_s6 + $0x58] ss:$20 sps:$4 sm:$0xff]  }
 0x221   :  { %5434 = vmatprep.subr.bf16.mxu1 %v17404_v5 }
 0x223   :  { %5343 = vmatpush1.bf16.msra.mxu0 %v17441_v51  ;;  %5435 = vmatpush1.bf16.msra.mxu1 %v17402_v19 }
 0x224   :  { %5344 = vmatprep.subr.bf16.mxu0 %v17449_v53  ;;  %5436 = vmatprep.subr.bf16.mxu1 %v17410_v60 }
 0x226   :  { %15650 = vmatmul.mubr.msk.bf16.gmra.mrb[132].mxu1 %vm4208_vm0, %v19916_v50  ;;  %v17459_v50 = vld [vmem:[%s23461_s6 + $0x1b8] ss:$20 sps:$4 sm:$0xff]  }
 0x227   :  { %5345 = vmatpush1.bf16.msra.mxu0 %v17447_v62  ;;  %5437 = vmatpush1.bf16.msra.mxu1 %v17408_v15 }
 0x228   :  { %5346 = vmatprep.subr.bf16.mxu0 %v17455_v0  ;;  %15653 = vmatprep.mubr.msk.bf16.mxu1 %vm4208_vm0, %v19954_v11  ;;  %v17420_v11 = vld [vmem:[%s23461_s6 + $0xa8] ss:$20 sps:$4 sm:$0xff]  }
 0x229   :  { %5438 = vmatprep.subr.bf16.mxu1 %v17416_v26 }
 0x22b   :  { %5347 = vmatpush1.bf16.msra.mxu0 %v17453_v33  ;;  %5439 = vmatpush1.bf16.msra.mxu1 %v17414_v12 }
 0x22c   :  { %5348 = vmatprep.subr.bf16.mxu0 %v17461_v21  ;;  %5440 = vmatprep.subr.bf16.mxu1 %v17422_v27 }
 0x22e   :  { %15654 = vmatmul.mubr.msk.bf16.gmra.mrb[136].mxu1 %vm4208_vm0, %v19981_v22  ;;  %v17471_v22 = vld [vmem:[%s23461_s6 + $0x208] ss:$20 sps:$4 sm:$0xff]  }
 0x22f   :  { %5349 = vmatpush1.bf16.msra.mxu0 %v17459_v50  ;;  %5441 = vmatpush1.bf16.msra.mxu1 %v17420_v11 }
 0x230   :  { %5350 = vmatprep.subr.bf16.mxu0 %v17467_v49  ;;  %15657 = vmatprep.mubr.msk.bf16.mxu1 %vm4208_vm0, %v20003_v35  ;;  %v17440_v35 = vld [vmem:[%s23461_s6 + $0x124] ss:$20 sps:$4 sm:$0xff]  }
 0x231   :  { %5442 = vmatprep.subr.bf16.mxu1 %v17428_v30 }
 0x233   :  { %5351 = vmatpush1.bf16.msra.mxu0 %v17465_v31  ;;  %5443 = vmatpush1.bf16.msra.mxu1 %v17426_v32 }
 0x234   :  { %5352 = vmatprep.subr.bf16.mxu0 %v17473_v24  ;;  %5444 = vmatprep.subr.bf16.mxu1 %v17434_v39 }
 0x236   :  { %15658 = vmatmul.mubr.msk.bf16.gmra.mrb[140].mxu1 %vm4208_vm0, %v20030_v37  ;;  %v17452_v37 = vld [vmem:[%s23461_s6 + $0x174] ss:$20 sps:$4 sm:$0xff]  }
 0x237   :  { %5353 = vmatpush1.bf16.msra.mxu0 %v17471_v22  ;;  %5445 = vmatpush1.bf16.msra.mxu1 %v17432_v40 }
 0x238   :  { %5446 = vmatprep.subr.bf16.mxu1 %v17440_v35  ;;  %5354 = vmatprep.subr.bf16.mxu0 %v17479_v14 }
 0x23b   :  { %5447 = vmatpush1.bf16.msra.mxu1 %v17438_v9  ;;  %5355 = vmatpush1.bf16.msra.mxu0 %v17477_v4 }
 0x23c   :  { %5448 = vmatprep.subr.bf16.mxu1 %v17446_v58  ;;  %5356 = vmatprep.subr.bf16.mxu0 %v17485_v6 }
 0x23f   :  { %5449 = vmatpush1.bf16.msra.mxu1 %v17444_v45  ;;  %5357 = vmatpush1.bf16.msra.mxu0 %v17483_v25 }
 0x240   :  { %5450 = vmatprep.subr.bf16.mxu1 %v17452_v37  ;;  %5379 = vmatprep.subr.bf16.mxu0 %v17491_v43 }
 0x243   :  { %5451 = vmatpush1.bf16.msra.mxu1 %v17450_v38 }
 0x244   :  { %5452 = vmatprep.subr.bf16.mxu1 %v17458_v17 }
 0x247   :  { %5453 = vmatpush1.bf16.msra.mxu1 %v17456_v52 }
 0x248   :  { %5454 = vmatprep.subr.bf16.mxu1 %v17464_v13 }
 0x24b   :  { %5455 = vmatpush1.bf16.msra.mxu1 %v17462_v55 }
 0x24c   :  { %5456 = vmatprep.subr.bf16.mxu1 %v17470_v57 }
 0x24f   :  { %5457 = vmatpush1.bf16.msra.mxu1 %v17468_v59 }
 0x250   :  { %5458 = vmatprep.subr.bf16.mxu1 %v17476_v20 }
 0x253   :  { %5459 = vmatpush1.bf16.msra.mxu1 %v17474_v2 }
 0x254   :  { %5460 = vmatprep.subr.bf16.mxu1 %v17482_v44 }
 0x257   :  { %5461 = vmatpush1.bf16.msra.mxu1 %v17480_v41 }
 0x258   :  { %5462 = vmatprep.subr.bf16.mxu1 %v17488_v42 }
 0x25b   :  { %5463 = vmatpush1.bf16.msra.mxu1 %v17486_v36 }
 0x25c   :  { %5485 = vmatprep.subr.bf16.mxu1 %v17494_v16 }
 0x271   :  { %v4380_v1 = vpop.f32.mrb[64].mxu1 }
 0x272   :  { %v4382_v34 = vpop.f32.mrb[65].mxu1  ;;  %v16177_v18 = vadd.f32 %v4380_v1, %v20361_v54 }
 0x273   :  { %v4384_v3 = vpop.f32.mrb[66].mxu1  ;;  %v16178_v48 = vadd.f32 %v4382_v34, %v20365_v10 }
 0x274   :  { %v4386_v7 = vpop.f32.mrb[67].mxu1  ;;  %v16179_v23 = vadd.f32 %v4384_v3, %v20361_v54 }
 0x275   :  { %v16180_v5 = vadd.f32 %v4386_v7, %v20365_v10 }
 0x276   :  { %v20372_v60 = vpack.c.bf16 %v16179_v23, %v16177_v18 }
 0x277   :  { %v20374_v62 = vpack.c.bf16 %v16180_v5, %v16178_v48 }
 0x279   :  { %v4390_v51 = vpop.f32.mrb[68].mxu1  ;;  %23524 = vst [vmem:[#allocation5_spill] sm:$0xff] %v20374_v62 }
 0x27a   :  { %v16181_v53 = vadd.f32 %v4390_v51, %v20361_v54  ;;  %v4392_v19 = vpop.f32.mrb[69].mxu1 }
 0x27b   :  { %v16182_v0 = vadd.f32 %v4392_v19, %v20365_v10  ;;  %v4394_v15 = vpop.f32.mrb[70].mxu1 }
 0x27c   :  { %v16183_v26 = vadd.f32 %v4394_v15, %v20361_v54  ;;  %v4396_v33 = vpop.f32.mrb[71].mxu1 }
 0x27d   :  { %v16184_v21 = vadd.f32 %v4396_v33, %v20365_v10 }
 0x27e   :  { %v20379_v27 = vpack.c.bf16 %v16183_v26, %v16181_v53 }
 0x27f   :  { %v20382_v11 = vpack.c.bf16 %v16184_v21, %v16182_v0 }
 0x280   :  { %6253 = vrot.lane.b32.xlu1 %v20379_v27, %s18259_s5 }
 0x281   :  { %v4400_v12 = vpop.f32.mrb[72].mxu1  ;;  %23525 = vst [vmem:[#allocation6_spill] sm:$0xff] %v20382_v11 }
 0x282   :  { %v16185_v50 = vadd.f32 %v4400_v12, %v20361_v54  ;;  %v4402_v49 = vpop.f32.mrb[73].mxu1 }
 0x283   :  { %v16186_v30 = vadd.f32 %v4402_v49, %v20365_v10  ;;  %v4404_v31 = vpop.f32.mrb[74].mxu1 }
 0x284   :  { %v16187_v24 = vadd.f32 %v4404_v31, %v20361_v54  ;;  %v4406_v32 = vpop.f32.mrb[75].mxu1 }
 0x285   :  { %v16188_v39 = vadd.f32 %v4406_v32, %v20365_v10 }
 0x286   :  { %v20389_v40 = vpack.c.bf16 %v16187_v24, %v16185_v50 }
 0x287   :  { %v20392_v58 = vpack.c.bf16 %v16188_v39, %v16186_v30 }
 0x288   :  { %6255 = vrot.lane.b32.xlu1 %v20389_v40, %s18259_s5 }
 0x289   :  { %v4410_v22 = vpop.f32.mrb[76].mxu1  ;;  %23526 = vst [vmem:[#allocation7_spill] sm:$0xff] %v20392_v58 }
 0x28a   :  { %v16189_v35 = vadd.f32 %v4410_v22, %v20361_v54  ;;  %v4412_v9 = vpop.f32.mrb[77].mxu1 }
 0x28b   :  { %v16190_v45 = vadd.f32 %v4412_v9, %v20365_v10  ;;  %v4414_v37 = vpop.f32.mrb[78].mxu1 }
 0x28c   :  { %v16191_v38 = vadd.f32 %v4414_v37, %v20361_v54  ;;  %v4416_v17 = vpop.f32.mrb[79].mxu1 }
 0x28d   :  { %v16192_v52 = vadd.f32 %v4416_v17, %v20365_v10 }
 0x28e   :  { %v20399_v55 = vpack.c.bf16 %v16191_v38, %v16189_v35  ;;  %v20433_v35 = vrot.slane %v20357_v63, %v19567_v56 }
 0x28f   :  { %v20402_v20 = vpack.c.bf16 %v16192_v52, %v16190_v45 }
 0x291   :  { %v4420_v13 = vpop.f32.mrb[80].mxu1  ;;  %23527 = vst [vmem:[#allocation8_spill] sm:$0xff] %v20402_v20 }
 0x292   :  { %v16193_v57 = vadd.f32 %v4420_v13, %v20361_v54  ;;  %v4422_v59 = vpop.f32.mrb[81].mxu1 }
 0x293   :  { %v16194_v2 = vadd.f32 %v4422_v59, %v20365_v10  ;;  %v4424_v14 = vpop.f32.mrb[82].mxu1 }
 0x294   :  { %v16195_v4 = vadd.f32 %v4424_v14, %v20361_v54  ;;  %v4426_v44 = vpop.f32.mrb[83].mxu1 }
 0x295   :  { %v16196_v41 = vadd.f32 %v4426_v44, %v20365_v10 }
 0x296   :  { %v20407_v25 = vpack.c.bf16 %v16195_v4, %v16193_v57 }
 0x297   :  { %v20410_v43 = vpack.c.bf16 %v16196_v41, %v16194_v2 }
 0x299   :  { %v4430_v6 = vpop.f32.mrb[84].mxu1  ;;  %23528 = vst [vmem:[#allocation9_spill] sm:$0xff] %v20410_v43 }
 0x29a   :  { %v16197_v42 = vadd.f32 %v4430_v6, %v20361_v54  ;;  %v4432_v36 = vpop.f32.mrb[85].mxu1 }
 0x29b   :  { %v16198_v16 = vadd.f32 %v4432_v36, %v20365_v10  ;;  %v4434_v1 = vpop.f32.mrb[86].mxu1 }
 0x29c   :  { %v16199_v34 = vadd.f32 %v4434_v1, %v20361_v54  ;;  %v4436_v3 = vpop.f32.mrb[87].mxu1 }
 0x29d   :  { %v16200_v7 = vadd.f32 %v4436_v3, %v20365_v10 }
 0x29e   :  { %v20415_v48 = vpack.c.bf16 %v16199_v34, %v16197_v42 }
 0x29f   :  { %v20418_v51 = vpack.c.bf16 %v16200_v7, %v16198_v16 }
 0x2a1   :  { %v4440_v18 = vpop.f32.mrb[88].mxu1  ;;  %23529 = vst [vmem:[#allocation10_spill] sm:$0xff] %v20418_v51 }
 0x2a2   :  { %v16201_v23 = vadd.f32 %v4440_v18, %v20361_v54  ;;  %v4442_v5 = vpop.f32.mrb[89].mxu1 }
 0x2a3   :  { %v16202_v53 = vadd.f32 %v4442_v5, %v20365_v10  ;;  %v4444_v19 = vpop.f32.mrb[90].mxu1 }
 0x2a4   :  { %v16203_v0 = vadd.f32 %v4444_v19, %v20361_v54  ;;  %v4446_v15 = vpop.f32.mrb[91].mxu1 }
 0x2a5   :  { %v16204_v26 = vadd.f32 %v4446_v15, %v20365_v10 }
 0x2a6   :  { %v20423_v21 = vpack.c.bf16 %v16203_v0, %v16201_v23 }
 0x2a7   :  { %v20426_v49 = vpack.c.bf16 %v16204_v26, %v16202_v53 }
 0x2a9   :  { %v4450_v33 = vpop.f32.mrb[92].mxu1  ;;  %23530 = vst [vmem:[#allocation11_spill] sm:$0xff] %v20426_v49 }
 0x2aa   :  { %v16205_v12 = vadd.f32 %v4450_v33, %v20361_v54  ;;  %v4452_v50 = vpop.f32.mrb[93].mxu1 }
 0x2ab   :  { %v16206_v30 = vadd.f32 %v4452_v50, %v20365_v10  ;;  %v4454_v31 = vpop.f32.mrb[94].mxu1 }
 0x2ac   :  { %v16207_v24 = vadd.f32 %v4454_v31, %v20361_v54  ;;  %v4456_v32 = vpop.f32.mrb[95].mxu1 }
 0x2ad   :  { %v16208_v39 = vadd.f32 %v4456_v32, %v20365_v10 }
 0x2ae   :  { %v20435_v9 = vpack.c.bf16 %v16207_v24, %v16205_v12  ;;  %v18257_v12 = vld [vmem:[%s23459_s3] sm:$0x7] }
 0x2af   :  { %v20437_v37 = vpack.c.bf16 %v16208_v39, %v16206_v30  ;;  %v629_v50 = vrot.slane %v18257_v12, %v20349_v28  ;;  %v633_v24 = vrot.slane %v18257_v12, %v20352_v29  ;;  %v17495_v12 = vld [vmem:[%s23461_s6 + $0x2a8] ss:$20 sps:$4 sm:$0xff]  }
 0x2b0   :  { %23531 = vst [vmem:[#allocation12_spill] sm:$0xff] %v20435_v9 }
 0x2b1   :  { %v15231_v22 = vpop.f32.mrb[96].mxu1  ;;  %23532 = vst [vmem:[#allocation13_spill] sm:$0xff] %v20437_v37 }
 0x2b2   :  { %v15232_v45 = vpop.f32.mrb[97].mxu1 }
 0x2b3   :  { %v15233_v38 = vadd.f32 %v15232_v45, %v15231_v22  ;;  %v15234_v17 = vpop.f32.mrb[98].mxu1 }
 0x2b4   :  { %v15235_v52 = vpop.f32.mrb[99].mxu1 }
 0x2b5   :  { %v15236_v13 = vadd.f32 %v15235_v52, %v15234_v17  ;;  %v20440_v57 = vadd.f32 %v15233_v38, %v20433_v35 }
 0x2b7   :  { %v20443_v10 = vadd.f32 %v15236_v13, %v20433_v35 }
 0x2b9   :  { %v15237_v54 = vpop.f32.mrb[100].mxu1 }
 0x2ba   :  { %v15238_v59 = vpop.f32.mrb[101].mxu1 }
 0x2bb   :  { %v15239_v2 = vadd.f32 %v15238_v59, %v15237_v54  ;;  %v15240_v63 = vpop.f32.mrb[102].mxu1 }
 0x2bc   :  { %v15241_v14 = vpop.f32.mrb[103].mxu1 }
 0x2bd   :  { %v15242_v4 = vadd.f32 %v15241_v14, %v15240_v63  ;;  %v20446_v44 = vadd.f32 %v15239_v2, %v20433_v35 }
 0x2bf   :  { %v20449_v41 = vadd.f32 %v15242_v4, %v20433_v35 }
 0x2c1   :  { %v15243_v6 = vpop.f32.mrb[104].mxu1 }
 0x2c2   :  { %v15244_v42 = vpop.f32.mrb[105].mxu1 }
 0x2c3   :  { %v15245_v36 = vadd.f32 %v15244_v42, %v15243_v6  ;;  %v15246_v16 = vpop.f32.mrb[106].mxu1  ;;  %v17489_v42 = vld [vmem:[%s23461_s6 + $0x280] ss:$20 sps:$4 sm:$0xff]  }
 0x2c4   :  { %v15247_v1 = vpop.f32.mrb[107].mxu1 }
 0x2c5   :  { %v15248_v34 = vadd.f32 %v15247_v1, %v15246_v16  ;;  %v20452_v3 = vadd.f32 %v15245_v36, %v20433_v35  ;;  %v17492_v36 = vld [vmem:[%s23461_s6 + $0x288] ss:$20 sps:$4 sm:$0xff]   ;;  %v17497_v1 = vld [vmem:[%s23461_s6 + $0x2ac] ss:$20 sps:$4 sm:$0xff]  }
 0x2c7   :  { %v20455_v7 = vadd.f32 %v15248_v34, %v20433_v35  ;;  %v17500_v34 = vld [vmem:[%s23461_s6 + $0x2b4] ss:$20 sps:$4 sm:$0xff]  }
 0x2c9   :  { %v15249_v18 = vpop.f32.mrb[108].mxu1 }
 0x2ca   :  { %v15250_v23 = vpop.f32.mrb[109].mxu1 }
 0x2cb   :  { %v15251_v5 = vadd.f32 %v15250_v23, %v15249_v18  ;;  %v15252_v53 = vpop.f32.mrb[110].mxu1 }
 0x2cc   :  { %v15253_v19 = vpop.f32.mrb[111].mxu1 }
 0x2cd   :  { %v15254_v0 = vadd.f32 %v15253_v19, %v15252_v53  ;;  %v20458_v15 = vadd.f32 %v15251_v5, %v20433_v35 }
 0x2cf   :  { %v20461_v26 = vadd.f32 %v15254_v0, %v20433_v35 }
 0x2d1   :  { %v15255_v33 = vpop.f32.mrb[112].mxu1 }
 0x2d2   :  { %v15256_v30 = vpop.f32.mrb[113].mxu1 }
 0x2d3   :  { %v15257_v32 = vadd.f32 %v15256_v30, %v15255_v33  ;;  %v15258_v39 = vpop.f32.mrb[114].mxu1  ;;  %v17498_v30 = vld [vmem:[%s23461_s6 + $0x2b0] ss:$20 sps:$4 sm:$0xff]  }
 0x2d4   :  { %v15259_v45 = vpop.f32.mrb[115].mxu1 }
 0x2d5   :  { %v3254_v31 = vpop.f32.mrb[0].mxu0  ;;  %v15260_v17 = vadd.f32 %v15259_v45, %v15258_v39  ;;  %v20469_v52 = vadd.f32 %v15257_v32, %v20433_v35 }
 0x2d6   :  { %v3256_v22 = vpop.f32.mrb[1].mxu0  ;;  %v16169_v13 = vadd.f32 %v3254_v31, %v629_v50 }
 0x2d7   :  { %v3258_v38 = vpop.f32.mrb[2].mxu0  ;;  %v16170_v2 = vadd.f32 %v3256_v22, %v633_v24  ;;  %v20472_v14 = vadd.f32 %v15260_v17, %v20433_v35  ;;  %v17506_v17 = vld [vmem:[%s23461_s6 + $0x2dc] ss:$20 sps:$4 sm:$0xff]  }
 0x2d8   :  { %v16171_v54 = vadd.f32 %v3258_v38, %v629_v50  ;;  %v3260_v59 = vpop.f32.mrb[3].mxu0  ;;  %v17503_v38 = vld [vmem:[%s23461_s6 + $0x2d4] ss:$20 sps:$4 sm:$0xff]  }
 0x2d9   :  { %v16172_v63 = vadd.f32 %v3260_v59, %v633_v24  ;;  %v15261_v16 = vpop.f32.mrb[116].mxu1 }
 0x2da   :  { %v20474_v4 = vpack.c.bf16 %v16171_v54, %v16169_v13  ;;  %v15262_v18 = vpop.f32.mrb[117].mxu1 }
 0x2db   :  { %v20476_v6 = vpack.c.bf16 %v16172_v63, %v16170_v2  ;;  %v15263_v5 = vadd.f32 %v15262_v18, %v15261_v16  ;;  %v15264_v53 = vpop.f32.mrb[118].mxu1  ;;  %v17512_v16 = vld [vmem:[%s23461_s6 + $0x304] ss:$20 sps:$4 sm:$0xff]  }
 0x2dc   :  { %v15265_v0 = vpop.f32.mrb[119].mxu1 }
 0x2dd   :  { %v3264_v23 = vpop.f32.mrb[4].mxu0  ;;  %5358 = vmatprep.mubr.bf16.mxu0 %v20476_v6  ;;  %5464 = vmatprep.mubr.bf16.mxu1 %v20476_v6  ;;  %v15266_v31 = vadd.f32 %v15265_v0, %v15264_v53  ;;  %v20501_v32 = vadd.f32 %v15263_v5, %v20433_v35  ;;  %v17507_v5 = vld [vmem:[%s23461_s6 + $0x2f8] ss:$20 sps:$4 sm:$0xff]   ;;  %v17510_v53 = vld [vmem:[%s23461_s6 + $0x300] ss:$20 sps:$4 sm:$0xff]  }
 0x2de   :  { %v3266_v19 = vpop.f32.mrb[5].mxu0  ;;  %5359 = vmatmul.mubr.bf16.vlgmr.msra.gmra.mrb[8].mxu0 %v20474_v4  ;;  %5465 = vmatmul.mubr.bf16.vlgmr.msra.gmra.mrb[144].mxu1 %v20474_v4  ;;  %v16173_v39 = vadd.f32 %v3264_v23, %v629_v50 }
 0x2df   :  { %5380 = vmatpush1.bf16.msra.mxu0 %v17489_v42  ;;  %v3268_v33 = vpop.f32.mrb[6].mxu0  ;;  %5486 = vmatpush1.bf16.msra.mxu1 %v17492_v36  ;;  %v16174_v13 = vadd.f32 %v3266_v19, %v633_v24  ;;  %v20510_v59 = vadd.f32 %v15266_v31, %v20433_v35  ;;  %v17504_v42 = vld [vmem:[%s23461_s6 + $0x2d8] ss:$20 sps:$4 sm:$0xff]   ;;  %v17514_v31 = vld [vmem:[%s23461_s6 + $0x10] ss:$20 sps:$4 sm:$0xff]  }
 0x2e0   :  { %v16175_v22 = vadd.f32 %v3268_v33, %v629_v50  ;;  %v3270_v45 = vpop.f32.mrb[7].mxu0  ;;  %5381 = vmatprep.subr.bf16.mxu0 %v17497_v1  ;;  %5487 = vmatprep.subr.bf16.mxu1 %v17500_v34  ;;  %v17501_v50 = vld [vmem:[%s23461_s6 + $0x2d0] ss:$20 sps:$4 sm:$0xff]  }
 0x2e1   :  { %v16176_v54 = vadd.f32 %v3270_v45, %v633_v24  ;;  %v15267_v36 = vpop.f32.mrb[120].mxu1  ;;  %v17509_v24 = vld [vmem:[%s23461_s6 + $0x2fc] ss:$20 sps:$4 sm:$0xff]   ;;  %v17518_v45 = vld [vmem:[%s23461_s6 + $0x2b8] ss:$20 sps:$4 sm:$0xff]  }
 0x2e2   :  { %v20512_v2 = vpack.c.bf16 %v16175_v22, %v16173_v39  ;;  %v15268_v1 = vpop.f32.mrb[121].mxu1  ;;  %v17513_v33 = vld [vmem:[%s23461_s6 + $0x150] ss:$20 sps:$4 sm:$0xff]   ;;  %v17516_v22 = vld [vmem:[%s23461_s6 + $0x178] ss:$20 sps:$4 sm:$0xff]  }
 0x2e3   :  { %v20514_v63 = vpack.c.bf16 %v16176_v54, %v16174_v13  ;;  %5382 = vmatpush1.bf16.msra.mxu0 %v17495_v12  ;;  %5488 = vmatpush1.bf16.msra.mxu1 %v17498_v30  ;;  %v15269_v34 = vadd.f32 %v15268_v1, %v15267_v36  ;;  %v15270_v18 = vpop.f32.mrb[122].mxu1  ;;  %v17515_v12 = vld [vmem:[%s23461_s6 + $0x290] ss:$20 sps:$4 sm:$0xff]  }
 0x2e4   :  { %5383 = vmatprep.subr.bf16.mxu0 %v17503_v38  ;;  %5489 = vmatprep.subr.bf16.mxu1 %v17506_v17  ;;  %v15271_v23 = vpop.f32.mrb[123].mxu1 }
 0x2e5   :  { %5368 = vmatprep.mubr.bf16.mxu0 %v20514_v63  ;;  %5474 = vmatprep.mubr.bf16.mxu1 %v20514_v63  ;;  %v15272_v19 = vadd.f32 %v15271_v23, %v15270_v18  ;;  %v20539_v0 = vadd.f32 %v15269_v34, %v20433_v35  ;;  %v17520_v34 = vld [vmem:[%s23461_s6 + $0x60] ss:$20 sps:$4 sm:$0xff]  }
 0x2e6   :  { %5369 = vmatmul.mubr.bf16.gmra.mrb[12].mxu0 %v20512_v2  ;;  %5475 = vmatmul.mubr.bf16.gmra.mrb[148].mxu1 %v20512_v2 }
 0x2e7   :  { %5384 = vmatpush1.bf16.msra.mxu0 %v17501_v50  ;;  %5490 = vmatpush1.bf16.msra.mxu1 %v17504_v42  ;;  %v20550_v30 = vadd.f32 %v15272_v19, %v20433_v35  ;;  %v17517_v50 = vld [vmem:[%s23461_s6 + $0x38] ss:$20 sps:$4 sm:$0xff]  }
 0x2e8   :  { %5385 = vmatprep.subr.bf16.mxu0 %v17509_v24  ;;  %5491 = vmatprep.subr.bf16.mxu1 %v17512_v16  ;;  %v17519_v24 = vld [vmem:[%s23461_s6 + $0x1a0] ss:$20 sps:$4 sm:$0xff]  }
 0x2e9   :  { %5411 = vmatprep.mubr.bf16.mxu0 %v23471_v46  ;;  %5517 = vmatprep.mubr.bf16.mxu1 %v23471_v46  ;;  %v15273_v39 = vpop.f32.mrb[124].mxu1  ;;  %v17521_v16 = vld [vmem:[%s23461_s6 + $0x2e0] ss:$20 sps:$4 sm:$0xff]  }
 0x2ea   :  { %v15274_v38 = vpop.f32.mrb[125].mxu1 }
 0x2eb   :  { %5386 = vmatpush1.bf16.msra.mxu0 %v17507_v5  ;;  %5492 = vmatpush1.bf16.msra.mxu1 %v17510_v53  ;;  %v15275_v17 = vadd.f32 %v15274_v38, %v15273_v39  ;;  %v15276_v13 = vpop.f32.mrb[126].mxu1  ;;  %v17522_v53 = vld [vmem:[%s23461_s6 + $0x1c8] ss:$20 sps:$4 sm:$0xff]  }
 0x2ec   :  { %15291 = vmatprep.subr.bf16.mxu0 %v17513_v33  ;;  %15661 = vmatprep.subr.bf16.mxu1 %v17515_v12  ;;  %v15277_v54 = vpop.f32.mrb[127].mxu1 }
 0x2ed   :  { %v15278_v42 = vadd.f32 %v15277_v54, %v15276_v13  ;;  %v20569_v36 = vadd.f32 %v15275_v17, %v20433_v35 }
 0x2ee   :  { %14553 = vmatmul.mubr.msk.bf16.vlgmr.msra.gmra.mrb[8].mxu0 %vm4208_vm0, %v20107_v61  ;;  %14555 = vmatmul.mubr.msk.bf16.vlgmr.msra.gmra.mrb[144].mxu1 %vm4208_vm0, %v20107_v61 }
 0x2ef   :  { %15292 = vmatpush3.bf16.msra.mxu0 %v17514_v31  ;;  %15662 = vmatpush3.bf16.msra.mxu1 %v17515_v12  ;;  %v20580_v1 = vadd.f32 %v15278_v42, %v20433_v35  ;;  %v17524_v35 = vld [vmem:[%s23461_s6 + $0x308] ss:$20 sps:$4 sm:$0xff]   ;;  %v17528_v42 = vld [vmem:[%s23461_s6 + $0xd8] ss:$20 sps:$4 sm:$0xff]  }
 0x2f0   :  { %15293 = vmatprep.subr.bf16.mxu0 %v17516_v22  ;;  %15663 = vmatprep.subr.bf16.mxu1 %v17518_v45  ;;  %v17523_v31 = vld [vmem:[%s23461_s6 + $0x88] ss:$20 sps:$4 sm:$0xff]  }
 0x2f1   :  { %5421 = vmatprep.mubr.bf16.mxu0 %v23471_v46  ;;  %5527 = vmatprep.mubr.bf16.mxu1 %v23471_v46  ;;  %v15647_v18 = vpop.f32.mrb[128].mxu1 }
 0x2f2   :  { %v4599_v23 = vadd.f32 %v15647_v18, %v20446_v44  ;;  %v4590_v5 = vpop.f32.mrb[129].mxu1 }
 0x2f3   :  { %15294 = vmatpush3.bf16.msra.mxu0 %v17517_v50  ;;  %15664 = vmatpush3.bf16.msra.mxu1 %v17518_v45  ;;  %v4591_v19 = vadd.f32 %v4590_v5, %v20440_v57  ;;  %v15648_v33 = vpop.f32.mrb[130].mxu1  ;;  %v17525_v57 = vld [vmem:[%s23461_s6 + $0x1f0] ss:$20 sps:$4 sm:$0xff]  }
 0x2f4   :  { %15295 = vmatprep.subr.bf16.mxu0 %v17519_v24  ;;  %15665 = vmatprep.subr.bf16.mxu1 %v17521_v16  ;;  %v4602_v44 = vadd.f32 %v15648_v33, %v20449_v41  ;;  %v4593_v12 = vpop.f32.mrb[131].mxu1 }
 0x2f5   :  { %v4594_v39 = vadd.f32 %v4593_v12, %v20443_v10 }
 0x2f6   :  { %14554 = vmatmul.mubr.msk.bf16.gmra.mrb[12].mxu0 %vm4208_vm0, %v20125_v8  ;;  %14556 = vmatmul.mubr.msk.bf16.gmra.mrb[148].mxu1 %vm4208_vm0, %v20125_v8  ;;  %v20608_v22 = vpack.c.bf16 %v4602_v44, %v4599_v23 }
 0x2f7   :  { %15296 = vmatpush3.bf16.msra.mxu0 %v17520_v34  ;;  %5570 = vmatprep.mubr.bf16.mxu0 %v20476_v6  ;;  %v20610_v41 = vpack.c.bf16 %v4594_v39, %v4591_v19  ;;  %v17526_v6 = vld [vmem:[%s23461_s6 + $0xb0] ss:$20 sps:$4 sm:$0xff]   ;;  %v17532_v19 = vld [vmem:[%s23461_s6 + $0x128] ss:$20 sps:$4 sm:$0xff]  }
 0x2f8   :  { %15666 = vmatpush3.bf16.msra.mxu1 %v17521_v16  ;;  %15669 = vmatprep.mubr.msk.bf16.mxu1 %vm4208_vm0, %v20107_v61  ;;  %23533 = vst [vmem:[#allocation14_spill] sm:$0xff] %v20608_v22  ;;  %v17527_v61 = vld [vmem:[%s23461_s6 + $0x218] ss:$20 sps:$4 sm:$0xff]  }
 0x2f9   :  { %15297 = vmatprep.subr.bf16.mxu0 %v17522_v53  ;;  %15667 = vmatprep.subr.bf16.mxu1 %v17524_v35  ;;  %23534 = vst [vmem:[#allocation15_spill] sm:$0xff] %v20610_v41  ;;  %v15651_v10 = vpop.f32.mrb[132].mxu1 }
 0x2fa   :  { %v4615_v45 = vadd.f32 %v15651_v10, %v20458_v15  ;;  %v4606_v38 = vpop.f32.mrb[133].mxu1  ;;  %v17529_v15 = vld [vmem:[%s23461_s6 + $0x240] ss:$20 sps:$4 sm:$0xff]  }
 0x2fb   :  { %15298 = vmatpush3.bf16.msra.mxu0 %v17523_v31  ;;  %v4607_v17 = vadd.f32 %v4606_v38, %v20452_v3  ;;  %v15652_v13 = vpop.f32.mrb[134].mxu1 }
 0x2fc   :  { %15668 = vmatpush3.bf16.msra.mxu1 %v17524_v35  ;;  %15299 = vmatprep.subr.bf16.mxu0 %v17525_v57  ;;  %v4618_v54 = vadd.f32 %v15652_v13, %v20461_v26  ;;  %v4609_v50 = vpop.f32.mrb[135].mxu1 }
 0x2fd   :  { %v4610_v24 = vadd.f32 %v4609_v50, %v20455_v7  ;;  %v17531_v7 = vld [vmem:[%s23461_s6 + $0x268] ss:$20 sps:$4 sm:$0xff]  }
 0x2fe   :  { %v20632_v3 = vpack.c.bf16 %v4618_v54, %v4615_v45 }
 0x2ff   :  { %15300 = vmatpush3.bf16.msra.mxu0 %v17526_v6  ;;  %15670 = vmatmul.mubr.msk.bf16.vlgmr.msra.gmra.mrb[152].mxu1 %vm4208_vm0, %v20125_v8  ;;  %v20634_v26 = vpack.c.bf16 %v4610_v24, %v4607_v17  ;;  %v17530_v8 = vld [vmem:[%s23461_s6 + $0x100] ss:$20 sps:$4 sm:$0xff]   ;;  %s18264_s6 = smov 8  }
 0x300   :  { %15301 = vmatprep.subr.bf16.mxu0 %v17527_v61  ;;  %15675 = vmatprep.mubr.msk.bf16.mxu1 %vm5729_vm1, %v20372_v60  ;;  %23535 = vst [vmem:[#allocation16_spill] sm:$0xff] %v20632_v3 }
 0x301   :  { %23536 = vst [vmem:[#allocation17_spill] sm:$0xff] %v20634_v26  ;;  %v15655_v16 = vpop.f32.mrb[136].mxu1 }
 0x302   :  { %v4631_v34 = vadd.f32 %v15655_v16, %v20501_v32  ;;  %v4622_v18 = vpop.f32.mrb[137].mxu1 }
 0x303   :  { %15302 = vmatpush3.bf16.msra.mxu0 %v17528_v42  ;;  %v4623_v23 = vadd.f32 %v4622_v18, %v20469_v52  ;;  %v15656_v5 = vpop.f32.mrb[138].mxu1 }
 0x304   :  { %15303 = vmatprep.subr.bf16.mxu0 %v17529_v15  ;;  %v4634_v53 = vadd.f32 %v15656_v5, %v20510_v59  ;;  %v4625_v35 = vpop.f32.mrb[139].mxu1 }
 0x305   :  { %v4626_v33 = vadd.f32 %v4625_v35, %v20472_v14 }
 0x306   :  { %v20649_v44 = vpack.c.bf16 %v4634_v53, %v4631_v34 }
 0x307   :  { %15304 = vmatpush3.bf16.msra.mxu0 %v17530_v8  ;;  %v20651_v12 = vpack.c.bf16 %v4626_v33, %v4623_v23 }
 0x308   :  { %15305 = vmatprep.subr.bf16.mxu0 %v17531_v7  ;;  %23537 = vst [vmem:[#allocation18_spill] sm:$0xff] %v20649_v44 }
 0x309   :  { %23538 = vst [vmem:[#allocation19_spill] sm:$0xff] %v20651_v12  ;;  %v15659_v32 = vpop.f32.mrb[140].mxu1 }
 0x30a   :  { %v4647_v52 = vadd.f32 %v15659_v32, %v20569_v36  ;;  %v4638_v31 = vpop.f32.mrb[141].mxu1 }
 0x30b   :  { %15306 = vmatpush3.bf16.msra.mxu0 %v17532_v19  ;;  %v4639_v59 = vadd.f32 %v4638_v31, %v20539_v0  ;;  %v15660_v39 = vpop.f32.mrb[142].mxu1  ;;  %v4789_v0 = vsub.s32 3, %v19549_v47 }
 0x30c   :  { %v4650_v57 = vadd.f32 %v15660_v39, %v20580_v1  ;;  %v4641_v6 = vpop.f32.mrb[143].mxu1 }
 0x30d   :  { %v4642_v14 = vadd.f32 %v4641_v6, %v20550_v30 }
 0x30e   :  { %5571 = vmatmul.mubr.bf16.vlgmr.msra.gmra.mrb[16].mxu0 %v20474_v4  ;;  %v20659_v10 = vpack.c.bf16 %v4650_v57, %v4647_v52  ;;  %v20669_v4 = vld [vmem:[%s23463_s7] sm:$0x1f]  ;;  %s18260_s7 = smov 64  }
 0x30f   :  { %5578 = vmatprep.mubr.bf16.mxu0 %v20514_v63  ;;  %v20661_v61 = vpack.c.bf16 %v4642_v14, %v4639_v59  ;;  %v4778_v63 = vrot.slane %v20669_v4, %v20349_v28  ;;  %v4786_v30 = vrot.slane %v20669_v4, %v19567_v56  ;;  %v4790_v45 = vrot.slane %v20669_v4, %v4789_v0 }
 0x310   :  { %23539 = vst [vmem:[#allocation20_spill] sm:$0xff] %v20659_v10 }
 0x311   :  { %23540 = vst [vmem:[#allocation21_spill] sm:$0xff] %v20661_v61 }
 0x316   :  { %5579 = vmatmul.mubr.bf16.gmra.mrb[20].mxu0 %v20512_v2  ;;  %v4782_v2 = vrot.slane %v20669_v4, %v20352_v29 }
 0x317   :  { %15695 = vmatprep.mubr.msk.bf16.mxu0 %vm5729_vm1, %v20407_v25 }
 0x3c1   :  { %v5413_v36 = vpop.f32.mrb[8].mxu0  ;;  %v5519_v1 = vpop.f32.mrb[144].mxu1 }
 0x3c2   :  { %v5415_v38 = vpop.f32.mrb[9].mxu0  ;;  %v5521_v17 = vpop.f32.mrb[145].mxu1  ;;  %v16209_v50 = vadd.f32 %v5413_v36, %v4778_v63  ;;  %v16217_v42 = vadd.f32 %v5519_v1, %v4786_v30 }
 0x3c3   :  { %v5417_v13 = vpop.f32.mrb[10].mxu0  ;;  %v5523_v54 = vpop.f32.mrb[146].mxu1  ;;  %v16210_v7 = vadd.f32 %v5415_v38, %v4782_v2  ;;  %v16218_v34 = vadd.f32 %v5521_v17, %v4790_v45 }
 0x3c4   :  { %v16211_v24 = vadd.f32 %v5417_v13, %v4778_v63  ;;  %v16219_v15 = vadd.f32 %v5523_v54, %v4786_v30  ;;  %v5419_v8 = vpop.f32.mrb[11].mxu0  ;;  %v5525_v16 = vpop.f32.mrb[147].mxu1 }
 0x3c5   :  { %v16212_v18 = vadd.f32 %v5419_v8, %v4782_v2  ;;  %v16220_v23 = vadd.f32 %v5525_v16, %v4790_v45 }
 0x3c6   :  { %v20679_v5 = vpack.c.bf16 %v16211_v24, %v16209_v50  ;;  %v20681_v53 = vpack.c.bf16 %v16219_v15, %v16217_v42 }
 0x3c7   :  { %v20683_v35 = vpack.c.bf16 %v16212_v18, %v16210_v7  ;;  %v20685_v19 = vpack.c.bf16 %v16220_v23, %v16218_v34  ;;  %v4793_v7 = vsub.s32 4, %v19549_v47 }
 0x3c8   :  { %23541 = vst [vmem:[#allocation22_spill] sm:$0xff] %v20681_v53  ;;  %6260 = vrot.lane.b32.xlu0 %v20679_v5, %s18259_s5  ;;  %16729 = vmatprep.subr.msk.bf16.mxu1 %vm5729_vm1, %v20679_v5  ;;  %v5743_v33 = vsel %vm5729_vm1, %v20679_v5, 0 }
 0x3c9   :  { %23542 = vst [vmem:[#allocation23_spill] sm:$0xff] %v20683_v35  ;;  %v5423_v32 = vpop.f32.mrb[12].mxu0  ;;  %v5529_v52 = vpop.f32.mrb[148].mxu1  ;;  %15674 = vmatpush3.bf16.xpose.msra.mxu1 %v5743_v33  ;;  %v4794_v18 = vrot.slane %v20669_v4, %v4793_v7 }
 0x3ca   :  { %v5425_v31 = vpop.f32.mrb[13].mxu0  ;;  %v5531_v59 = vpop.f32.mrb[149].mxu1  ;;  %v16213_v14 = vadd.f32 %v5423_v32, %v4778_v63  ;;  %v16221_v0 = vadd.f32 %v5529_v52, %v4786_v30 }
 0x3cb   :  { %v16222_v39 = vadd.f32 %v5531_v59, %v4790_v45  ;;  %v5427_v57 = vpop.f32.mrb[14].mxu0  ;;  %v5533_v6 = vpop.f32.mrb[150].mxu1  ;;  %v16214_v13 = vadd.f32 %v5425_v31, %v4782_v2 }
 0x3cc   :  { %v16215_v36 = vadd.f32 %v5427_v57, %v4778_v63  ;;  %v16223_v1 = vadd.f32 %v5533_v6, %v4786_v30  ;;  %v5429_v38 = vpop.f32.mrb[15].mxu0  ;;  %v5535_v17 = vpop.f32.mrb[151].mxu1  ;;  %6251 = vrot.lane.b32.xlu0 %v20372_v60, %s18259_s5 }
 0x3cd   :  { %v16216_v54 = vadd.f32 %v5429_v38, %v4782_v2  ;;  %v16224_v50 = vadd.f32 %v5535_v17, %v4790_v45  ;;  %v6254_v7 = vpop.permute.xlu1 %6253 }
 0x3ce   :  { %v20695_v42 = vpack.c.bf16 %v16215_v36, %v16213_v14  ;;  %v20697_v24 = vpack.c.bf16 %v16223_v1, %v16221_v0 }
 0x3cf   :  { %v20699_v15 = vpack.c.bf16 %v16216_v54, %v16214_v13  ;;  %v20701_v8 = vpack.c.bf16 %v16224_v50, %v16222_v39 }
 0x3d0   :  { %16730 = vmatprep.subr.msk.bf16.mxu0 %vm5729_vm1, %v20695_v42  ;;  %6532 = vrot.lane.b32.xlu1 %v20695_v42, %s18259_s5  ;;  %v5997_v63 = vsel %vm5729_vm1, %v20695_v42, 0 }
 0x3d1   :  { %23543 = vst [vmem:[#allocation24_spill] sm:$0xff] %v20699_v15  ;;  %6257 = vrot.lane.b32.xlu0 %v20399_v55, %s18259_s5  ;;  %15676 = vmatmul.mubr.msk.bf16.vlgmr.msra.gmra.mrb[156].mxu1 %vm5729_vm1, %v20379_v27 }
 0x3d2   :  { %v15671_v30 = vpop.f32.mrb[152].mxu1  ;;  %15679 = vmatprep.mubr.msk.bf16.mxu1 %vm5729_vm1, %v20389_v40  ;;  %15694 = vmatpush3.bf16.xpose.msra.mxu0 %v5997_v63 }
 0x3d3   :  { %v5621_v2 = vpop.f32.mrb[153].mxu1 }
 0x3d4   :  { %v15672_v45 = vpop.f32.mrb[154].mxu1  ;;  %6525 = vrot.lane.b32.xlu1 %v20415_v48, %s18259_s5 }
 0x3d5   :  { %v5624_v16 = vpop.f32.mrb[155].mxu1  ;;  %6523 = vrot.lane.b32.xlu0 %v20407_v25, %s18259_s5 }
 0x3d8   :  { %6529 = vrot.lane.b32.xlu1 %v20435_v9, %s18259_s5 }
 0x3d9   :  { %15696 = vmatmul.mubr.msk.bf16.vlgmr.msra.gmra.mrb[24].mxu0 %vm5729_vm1, %v20415_v48  ;;  %6527 = vrot.lane.b32.xlu0 %v20423_v21, %s18259_s5  ;;  %s18261_s5 = smov 24  }
 0x3da   :  { %15680 = vmatmul.mubr.msk.bf16.gmra.mrb[160].mxu1 %vm5729_vm1, %v20399_v55  ;;  %15699 = vmatprep.mubr.msk.bf16.mxu0 %vm5729_vm1, %v20423_v21 }
 0x3dc   :  { %5904 = vrot.lane.b32.xlu1 %v20681_v53, %s18260_s7 }
 0x3dd   :  { %6157 = vrot.lane.b32.xlu0 %v20697_v24, %s18260_s7 }
 0x3e1   :  { %v15307_v34 = vpop.f32.mrb[16].mxu0  ;;  %15700 = vmatmul.mubr.msk.bf16.gmra.mrb[28].mxu0 %vm5729_vm1, %v20435_v9 }
 0x3e2   :  { %v15308_v23 = vpop.f32.mrb[17].mxu0 }
 0x3e3   :  { %v15309_v33 = vadd.f32 %v15308_v23, %v15307_v34  ;;  %v15310_v32 = vpop.f32.mrb[18].mxu0 }
 0x3e4   :  { %v15311_v52 = vpop.f32.mrb[19].mxu0 }
 0x3e5   :  { %v5573_v31 = vadd.f32 %v15309_v33, %v4794_v18  ;;  %v15312_v59 = vadd.f32 %v15311_v52, %v15310_v32 }
 0x3e7   :  { %v5622_v39 = vadd.f32 %v5621_v2, %v5573_v31  ;;  %v5576_v57 = vadd.f32 %v15312_v59, %v4794_v18 }
 0x3e9   :  { %v5625_v6 = vadd.f32 %v5624_v16, %v5576_v57  ;;  %v15313_v14 = vpop.f32.mrb[20].mxu0  ;;  %v6256_v16 = vpop.permute.xlu1 %6255 }
 0x3ea   :  { %v15314_v0 = vpop.f32.mrb[21].mxu0 }
 0x3eb   :  { %v20735_v36 = vpack.c.bf16 %v5625_v6, %v5622_v39  ;;  %v15315_v47 = vadd.f32 %v15314_v0, %v15313_v14  ;;  %v15316_v1 = vpop.f32.mrb[22].mxu0 }
 0x3ec   :  { %v15317_v38 = vpop.f32.mrb[23].mxu0 }
 0x3ed   :  { %23544 = vst [vmem:[#allocation25_spill] sm:$0xff] %v20735_v36  ;;  %v5581_v17 = vadd.f32 %v15315_v47, %v4794_v18  ;;  %v15318_v13 = vadd.f32 %v15317_v38, %v15316_v1 }
 0x3ef   :  { %v5630_v54 = vadd.f32 %v15671_v30, %v5581_v17  ;;  %v5584_v4 = vadd.f32 %v15318_v13, %v4794_v18 }
 0x3f1   :  { %v5633_v50 = vadd.f32 %v15672_v45, %v5584_v4 }
 0x3f3   :  { %v20737_v63 = vpack.c.bf16 %v5633_v50, %v5630_v54 }
 0x3f5   :  { %23545 = vst [vmem:[#allocation26_spill] sm:$0xff] %v20737_v63 }
 0x43a   :  { %v6261_v34 = vpop.permute.xlu0 %6260 }
 0x43b   :  { %16731 = vmatprep.subr.msk.bf16.mxu0 %vm5729_vm1, %v6261_v34  ;;  %v6275_v2 = vsel %vm5729_vm1, %v6261_v34, 0 }
 0x43c   :  { %15714 = vmatpush3.bf16.xpose.msra.mxu0 %v6275_v2 }
 0x43e   :  { %v6252_v23 = vpop.permute.xlu0 %6251 }
 0x43f   :  { %15715 = vmatprep.mubr.msk.bf16.mxu0 %vm5729_vm1, %v6252_v23 }
 0x442   :  { %v6533_v33 = vpop.permute.xlu1 %6532 }
 0x443   :  { %v6258_v32 = vpop.permute.xlu0 %6257  ;;  %15716 = vmatmul.mubr.msk.bf16.vlgmr.msra.gmra.mrb[32].mxu0 %vm5729_vm1, %v6254_v7  ;;  %16732 = vmatprep.subr.msk.bf16.mxu0 %vm5729_vm1, %v6533_v33  ;;  %v6547_v30 = vsel %vm5729_vm1, %v6533_v33, 0 }
 0x444   :  { %15719 = vmatprep.mubr.msk.bf16.mxu0 %vm5729_vm1, %v6256_v16  ;;  %15734 = vmatpush3.bf16.xpose.msra.mxu0 %v6547_v30 }
 0x446   :  { %v6526_v45 = vpop.permute.xlu1 %6525 }
 0x447   :  { %v6524_v18 = vpop.permute.xlu0 %6523 }
 0x44a   :  { %v6530_v52 = vpop.permute.xlu1 %6529 }
 0x44b   :  { %v6528_v31 = vpop.permute.xlu0 %6527  ;;  %15720 = vmatmul.mubr.msk.bf16.gmra.mrb[36].mxu0 %vm5729_vm1, %v6258_v32 }
 0x44c   :  { %15735 = vmatprep.mubr.msk.bf16.mxu0 %vm5729_vm1, %v6524_v18 }
 0x44e   :  { %v5905_v59 = vpop.permute.xlu1 %5904 }
 0x44f   :  { %15683 = vmatprep.subr.bf16.mxu1 %v5905_v59  ;;  %v20748_v39 = vpop.permute.xlu0 %6157 }
 0x450   :  { %15684 = vmatpush3.bf16.msra.mxu1 %v5905_v59 }
 0x451   :  { %15703 = vmatprep.subr.bf16.mxu1 %v20748_v39 }
 0x453   :  { %15736 = vmatmul.mubr.msk.bf16.vlgmr.msra.gmra.mrb[40].mxu0 %vm5729_vm1, %v6526_v45 }
 0x454   :  { %15739 = vmatprep.mubr.msk.bf16.mxu0 %vm5729_vm1, %v6528_v31 }
 0x45b   :  { %15740 = vmatmul.mubr.msk.bf16.gmra.mrb[44].mxu0 %vm5729_vm1, %v6530_v52 }
 0x45c   :  { %6904 = vmatprep.mubr.bf16.mxu0 %v23471_v46 }
 0x4a4   :  { %v20755_v57 = vpop.f32.mrb[156].mxu1 }
 0x4a5   :  { %v20757_v6 = vpop.f32.mrb[157].mxu1  ;;  %v5817_v14 = vsel %vm5810_vm2, %v20755_v57, -inf }
 0x4a6   :  { %5818 = vmax.xlane.f32.xlu0 %v5817_v14  ;;  %v20761_v0 = vpop.f32.mrb[158].mxu1  ;;  %v5811_v38 = vsel %vm5810_vm2, %v20757_v6, -inf }
 0x4a7   :  { %v20763_v47 = vpop.f32.mrb[159].mxu1  ;;  %v5820_v4 = vsel %vm5810_vm2, %v20761_v0, -inf }
 0x4a8   :  { %v5814_v1 = vsel %vm5810_vm2, %v20763_v47, -inf }
 0x4a9   :  { %5815 = vmax.xlane.f32.xlu1 %v5814_v1 }
 0x4aa   :  { %5812 = vmax.xlane.f32.xlu0 %v5811_v38 }
 0x4ac   :  { %v20769_v17 = vpop.f32.mrb[24].mxu0 }
 0x4ad   :  { %v20771_v13 = vpop.f32.mrb[160].mxu1  ;;  %v20773_v54 = vpop.f32.mrb[25].mxu0  ;;  %v6070_v32 = vsel %vm5810_vm2, %v20769_v17, -inf }
 0x4ae   :  { %v20777_v50 = vpop.f32.mrb[161].mxu1  ;;  %v20779_v7 = vpop.f32.mrb[26].mxu0  ;;  %5821 = vmax.xlane.f32.xlu0 %v5820_v4  ;;  %v5829_v34 = vsel %vm5810_vm2, %v20771_v13, -inf  ;;  %v6064_v1 = vsel %vm5810_vm2, %v20773_v54, -inf }
 0x4af   :  { %5830 = vmax.xlane.f32.xlu1 %v5829_v34  ;;  %v20783_v2 = vpop.f32.mrb[162].mxu1  ;;  %v20785_v16 = vpop.f32.mrb[27].mxu0  ;;  %v6073_v18 = vsel %vm5810_vm2, %v20779_v7, -inf  ;;  %v5823_v31 = vsel %vm5810_vm2, %v20777_v50, -inf }
 0x4b0   :  { %v20787_v23 = vpop.f32.mrb[163].mxu1  ;;  %v5832_v33 = vsel %vm5810_vm2, %v20783_v2, -inf  ;;  %v6067_v38 = vsel %vm5810_vm2, %v20785_v16, -inf }
 0x4b1   :  { %v5826_v14 = vsel %vm5810_vm2, %v20787_v23, -inf }
 0x4b2   :  { %5833 = vmax.xlane.f32.xlu0 %v5832_v33 }
 0x4b3   :  { %6071 = vmax.xlane.f32.xlu1 %v6070_v32 }
 0x4b4   :  { %v20793_v30 = vpop.f32.mrb[28].mxu0 }
 0x4b5   :  { %v20795_v45 = vpop.f32.mrb[29].mxu0  ;;  %v6082_v4 = vsel %vm5810_vm2, %v20793_v30, -inf }
 0x4b6   :  { %v20799_v52 = vpop.f32.mrb[30].mxu0  ;;  %6074 = vmax.xlane.f32.xlu0 %v6073_v18  ;;  %v6076_v33 = vsel %vm5810_vm2, %v20795_v45, -inf }
 0x4b7   :  { %5824 = vmax.xlane.f32.xlu1 %v5823_v31  ;;  %v20803_v59 = vpop.f32.mrb[31].mxu0  ;;  %v6085_v34 = vsel %vm5810_vm2, %v20799_v52, -inf }
 0x4b8   :  { %v6079_v32 = vsel %vm5810_vm2, %v20803_v59, -inf }
 0x4ba   :  { %5827 = vmax.xlane.f32.xlu0 %v5826_v14 }
 0x4bb   :  { %6065 = vmax.xlane.f32.xlu1 %v6064_v1 }
 0x4be   :  { %6068 = vmax.xlane.f32.xlu0 %v6067_v38 }
 0x4bf   :  { %6083 = vmax.xlane.f32.xlu1 %v6082_v4 }
 0x4c2   :  { %6086 = vmax.xlane.f32.xlu0 %v6085_v34 }
 0x4c3   :  { %6077 = vmax.xlane.f32.xlu1 %v6076_v33 }
 0x4c6   :  { %6080 = vmax.xlane.f32.xlu0 %v6079_v32 }
 0x516   :  { %v20819_v18 = vpop.f32.mrb[32].mxu0 }
 0x517   :  { %v20821_v31 = vpop.f32.mrb[33].mxu0  ;;  %v6348_v14 = vsel %vm5810_vm2, %v20819_v18, -inf }
 0x518   :  { %v20825_v1 = vpop.f32.mrb[34].mxu0  ;;  %6349 = vmax.xlane.f32.xlu1 %v6348_v14  ;;  %v6342_v34 = vsel %vm5810_vm2, %v20821_v31, -inf }
 0x519   :  { %v20827_v38 = vpop.f32.mrb[35].mxu0  ;;  %v6351_v4 = vsel %vm5810_vm2, %v20825_v1, -inf }
 0x51a   :  { %6352 = vmax.xlane.f32.xlu0 %v6351_v4  ;;  %v6345_v33 = vsel %vm5810_vm2, %v20827_v38, -inf }
 0x51c   :  { %6343 = vmax.xlane.f32.xlu1 %v6342_v34 }
 0x51e   :  { %v20835_v32 = vpop.f32.mrb[36].mxu0  ;;  %6346 = vmax.xlane.f32.xlu0 %v6345_v33 }
 0x51f   :  { %v20837_v46 = vpop.f32.mrb[37].mxu0  ;;  %v6360_v14 = vsel %vm5810_vm2, %v20835_v32, -inf }
 0x520   :  { %v20841_v28 = vpop.f32.mrb[38].mxu0  ;;  %6361 = vmax.xlane.f32.xlu1 %v6360_v14  ;;  %v6354_v34 = vsel %vm5810_vm2, %v20837_v46, -inf }
 0x521   :  { %v20843_v29 = vpop.f32.mrb[39].mxu0  ;;  %v6363_v4 = vsel %vm5810_vm2, %v20841_v28, -inf }
 0x522   :  { %6364 = vmax.xlane.f32.xlu0 %v6363_v4  ;;  %v6357_v33 = vsel %vm5810_vm2, %v20843_v29, -inf }
 0x524   :  { %6355 = vmax.xlane.f32.xlu1 %v6354_v34 }
 0x526   :  { %v20851_v56 = vpop.f32.mrb[40].mxu0  ;;  %6358 = vmax.xlane.f32.xlu0 %v6357_v33 }
 0x527   :  { %v20853_v10 = vpop.f32.mrb[41].mxu0  ;;  %v6620_v14 = vsel %vm5810_vm2, %v20851_v56, -inf }
 0x528   :  { %v20857_v61 = vpop.f32.mrb[42].mxu0  ;;  %6621 = vmax.xlane.f32.xlu1 %v6620_v14  ;;  %v6614_v34 = vsel %vm5810_vm2, %v20853_v10, -inf }
 0x529   :  { %v20859_v44 = vpop.f32.mrb[43].mxu0  ;;  %v6623_v4 = vsel %vm5810_vm2, %v20857_v61, -inf }
 0x52a   :  { %6624 = vmax.xlane.f32.xlu0 %v6623_v4  ;;  %v6617_v33 = vsel %vm5810_vm2, %v20859_v44, -inf }
 0x52c   :  { %6615 = vmax.xlane.f32.xlu1 %v6614_v34 }
 0x52e   :  { %v20867_v12 = vpop.f32.mrb[44].mxu0  ;;  %6618 = vmax.xlane.f32.xlu0 %v6617_v33 }
 0x52f   :  { %v20869_v3 = vpop.f32.mrb[45].mxu0  ;;  %v6632_v14 = vsel %vm5810_vm2, %v20867_v12, -inf }
 0x530   :  { %v20873_v26 = vpop.f32.mrb[46].mxu0  ;;  %6633 = vmax.xlane.f32.xlu1 %v6632_v14  ;;  %v6626_v34 = vsel %vm5810_vm2, %v20869_v3, -inf }
 0x531   :  { %v20875_v22 = vpop.f32.mrb[47].mxu0  ;;  %v6635_v4 = vsel %vm5810_vm2, %v20873_v26, -inf }
 0x532   :  { %6636 = vmax.xlane.f32.xlu0 %v6635_v4  ;;  %v6629_v33 = vsel %vm5810_vm2, %v20875_v22, -inf }
 0x533   :  { %v5819_v41 = vpop.xlane.xlu0 %5818 }
 0x534   :  { %6627 = vmax.xlane.f32.xlu1 %v6626_v34  ;;  %v5837_v49 = vsub.f32 %v20755_v57, %v5819_v41 }
 0x536   :  { %6630 = vmax.xlane.f32.xlu0 %v6629_v33  ;;  %v5816_v14 = vpop.xlane.xlu1 %5815  ;;  %v5847_v33 = vmul.f32 1.442695, %v5837_v49 }
 0x537   :  { %v5813_v63 = vpop.xlane.xlu0 %5812  ;;  %v5836_v20 = vsub.f32 %v20763_v47, %v5816_v14 }
 0x538   :  { %v5835_v15 = vsub.f32 %v20757_v6, %v5813_v63  ;;  %17745 = vpow2.f32 %v5847_v33 }
 0x539   :  { %v5845_v9 = vmul.f32 1.442695, %v5836_v20 }
 0x53a   :  { %v5843_v11 = vmul.f32 1.442695, %v5835_v15 }
 0x53b   :  { %v5822_v36 = vpop.xlane.xlu0 %5821 }
 0x53c   :  { %v5831_v4 = vpop.xlane.xlu1 %5830  ;;  %v5838_v51 = vsub.f32 %v20761_v0, %v5822_v36 }
 0x53d   :  { %v5841_v62 = vsub.f32 %v20771_v13, %v5831_v4 }
 0x53e   :  { %v5849_v58 = vmul.f32 1.442695, %v5838_v51 }
 0x53f   :  { %v5834_v37 = vpop.xlane.xlu0 %5833  ;;  %v5855_v57 = vmul.f32 1.442695, %v5841_v62 }
 0x540   :  { %v6072_v34 = vpop.xlane.xlu1 %6071  ;;  %17747 = vpow2.f32 %v5849_v58  ;;  %v5842_v41 = vsub.f32 %v20783_v2, %v5834_v37 }
 0x541   :  { %17749 = vpow2.f32 %v5843_v11  ;;  %v6090_v36 = vsub.f32 %v20769_v17, %v6072_v34 }
 0x542   :  { %17751 = vpow2.f32 %v5845_v9  ;;  %v5857_v63 = vmul.f32 1.442695, %v5842_v41  ;;  %v20896_v47 = vpop.eup %17745 }
 0x543   :  { %v6075_v43 = vpop.xlane.xlu0 %6074  ;;  %17753 = vpow2.f32 %v5855_v57  ;;  %v6100_v0 = vmul.f32 1.442695, %v6090_v36 }
 0x544   :  { %v6091_v6 = vsub.f32 %v20779_v7, %v6075_v43  ;;  %17755 = vpow2.f32 %v5857_v63  ;;  %v5865_v43 = vsel %vm5810_vm2, %v20896_v47, 0.0 }
 0x545   :  { %6435 = vrot.lane.b32.xlu1 %v20681_v53, %s18261_s5  ;;  %v5825_v53 = vpop.xlane.xlu1 %5824  ;;  %17757 = vpow2.f32 %v6100_v0 }
 0x546   :  { %v5839_v15 = vsub.f32 %v20777_v50, %v5825_v53  ;;  %v6102_v58 = vmul.f32 1.442695, %v6091_v6 }
 0x547   :  { %v5828_v35 = vpop.xlane.xlu0 %5827 }
 0x548   :  { %v5840_v20 = vsub.f32 %v20787_v23, %v5828_v35  ;;  %v5851_v37 = vmul.f32 1.442695, %v5839_v15  ;;  %17759 = vpow2.f32 %v6102_v58 }
 0x549   :  { %v6066_v49 = vpop.xlane.xlu1 %6065 }
 0x54a   :  { %v20899_v62 = vpop.eup %17747  ;;  %v6088_v9 = vsub.f32 %v20773_v54, %v6066_v49  ;;  %v5853_v53 = vmul.f32 1.442695, %v5840_v20  ;;  %17761 = vpow2.f32 %v5851_v37 }
 0x54b   :  { %v6069_v51 = vpop.xlane.xlu0 %6068  ;;  %v20904_v13 = vpop.eup %17749  ;;  %v5868_v35 = vsel %vm5810_vm2, %v20899_v62, 0.0 }
 0x54c   :  { %6437 = vrot.lane.b32.xlu0 %v20685_v19, %s18261_s5  ;;  %v6089_v50 = vsub.f32 %v20785_v16, %v6069_v51  ;;  %v20909_v7 = vpop.eup %17751  ;;  %v6096_v2 = vmul.f32 1.442695, %v6088_v9  ;;  %v5859_v14 = vsel %vm5810_vm2, %v20904_v13, 0.0  ;;  %17763 = vpow2.f32 %v5853_v53 }
 0x54d   :  { %v6084_v11 = vpop.xlane.xlu1 %6083  ;;  %v20914_v4 = vpop.eup %17753  ;;  %v5862_v41 = vsel %vm5810_vm2, %v20909_v7, 0.0 }
 0x54e   :  { %v6094_v54 = vsub.f32 %v20793_v30, %v6084_v11  ;;  %v6098_v34 = vmul.f32 1.442695, %v6089_v50  ;;  %v20919_v57 = vpop.eup %17755  ;;  %17765 = vpow2.f32 %v6096_v2  ;;  %v5877_v49 = vsel %vm5810_vm2, %v20914_v4, 0.0 }
 0x54f   :  { %v6087_v17 = vpop.xlane.xlu0 %6086  ;;  %v20924_v63 = vpop.eup %17757  ;;  %v5880_v51 = vsel %vm5810_vm2, %v20919_v57, 0.0 }
 0x550   :  { %v6095_v16 = vsub.f32 %v20799_v52, %v6087_v17  ;;  %v6108_v30 = vmul.f32 1.442695, %v6094_v54  ;;  %17767 = vpow2.f32 %v6098_v34 }
 0x551   :  { %v6078_v23 = vpop.xlane.xlu1 %6077 }
 0x552   :  { %v6092_v36 = vsub.f32 %v20795_v45, %v6078_v23  ;;  %v6110_v6 = vmul.f32 1.442695, %v6095_v16  ;;  %v20929_v0 = vpop.eup %17759  ;;  %17769 = vpow2.f32 %v6108_v30  ;;  %v6118_v45 = vsel %vm5810_vm2, %v20924_v63, 0.0 }
 0x553   :  { %v6081_v33 = vpop.xlane.xlu0 %6080 }
 0x554   :  { %v6093_v52 = vsub.f32 %v20803_v59, %v6081_v33  ;;  %v6104_v15 = vmul.f32 1.442695, %v6092_v36  ;;  %v20933_v58 = vpop.eup %17761  ;;  %17771 = vpow2.f32 %v6110_v6  ;;  %v6121_v59 = vsel %vm5810_vm2, %v20929_v0, 0.0 }
 0x555   :  { %v5871_v37 = vsel %vm5810_vm2, %v20933_v58, 0.0 }
 0x556   :  { %v6106_v20 = vmul.f32 1.442695, %v6093_v52  ;;  %v20937_v11 = vpop.eup %17763  ;;  %17773 = vpow2.f32 %v6104_v15 }
 0x557   :  { %v5874_v17 = vsel %vm5810_vm2, %v20937_v11, 0.0 }
 0x558   :  { %v20941_v9 = vpop.eup %17765  ;;  %17775 = vpow2.f32 %v6106_v20 }
 0x559   :  { %v6112_v53 = vsel %vm5810_vm2, %v20941_v9, 0.0 }
 0x569   :  { %5866 = vadd.xlane.f32.xlu1 %v5865_v43  ;;  %v20945_v43 = vpop.eup %17767 }
 0x56a   :  { %v20949_v50 = vpop.eup %17769 }
 0x56b   :  { %5869 = vadd.xlane.f32.xlu0 %v5868_v35  ;;  %v6115_v35 = vsel %vm5810_vm2, %v20945_v43, 0.0  ;;  %v20953_v2 = vpop.eup %17771  ;;  %v6130_v54 = vsel %vm5810_vm2, %v20949_v50, 0.0 }
 0x56c   :  { %v20957_v23 = vpop.eup %17773 }
 0x56d   :  { %5860 = vadd.xlane.f32.xlu1 %v5859_v14  ;;  %v6133_v14 = vsel %vm5810_vm2, %v20953_v2, 0.0  ;;  %v20961_v34 = vpop.eup %17775  ;;  %v6124_v16 = vsel %vm5810_vm2, %v20957_v23, 0.0 }
 0x56e   :  { %v6127_v33 = vsel %vm5810_vm2, %v20961_v34, 0.0 }
 0x56f   :  { %5863 = vadd.xlane.f32.xlu0 %v5862_v41 }
 0x571   :  { %5878 = vadd.xlane.f32.xlu1 %v5877_v49 }
 0x573   :  { %5881 = vadd.xlane.f32.xlu0 %v5880_v51 }
 0x575   :  { %6119 = vadd.xlane.f32.xlu1 %v6118_v45 }
 0x577   :  { %6122 = vadd.xlane.f32.xlu0 %v6121_v59 }
 0x579   :  { %5872 = vadd.xlane.f32.xlu1 %v5871_v37 }
 0x57b   :  { %5875 = vadd.xlane.f32.xlu0 %v5874_v17 }
 0x57d   :  { %6113 = vadd.xlane.f32.xlu1 %v6112_v53 }
 0x57f   :  { %6116 = vadd.xlane.f32.xlu0 %v6115_v35 }
 0x581   :  { %6131 = vadd.xlane.f32.xlu1 %v6130_v54 }
 0x583   :  { %6134 = vadd.xlane.f32.xlu0 %v6133_v14 }
 0x585   :  { %6125 = vadd.xlane.f32.xlu1 %v6124_v16 }
 0x587   :  { %6128 = vadd.xlane.f32.xlu0 %v6127_v33 }
 0x5a5   :  { %v6350_v41 = vpop.xlane.xlu1 %6349 }
 0x5a6   :  { %v6368_v30 = vsub.f32 %v20819_v18, %v6350_v41 }
 0x5a7   :  { %v6353_v36 = vpop.xlane.xlu0 %6352 }
 0x5a8   :  { %v6378_v49 = vmul.f32 1.442695, %v6368_v30  ;;  %v6369_v6 = vsub.f32 %v20825_v1, %v6353_v36 }
 0x5a9   :  { %v6344_v52 = vpop.xlane.xlu1 %6343 }
 0x5aa   :  { %17777 = vpow2.f32 %v6378_v49  ;;  %v6366_v51 = vsub.f32 %v20821_v31, %v6344_v52  ;;  %v6380_v45 = vmul.f32 1.442695, %v6369_v6 }
 0x5ab   :  { %v6347_v15 = vpop.xlane.xlu0 %6346 }
 0x5ac   :  { %v6374_v20 = vmul.f32 1.442695, %v6366_v51  ;;  %v6367_v59 = vsub.f32 %v20827_v38, %v6347_v15 }
 0x5ad   :  { %v6362_v37 = vpop.xlane.xlu1 %6361 }
 0x5ae   :  { %17779 = vpow2.f32 %v6374_v20  ;;  %v6376_v53 = vmul.f32 1.442695, %v6367_v59  ;;  %v6372_v18 = vsub.f32 %v20835_v32, %v6362_v37 }
 0x5af   :  { %v6365_v17 = vpop.xlane.xlu0 %6364  ;;  %17781 = vpow2.f32 %v6380_v45 }
 0x5b0   :  { %v6373_v1 = vsub.f32 %v20841_v28, %v6365_v17  ;;  %17783 = vpow2.f32 %v6376_v53  ;;  %v6386_v31 = vmul.f32 1.442695, %v6372_v18 }
 0x5b1   :  { %v6356_v35 = vpop.xlane.xlu1 %6355 }
 0x5b2   :  { %v6370_v54 = vsub.f32 %v20837_v46, %v6356_v35  ;;  %v6388_v32 = vmul.f32 1.442695, %v6373_v1 }
 0x5b3   :  { %v6359_v14 = vpop.xlane.xlu0 %6358 }
 0x5b4   :  { %v20974_v16 = vpop.eup %17777  ;;  %v6382_v33 = vmul.f32 1.442695, %v6370_v54  ;;  %v6371_v36 = vsub.f32 %v20843_v29, %v6359_v14 }
 0x5b5   :  { %v6622_v41 = vpop.xlane.xlu1 %6621  ;;  %v6396_v38 = vsel %vm5810_vm2, %v20974_v16, 0.0 }
 0x5b6   :  { %17785 = vpow2.f32 %v6382_v33  ;;  %v6640_v30 = vsub.f32 %v20851_v56, %v6622_v41  ;;  %6397 = vadd.xlane.f32.xlu0 %v6396_v38  ;;  %v6384_v56 = vmul.f32 1.442695, %v6371_v36 }
 0x5b7   :  { %v6625_v46 = vpop.xlane.xlu0 %6624  ;;  %17787 = vpow2.f32 %v6386_v31 }
 0x5b8   :  { %v20980_v49 = vpop.eup %17779  ;;  %v6650_v28 = vmul.f32 1.442695, %v6640_v30  ;;  %v6641_v6 = vsub.f32 %v20857_v61, %v6625_v46 }
 0x5b9   :  { %v6616_v52 = vpop.xlane.xlu1 %6615  ;;  %v6390_v51 = vsel %vm5810_vm2, %v20980_v49, 0.0  ;;  %v20985_v15 = vpop.eup %17781 }
 0x5ba   :  { %17789 = vpow2.f32 %v6650_v28  ;;  %v6652_v45 = vmul.f32 1.442695, %v6641_v6  ;;  %6391 = vadd.xlane.f32.xlu0 %v6390_v51  ;;  %v6638_v29 = vsub.f32 %v20853_v10, %v6616_v52  ;;  %v6399_v61 = vsel %vm5810_vm2, %v20985_v15, 0.0  ;;  %v20991_v17 = vpop.eup %17783 }
 0x5bb   :  { %17791 = vpow2.f32 %v6388_v32  ;;  %v6619_v20 = vpop.xlane.xlu0 %6618  ;;  %v6393_v33 = vsel %vm5810_vm2, %v20991_v17, 0.0 }
 0x5bc   :  { %17793 = vpow2.f32 %v6652_v45  ;;  %v6639_v59 = vsub.f32 %v20859_v44, %v6619_v20  ;;  %v6646_v35 = vmul.f32 1.442695, %v6638_v29 }
 0x5bd   :  { %v6634_v37 = vpop.xlane.xlu1 %6633  ;;  %17795 = vpow2.f32 %v6384_v56 }
 0x5be   :  { %v6648_v53 = vmul.f32 1.442695, %v6639_v59  ;;  %v6644_v18 = vsub.f32 %v20867_v12, %v6634_v37  ;;  %6400 = vadd.xlane.f32.xlu0 %v6399_v61 }
 0x5bf   :  { %v6637_v54 = vpop.xlane.xlu0 %6636 }
 0x5c0   :  { %v20994_v1 = vpop.eup %17785  ;;  %17797 = vpow2.f32 %v6648_v53  ;;  %v6658_v10 = vmul.f32 1.442695, %v6644_v18  ;;  %v6645_v14 = vsub.f32 %v20873_v26, %v6637_v54 }
 0x5c1   :  { %v6628_v44 = vpop.xlane.xlu1 %6627  ;;  %v6402_v31 = vsel %vm5810_vm2, %v20994_v1, 0.0  ;;  %v21001_v41 = vpop.eup %17787  ;;  %17799 = vpow2.f32 %v6646_v35 }
 0x5c2   :  { %v6642_v12 = vsub.f32 %v20869_v3, %v6628_v44  ;;  %6403 = vadd.xlane.f32.xlu1 %v6402_v31  ;;  %6394 = vadd.xlane.f32.xlu0 %v6393_v33  ;;  %v6660_v38 = vmul.f32 1.442695, %v6645_v14  ;;  %17801 = vpow2.f32 %v6658_v10  ;;  %v6408_v6 = vsel %vm5810_vm2, %v21001_v41, 0.0 }
 0x5c3   :  { %v6631_v30 = vpop.xlane.xlu0 %6630 }
 0x5c4   :  { %v21004_v32 = vpop.eup %17789  ;;  %v6654_v26 = vmul.f32 1.442695, %v6642_v12  ;;  %v6643_v36 = vsub.f32 %v20875_v22, %v6631_v30  ;;  %17803 = vpow2.f32 %v6660_v38 }
 0x5c5   :  { %v21007_v46 = vpop.eup %17791  ;;  %v6668_v28 = vsel %vm5810_vm2, %v21004_v32, 0.0  ;;  %v6436_v31 = vpop.permute.xlu1 %6435 }
 0x5c6   :  { %v21013_v3 = vpop.eup %17793  ;;  %6669 = vadd.xlane.f32.xlu1 %v6668_v28  ;;  %6409 = vadd.xlane.f32.xlu0 %v6408_v6  ;;  %17805 = vpow2.f32 %v6654_v26  ;;  %v6656_v52 = vmul.f32 1.442695, %v6643_v36  ;;  %v6411_v22 = vsel %vm5810_vm2, %v21007_v46, 0.0 }
 0x5c7   :  { %v21015_v51 = vpop.eup %17795  ;;  %v6671_v45 = vsel %vm5810_vm2, %v21013_v3, 0.0  ;;  %v6438_v33 = vpop.permute.xlu0 %6437 }
 0x5c8   :  { %17807 = vpow2.f32 %v6656_v52  ;;  %v6405_v20 = vsel %vm5810_vm2, %v21015_v51, 0.0 }
 0x5ca   :  { %v21021_v56 = vpop.eup %17797  ;;  %6412 = vadd.xlane.f32.xlu0 %v6411_v22  ;;  %6672 = vadd.xlane.f32.xlu1 %v6671_v45 }
 0x5cb   :  { %v21023_v29 = vpop.eup %17799  ;;  %v6665_v59 = vsel %vm5810_vm2, %v21021_v56, 0.0 }
 0x5cc   :  { %v21029_v37 = vpop.eup %17801  ;;  %v6662_v53 = vsel %vm5810_vm2, %v21023_v29, 0.0 }
 0x5cd   :  { %v6680_v18 = vsel %vm5810_vm2, %v21029_v37, 0.0 }
 0x5ce   :  { %6406 = vadd.xlane.f32.xlu0 %v6405_v20  ;;  %6666 = vadd.xlane.f32.xlu1 %v6665_v59  ;;  %v21031_v61 = vpop.eup %17803 }
 0x5cf   :  { %v6683_v10 = vsel %vm5810_vm2, %v21031_v61, 0.0 }
 0x5d0   :  { %v21037_v35 = vpop.eup %17805 }
 0x5d1   :  { %v6674_v54 = vsel %vm5810_vm2, %v21037_v35, 0.0 }
 0x5d2   :  { %6663 = vadd.xlane.f32.xlu0 %v6662_v53  ;;  %6681 = vadd.xlane.f32.xlu1 %v6680_v18  ;;  %v21043_v14 = vpop.eup %17807 }
 0x5d3   :  { %v6677_v44 = vsel %vm5810_vm2, %v21043_v14, 0.0 }
 0x5d6   :  { %6675 = vadd.xlane.f32.xlu1 %v6674_v54  ;;  %6684 = vadd.xlane.f32.xlu0 %v6683_v10 }
 0x5da   :  { %6678 = vadd.xlane.f32.xlu1 %v6677_v44 }
 0x5eb   :  { %6707 = vrot.lane.b32.xlu1 %v20697_v24, %s18261_s5 }
 0x5ec   :  { %6709 = vrot.lane.b32.xlu0 %v20701_v8, %s18261_s5 }
 0x5ef   :  { %7373 = vrot.lane.b32.xlu1 %v20679_v5, %s18262_s28 }
 0x5f0   :  { %7371 = vrot.lane.b32.xlu0 %v20399_v55, %s18262_s28 }
 0x5f3   :  { %7365 = vrot.lane.b32.xlu1 %v20372_v60, %s18262_s28 }
 0x5f6   :  { %v5867_v12 = vpop.xlane.xlu1 %5866 }
 0x5f7   :  { %7367 = vrot.lane.b32.xlu1 %v20379_v27, %s18262_s28 }
 0x5f8   :  { %v5870_v38 = vpop.xlane.xlu0 %5869 }
 0x5f9   :  { %17809 = vrcp.f32 %v5870_v38 }
 0x5fa   :  { %v5861_v30 = vpop.xlane.xlu1 %5860 }
 0x5fb   :  { %17811 = vrcp.f32 %v5861_v30  ;;  %7369 = vrot.lane.b32.xlu1 %v20389_v40, %s18262_s28 }
 0x5fc   :  { %17813 = vrcp.f32 %v5867_v12  ;;  %v5864_v26 = vpop.xlane.xlu0 %5863 }
 0x5fd   :  { %17815 = vrcp.f32 %v5864_v26 }
 0x5fe   :  { %v5879_v36 = vpop.xlane.xlu1 %5878 }
 0x600   :  { %v5882_v28 = vpop.xlane.xlu0 %5881 }
 0x601   :  { %17817 = vrcp.f32 %v5882_v28 }
 0x602   :  { %v6120_v6 = vpop.xlane.xlu1 %6119 }
 0x603   :  { %v17810_v52 = vpop.eup %17809 }
 0x604   :  { %v6123_v22 = vpop.xlane.xlu0 %6122  ;;  %v5894_v18 = vmul.f32 %v17810_v52, %v20899_v62 }
 0x605   :  { %v17812_v45 = vpop.eup %17811 }
 0x606   :  { %v17814_v20 = vpop.eup %17813  ;;  %v5873_v59 = vpop.xlane.xlu1 %5872  ;;  %v5891_v10 = vmul.f32 %v17812_v45, %v20904_v13  ;;  %v6440_v13 = vsel %vm6439_vm3, %v6436_v31, %v6438_v33 }
 0x607   :  { %v17816_v53 = vpop.eup %17815  ;;  %17819 = vrcp.f32 %v5873_v59  ;;  %v5893_v12 = vmul.f32 %v17814_v20, %v20896_v47 }
 0x608   :  { %17821 = vrcp.f32 %v5879_v36  ;;  %v5876_v54 = vpop.xlane.xlu0 %5875  ;;  %v5892_v44 = vmul.f32 %v17816_v53, %v20909_v7 }
 0x609   :  { %17823 = vrcp.f32 %v5876_v54  ;;  %v5900_v26 = vpack.c.bf16 %v5894_v18, %v5893_v12 }
 0x60a   :  { %v6114_v38 = vpop.xlane.xlu1 %6113  ;;  %v5899_v30 = vpack.c.bf16 %v5892_v44, %v5891_v10 }
 0x60b   :  { %17825 = vrcp.f32 %v6114_v38  ;;  %v17818_v47 = vpop.eup %17817 }
 0x60c   :  { %15685 = vmatprep.mubr.msk.bf16.mxu1 %vm5810_vm2, %v5899_v30  ;;  %v6117_v28 = vpop.xlane.xlu0 %6116  ;;  %v5898_v59 = vmul.f32 %v17818_v47, %v20919_v57 }
 0x60d   :  { %17827 = vrcp.f32 %v6117_v28  ;;  %15686 = vmatmul.mubr.msk.bf16.vlgmr.msra.gmra.mrb[164].mxu1 %vm5810_vm2, %v5900_v26 }
 0x60e   :  { %17829 = vrcp.f32 %v6123_v22  ;;  %15704 = vmatpush3.bf16.msra.mxu1 %v20748_v39  ;;  %v6132_v62 = vpop.xlane.xlu1 %6131 }
 0x60f   :  { %15723 = vmatprep.subr.bf16.mxu1 %v6440_v13  ;;  %17831 = vrcp.f32 %v6120_v6 }
 0x610   :  { %v6135_v7 = vpop.xlane.xlu0 %6134 }
 0x611   :  { %v17820_v36 = vpop.eup %17819 }
 0x612   :  { %v17822_v52 = vpop.eup %17821  ;;  %v6126_v45 = vpop.xlane.xlu1 %6125  ;;  %v5895_v18 = vmul.f32 %v17820_v36, %v20933_v58 }
 0x613   :  { %v17824_v20 = vpop.eup %17823  ;;  %17833 = vrcp.f32 %v6126_v45  ;;  %v5897_v31 = vmul.f32 %v17822_v52, %v20914_v4 }
 0x614   :  { %v6129_v53 = vpop.xlane.xlu0 %6128  ;;  %v5896_v22 = vmul.f32 %v17824_v20, %v20937_v11 }
 0x615   :  { %v17826_v39 = vpop.eup %17825  ;;  %17835 = vrcp.f32 %v6129_v53  ;;  %v5902_v54 = vpack.c.bf16 %v5898_v59, %v5897_v31 }
 0x616   :  { %17837 = vrcp.f32 %v6135_v7  ;;  %v5901_v33 = vpack.c.bf16 %v5896_v22, %v5895_v18  ;;  %v6144_v44 = vmul.f32 %v17826_v39, %v20941_v9 }
 0x617   :  { %v17828_v6 = vpop.eup %17827  ;;  %17839 = vrcp.f32 %v6132_v62 }
 0x618   :  { %v17830_v10 = vpop.eup %17829  ;;  %15689 = vmatprep.mubr.msk.bf16.mxu1 %vm5810_vm2, %v5901_v33  ;;  %v6145_v57 = vmul.f32 %v17828_v6, %v20945_v43 }
 0x619   :  { %15690 = vmatmul.mubr.msk.bf16.gmra.mrb[168].mxu1 %vm5810_vm2, %v5902_v54  ;;  %v17832_v58 = vpop.eup %17831  ;;  %v6147_v12 = vmul.f32 %v17830_v10, %v20929_v0 }
 0x61a   :  { %v6152_v11 = vpack.c.bf16 %v6145_v57, %v6144_v44  ;;  %v6146_v38 = vmul.f32 %v17832_v58, %v20924_v63 }
 0x61c   :  { %15705 = vmatprep.mubr.msk.bf16.mxu1 %vm5810_vm2, %v6152_v11  ;;  %v6153_v26 = vpack.c.bf16 %v6147_v12, %v6146_v38 }
 0x61d   :  { %v17834_v4 = vpop.eup %17833 }
 0x61e   :  { %v6148_v62 = vmul.f32 %v17834_v4, %v20957_v23 }
 0x61f   :  { %v17836_v30 = vpop.eup %17835 }
 0x620   :  { %v17838_v28 = vpop.eup %17837  ;;  %v6149_v9 = vmul.f32 %v17836_v30, %v20961_v34 }
 0x621   :  { %15706 = vmatmul.mubr.msk.bf16.vlgmr.msra.gmra.mrb[172].mxu1 %vm5810_vm2, %v6153_v26  ;;  %v17840_v43 = vpop.eup %17839  ;;  %v6151_v7 = vmul.f32 %v17838_v28, %v20953_v2 }
 0x622   :  { %15724 = vmatpush3.bf16.msra.mxu1 %v6440_v13  ;;  %v6154_v47 = vpack.c.bf16 %v6149_v9, %v6148_v62  ;;  %v6150_v0 = vmul.f32 %v17840_v43, %v20949_v50 }
 0x624   :  { %15709 = vmatprep.mubr.msk.bf16.mxu1 %vm5810_vm2, %v6154_v47  ;;  %v6155_v36 = vpack.c.bf16 %v6151_v7, %v6150_v0 }
 0x629   :  { %15710 = vmatmul.mubr.msk.bf16.gmra.mrb[176].mxu1 %vm5810_vm2, %v6155_v36 }
 0x643   :  { %v6398_v63 = vpop.xlane.xlu0 %6397 }
 0x647   :  { %v6392_v52 = vpop.xlane.xlu0 %6391 }
 0x64b   :  { %v6401_v45 = vpop.xlane.xlu0 %6400 }
 0x64c   :  { %17841 = vrcp.f32 %v6401_v45 }
 0x64d   :  { %17843 = vrcp.f32 %v6392_v52 }
 0x64e   :  { %17845 = vrcp.f32 %v6398_v63 }
 0x64f   :  { %v6404_v23 = vpop.xlane.xlu1 %6403  ;;  %v6395_v34 = vpop.xlane.xlu0 %6394 }
 0x650   :  { %17847 = vrcp.f32 %v6395_v34 }
 0x653   :  { %v6670_v13 = vpop.xlane.xlu1 %6669  ;;  %v6410_v20 = vpop.xlane.xlu0 %6409 }
 0x656   :  { %v17842_v53 = vpop.eup %17841 }
 0x657   :  { %v6673_v59 = vpop.xlane.xlu1 %6672  ;;  %v6413_v2 = vpop.xlane.xlu0 %6412  ;;  %v6425_v39 = vmul.f32 %v17842_v53, %v20985_v15 }
 0x658   :  { %v17844_v18 = vpop.eup %17843  ;;  %17849 = vrcp.f32 %v6413_v2 }
 0x659   :  { %v17846_v22 = vpop.eup %17845  ;;  %17851 = vrcp.f32 %v6404_v23  ;;  %v6422_v6 = vmul.f32 %v17844_v18, %v20980_v49 }
 0x65a   :  { %v17848_v50 = vpop.eup %17847  ;;  %17853 = vrcp.f32 %v6410_v20  ;;  %v6424_v10 = vmul.f32 %v17846_v22, %v20974_v16 }
 0x65b   :  { %v6667_v31 = vpop.xlane.xlu1 %6666  ;;  %v6407_v33 = vpop.xlane.xlu0 %6406  ;;  %v6423_v54 = vmul.f32 %v17848_v50, %v20991_v17  ;;  %v17540_v50 = vld [vmem:[%s23464_s8 + $0x5c] ss:$12 sps:$4 sm:$0xff]  }
 0x65c   :  { %17855 = vrcp.f32 %v6407_v33  ;;  %v6431_v57 = vpack.c.bf16 %v6425_v39, %v6424_v10  ;;  %v5654_v39 = vld [vmem:[%s23464_s8 + $0x6c] sm:$0xff]  ;;  %v17542_v33 = vld [vmem:[%s23464_s8 + $0x74] ss:$0 sps:$4 sm:$0xff]  }
 0x65d   :  { %v6430_v44 = vpack.c.bf16 %v6423_v54, %v6422_v6  ;;  %17857 = vrcp.f32 %v6667_v31  ;;  %v14598_v31 = vcombine.high %v5654_v39, %v5654_v39  ;;  %v14597_v6 = vcombine.low %v5654_v39, %v5654_v39 }
 0x65e   :  { %v6870_v10 = vsel %vm6862_vm4, %v17542_v33, 0 }
 0x65f   :  { %v6682_v58 = vpop.xlane.xlu1 %6681  ;;  %v6664_v11 = vpop.xlane.xlu0 %6663  ;;  %15725 = vmatprep.mubr.msk.bf16.mxu1 %vm5810_vm2, %v6430_v44  ;;  %v6864_v54 = vsel %vm6862_vm4, %v14597_v6, 0  ;;  %v17544_v44 = vld [vmem:[%s23464_s8 + $0x8] ss:$12 sps:$4 sm:$0xff]  }
 0x660   :  { %17859 = vrcp.f32 %v6664_v11  ;;  %15726 = vmatmul.mubr.msk.bf16.vlgmr.msra.gmra.mrb[180].mxu1 %vm5810_vm2, %v6431_v57 }
 0x661   :  { %17861 = vrcp.f32 %v6673_v59 }
 0x662   :  { %v17850_v12 = vpop.eup %17849  ;;  %17863 = vrcp.f32 %v6670_v13 }
 0x663   :  { %v6676_v15 = vpop.xlane.xlu1 %6675  ;;  %v17852_v49 = vpop.eup %17851  ;;  %v6429_v30 = vmul.f32 %v17850_v12, %v21007_v46 }
 0x664   :  { %v6685_v4 = vpop.xlane.xlu0 %6684  ;;  %v17854_v17 = vpop.eup %17853  ;;  %17865 = vrcp.f32 %v6676_v15  ;;  %v6426_v26 = vmul.f32 %v17852_v49, %v20994_v1 }
 0x665   :  { %v6428_v9 = vmul.f32 %v17854_v17, %v21001_v41 }
 0x666   :  { %v17856_v16 = vpop.eup %17855 }
 0x667   :  { %v6679_v38 = vpop.xlane.xlu1 %6678  ;;  %v6427_v28 = vmul.f32 %v17856_v16, %v21015_v51  ;;  %v17858_v62 = vpop.eup %17857  ;;  %v6433_v36 = vpack.c.bf16 %v6429_v30, %v6428_v9 }
 0x668   :  { %17867 = vrcp.f32 %v6679_v38  ;;  %v6710_v7 = vpop.permute.xlu0 %6709  ;;  %v6695_v1 = vmul.f32 %v17858_v62, %v21021_v56 }
 0x669   :  { %17869 = vrcp.f32 %v6685_v4  ;;  %v6432_v43 = vpack.c.bf16 %v6427_v28, %v6426_v26  ;;  %v17549_v4 = vld [vmem:[%s23464_s8 + $0x4] ss:$12 sps:$4 sm:$0xff]  }
 0x66a   :  { %v17860_v47 = vpop.eup %17859  ;;  %17871 = vrcp.f32 %v6682_v58 }
 0x66b   :  { %v6708_v0 = vpop.permute.xlu1 %6707  ;;  %v17862_v63 = vpop.eup %17861  ;;  %15729 = vmatprep.mubr.msk.bf16.mxu1 %vm5810_vm2, %v6432_v43  ;;  %v6694_v52 = vmul.f32 %v17860_v47, %v21023_v29 }
 0x66c   :  { %v6711_v46 = vsel %vm6439_vm3, %v6708_v0, %v6710_v7  ;;  %15730 = vmatmul.mubr.msk.bf16.gmra.mrb[184].mxu1 %vm5810_vm2, %v6433_v36  ;;  %v17864_v41 = vpop.eup %17863  ;;  %v6697_v45 = vmul.f32 %v17862_v63, %v21013_v3 }
 0x66d   :  { %15743 = vmatprep.subr.bf16.mxu1 %v6711_v46  ;;  %v6702_v51 = vpack.c.bf16 %v6695_v1, %v6694_v52  ;;  %v6696_v34 = vmul.f32 %v17864_v41, %v21004_v32  ;;  %v17533_v32 = vld [vmem:[%s23464_s8 + $0x3c] ss:$12 sps:$4 sm:$0xff]  }
 0x66e   :  { %15744 = vmatpush3.bf16.msra.mxu1 %v6711_v46  ;;  %v17866_v23 = vpop.eup %17865 }
 0x66f   :  { %15745 = vmatprep.mubr.msk.bf16.mxu1 %vm5810_vm2, %v6702_v51  ;;  %v6703_v20 = vpack.c.bf16 %v6697_v45, %v6696_v34  ;;  %v6698_v59 = vmul.f32 %v17866_v23, %v21037_v35  ;;  %v17535_v35 = vld [vmem:[%s23464_s8 + $0x40] ss:$12 sps:$4 sm:$0xff]  }
 0x670   :  { %6872 = vmatprep.subr.bf16.mxu0 %v17535_v35 }
 0x671   :  { %6873 = vmatpush1.bf16.msra.mxu0 %v17533_v32 }
 0x672   :  { %v17868_v13 = vpop.eup %17867 }
 0x673   :  { %v6699_v29 = vmul.f32 %v17868_v13, %v21043_v14  ;;  %v17870_v56 = vpop.eup %17869  ;;  %v17536_v14 = vld [vmem:[%s23464_s8 + $0x44] ss:$12 sps:$4 sm:$0xff]  }
 0x674   :  { %15746 = vmatmul.mubr.msk.bf16.vlgmr.msra.gmra.mrb[188].mxu1 %vm5810_vm2, %v6703_v20  ;;  %v17872_v53 = vpop.eup %17871  ;;  %v6701_v3 = vmul.f32 %v17870_v56, %v21031_v61  ;;  %v17539_v61 = vld [vmem:[%s23464_s8 + $0x58] ss:$12 sps:$4 sm:$0xff]   ;;  %15753 = vmatprep.subr.bf16.mxu1 %v17536_v14  ;;  %v17552_v56 = vld [vmem:[%s23464_s8 + $0x1c] ss:$12 sps:$4 sm:$0xff]  }
 0x675   :  { %v6704_v2 = vpack.c.bf16 %v6699_v29, %v6698_v59  ;;  %v6700_v18 = vmul.f32 %v17872_v53, %v21029_v37  ;;  %v17537_v37 = vld [vmem:[%s23464_s8 + $0x54] ss:$12 sps:$4 sm:$0xff]   ;;  %15754 = vmatpush3.bf16.msra.mxu1 %v17536_v14  ;;  %6874 = vmatprep.subr.bf16.mxu0 %v17539_v61  ;;  %v23546_v53 = vmov 0  }
 0x676   :  { %15755 = vmatprep.subr.bf16.mxu1 %v17540_v50  ;;  %6875 = vmatpush1.bf16.msra.mxu0 %v17537_v37  ;;  %v17547_v59 = vld [vmem:[%s23464_s8] ss:$12 sps:$4 sm:$0xff]  }
 0x677   :  { %15749 = vmatprep.mubr.msk.bf16.mxu1 %vm5810_vm2, %v6704_v2  ;;  %v6705_v22 = vpack.c.bf16 %v6701_v3, %v6700_v18  ;;  %14600 = vmatprep.subr.msk.bf16.mxu0 %vm6862_vm4, %v14598_v31  ;;  %v17545_v29 = vld [vmem:[%s23464_s8 + $0x20] ss:$12 sps:$4 sm:$0xff]   ;;  %v5644_v2 = vld [vmem:[%s23464_s8 + $0x30] sm:$0xff]  ;;  %v17550_v3 = vld [vmem:[%s23464_s8 + $0x18] ss:$12 sps:$4 sm:$0xff]  }
 0x678   :  { %v17546_v18 = vld [vmem:[%s23464_s8 + $0x38] ss:$0 sps:$4 sm:$0xff]   ;;  %v14623_v32 = vcombine.low %v5644_v2, %v5644_v2 }
 0x679   :  { %15756 = vmatpush3.bf16.msra.mxu1 %v17540_v50  ;;  %v7153_v37 = vsel %vm6862_vm4, %v17546_v18, 0 }
 0x67a   :  { %16733 = vmatprep.subr.msk.bf16.mxu1 %vm6862_vm4, %v17542_v33  ;;  %6877 = vmatpush1.bf16.msra.mxu0 %v6864_v54  ;;  %v7147_v61 = vsel %vm6862_vm4, %v14623_v32, 0  ;;  %v7374_v33 = vpop.permute.xlu1 %7373 }
 0x67b   :  { %7155 = vmatprep.subr.bf16.mxu0 %v17549_v4 }
 0x67c   :  { %15750 = vmatmul.mubr.msk.bf16.gmra.mrb[192].mxu1 %vm5810_vm2, %v6705_v22  ;;  %v14624_v22 = vcombine.high %v5644_v2, %v5644_v2 }
 0x67d   :  { %15758 = vmatpush3.bf16.msra.mxu1 %v6870_v10 }
 0x67e   :  { %15775 = vmatprep.subr.bf16.mxu1 %v17544_v44 }
 0x6e0   :  { %v15687_v57 = vpop.f32.mrb[164].mxu1 }
 0x6e1   :  { %v5953_v58 = vpop.f32.mrb[165].mxu1 }
 0x6e2   :  { %v15688_v11 = vpop.f32.mrb[166].mxu1 }
 0x6e3   :  { %v21143_v15 = vpack.c.bf16 %v15688_v11, %v15687_v57  ;;  %v5956_v12 = vpop.f32.mrb[167].mxu1 }
 0x6e4   :  { %v21145_v49 = vpack.c.bf16 %v5956_v12, %v5953_v58 }
 0x6ec   :  { %v15691_v17 = vpop.f32.mrb[168].mxu1 }
 0x6ed   :  { %v5969_v16 = vpop.f32.mrb[169].mxu1 }
 0x6ee   :  { %v15692_v38 = vpop.f32.mrb[170].mxu1 }
 0x6ef   :  { %v21150_v30 = vpack.c.bf16 %v15692_v38, %v15691_v17  ;;  %v5972_v26 = vpop.f32.mrb[171].mxu1 }
 0x6f0   :  { %v21152_v28 = vpack.c.bf16 %v5972_v26, %v5969_v16 }
 0x6f4   :  { %v15707_v62 = vpop.f32.mrb[172].mxu1 }
 0x6f5   :  { %v6206_v9 = vpop.f32.mrb[173].mxu1 }
 0x6f6   :  { %v15708_v43 = vpop.f32.mrb[174].mxu1 }
 0x6f7   :  { %v21154_v47 = vpack.c.bf16 %v15708_v43, %v15707_v62  ;;  %v6209_v7 = vpop.f32.mrb[175].mxu1  ;;  %v7388_v62 = vsel %vm5729_vm1, %v7374_v33, 0 }
 0x6f8   :  { %v21156_v0 = vpack.c.bf16 %v6209_v7, %v6206_v9  ;;  %v7366_v9 = vpop.permute.xlu1 %7365 }
 0x6fc   :  { %v15711_v36 = vpop.f32.mrb[176].mxu1  ;;  %v7368_v43 = vpop.permute.xlu1 %7367 }
 0x6fd   :  { %v6222_v63 = vpop.f32.mrb[177].mxu1 }
 0x6fe   :  { %v15712_v46 = vpop.f32.mrb[178].mxu1 }
 0x6ff   :  { %v21158_v52 = vpack.c.bf16 %v15712_v46, %v15711_v36  ;;  %v6225_v1 = vpop.f32.mrb[179].mxu1  ;;  %v7372_v36 = vpop.permute.xlu0 %7371 }
 0x700   :  { %v21160_v41 = vpack.c.bf16 %v6225_v1, %v6222_v63  ;;  %v7370_v7 = vpop.permute.xlu1 %7369 }
 0x733   :  { %v15727_v51 = vpop.f32.mrb[180].mxu1 }
 0x734   :  { %v6488_v45 = vpop.f32.mrb[181].mxu1 }
 0x735   :  { %v15728_v23 = vpop.f32.mrb[182].mxu1 }
 0x736   :  { %v6791_v34 = vpack.c.bf16 %v15728_v23, %v15727_v51  ;;  %v6491_v13 = vpop.f32.mrb[183].mxu1 }
 0x737   :  { %v6790_v20 = vpack.c.bf16 %v6491_v13, %v6488_v45 }
 0x739   :  { %14601 = vmatmul.mubr.msk.bf16.vlgmr.msra.gmra.mrb[48].mxu0 %vm5729_vm1, %v6790_v20  ;;  %15759 = vmatprep.mubr.msk.bf16.mxu1 %vm5729_vm1, %v6790_v20 }
 0x73a   :  { %15760 = vmatmul.mubr.msk.bf16.vlgmr.msra.gmra.mrb[196].mxu1 %vm5729_vm1, %v6791_v34  ;;  %6914 = vmatprep.mubr.bf16.mxu0 %v23546_v53 }
 0x73b   :  { %15776 = vmatpush3.bf16.msra.mxu1 %v17544_v44  ;;  %7156 = vmatpush1.bf16.msra.mxu0 %v17547_v59 }
 0x73c   :  { %15777 = vmatprep.subr.bf16.mxu1 %v17545_v29  ;;  %7157 = vmatprep.subr.bf16.mxu0 %v17552_v56 }
 0x73f   :  { %15778 = vmatpush3.bf16.msra.mxu1 %v17545_v29  ;;  %v15731_v35 = vpop.f32.mrb[184].mxu1  ;;  %7158 = vmatpush1.bf16.msra.mxu0 %v17550_v3 }
 0x740   :  { %v6504_v14 = vpop.f32.mrb[185].mxu1  ;;  %16734 = vmatprep.subr.msk.bf16.mxu1 %vm6862_vm4, %v17546_v18  ;;  %14626 = vmatprep.subr.msk.bf16.mxu0 %vm6862_vm4, %v14624_v22 }
 0x741   :  { %v15732_v50 = vpop.f32.mrb[186].mxu1  ;;  %14602 = vmatmul.mubr.msk.bf16.gmra.mrb[52].mxu0 %vm5729_vm1, %v6791_v34 }
 0x742   :  { %v6793_v39 = vpack.c.bf16 %v15732_v50, %v15731_v35  ;;  %v6507_v31 = vpop.f32.mrb[187].mxu1  ;;  %6924 = vmatprep.mubr.bf16.mxu0 %v23546_v53 }
 0x743   :  { %v6792_v6 = vpack.c.bf16 %v6507_v31, %v6504_v14  ;;  %15780 = vmatpush3.bf16.msra.mxu1 %v7153_v37  ;;  %7160 = vmatpush1.bf16.msra.mxu0 %v7147_v61 }
 0x744   :  { %16735 = vmatprep.subr.msk.bf16.mxu1 %vm5729_vm1, %v7374_v33 }
 0x745   :  { %15763 = vmatprep.mubr.msk.bf16.mxu1 %vm5729_vm1, %v6792_v6 }
 0x746   :  { %15764 = vmatmul.mubr.msk.bf16.gmra.mrb[200].mxu1 %vm5729_vm1, %v6793_v39 }
 0x747   :  { %v15747_v54 = vpop.f32.mrb[188].mxu1 }
 0x748   :  { %v6759_v10 = vpop.f32.mrb[189].mxu1 }
 0x749   :  { %v15748_v44 = vpop.f32.mrb[190].mxu1  ;;  %14603 = vmatmul.mubr.msk.bf16.gmra.mrb[56].mxu0 %vm5729_vm1, %v6792_v6 }
 0x74a   :  { %v6795_v57 = vpack.c.bf16 %v15748_v44, %v15747_v54  ;;  %v6762_v58 = vpop.f32.mrb[191].mxu1  ;;  %6934 = vmatprep.mubr.bf16.mxu0 %v23546_v53 }
 0x74b   :  { %v6794_v11 = vpack.c.bf16 %v6762_v58, %v6759_v10 }
 0x74d   :  { %15767 = vmatprep.mubr.msk.bf16.mxu1 %vm5729_vm1, %v6794_v11 }
 0x74e   :  { %15768 = vmatmul.mubr.msk.bf16.gmra.mrb[204].mxu1 %vm5729_vm1, %v6795_v57 }
 0x74f   :  { %v15751_v12 = vpop.f32.mrb[192].mxu1 }
 0x750   :  { %v6775_v4 = vpop.f32.mrb[193].mxu1 }
 0x751   :  { %v15752_v17 = vpop.f32.mrb[194].mxu1  ;;  %14604 = vmatmul.mubr.msk.bf16.gmra.mrb[60].mxu0 %vm5729_vm1, %v6793_v39 }
 0x752   :  { %v6797_v16 = vpack.c.bf16 %v15752_v17, %v15751_v12  ;;  %v6778_v38 = vpop.f32.mrb[195].mxu1  ;;  %6944 = vmatprep.mubr.bf16.mxu0 %v23546_v53 }
 0x753   :  { %v6796_v26 = vpack.c.bf16 %v6778_v38, %v6775_v4 }
 0x755   :  { %15771 = vmatprep.mubr.msk.bf16.mxu1 %vm5729_vm1, %v6796_v26 }
 0x756   :  { %15772 = vmatmul.mubr.msk.bf16.gmra.mrb[208].mxu1 %vm5729_vm1, %v6797_v16 }
 0x757   :  { %15781 = vmatprep.mubr.msk.bf16.mxu1 %vm5729_vm1, %v21145_v49 }
 0x759   :  { %14605 = vmatmul.mubr.msk.bf16.gmra.mrb[64].mxu0 %vm5729_vm1, %v6794_v11 }
 0x75a   :  { %6954 = vmatprep.mubr.bf16.mxu0 %v23546_v53 }
 0x75e   :  { %15782 = vmatmul.mubr.msk.bf16.vlgmr.msra.gmra.mrb[196].mxu1 %vm5729_vm1, %v21143_v15 }
 0x75f   :  { %15798 = vmatpush3.bf16.xpose.msra.mxu1 %v7388_v62  ;;  %15785 = vmatprep.mubr.msk.bf16.mxu1 %vm5729_vm1, %v21152_v28 }
 0x761   :  { %14606 = vmatmul.mubr.msk.bf16.gmra.mrb[68].mxu0 %vm5729_vm1, %v6795_v57 }
 0x762   :  { %6964 = vmatprep.mubr.bf16.mxu0 %v23546_v53 }
 0x766   :  { %15786 = vmatmul.mubr.msk.bf16.gmra.mrb[200].mxu1 %vm5729_vm1, %v21150_v30 }
 0x767   :  { %15789 = vmatprep.mubr.msk.bf16.mxu1 %vm5729_vm1, %v21156_v0 }
 0x769   :  { %14607 = vmatmul.mubr.msk.bf16.gmra.mrb[72].mxu0 %vm5729_vm1, %v6796_v26 }
 0x76a   :  { %6974 = vmatprep.mubr.bf16.mxu0 %v23546_v53 }
 0x76e   :  { %15790 = vmatmul.mubr.msk.bf16.gmra.mrb[204].mxu1 %vm5729_vm1, %v21154_v47 }
 0x76f   :  { %15793 = vmatprep.mubr.msk.bf16.mxu1 %vm5729_vm1, %v21160_v41 }
 0x771   :  { %14608 = vmatmul.mubr.msk.bf16.gmra.mrb[76].mxu0 %vm5729_vm1, %v6797_v16 }
 0x772   :  { %7187 = vmatprep.mubr.bf16.mxu0 %v23546_v53 }
 0x776   :  { %15794 = vmatmul.mubr.msk.bf16.gmra.mrb[208].mxu1 %vm5729_vm1, %v21158_v52 }
 0x777   :  { %15799 = vmatprep.mubr.msk.bf16.mxu1 %vm5729_vm1, %v7366_v9 }
 0x779   :  { %14627 = vmatmul.mubr.msk.bf16.vlgmr.msra.gmra.mrb[48].mxu0 %vm5729_vm1, %v21145_v49 }
 0x77a   :  { %7197 = vmatprep.mubr.bf16.mxu0 %v23546_v53 }
 0x77e   :  { %15800 = vmatmul.mubr.msk.bf16.vlgmr.msra.gmra.mrb[212].mxu1 %vm5729_vm1, %v7368_v43 }
 0x77f   :  { %15803 = vmatprep.mubr.msk.bf16.mxu1 %vm5729_vm1, %v7370_v7 }
 0x781   :  { %14628 = vmatmul.mubr.msk.bf16.gmra.mrb[52].mxu0 %vm5729_vm1, %v21143_v15 }
 0x782   :  { %7207 = vmatprep.mubr.bf16.mxu0 %v23546_v53 }
 0x786   :  { %15804 = vmatmul.mubr.msk.bf16.gmra.mrb[216].mxu1 %vm5729_vm1, %v7372_v36 }
 0x789   :  { %14629 = vmatmul.mubr.msk.bf16.gmra.mrb[56].mxu0 %vm5729_vm1, %v21152_v28 }
 0x78a   :  { %7217 = vmatprep.mubr.bf16.mxu0 %v23546_v53 }
 0x791   :  { %14630 = vmatmul.mubr.msk.bf16.gmra.mrb[60].mxu0 %vm5729_vm1, %v21150_v30 }
 0x792   :  { %7227 = vmatprep.mubr.bf16.mxu0 %v23546_v53 }
 0x799   :  { %14631 = vmatmul.mubr.msk.bf16.gmra.mrb[64].mxu0 %vm5729_vm1, %v21156_v0 }
 0x79a   :  { %7237 = vmatprep.mubr.bf16.mxu0 %v23546_v53 }
 0x7a1   :  { %14632 = vmatmul.mubr.msk.bf16.gmra.mrb[68].mxu0 %vm5729_vm1, %v21154_v47 }
 0x7a2   :  { %7247 = vmatprep.mubr.bf16.mxu0 %v23546_v53 }
 0x7a9   :  { %14633 = vmatmul.mubr.msk.bf16.gmra.mrb[72].mxu0 %vm5729_vm1, %v21160_v41 }
 0x7aa   :  { %7257 = vmatprep.mubr.bf16.mxu0 %v23546_v53 }
 0x7b1   :  { %14634 = vmatmul.mubr.msk.bf16.gmra.mrb[76].mxu0 %vm5729_vm1, %v21158_v52 }
 0x7b2   :  { %8002 = vmatprep.mubr.bf16.mxu0 %v23546_v53 }
 0x851   :  { %v15801_v15 = vpop.f32.mrb[212].mxu1 }
 0x852   :  { %v7424_v49 = vpop.f32.mrb[213].mxu1  ;;  %v7461_v1 = vsel %vm5810_vm2, %v15801_v15, -inf }
 0x853   :  { %v15802_v30 = vpop.f32.mrb[214].mxu1  ;;  %v7455_v28 = vsel %vm5810_vm2, %v7424_v49, -inf }
 0x854   :  { %7456 = vmax.xlane.f32.xlu1 %v7455_v28  ;;  %v7427_v0 = vpop.f32.mrb[215].mxu1  ;;  %v7464_v63 = vsel %vm5810_vm2, %v15802_v30, -inf }
 0x855   :  { %v7458_v47 = vsel %vm5810_vm2, %v7427_v0, -inf }
 0x856   :  { %7459 = vmax.xlane.f32.xlu0 %v7458_v47  ;;  %v23547_v47 = vld [vmem:[#allocation12_spill] sm:$0xff] }
 0x858   :  { %7465 = vmax.xlane.f32.xlu1 %v7464_v63  ;;  %v17555_v63 = vld [vmem:[%s23464_s8 + $0x78] ss:$12 sps:$4 sm:$0xff]  }
 0x859   :  { %v15805_v46 = vpop.f32.mrb[216].mxu1 }
 0x85a   :  { %7462 = vmax.xlane.f32.xlu0 %v7461_v1  ;;  %v7440_v52 = vpop.f32.mrb[217].mxu1  ;;  %v7473_v34 = vsel %vm5810_vm2, %v15805_v46, -inf  ;;  %v17560_v1 = vld [vmem:[%s23464_s8 + $0x94] ss:$12 sps:$4 sm:$0xff]  }
 0x85b   :  { %v15806_v41 = vpop.f32.mrb[218].mxu1  ;;  %v7467_v45 = vsel %vm5810_vm2, %v7440_v52, -inf }
 0x85c   :  { %v7443_v51 = vpop.f32.mrb[219].mxu1  ;;  %v7476_v13 = vsel %vm5810_vm2, %v15806_v41, -inf }
 0x85d   :  { %v7470_v23 = vsel %vm5810_vm2, %v7443_v51, -inf }
 0x85e   :  { %7468 = vmax.xlane.f32.xlu0 %v7467_v45  ;;  %7471 = vmax.xlane.f32.xlu1 %v7470_v23 }
 0x862   :  { %7474 = vmax.xlane.f32.xlu0 %v7473_v34  ;;  %7477 = vmax.xlane.f32.xlu1 %v7476_v13 }
 0x8e1   :  { %v7457_v20 = vpop.xlane.xlu1 %7456 }
 0x8e2   :  { %v7479_v2 = vsub.f32 %v7424_v49, %v7457_v20 }
 0x8e3   :  { %v7460_v59 = vpop.xlane.xlu0 %7459 }
 0x8e4   :  { %v7480_v29 = vsub.f32 %v7427_v0, %v7460_v59  ;;  %v7487_v14 = vmul.f32 1.442695, %v7479_v2 }
 0x8e5   :  { %v7466_v56 = vpop.xlane.xlu1 %7465 }
 0x8e6   :  { %v7482_v3 = vsub.f32 %v15802_v30, %v7466_v56  ;;  %v7489_v18 = vmul.f32 1.442695, %v7480_v29 }
 0x8e7   :  { %v7463_v22 = vpop.xlane.xlu0 %7462 }
 0x8e8   :  { %v7493_v32 = vmul.f32 1.442695, %v7482_v3  ;;  %v7481_v35 = vsub.f32 %v15801_v15, %v7463_v22 }
 0x8ea   :  { %17873 = vpow2.f32 %v7493_v32  ;;  %v7491_v37 = vmul.f32 1.442695, %v7481_v35 }
 0x8eb   :  { %17875 = vpow2.f32 %v7489_v18  ;;  %v7472_v61 = vpop.xlane.xlu1 %7471  ;;  %v7469_v50 = vpop.xlane.xlu0 %7468 }
 0x8ec   :  { %17877 = vpow2.f32 %v7491_v37  ;;  %v7484_v39 = vsub.f32 %v7443_v51, %v7472_v61  ;;  %v7483_v31 = vsub.f32 %v7440_v52, %v7469_v50  ;;  %v17558_v52 = vld [vmem:[%s23464_s8 + $0x90] ss:$12 sps:$4 sm:$0xff]  }
 0x8ed   :  { %17879 = vpow2.f32 %v7487_v14 }
 0x8ee   :  { %v7497_v44 = vmul.f32 1.442695, %v7484_v39  ;;  %v7495_v11 = vmul.f32 1.442695, %v7483_v31 }
 0x8ef   :  { %v7478_v33 = vpop.xlane.xlu1 %7477  ;;  %v7475_v6 = vpop.xlane.xlu0 %7474 }
 0x8f0   :  { %v7486_v54 = vsub.f32 %v15806_v41, %v7478_v33  ;;  %v7485_v10 = vsub.f32 %v15805_v46, %v7475_v6  ;;  %v17557_v46 = vld [vmem:[%s23464_s8 + $0x7c] ss:$12 sps:$4 sm:$0xff]  }
 0x8f1   :  { %7970 = vmatprep.subr.bf16.mxu0 %v17557_v46 }
 0x8f2   :  { %v7501_v57 = vmul.f32 1.442695, %v7486_v54  ;;  %v7499_v58 = vmul.f32 1.442695, %v7485_v10  ;;  %7971 = vmatpush1.bf16.msra.mxu0 %v17555_v63 }
 0x8f3   :  { %7972 = vmatprep.subr.bf16.mxu0 %v17560_v1 }
 0x8f4   :  { %v21262_v12 = vpop.eup %17873  ;;  %17881 = vpow2.f32 %v7501_v57 }
 0x8f5   :  { %v21264_v4 = vpop.eup %17875  ;;  %17883 = vpow2.f32 %v7499_v58  ;;  %v7512_v17 = vsel %vm5810_vm2, %v21262_v12, 0.0 }
 0x8f6   :  { %v17878_v16 = vpop.eup %17877  ;;  %17885 = vpow2.f32 %v7497_v44  ;;  %7513 = vadd.xlane.f32.xlu1 %v7512_v17  ;;  %v7506_v62 = vsel %vm5810_vm2, %v21264_v4, 0.0  ;;  %7973 = vmatpush1.bf16.msra.mxu0 %v17558_v52 }
 0x8f7   :  { %17887 = vpow2.f32 %v7495_v11  ;;  %v7509_v38 = vsel %vm5810_vm2, %v17878_v16, 0.0  ;;  %v17880_v26 = vpop.eup %17879 }
 0x8f8   :  { %7510 = vadd.xlane.f32.xlu0 %v7509_v38  ;;  %v7503_v9 = vsel %vm5810_vm2, %v17880_v26, 0.0 }
 0x8fa   :  { %7507 = vadd.xlane.f32.xlu1 %v7506_v62 }
 0x8fc   :  { %7504 = vadd.xlane.f32.xlu0 %v7503_v9 }
 0x8fe   :  { %v21272_v43 = vpop.eup %17881 }
 0x8ff   :  { %v21274_v7 = vpop.eup %17883  ;;  %v7524_v36 = vsel %vm5810_vm2, %v21272_v43, 0.0 }
 0x900   :  { %v17886_v15 = vpop.eup %17885  ;;  %7525 = vadd.xlane.f32.xlu1 %v7524_v36  ;;  %v7521_v49 = vsel %vm5810_vm2, %v21274_v7, 0.0 }
 0x901   :  { %v17888_v30 = vpop.eup %17887  ;;  %7522 = vadd.xlane.f32.xlu0 %v7521_v49  ;;  %v7518_v28 = vsel %vm5810_vm2, %v17886_v15, 0.0 }
 0x902   :  { %v7515_v0 = vsel %vm5810_vm2, %v17888_v30, 0.0 }
 0x904   :  { %7519 = vadd.xlane.f32.xlu1 %v7518_v28 }
 0x905   :  { %7516 = vadd.xlane.f32.xlu0 %v7515_v0 }
 0x915   :  { %7635 = vrot.lane.b32.xlu1 %v20695_v42, %s18262_s28 }
 0x919   :  { %7627 = vrot.lane.b32.xlu1 %v20407_v25, %s18262_s28 }
 0x91b   :  { %7547 = vrot.lane.b32.xlu0 %v20685_v19, %s18263_s20 }
 0x91d   :  { %7631 = vrot.lane.b32.xlu1 %v20423_v21, %s18262_s28 }
 0x91f   :  { %7629 = vrot.lane.b32.xlu0 %v20415_v48, %s18262_s28 }
 0x923   :  { %7633 = vrot.lane.b32.xlu0 %v23547_v47, %s18262_s28 }
 0x983   :  { %v7514_v41 = vpop.xlane.xlu1 %7513 }
 0x985   :  { %v7511_v51 = vpop.xlane.xlu0 %7510 }
 0x986   :  { %17889 = vrcp.f32 %v7511_v51 }
 0x987   :  { %v7508_v45 = vpop.xlane.xlu1 %7507 }
 0x988   :  { %17891 = vrcp.f32 %v7508_v45 }
 0x989   :  { %17893 = vrcp.f32 %v7514_v41  ;;  %v7505_v23 = vpop.xlane.xlu0 %7504 }
 0x98a   :  { %17895 = vrcp.f32 %v7505_v23 }
 0x98d   :  { %v7526_v34 = vpop.xlane.xlu1 %7525 }
 0x98e   :  { %v7523_v13 = vpop.xlane.xlu0 %7522  ;;  %17897 = vrcp.f32 %v7526_v34 }
 0x98f   :  { %17899 = vrcp.f32 %v7523_v13 }
 0x990   :  { %v17890_v20 = vpop.eup %17889 }
 0x991   :  { %v7520_v59 = vpop.xlane.xlu1 %7519  ;;  %v7537_v18 = vmul.f32 %v17890_v20, %v17878_v16 }
 0x992   :  { %v17892_v29 = vpop.eup %17891  ;;  %17901 = vrcp.f32 %v7520_v59  ;;  %v7517_v56 = vpop.xlane.xlu0 %7516 }
 0x993   :  { %v17894_v2 = vpop.eup %17893  ;;  %17903 = vrcp.f32 %v7517_v56  ;;  %v7536_v32 = vmul.f32 %v17892_v29, %v21264_v4 }
 0x994   :  { %v17896_v3 = vpop.eup %17895  ;;  %v7538_v14 = vmul.f32 %v17894_v2, %v21262_v12 }
 0x995   :  { %v7535_v22 = vmul.f32 %v17896_v3, %v17880_v26  ;;  %v7636_v61 = vpop.permute.xlu1 %7635  ;;  %v5664_v26 = vld [vmem:[%s23464_s8 + $0xa8] sm:$0xff] }
 0x996   :  { %v7548_v35 = vpop.permute.xlu0 %7547  ;;  %v7544_v39 = vpack.c.bf16 %v7538_v14, %v7537_v18  ;;  %v7650_v58 = vsel %vm5729_vm1, %v7636_v61, 0  ;;  %v14666_v62 = vcombine.high %v5664_v26, %v5664_v26  ;;  %v14665_v9 = vcombine.low %v5664_v26, %v5664_v26 }
 0x997   :  { %15807 = vmatprep.subr.bf16.mxu1 %v7548_v35  ;;  %v7543_v37 = vpack.c.bf16 %v7536_v32, %v7535_v22 }
 0x998   :  { %15808 = vmatpush3.bf16.msra.mxu1 %v7548_v35  ;;  %v17898_v50 = vpop.eup %17897  ;;  %14668 = vmatprep.subr.msk.bf16.mxu0 %vm6862_vm4, %v14666_v62 }
 0x999   :  { %16736 = vmatprep.subr.msk.bf16.mxu1 %vm5729_vm1, %v7636_v61  ;;  %15809 = vmatprep.mubr.msk.bf16.mxu1 %vm5810_vm2, %v7543_v37  ;;  %v17900_v31 = vpop.eup %17899  ;;  %v7542_v44 = vmul.f32 %v17898_v50, %v21272_v43  ;;  %v7628_v4 = vpop.permute.xlu1 %7627  ;;  %v7962_v43 = vsel %vm6862_vm4, %v14665_v9, 0 }
 0x99a   :  { %v7541_v10 = vmul.f32 %v17900_v31, %v21274_v7  ;;  %v7630_v17 = vpop.permute.xlu0 %7629  ;;  %7975 = vmatpush1.bf16.msra.mxu0 %v7962_v43 }
 0x99b   :  { %15810 = vmatmul.mubr.msk.bf16.vlgmr.msra.gmra.mrb[220].mxu1 %vm5810_vm2, %v7544_v39 }
 0x99c   :  { %v17902_v33 = vpop.eup %17901  ;;  %v7546_v12 = vpack.c.bf16 %v7542_v44, %v7541_v10 }
 0x99d   :  { %v17904_v6 = vpop.eup %17903  ;;  %v7540_v54 = vmul.f32 %v17902_v33, %v17886_v15  ;;  %v7632_v16 = vpop.permute.xlu1 %7631 }
 0x99e   :  { %v7539_v57 = vmul.f32 %v17904_v6, %v17888_v30  ;;  %v7634_v38 = vpop.permute.xlu0 %7633 }
 0x9a0   :  { %v7545_v11 = vpack.c.bf16 %v7540_v54, %v7539_v57 }
 0x9a1   :  { %15818 = vmatpush3.bf16.xpose.msra.mxu1 %v7650_v58 }
 0x9a2   :  { %15813 = vmatprep.mubr.msk.bf16.mxu1 %vm5810_vm2, %v7545_v11 }
 0x9a3   :  { %15814 = vmatmul.mubr.msk.bf16.gmra.mrb[224].mxu1 %vm5810_vm2, %v7546_v12 }
 0x9a4   :  { %15819 = vmatprep.mubr.msk.bf16.mxu1 %vm5729_vm1, %v7628_v4 }
 0x9ab   :  { %15820 = vmatmul.mubr.msk.bf16.vlgmr.msra.gmra.mrb[228].mxu1 %vm5729_vm1, %v7630_v17 }
 0x9ac   :  { %15823 = vmatprep.mubr.msk.bf16.mxu1 %vm5729_vm1, %v7632_v16 }
 0x9b3   :  { %15824 = vmatmul.mubr.msk.bf16.gmra.mrb[232].mxu1 %vm5729_vm1, %v7634_v38 }
 0xa6e   :  { %v15811_v7 = vpop.f32.mrb[220].mxu1 }
 0xa6f   :  { %v7596_v36 = vpop.f32.mrb[221].mxu1 }
 0xa70   :  { %v15812_v15 = vpop.f32.mrb[222].mxu1 }
 0xa71   :  { %v21325_v49 = vpack.c.bf16 %v15812_v15, %v15811_v7  ;;  %v7599_v30 = vpop.f32.mrb[223].mxu1 }
 0xa72   :  { %v21327_v28 = vpack.c.bf16 %v7599_v30, %v7596_v36 }
 0xa74   :  { %14669 = vmatmul.mubr.msk.bf16.vlgmr.msra.gmra.mrb[48].mxu0 %vm5729_vm1, %v21327_v28 }
 0xa75   :  { %8012 = vmatprep.mubr.bf16.mxu0 %v23546_v53 }
 0xa76   :  { %v15815_v0 = vpop.f32.mrb[224].mxu1 }
 0xa77   :  { %v7612_v63 = vpop.f32.mrb[225].mxu1 }
 0xa78   :  { %v15816_v46 = vpop.f32.mrb[226].mxu1 }
 0xa79   :  { %v21332_v1 = vpack.c.bf16 %v15816_v46, %v15815_v0  ;;  %v7615_v52 = vpop.f32.mrb[227].mxu1 }
 0xa7a   :  { %v21334_v41 = vpack.c.bf16 %v7615_v52, %v7612_v63 }
 0xa7c   :  { %14670 = vmatmul.mubr.msk.bf16.gmra.mrb[52].mxu0 %vm5729_vm1, %v21325_v49 }
 0xa7d   :  { %8022 = vmatprep.mubr.bf16.mxu0 %v23546_v53 }
 0xa7e   :  { %v15821_v51 = vpop.f32.mrb[228].mxu1 }
 0xa7f   :  { %v7686_v45 = vpop.f32.mrb[229].mxu1  ;;  %v7723_v56 = vsel %vm5810_vm2, %v15821_v51, -inf }
 0xa80   :  { %v15822_v23 = vpop.f32.mrb[230].mxu1  ;;  %v7717_v34 = vsel %vm5810_vm2, %v7686_v45, -inf }
 0xa81   :  { %7718 = vmax.xlane.f32.xlu1 %v7717_v34  ;;  %v7689_v13 = vpop.f32.mrb[231].mxu1  ;;  %v7726_v59 = vsel %vm5810_vm2, %v15822_v23, -inf }
 0xa82   :  { %v7720_v20 = vsel %vm5810_vm2, %v7689_v13, -inf }
 0xa83   :  { %7721 = vmax.xlane.f32.xlu0 %v7720_v20 }
 0xa84   :  { %14671 = vmatmul.mubr.msk.bf16.gmra.mrb[56].mxu0 %vm5729_vm1, %v21334_v41 }
 0xa85   :  { %7727 = vmax.xlane.f32.xlu1 %v7726_v59  ;;  %8032 = vmatprep.mubr.bf16.mxu0 %v23546_v53 }
 0xa86   :  { %v15825_v29 = vpop.f32.mrb[232].mxu1 }
 0xa87   :  { %7724 = vmax.xlane.f32.xlu0 %v7723_v56  ;;  %v7702_v2 = vpop.f32.mrb[233].mxu1  ;;  %v7735_v35 = vsel %vm5810_vm2, %v15825_v29, -inf }
 0xa88   :  { %v15826_v3 = vpop.f32.mrb[234].mxu1  ;;  %v7729_v22 = vsel %vm5810_vm2, %v7702_v2, -inf }
 0xa89   :  { %v7705_v18 = vpop.f32.mrb[235].mxu1  ;;  %v7738_v14 = vsel %vm5810_vm2, %v15826_v3, -inf }
 0xa8a   :  { %v7732_v32 = vsel %vm5810_vm2, %v7705_v18, -inf }
 0xa8b   :  { %7730 = vmax.xlane.f32.xlu0 %v7729_v22  ;;  %7733 = vmax.xlane.f32.xlu1 %v7732_v32  ;;  %v23550_v22 = vld [vmem:[#allocation6_spill] sm:$0xff]  ;;  %v23551_v32 = vld [vmem:[#allocation7_spill] sm:$0xff] }
 0xa8c   :  { %14672 = vmatmul.mubr.msk.bf16.gmra.mrb[60].mxu0 %vm5729_vm1, %v21332_v1 }
 0xa8d   :  { %8042 = vmatprep.mubr.bf16.mxu0 %v23546_v53 }
 0xa8f   :  { %7736 = vmax.xlane.f32.xlu0 %v7735_v35  ;;  %7739 = vmax.xlane.f32.xlu1 %v7738_v14  ;;  %v23552_v35 = vld [vmem:[#allocation8_spill] sm:$0xff]  ;;  %v23554_v14 = vld [vmem:[#allocation9_spill] sm:$0xff] }
 0xb0e   :  { %v7719_v37 = vpop.xlane.xlu1 %7718 }
 0xb0f   :  { %v7741_v31 = vsub.f32 %v7686_v45, %v7719_v37  ;;  %v23555_v37 = vld [vmem:[#allocation10_spill] sm:$0xff] }
 0xb10   :  { %v7722_v61 = vpop.xlane.xlu0 %7721 }
 0xb11   :  { %v7742_v50 = vsub.f32 %v7689_v13, %v7722_v61  ;;  %v7749_v57 = vmul.f32 1.442695, %v7741_v31 }
 0xb12   :  { %v7728_v39 = vpop.xlane.xlu1 %7727 }
 0xb13   :  { %v7751_v33 = vmul.f32 1.442695, %v7742_v50  ;;  %v7744_v6 = vsub.f32 %v15822_v23, %v7728_v39 }
 0xb14   :  { %v7725_v54 = vpop.xlane.xlu0 %7724 }
 0xb15   :  { %17905 = vpow2.f32 %v7751_v33  ;;  %v7755_v10 = vmul.f32 1.442695, %v7744_v6  ;;  %v7743_v44 = vsub.f32 %v15821_v51, %v7725_v54 }
 0xb17   :  { %17907 = vpow2.f32 %v7755_v10  ;;  %v7753_v58 = vmul.f32 1.442695, %v7743_v44 }
 0xb18   :  { %v7734_v11 = vpop.xlane.xlu1 %7733  ;;  %v7731_v12 = vpop.xlane.xlu0 %7730 }
 0xb19   :  { %17909 = vpow2.f32 %v7753_v58  ;;  %v7746_v4 = vsub.f32 %v7705_v18, %v7734_v11  ;;  %v7745_v16 = vsub.f32 %v7702_v2, %v7731_v12  ;;  %v23549_v18 = vld [vmem:[#allocation5_spill] sm:$0xff] }
 0xb1a   :  { %17911 = vpow2.f32 %v7749_v57  ;;  %v17563_v57 = vld [vmem:[%s23464_s8 + $0x80] ss:$12 sps:$4 sm:$0xff]  }
 0xb1b   :  { %v7759_v17 = vmul.f32 1.442695, %v7746_v4  ;;  %v7757_v15 = vmul.f32 1.442695, %v7745_v16 }
 0xb1c   :  { %v7740_v38 = vpop.xlane.xlu1 %7739  ;;  %v7737_v26 = vpop.xlane.xlu0 %7736 }
 0xb1d   :  { %17913 = vpow2.f32 %v7759_v17  ;;  %v7748_v62 = vsub.f32 %v15826_v3, %v7740_v38  ;;  %v7747_v9 = vsub.f32 %v15825_v29, %v7737_v26  ;;  %v23548_v3 = vld [vmem:[#allocation23_spill] sm:$0xff]  ;;  %v17564_v26 = vld [vmem:[%s23464_s8 + $0x98] ss:$12 sps:$4 sm:$0xff]  }
 0xb1f   :  { %v21353_v43 = vpop.eup %17905  ;;  %v7763_v7 = vmul.f32 1.442695, %v7748_v62  ;;  %v7761_v36 = vmul.f32 1.442695, %v7747_v9 }
 0xb20   :  { %v7768_v30 = vsel %vm5810_vm2, %v21353_v43, 0.0 }
 0xb21   :  { %v21357_v0 = vpop.eup %17907  ;;  %17915 = vpow2.f32 %v7763_v7  ;;  %7769 = vadd.xlane.f32.xlu1 %v7768_v30 }
 0xb22   :  { %17917 = vpow2.f32 %v7761_v36  ;;  %v7774_v46 = vsel %vm5810_vm2, %v21357_v0, 0.0 }
 0xb23   :  { %v21359_v63 = vpop.eup %17909  ;;  %17919 = vpow2.f32 %v7757_v15 }
 0xb24   :  { %v7771_v52 = vsel %vm5810_vm2, %v21359_v63, 0.0  ;;  %v21365_v51 = vpop.eup %17911 }
 0xb25   :  { %7775 = vadd.xlane.f32.xlu1 %v7774_v46  ;;  %7772 = vadd.xlane.f32.xlu0 %v7771_v52  ;;  %v7765_v34 = vsel %vm5810_vm2, %v21365_v51, 0.0 }
 0xb27   :  { %v21367_v45 = vpop.eup %17913 }
 0xb28   :  { %v7780_v23 = vsel %vm5810_vm2, %v21367_v45, 0.0 }
 0xb29   :  { %7781 = vadd.xlane.f32.xlu1 %v7780_v23  ;;  %7766 = vadd.xlane.f32.xlu0 %v7765_v34 }
 0xb2b   :  { %v21373_v13 = vpop.eup %17915 }
 0xb2c   :  { %v21375_v20 = vpop.eup %17917  ;;  %v7786_v59 = vsel %vm5810_vm2, %v21373_v13, 0.0 }
 0xb2d   :  { %7787 = vadd.xlane.f32.xlu1 %v7786_v59  ;;  %v7783_v29 = vsel %vm5810_vm2, %v21375_v20, 0.0  ;;  %v21381_v56 = vpop.eup %17919 }
 0xb2e   :  { %7784 = vadd.xlane.f32.xlu0 %v7783_v29  ;;  %v7777_v2 = vsel %vm5810_vm2, %v21381_v56, 0.0 }
 0xb32   :  { %7778 = vadd.xlane.f32.xlu0 %v7777_v2 }
 0xb3e   :  { %8264 = vrot.lane.b32.xlu1 %v20679_v5, %s18264_s6  ;;  %v23553_v5 = vld [vmem:[#allocation24_spill] sm:$0xff] }
 0xb42   :  { %8266 = vrot.lane.b32.xlu1 %v23548_v3, %s18264_s6 }
 0xb46   :  { %8244 = vrot.lane.b32.xlu1 %v23549_v18, %s18264_s6 }
 0xb48   :  { %7809 = vrot.lane.b32.xlu0 %v20701_v8, %s18263_s20  ;;  %s18271_s20 = smov 80  }
 0xb4a   :  { %8248 = vrot.lane.b32.xlu1 %v23550_v22, %s18264_s6 }
 0xb4c   :  { %8242 = vrot.lane.b32.xlu0 %v20372_v60, %s18264_s6  ;;  %v23556_v60 = vld [vmem:[#allocation11_spill] sm:$0xff] }
 0xb4e   :  { %8252 = vrot.lane.b32.xlu1 %v23551_v32, %s18264_s6 }
 0xb50   :  { %8246 = vrot.lane.b32.xlu0 %v20379_v27, %s18264_s6  ;;  %v23557_v27 = vld [vmem:[#allocation13_spill] sm:$0xff] }
 0xb52   :  { %8256 = vrot.lane.b32.xlu1 %v23552_v35, %s18264_s6 }
 0xb54   :  { %8250 = vrot.lane.b32.xlu0 %v20389_v40, %s18264_s6 }
 0xb56   :  { %8548 = vrot.lane.b32.xlu1 %v23553_v5, %s18264_s6 }
 0xb58   :  { %8254 = vrot.lane.b32.xlu0 %v20399_v55, %s18264_s6 }
 0xb5a   :  { %8527 = vrot.lane.b32.xlu1 %v23554_v14, %s18264_s6 }
 0xb5c   :  { %8546 = vrot.lane.b32.xlu0 %v20695_v42, %s18264_s6 }
 0xb5e   :  { %8531 = vrot.lane.b32.xlu1 %v23555_v37, %s18264_s6 }
 0xb60   :  { %8525 = vrot.lane.b32.xlu0 %v20407_v25, %s18264_s6 }
 0xb62   :  { %8535 = vrot.lane.b32.xlu1 %v23556_v60, %s18264_s6 }
 0xb64   :  { %8529 = vrot.lane.b32.xlu0 %v20415_v48, %s18264_s6 }
 0xb66   :  { %8539 = vrot.lane.b32.xlu1 %v23557_v27, %s18264_s6 }
 0xb68   :  { %8533 = vrot.lane.b32.xlu0 %v20423_v21, %s18264_s6 }
 0xb6c   :  { %8537 = vrot.lane.b32.xlu0 %v23547_v47, %s18264_s6 }
 0xbae   :  { %v7770_v40 = vpop.xlane.xlu1 %7769 }
 0xbb2   :  { %v7776_v55 = vpop.xlane.xlu1 %7775  ;;  %v7773_v61 = vpop.xlane.xlu0 %7772 }
 0xbb3   :  { %17921 = vrcp.f32 %v7776_v55 }
 0xbb4   :  { %17923 = vrcp.f32 %v7773_v61 }
 0xbb5   :  { %17925 = vrcp.f32 %v7770_v40 }
 0xbb6   :  { %v7782_v42 = vpop.xlane.xlu1 %7781  ;;  %v7767_v50 = vpop.xlane.xlu0 %7766 }
 0xbb7   :  { %17927 = vrcp.f32 %v7767_v50 }
 0xbba   :  { %v7788_v25 = vpop.xlane.xlu1 %7787 }
 0xbbb   :  { %v7785_v39 = vpop.xlane.xlu0 %7784  ;;  %17929 = vrcp.f32 %v7788_v25 }
 0xbbc   :  { %17931 = vrcp.f32 %v7785_v39 }
 0xbbd   :  { %v17922_v48 = vpop.eup %17921  ;;  %17933 = vrcp.f32 %v7782_v42 }
 0xbbe   :  { %v8265_v31 = vpop.permute.xlu1 %8264  ;;  %v17924_v33 = vpop.eup %17923  ;;  %v7800_v54 = vmul.f32 %v17922_v48, %v21357_v0  ;;  %v17565_v0 = vld [vmem:[%s23464_s8 + $0xb0] ss:$0 sps:$4 sm:$0xff]  }
 0xbbf   :  { %v7779_v21 = vpop.xlane.xlu0 %7778  ;;  %v17926_v6 = vpop.eup %17925  ;;  %v7799_v10 = vmul.f32 %v17924_v33, %v21359_v63 }
 0xbc0   :  { %17935 = vrcp.f32 %v7779_v21  ;;  %v7798_v12 = vmul.f32 %v17926_v6, %v21353_v43 }
 0xbc1   :  { %v17928_v47 = vpop.eup %17927  ;;  %v7806_v16 = vpack.c.bf16 %v7800_v54, %v7799_v10 }
 0xbc2   :  { %v8267_v44 = vpop.permute.xlu1 %8266  ;;  %v7797_v11 = vmul.f32 %v17928_v47, %v21365_v51 }
 0xbc3   :  { %v7810_v58 = vpop.permute.xlu0 %7809  ;;  %v8268_v59 = vsel %vm8258_vm5, %v8265_v31, %v8267_v44 }
 0xbc4   :  { %15827 = vmatprep.subr.bf16.mxu1 %v7810_v58  ;;  %v7805_v4 = vpack.c.bf16 %v7798_v12, %v7797_v11  ;;  %v8282_v55 = vsel %vm5729_vm1, %v8268_v59, 0 }
 0xbc5   :  { %15828 = vmatpush3.bf16.msra.mxu1 %v7810_v58  ;;  %v17930_v17 = vpop.eup %17929 }
 0xbc6   :  { %v21414_v38 = vpop.permute.xlu1 %8244  ;;  %15837 = vmatprep.subr.bf16.mxu1 %v17563_v57  ;;  %v17932_v62 = vpop.eup %17931  ;;  %15829 = vmatprep.mubr.msk.bf16.mxu1 %vm5810_vm2, %v7805_v4  ;;  %v7804_v30 = vmul.f32 %v17930_v17, %v21373_v13 }
 0xbc7   :  { %v8243_v9 = vpop.permute.xlu0 %8242  ;;  %v17934_v7 = vpop.eup %17933  ;;  %v7803_v15 = vmul.f32 %v17932_v62, %v21375_v20  ;;  %v7968_v20 = vsel %vm6862_vm4, %v17565_v0, 0 }
 0xbc8   :  { %15830 = vmatmul.mubr.msk.bf16.vlgmr.msra.gmra.mrb[236].mxu1 %vm5810_vm2, %v7806_v16  ;;  %v7802_v52 = vmul.f32 %v17934_v7, %v21367_v45  ;;  %v8259_v6 = vsel %vm8258_vm5, %v8243_v9, %v21414_v38 }
 0xbc9   :  { %15838 = vmatpush3.bf16.msra.mxu1 %v17563_v57  ;;  %v7808_v34 = vpack.c.bf16 %v7804_v30, %v7803_v15 }
 0xbca   :  { %v17936_v43 = vpop.eup %17935  ;;  %v8249_v36 = vpop.permute.xlu1 %8248  ;;  %15839 = vmatprep.subr.bf16.mxu1 %v17564_v26 }
 0xbcb   :  { %v8247_v63 = vpop.permute.xlu0 %8246  ;;  %v7801_v46 = vmul.f32 %v17936_v43, %v21381_v56 }
 0xbcc   :  { %v8260_v47 = vsel %vm8258_vm5, %v8247_v63, %v8249_v36 }
 0xbcd   :  { %15840 = vmatpush3.bf16.msra.mxu1 %v17564_v26  ;;  %v7807_v51 = vpack.c.bf16 %v7802_v52, %v7801_v46 }
 0xbce   :  { %v8253_v23 = vpop.permute.xlu1 %8252  ;;  %16737 = vmatprep.subr.msk.bf16.mxu1 %vm6862_vm4, %v17565_v0 }
 0xbcf   :  { %15833 = vmatprep.mubr.msk.bf16.mxu1 %vm5810_vm2, %v7807_v51  ;;  %v8251_v13 = vpop.permute.xlu0 %8250 }
 0xbd0   :  { %15834 = vmatmul.mubr.msk.bf16.gmra.mrb[240].mxu1 %vm5810_vm2, %v7808_v34  ;;  %v8261_v54 = vsel %vm8258_vm5, %v8251_v13, %v8253_v23 }
 0xbd1   :  { %15842 = vmatpush3.bf16.msra.mxu1 %v7968_v20  ;;  %15843 = vmatprep.mubr.msk.bf16.mxu1 %vm5729_vm1, %v21327_v28 }
 0xbd2   :  { %16738 = vmatprep.subr.msk.bf16.mxu1 %vm5729_vm1, %v8268_v59  ;;  %v8257_v45 = vpop.permute.xlu1 %8256 }
 0xbd3   :  { %v8255_v29 = vpop.permute.xlu0 %8254 }
 0xbd4   :  { %v8262_v11 = vsel %vm8258_vm5, %v8255_v29, %v8257_v45 }
 0xbd6   :  { %v8549_v56 = vpop.permute.xlu1 %8548 }
 0xbd7   :  { %v8547_v2 = vpop.permute.xlu0 %8546 }
 0xbd8   :  { %v8550_v40 = vsel %vm8258_vm5, %v8547_v2, %v8549_v56  ;;  %15844 = vmatmul.mubr.msk.bf16.vlgmr.msra.gmra.mrb[196].mxu1 %vm5729_vm1, %v21325_v49 }
 0xbd9   :  { %v8564_v61 = vsel %vm5729_vm1, %v8550_v40, 0  ;;  %15847 = vmatprep.mubr.msk.bf16.mxu1 %vm5729_vm1, %v21334_v41  ;;  %16739 = vmatprep.subr.msk.bf16.mxu0 %vm5729_vm1, %v8550_v40 }
 0xbda   :  { %15860 = vmatpush3.bf16.xpose.msra.mxu1 %v8282_v55  ;;  %15880 = vmatpush3.bf16.xpose.msra.mxu0 %v8564_v61  ;;  %v8528_v10 = vpop.permute.xlu1 %8527 }
 0xbdb   :  { %v8526_v44 = vpop.permute.xlu0 %8525 }
 0xbdc   :  { %v8541_v12 = vsel %vm8258_vm5, %v8526_v44, %v8528_v10 }
 0xbde   :  { %v8532_v57 = vpop.permute.xlu1 %8531 }
 0xbdf   :  { %v8530_v58 = vpop.permute.xlu0 %8529 }
 0xbe0   :  { %15848 = vmatmul.mubr.msk.bf16.gmra.mrb[200].mxu1 %vm5729_vm1, %v21332_v1  ;;  %v8542_v16 = vsel %vm8258_vm5, %v8530_v58, %v8532_v57 }
 0xbe2   :  { %v8536_v4 = vpop.permute.xlu1 %8535 }
 0xbe3   :  { %v8534_v17 = vpop.permute.xlu0 %8533 }
 0xbe4   :  { %v8543_v38 = vsel %vm8258_vm5, %v8534_v17, %v8536_v4 }
 0xbe6   :  { %v8540_v26 = vpop.permute.xlu1 %8539 }
 0xbe7   :  { %v8538_v62 = vpop.permute.xlu0 %8537 }
 0xbe8   :  { %v8544_v9 = vsel %vm8258_vm5, %v8538_v62, %v8540_v26 }
 0xc9b   :  { %v15831_v28 = vpop.f32.mrb[236].mxu1 }
 0xc9c   :  { %v7858_v42 = vpop.f32.mrb[237].mxu1 }
 0xc9d   :  { %v15832_v50 = vpop.f32.mrb[238].mxu1 }
 0xc9e   :  { %v7894_v25 = vpack.c.bf16 %v15832_v50, %v15831_v28  ;;  %v7861_v39 = vpop.f32.mrb[239].mxu1 }
 0xc9f   :  { %v7893_v49 = vpack.c.bf16 %v7861_v39, %v7858_v42 }
 0xca1   :  { %14673 = vmatmul.mubr.msk.bf16.gmra.mrb[64].mxu0 %vm5729_vm1, %v7893_v49  ;;  %15851 = vmatprep.mubr.msk.bf16.mxu1 %vm5729_vm1, %v7893_v49 }
 0xca2   :  { %15852 = vmatmul.mubr.msk.bf16.gmra.mrb[204].mxu1 %vm5729_vm1, %v7894_v25  ;;  %8052 = vmatprep.mubr.bf16.mxu0 %v23546_v53 }
 0xca3   :  { %v15835_v41 = vpop.f32.mrb[240].mxu1 }
 0xca4   :  { %v7874_v48 = vpop.f32.mrb[241].mxu1 }
 0xca5   :  { %v15836_v31 = vpop.f32.mrb[242].mxu1 }
 0xca6   :  { %v7896_v33 = vpack.c.bf16 %v15836_v31, %v15835_v41  ;;  %v7877_v21 = vpop.f32.mrb[243].mxu1 }
 0xca7   :  { %v7895_v1 = vpack.c.bf16 %v7877_v21, %v7874_v48 }
 0xca9   :  { %14674 = vmatmul.mubr.msk.bf16.gmra.mrb[68].mxu0 %vm5729_vm1, %v7894_v25  ;;  %15855 = vmatprep.mubr.msk.bf16.mxu1 %vm5729_vm1, %v7895_v1 }
 0xcaa   :  { %15856 = vmatmul.mubr.msk.bf16.gmra.mrb[208].mxu1 %vm5729_vm1, %v7896_v33  ;;  %8062 = vmatprep.mubr.bf16.mxu0 %v23546_v53 }
 0xcab   :  { %15861 = vmatprep.mubr.msk.bf16.mxu1 %vm5729_vm1, %v8259_v6 }
 0xcb1   :  { %14675 = vmatmul.mubr.msk.bf16.gmra.mrb[72].mxu0 %vm5729_vm1, %v7895_v1 }
 0xcb2   :  { %15862 = vmatmul.mubr.msk.bf16.vlgmr.msra.gmra.mrb[244].mxu1 %vm5729_vm1, %v8260_v47  ;;  %8072 = vmatprep.mubr.bf16.mxu0 %v23546_v53 }
 0xcb3   :  { %15865 = vmatprep.mubr.msk.bf16.mxu1 %vm5729_vm1, %v8261_v54 }
 0xcb9   :  { %14676 = vmatmul.mubr.msk.bf16.gmra.mrb[76].mxu0 %vm5729_vm1, %v7896_v33 }
 0xcba   :  { %15866 = vmatmul.mubr.msk.bf16.gmra.mrb[248].mxu1 %vm5729_vm1, %v8262_v11  ;;  %15881 = vmatprep.mubr.msk.bf16.mxu0 %vm5729_vm1, %v8541_v12 }
 0xcc1   :  { %15882 = vmatmul.mubr.msk.bf16.vlgmr.msra.gmra.mrb[80].mxu0 %vm5729_vm1, %v8542_v16 }
 0xcc2   :  { %15885 = vmatprep.mubr.msk.bf16.mxu0 %vm5729_vm1, %v8543_v38 }
 0xcc9   :  { %15886 = vmatmul.mubr.msk.bf16.gmra.mrb[84].mxu0 %vm5729_vm1, %v8544_v9 }
 0xcca   :  { %8916 = vmatprep.mubr.bf16.mxu0 %v23546_v53 }
 0xd85   :  { %v15863_v7 = vpop.f32.mrb[244].mxu1 }
 0xd86   :  { %v8318_v43 = vpop.f32.mrb[245].mxu1  ;;  %v8355_v63 = vsel %vm5810_vm2, %v15863_v7, -inf }
 0xd87   :  { %v15864_v36 = vpop.f32.mrb[246].mxu1  ;;  %v8349_v15 = vsel %vm5810_vm2, %v8318_v43, -inf }
 0xd88   :  { %8350 = vmax.xlane.f32.xlu0 %v8349_v15  ;;  %v8321_v30 = vpop.f32.mrb[247].mxu1  ;;  %v8358_v23 = vsel %vm5810_vm2, %v15864_v36, -inf }
 0xd89   :  { %v8352_v0 = vsel %vm5810_vm2, %v8321_v30, -inf }
 0xd8a   :  { %8353 = vmax.xlane.f32.xlu1 %v8352_v0 }
 0xd8c   :  { %8356 = vmax.xlane.f32.xlu0 %v8355_v63 }
 0xd8d   :  { %v15867_v46 = vpop.f32.mrb[248].mxu1 }
 0xd8e   :  { %v8334_v52 = vpop.f32.mrb[249].mxu1  ;;  %v8367_v13 = vsel %vm5810_vm2, %v15867_v46, -inf }
 0xd8f   :  { %v21478_v51 = vpop.f32.mrb[250].mxu1  ;;  %v8361_v34 = vsel %vm5810_vm2, %v8334_v52, -inf }
 0xd90   :  { %8359 = vmax.xlane.f32.xlu0 %v8358_v23  ;;  %8362 = vmax.xlane.f32.xlu1 %v8361_v34  ;;  %v8337_v20 = vpop.f32.mrb[251].mxu1  ;;  %v8370_v55 = vsel %vm5810_vm2, %v21478_v51, -inf }
 0xd91   :  { %v8364_v59 = vsel %vm5810_vm2, %v8337_v20, -inf }
 0xd94   :  { %8368 = vmax.xlane.f32.xlu1 %v8367_v13  ;;  %8365 = vmax.xlane.f32.xlu0 %v8364_v59  ;;  %v21484_v45 = vpop.f32.mrb[80].mxu0 }
 0xd95   :  { %v21486_v29 = vpop.f32.mrb[81].mxu0  ;;  %v8637_v61 = vsel %vm5810_vm2, %v21484_v45, -inf }
 0xd96   :  { %v21488_v56 = vpop.f32.mrb[82].mxu0  ;;  %v8631_v2 = vsel %vm5810_vm2, %v21486_v29, -inf }
 0xd97   :  { %v21492_v40 = vpop.f32.mrb[83].mxu0  ;;  %v8640_v41 = vsel %vm5810_vm2, %v21488_v56, -inf }
 0xd98   :  { %8371 = vmax.xlane.f32.xlu0 %v8370_v55  ;;  %8632 = vmax.xlane.f32.xlu1 %v8631_v2  ;;  %v8634_v28 = vsel %vm5810_vm2, %v21492_v40, -inf }
 0xd9c   :  { %8638 = vmax.xlane.f32.xlu1 %v8637_v61  ;;  %8635 = vmax.xlane.f32.xlu0 %v8634_v28  ;;  %v21500_v42 = vpop.f32.mrb[84].mxu0 }
 0xd9d   :  { %v21502_v50 = vpop.f32.mrb[85].mxu0  ;;  %v8649_v48 = vsel %vm5810_vm2, %v21500_v42, -inf }
 0xd9e   :  { %v21504_v25 = vpop.f32.mrb[86].mxu0  ;;  %v8643_v39 = vsel %vm5810_vm2, %v21502_v50, -inf }
 0xd9f   :  { %v21508_v49 = vpop.f32.mrb[87].mxu0  ;;  %v8652_v33 = vsel %vm5810_vm2, %v21504_v25, -inf }
 0xda0   :  { %8641 = vmax.xlane.f32.xlu0 %v8640_v41  ;;  %8644 = vmax.xlane.f32.xlu1 %v8643_v39  ;;  %v8646_v31 = vsel %vm5810_vm2, %v21508_v49, -inf }
 0xda4   :  { %8650 = vmax.xlane.f32.xlu1 %v8649_v48  ;;  %8647 = vmax.xlane.f32.xlu0 %v8646_v31 }
 0xda8   :  { %8653 = vmax.xlane.f32.xlu0 %v8652_v33 }
 0xe15   :  { %v8351_v21 = vpop.xlane.xlu0 %8350 }
 0xe16   :  { %v8373_v1 = vsub.f32 %v8318_v43, %v8351_v21 }
 0xe17   :  { %v8354_v6 = vpop.xlane.xlu1 %8353 }
 0xe18   :  { %v8381_v10 = vmul.f32 1.442695, %v8373_v1  ;;  %v8374_v57 = vsub.f32 %v8321_v30, %v8354_v6 }
 0xe19   :  { %v8357_v47 = vpop.xlane.xlu0 %8356 }
 0xe1a   :  { %v8375_v54 = vsub.f32 %v15863_v7, %v8357_v47  ;;  %v8383_v16 = vmul.f32 1.442695, %v8374_v57 }
 0xe1c   :  { %v8385_v44 = vmul.f32 1.442695, %v8375_v54 }
 0xe1d   :  { %v8363_v58 = vpop.xlane.xlu1 %8362  ;;  %v8360_v11 = vpop.xlane.xlu0 %8359 }
 0xe1e   :  { %17937 = vpow2.f32 %v8385_v44  ;;  %v8376_v12 = vsub.f32 %v15864_v36, %v8360_v11  ;;  %v8377_v4 = vsub.f32 %v8334_v52, %v8363_v58 }
 0xe1f   :  { %17939 = vpow2.f32 %v8381_v10 }
 0xe20   :  { %v8387_v17 = vmul.f32 1.442695, %v8376_v12  ;;  %v8389_v9 = vmul.f32 1.442695, %v8377_v4 }
 0xe21   :  { %v8369_v38 = vpop.xlane.xlu1 %8368  ;;  %v8366_v26 = vpop.xlane.xlu0 %8365 }
 0xe22   :  { %v8379_v62 = vsub.f32 %v15867_v46, %v8369_v38  ;;  %17941 = vpow2.f32 %v8387_v17  ;;  %v8378_v15 = vsub.f32 %v8337_v20, %v8366_v26 }
 0xe23   :  { %17943 = vpow2.f32 %v8383_v16 }
 0xe24   :  { %v8393_v43 = vmul.f32 1.442695, %v8379_v62  ;;  %v8391_v52 = vmul.f32 1.442695, %v8378_v15 }
 0xe25   :  { %v8633_v7 = vpop.xlane.xlu1 %8632  ;;  %v8372_v0 = vpop.xlane.xlu0 %8371 }
 0xe26   :  { %17945 = vpow2.f32 %v8393_v43  ;;  %v8380_v30 = vsub.f32 %v21478_v51, %v8372_v0  ;;  %v8655_v51 = vsub.f32 %v21486_v29, %v8633_v7 }
 0xe27   :  { %17947 = vpow2.f32 %v8389_v9 }
 0xe28   :  { %v21519_v63 = vpop.eup %17937  ;;  %v8395_v36 = vmul.f32 1.442695, %v8380_v30  ;;  %v8663_v48 = vmul.f32 1.442695, %v8655_v51 }
 0xe29   :  { %v8639_v23 = vpop.xlane.xlu1 %8638  ;;  %v8636_v34 = vpop.xlane.xlu0 %8635  ;;  %v8403_v46 = vsel %vm5810_vm2, %v21519_v63, 0.0 }
 0xe2a   :  { %v21523_v13 = vpop.eup %17939  ;;  %v8657_v59 = vsub.f32 %v21484_v45, %v8639_v23  ;;  %8404 = vadd.xlane.f32.xlu1 %v8403_v46  ;;  %17949 = vpow2.f32 %v8395_v36  ;;  %v8656_v47 = vsub.f32 %v21492_v40, %v8636_v34 }
 0xe2b   :  { %17951 = vpow2.f32 %v8391_v52  ;;  %v8397_v55 = vsel %vm5810_vm2, %v21523_v13, 0.0 }
 0xe2c   :  { %v21526_v20 = vpop.eup %17941  ;;  %v8667_v2 = vmul.f32 1.442695, %v8657_v59  ;;  %v8665_v58 = vmul.f32 1.442695, %v8656_v47 }
 0xe2d   :  { %v8642_v61 = vpop.xlane.xlu0 %8641  ;;  %v8406_v28 = vsel %vm5810_vm2, %v21526_v20, 0.0  ;;  %v21533_v39 = vpop.eup %17943 }
 0xe2e   :  { %8398 = vadd.xlane.f32.xlu1 %v8397_v55  ;;  %8407 = vadd.xlane.f32.xlu0 %v8406_v28  ;;  %v8645_v41 = vpop.xlane.xlu1 %8644  ;;  %17953 = vpow2.f32 %v8667_v2  ;;  %v8658_v31 = vsub.f32 %v21488_v56, %v8642_v61  ;;  %v8400_v21 = vsel %vm5810_vm2, %v21533_v39, 0.0  ;;  %v17568_v55 = vld [vmem:[%s23464_s8 + $0xb4] ss:$12 sps:$4 sm:$0xff]   ;;  %v17574_v61 = vld [vmem:[%s23464_s8 + $0xd0] ss:$12 sps:$4 sm:$0xff]  }
 0xe2f   :  { %17955 = vpow2.f32 %v8663_v48  ;;  %v8659_v34 = vsub.f32 %v21502_v50, %v8645_v41  ;;  %v17570_v50 = vld [vmem:[%s23464_s8 + $0xb8] ss:$12 sps:$4 sm:$0xff]  }
 0xe30   :  { %v21535_v45 = vpop.eup %17945  ;;  %v8669_v54 = vmul.f32 1.442695, %v8658_v31  ;;  %8884 = vmatprep.subr.bf16.mxu0 %v17570_v50  ;;  %v17572_v28 = vld [vmem:[%s23464_s8 + $0xcc] ss:$12 sps:$4 sm:$0xff]   ;;  %v5674_v41 = vld [vmem:[%s23464_s8 + $0xe4] sm:$0xff] }
 0xe31   :  { %v8415_v29 = vsel %vm5810_vm2, %v21535_v45, 0.0  ;;  %v21540_v33 = vpop.eup %17947  ;;  %v8648_v1 = vpop.xlane.xlu0 %8647  ;;  %v8671_v59 = vmul.f32 1.442695, %v8659_v34  ;;  %8885 = vmatpush1.bf16.msra.mxu0 %v17568_v55  ;;  %v14708_v48 = vcombine.high %v5674_v41, %v5674_v41  ;;  %v14707_v31 = vcombine.low %v5674_v41, %v5674_v41 }
 0xe32   :  { %8416 = vadd.xlane.f32.xlu1 %v8415_v29  ;;  %8401 = vadd.xlane.f32.xlu0 %v8400_v21  ;;  %v8409_v56 = vsel %vm5810_vm2, %v21540_v33, 0.0  ;;  %v8651_v10 = vpop.xlane.xlu1 %8650  ;;  %17957 = vpow2.f32 %v8669_v54 }
 0xe33   :  { %v8661_v11 = vsub.f32 %v21500_v42, %v8651_v10  ;;  %17959 = vpow2.f32 %v8665_v58  ;;  %v8660_v42 = vsub.f32 %v21508_v49, %v8648_v1  ;;  %8886 = vmatprep.subr.bf16.mxu0 %v17574_v61  ;;  %v8876_v29 = vsel %vm6862_vm4, %v14707_v31, 0 }
 0xe34   :  { %v21544_v6 = vpop.eup %17949 }
 0xe35   :  { %v8418_v44 = vsel %vm5810_vm2, %v21544_v6, 0.0  ;;  %v21551_v57 = vpop.eup %17951  ;;  %v8654_v12 = vpop.xlane.xlu0 %8653  ;;  %v8675_v17 = vmul.f32 1.442695, %v8661_v11  ;;  %v8673_v15 = vmul.f32 1.442695, %v8660_v42  ;;  %8887 = vmatpush1.bf16.msra.mxu0 %v17572_v28 }
 0xe36   :  { %8410 = vadd.xlane.f32.xlu1 %v8409_v56  ;;  %8419 = vadd.xlane.f32.xlu0 %v8418_v44  ;;  %v8412_v40 = vsel %vm5810_vm2, %v21551_v57, 0.0  ;;  %v8662_v16 = vsub.f32 %v21504_v25, %v8654_v12 }
 0xe37   :  { %17961 = vpow2.f32 %v8675_v17  ;;  %14710 = vmatprep.subr.msk.bf16.mxu0 %vm6862_vm4, %v14708_v48 }
 0xe38   :  { %v21556_v4 = vpop.eup %17953  ;;  %v8677_v62 = vmul.f32 1.442695, %v8662_v16 }
 0xe39   :  { %v8685_v38 = vsel %vm5810_vm2, %v21556_v4, 0.0  ;;  %v21561_v26 = vpop.eup %17955  ;;  %8889 = vmatpush1.bf16.msra.mxu0 %v8876_v29 }
 0xe3a   :  { %8413 = vadd.xlane.f32.xlu0 %v8412_v40  ;;  %v8679_v9 = vsel %vm5810_vm2, %v21561_v26, 0.0  ;;  %17963 = vpow2.f32 %v8677_v62 }
 0xe3b   :  { %17965 = vpow2.f32 %v8673_v15 }
 0xe3c   :  { %v21566_v43 = vpop.eup %17957  ;;  %17967 = vpow2.f32 %v8671_v59 }
 0xe3d   :  { %v8688_v25 = vsel %vm5810_vm2, %v21566_v43, 0.0  ;;  %v21570_v7 = vpop.eup %17959 }
 0xe3e   :  { %8686 = vadd.xlane.f32.xlu0 %v8685_v38  ;;  %v8682_v49 = vsel %vm5810_vm2, %v21570_v7, 0.0 }
 0xe41   :  { %v21575_v0 = vpop.eup %17961 }
 0xe42   :  { %8680 = vadd.xlane.f32.xlu0 %v8679_v9  ;;  %v8697_v30 = vsel %vm5810_vm2, %v21575_v0, 0.0 }
 0xe44   :  { %v21579_v36 = vpop.eup %17963 }
 0xe45   :  { %v8700_v52 = vsel %vm5810_vm2, %v21579_v36, 0.0  ;;  %v21583_v23 = vpop.eup %17965 }
 0xe46   :  { %8689 = vadd.xlane.f32.xlu0 %v8688_v25  ;;  %v8694_v46 = vsel %vm5810_vm2, %v21583_v23, 0.0  ;;  %v21588_v51 = vpop.eup %17967 }
 0xe47   :  { %8441 = vrot.lane.b32.xlu1 %v20685_v19, %s18265_s15  ;;  %v8691_v2 = vsel %vm5810_vm2, %v21588_v51, 0.0 }
 0xe4a   :  { %8683 = vadd.xlane.f32.xlu0 %v8682_v49 }
 0xe4e   :  { %8698 = vadd.xlane.f32.xlu0 %v8697_v30 }
 0xe52   :  { %8701 = vadd.xlane.f32.xlu0 %v8700_v52 }
 0xe56   :  { %8695 = vadd.xlane.f32.xlu0 %v8694_v46 }
 0xe6b   :  { %8692 = vadd.xlane.f32.xlu1 %v8691_v2 }
 0xe6c   :  { %8723 = vrot.lane.b32.xlu0 %v20701_v8, %s18265_s15  ;;  %s18273_s15 = smov 40  }
 0xe70   :  { %9152 = vrot.lane.b32.xlu0 %v23548_v3, %s18266_s16 }
 0xe74   :  { %9146 = vrot.lane.b32.xlu0 %v23550_v22, %s18266_s16 }
 0xe78   :  { %9148 = vrot.lane.b32.xlu0 %v23551_v32, %s18266_s16 }
 0xe7c   :  { %9144 = vrot.lane.b32.xlu1 %v23549_v18, %s18266_s16  ;;  %9150 = vrot.lane.b32.xlu0 %v23552_v35, %s18266_s16 }
 0xe80   :  { %9411 = vrot.lane.b32.xlu1 %v23554_v14, %s18266_s16  ;;  %9419 = vrot.lane.b32.xlu0 %v23553_v5, %s18266_s16 }
 0xe84   :  { %9415 = vrot.lane.b32.xlu1 %v23556_v60, %s18266_s16  ;;  %9413 = vrot.lane.b32.xlu0 %v23555_v37, %s18266_s16 }
 0xe88   :  { %9417 = vrot.lane.b32.xlu0 %v23557_v27, %s18266_s16 }
 0xeb7   :  { %v8405_v21 = vpop.xlane.xlu1 %8404 }
 0xebb   :  { %v8399_v1 = vpop.xlane.xlu1 %8398  ;;  %v8408_v47 = vpop.xlane.xlu0 %8407 }
 0xebc   :  { %17969 = vrcp.f32 %v8408_v47  ;;  %v17566_v47 = vld [vmem:[%s23464_s8 + $0xbc] ss:$12 sps:$4 sm:$0xff]  }
 0xebd   :  { %17971 = vrcp.f32 %v8399_v1 }
 0xebe   :  { %17973 = vrcp.f32 %v8405_v21 }
 0xebf   :  { %v8417_v54 = vpop.xlane.xlu1 %8416  ;;  %v8402_v56 = vpop.xlane.xlu0 %8401 }
 0xec0   :  { %17975 = vrcp.f32 %v8402_v56 }
 0xec3   :  { %v8411_v10 = vpop.xlane.xlu1 %8410  ;;  %v8420_v44 = vpop.xlane.xlu0 %8419 }
 0xec4   :  { %17977 = vrcp.f32 %v8420_v44 }
 0xec5   :  { %17979 = vrcp.f32 %v8411_v10 }
 0xec6   :  { %v17970_v11 = vpop.eup %17969  ;;  %17981 = vrcp.f32 %v8417_v54 }
 0xec7   :  { %v8442_v58 = vpop.permute.xlu1 %8441  ;;  %v8414_v12 = vpop.xlane.xlu0 %8413  ;;  %v8432_v38 = vmul.f32 %v17970_v11, %v21526_v20 }
 0xec8   :  { %15869 = vmatprep.subr.bf16.mxu1 %v8442_v58  ;;  %v17972_v40 = vpop.eup %17971  ;;  %17983 = vrcp.f32 %v8414_v12 }
 0xec9   :  { %15870 = vmatpush3.bf16.msra.mxu1 %v8442_v58  ;;  %v17974_v17 = vpop.eup %17973  ;;  %v8429_v62 = vmul.f32 %v17972_v40, %v21523_v13 }
 0xeca   :  { %v17976_v16 = vpop.eup %17975  ;;  %v8431_v15 = vmul.f32 %v17974_v17, %v21519_v63 }
 0xecb   :  { %v8687_v42 = vpop.xlane.xlu0 %8686  ;;  %v8430_v9 = vmul.f32 %v17976_v16, %v21533_v39 }
 0xecc   :  { %v8438_v49 = vpack.c.bf16 %v8432_v38, %v8431_v15 }
 0xecd   :  { %v8437_v25 = vpack.c.bf16 %v8430_v9, %v8429_v62 }
 0xece   :  { %v17978_v30 = vpop.eup %17977 }
 0xecf   :  { %15871 = vmatprep.mubr.msk.bf16.mxu1 %vm5810_vm2, %v8437_v25  ;;  %v8681_v52 = vpop.xlane.xlu0 %8680  ;;  %v17980_v34 = vpop.eup %17979  ;;  %v8436_v20 = vmul.f32 %v17978_v30, %v21544_v6 }
 0xed0   :  { %15872 = vmatmul.mubr.msk.bf16.vlgmr.msra.gmra.mrb[252].mxu1 %vm5810_vm2, %v8438_v49  ;;  %v17982_v46 = vpop.eup %17981  ;;  %v8433_v13 = vmul.f32 %v17980_v34, %v21540_v33  ;;  %17985 = vrcp.f32 %v8681_v52 }
 0xed1   :  { %v8435_v63 = vmul.f32 %v17982_v46, %v21535_v45 }
 0xed2   :  { %v17984_v59 = vpop.eup %17983 }
 0xed3   :  { %v8690_v2 = vpop.xlane.xlu0 %8689  ;;  %v8434_v39 = vmul.f32 %v17984_v59, %v21551_v57  ;;  %v8440_v55 = vpack.c.bf16 %v8436_v20, %v8435_v63 }
 0xed5   :  { %v8439_v50 = vpack.c.bf16 %v8434_v39, %v8433_v13 }
 0xed7   :  { %15875 = vmatprep.mubr.msk.bf16.mxu1 %vm5810_vm2, %v8439_v50  ;;  %v8684_v61 = vpop.xlane.xlu0 %8683 }
 0xed8   :  { %17987 = vrcp.f32 %v8684_v61  ;;  %15876 = vmatmul.mubr.msk.bf16.gmra.mrb[0].mxu1 %vm5810_vm2, %v8440_v55 }
 0xed9   :  { %17989 = vrcp.f32 %v8690_v2 }
 0xeda   :  { %17991 = vrcp.f32 %v8687_v42  ;;  %v17986_v41 = vpop.eup %17985 }
 0xedb   :  { %v8699_v28 = vpop.xlane.xlu0 %8698  ;;  %v8711_v57 = vmul.f32 %v17986_v41, %v21561_v26  ;;  %v17567_v26 = vld [vmem:[%s23464_s8 + $0xd4] ss:$12 sps:$4 sm:$0xff]  }
 0xedf   :  { %v8702_v6 = vpop.xlane.xlu0 %8701 }
 0xee0   :  { %17993 = vrcp.f32 %v8702_v6 }
 0xee2   :  { %v17988_v48 = vpop.eup %17987 }
 0xee3   :  { %v17990_v33 = vpop.eup %17989  ;;  %v8696_v31 = vpop.xlane.xlu0 %8695  ;;  %v8712_v45 = vmul.f32 %v17988_v48, %v21570_v7 }
 0xee4   :  { %v17992_v29 = vpop.eup %17991  ;;  %v8714_v1 = vmul.f32 %v17990_v33, %v21566_v43  ;;  %v17571_v43 = vld [vmem:[%s23464_s8 + $0xec] ss:$0 sps:$4 sm:$0xff]   ;;  %17995 = vrcp.f32 %v8696_v31 }
 0xee5   :  { %v8719_v21 = vpack.c.bf16 %v8712_v45, %v8711_v57  ;;  %v8713_v56 = vmul.f32 %v17992_v29, %v21556_v4  ;;  %v8882_v4 = vsel %vm6862_vm4, %v17571_v43, 0  ;;  %17997 = vrcp.f32 %v8699_v28 }
 0xee7   :  { %15891 = vmatprep.mubr.msk.bf16.mxu1 %vm5810_vm2, %v8719_v21  ;;  %v8724_v54 = vpop.permute.xlu0 %8723  ;;  %v8720_v10 = vpack.c.bf16 %v8714_v1, %v8713_v56 }
 0xee8   :  { %15889 = vmatprep.subr.bf16.mxu1 %v8724_v54 }
 0xee9   :  { %15890 = vmatpush3.bf16.msra.mxu1 %v8724_v54 }
 0xeea   :  { %15899 = vmatprep.subr.bf16.mxu1 %v17566_v47  ;;  %v17994_v17 = vpop.eup %17993 }
 0xeeb   :  { %v9153_v7 = vpop.permute.xlu0 %9152  ;;  %v8718_v62 = vmul.f32 %v17994_v17, %v21579_v36 }
 0xeec   :  { %15892 = vmatmul.mubr.msk.bf16.vlgmr.msra.gmra.mrb[4].mxu1 %vm5810_vm2, %v8720_v10 }
 0xeed   :  { %15900 = vmatpush3.bf16.msra.mxu1 %v17566_v47 }
 0xeee   :  { %15901 = vmatprep.subr.bf16.mxu1 %v17567_v26  ;;  %v17996_v16 = vpop.eup %17995 }
 0xeef   :  { %v21647_v44 = vpop.permute.xlu0 %9146  ;;  %v17998_v38 = vpop.eup %17997  ;;  %v8716_v15 = vmul.f32 %v17996_v16, %v21583_v23 }
 0xef0   :  { %v8717_v25 = vmul.f32 %v17998_v38, %v21575_v0  ;;  %v9167_v0 = vsel %vm5729_vm1, %v9153_v7, 0 }
 0xef1   :  { %15902 = vmatpush3.bf16.msra.mxu1 %v17567_v26 }
 0xef2   :  { %16740 = vmatprep.subr.msk.bf16.mxu1 %vm6862_vm4, %v17571_v43  ;;  %v8722_v30 = vpack.c.bf16 %v8718_v62, %v8717_v25 }
 0xef3   :  { %v21651_v58 = vpop.permute.xlu0 %9148 }
 0xef5   :  { %15904 = vmatpush3.bf16.msra.mxu1 %v8882_v4 }
 0xef6   :  { %16741 = vmatprep.subr.msk.bf16.mxu1 %vm5729_vm1, %v9153_v7 }
 0xef7   :  { %v21654_v11 = vpop.permute.xlu0 %9150 }
 0xef8   :  { %v8693_v12 = vpop.xlane.xlu1 %8692 }
 0xef9   :  { %17999 = vrcp.f32 %v8693_v12 }
 0xefb   :  { %v9420_v40 = vpop.permute.xlu0 %9419 }
 0xefc   :  { %16742 = vmatprep.subr.msk.bf16.mxu0 %vm5729_vm1, %v9420_v40  ;;  %v9434_v36 = vsel %vm5729_vm1, %v9420_v40, 0  ;;  %v9145_v1 = vpop.permute.xlu1 %9144 }
 0xeff   :  { %v9414_v54 = vpop.permute.xlu0 %9413 }
 0xf00   :  { %v9412_v47 = vpop.permute.xlu1 %9411 }
 0xf03   :  { %v18000_v42 = vpop.eup %17999  ;;  %v9418_v10 = vpop.permute.xlu0 %9417 }
 0xf04   :  { %v8715_v9 = vmul.f32 %v18000_v42, %v21588_v51  ;;  %v9416_v56 = vpop.permute.xlu1 %9415 }
 0xf06   :  { %v8721_v49 = vpack.c.bf16 %v8716_v15, %v8715_v9 }
 0xf08   :  { %15895 = vmatprep.mubr.msk.bf16.mxu1 %vm5810_vm2, %v8721_v49 }
 0xf09   :  { %15896 = vmatmul.mubr.msk.bf16.gmra.mrb[8].mxu1 %vm5810_vm2, %v8722_v30 }
 0xfa3   :  { %v15873_v52 = vpop.f32.mrb[252].mxu1 }
 0xfa4   :  { %v8490_v34 = vpop.f32.mrb[253].mxu1 }
 0xfa5   :  { %v15874_v46 = vpop.f32.mrb[254].mxu1 }
 0xfa6   :  { %v8804_v59 = vpack.c.bf16 %v15874_v46, %v15873_v52  ;;  %v8493_v20 = vpop.f32.mrb[255].mxu1 }
 0xfa7   :  { %v8803_v2 = vpack.c.bf16 %v8493_v20, %v8490_v34 }
 0xfa9   :  { %14711 = vmatmul.mubr.msk.bf16.vlgmr.msra.gmra.mrb[48].mxu0 %vm5729_vm1, %v8803_v2  ;;  %15905 = vmatprep.mubr.msk.bf16.mxu1 %vm5729_vm1, %v8803_v2 }
 0xfaa   :  { %15942 = vmatpush3.bf16.xpose.msra.mxu0 %v9434_v36  ;;  %15906 = vmatmul.mubr.msk.bf16.vlgmr.msra.gmra.mrb[196].mxu1 %vm5729_vm1, %v8804_v59 }
 0xfab   :  { %15922 = vmatpush3.bf16.xpose.msra.mxu1 %v9167_v0  ;;  %v15877_v23 = vpop.f32.mrb[0].mxu1  ;;  %8926 = vmatprep.mubr.bf16.mxu0 %v23546_v53 }
 0xfac   :  { %v8506_v51 = vpop.f32.mrb[1].mxu1 }
 0xfad   :  { %v15878_v13 = vpop.f32.mrb[2].mxu1 }
 0xfae   :  { %v8806_v39 = vpack.c.bf16 %v15878_v13, %v15877_v23  ;;  %v8509_v63 = vpop.f32.mrb[3].mxu1 }
 0xfaf   :  { %v8805_v50 = vpack.c.bf16 %v8509_v63, %v8506_v51 }
 0xfb1   :  { %14712 = vmatmul.mubr.msk.bf16.gmra.mrb[52].mxu0 %vm5729_vm1, %v8804_v59  ;;  %15909 = vmatprep.mubr.msk.bf16.mxu1 %vm5729_vm1, %v8805_v50 }
 0xfb2   :  { %15910 = vmatmul.mubr.msk.bf16.gmra.mrb[200].mxu1 %vm5729_vm1, %v8806_v39  ;;  %8936 = vmatprep.mubr.bf16.mxu0 %v23546_v53 }
 0xfb9   :  { %14713 = vmatmul.mubr.msk.bf16.gmra.mrb[56].mxu0 %vm5729_vm1, %v8805_v50  ;;  %v23558_v50 = vld [vmem:[#allocation25_spill] sm:$0xff] }
 0xfba   :  { %8946 = vmatprep.mubr.bf16.mxu0 %v23546_v53 }
 0xfbf   :  { %v15893_v55 = vpop.f32.mrb[4].mxu1 }
 0xfc0   :  { %v8772_v61 = vpop.f32.mrb[5].mxu1 }
 0xfc1   :  { %v15894_v28 = vpop.f32.mrb[6].mxu1  ;;  %14714 = vmatmul.mubr.msk.bf16.gmra.mrb[60].mxu0 %vm5729_vm1, %v8806_v39 }
 0xfc2   :  { %v8808_v6 = vpack.c.bf16 %v15894_v28, %v15893_v55  ;;  %v8775_v41 = vpop.f32.mrb[7].mxu1  ;;  %8956 = vmatprep.mubr.bf16.mxu0 %v23546_v53 }
 0xfc3   :  { %v8807_v48 = vpack.c.bf16 %v8775_v41, %v8772_v61 }
 0xfc5   :  { %15913 = vmatprep.mubr.msk.bf16.mxu1 %vm5729_vm1, %v8807_v48 }
 0xfc6   :  { %15914 = vmatmul.mubr.msk.bf16.gmra.mrb[204].mxu1 %vm5729_vm1, %v8808_v6 }
 0xfc9   :  { %14715 = vmatmul.mubr.msk.bf16.gmra.mrb[64].mxu0 %vm5729_vm1, %v8807_v48 }
 0xfca   :  { %8966 = vmatprep.mubr.bf16.mxu0 %v23546_v53 }
 0xfd1   :  { %14716 = vmatmul.mubr.msk.bf16.gmra.mrb[68].mxu0 %vm5729_vm1, %v8808_v6 }
 0xfd2   :  { %8976 = vmatprep.mubr.bf16.mxu0 %v23546_v53 }
 0xfdc   :  { %v15897_v33 = vpop.f32.mrb[8].mxu1 }
 0xfdd   :  { %v8788_v31 = vpop.f32.mrb[9].mxu1 }
 0xfde   :  { %v15898_v57 = vpop.f32.mrb[10].mxu1 }
 0xfdf   :  { %v8810_v45 = vpack.c.bf16 %v15898_v57, %v15897_v33  ;;  %v8791_v29 = vpop.f32.mrb[11].mxu1 }
 0xfe0   :  { %v8809_v21 = vpack.c.bf16 %v8791_v29, %v8788_v31 }
 0xfe2   :  { %14717 = vmatmul.mubr.msk.bf16.gmra.mrb[72].mxu0 %vm5729_vm1, %v8809_v21  ;;  %15917 = vmatprep.mubr.msk.bf16.mxu1 %vm5729_vm1, %v8809_v21 }
 0xfe3   :  { %15918 = vmatmul.mubr.msk.bf16.gmra.mrb[208].mxu1 %vm5729_vm1, %v8810_v45  ;;  %8986 = vmatprep.mubr.bf16.mxu0 %v23546_v53 }
 0xfe4   :  { %15923 = vmatprep.mubr.msk.bf16.mxu1 %vm5729_vm1, %v9145_v1 }
 0xfea   :  { %14718 = vmatmul.mubr.msk.bf16.gmra.mrb[76].mxu0 %vm5729_vm1, %v8810_v45 }
 0xfeb   :  { %15924 = vmatmul.mubr.msk.bf16.vlgmr.msra.gmra.mrb[12].mxu1 %vm5729_vm1, %v21647_v44  ;;  %15943 = vmatprep.mubr.msk.bf16.mxu0 %vm5729_vm1, %v9412_v47 }
 0xfec   :  { %15927 = vmatprep.mubr.msk.bf16.mxu1 %vm5729_vm1, %v21651_v58 }
 0xff2   :  { %15944 = vmatmul.mubr.msk.bf16.vlgmr.msra.gmra.mrb[88].mxu0 %vm5729_vm1, %v9414_v54 }
 0xff3   :  { %15928 = vmatmul.mubr.msk.bf16.gmra.mrb[16].mxu1 %vm5729_vm1, %v21654_v11  ;;  %15947 = vmatprep.mubr.msk.bf16.mxu0 %vm5729_vm1, %v9416_v56 }
 0xffa   :  { %15948 = vmatmul.mubr.msk.bf16.gmra.mrb[92].mxu0 %vm5729_vm1, %v9418_v10 }
 0xffb   :  { %9790 = vmatprep.mubr.bf16.mxu0 %v23546_v53 }
0x10be   :  { %v15925_v26 = vpop.f32.mrb[12].mxu1 }
0x10bf   :  { %v9203_v7 = vpop.f32.mrb[13].mxu1  ;;  %v9240_v43 = vsel %vm5810_vm2, %v15925_v26, -inf }
0x10c0   :  { %9241 = vmax.xlane.f32.xlu0 %v9240_v43  ;;  %v15926_v44 = vpop.f32.mrb[14].mxu1  ;;  %v9234_v4 = vsel %vm5810_vm2, %v9203_v7, -inf }
0x10c1   :  { %9235 = vmax.xlane.f32.xlu1 %v9234_v4  ;;  %v9206_v58 = vpop.f32.mrb[15].mxu1  ;;  %v9243_v11 = vsel %vm5810_vm2, %v15926_v44, -inf }
0x10c2   :  { %v9237_v12 = vsel %vm5810_vm2, %v9206_v58, -inf }
0x10c4   :  { %9238 = vmax.xlane.f32.xlu0 %v9237_v12 }
0x10c5   :  { %9244 = vmax.xlane.f32.xlu1 %v9243_v11  ;;  %v21704_v40 = vpop.f32.mrb[88].mxu0 }
0x10c6   :  { %v15929_v17 = vpop.f32.mrb[16].mxu1  ;;  %v21706_v16 = vpop.f32.mrb[89].mxu0  ;;  %v9507_v20 = vsel %vm5810_vm2, %v21704_v40, -inf }
0x10c7   :  { %v21708_v38 = vpop.f32.mrb[17].mxu1  ;;  %v21710_v42 = vpop.f32.mrb[90].mxu0  ;;  %v9252_v62 = vsel %vm5810_vm2, %v15929_v17, -inf  ;;  %v9501_v0 = vsel %vm5810_vm2, %v21706_v16, -inf }
0x10c8   :  { %9253 = vmax.xlane.f32.xlu0 %v9252_v62  ;;  %v15930_v9 = vpop.f32.mrb[18].mxu1  ;;  %v21713_v15 = vpop.f32.mrb[91].mxu0  ;;  %v9246_v30 = vsel %vm5810_vm2, %v21708_v38, -inf  ;;  %v9510_v36 = vsel %vm5810_vm2, %v21710_v42, -inf }
0x10c9   :  { %v21715_v25 = vpop.f32.mrb[19].mxu1  ;;  %v9255_v49 = vsel %vm5810_vm2, %v15930_v9, -inf  ;;  %v9504_v23 = vsel %vm5810_vm2, %v21713_v15, -inf }
0x10ca   :  { %9256 = vmax.xlane.f32.xlu1 %v9255_v49  ;;  %v9249_v34 = vsel %vm5810_vm2, %v21715_v25, -inf }
0x10cc   :  { %9247 = vmax.xlane.f32.xlu0 %v9246_v30 }
0x10cd   :  { %v21720_v52 = vpop.f32.mrb[92].mxu0 }
0x10ce   :  { %9250 = vmax.xlane.f32.xlu1 %v9249_v34  ;;  %v21724_v46 = vpop.f32.mrb[93].mxu0  ;;  %v9519_v51 = vsel %vm5810_vm2, %v21720_v52, -inf }
0x10cf   :  { %v21726_v59 = vpop.f32.mrb[94].mxu0  ;;  %v9513_v39 = vsel %vm5810_vm2, %v21724_v46, -inf }
0x10d0   :  { %9508 = vmax.xlane.f32.xlu0 %v9507_v20  ;;  %v21730_v2 = vpop.f32.mrb[95].mxu0  ;;  %v9522_v13 = vsel %vm5810_vm2, %v21726_v59, -inf }
0x10d1   :  { %v9516_v63 = vsel %vm5810_vm2, %v21730_v2, -inf }
0x10d2   :  { %9511 = vmax.xlane.f32.xlu1 %v9510_v36 }
0x10d4   :  { %9502 = vmax.xlane.f32.xlu0 %v9501_v0 }
0x10d6   :  { %9505 = vmax.xlane.f32.xlu1 %v9504_v23 }
0x10d8   :  { %9520 = vmax.xlane.f32.xlu0 %v9519_v51 }
0x10da   :  { %9523 = vmax.xlane.f32.xlu1 %v9522_v13 }
0x10dc   :  { %9514 = vmax.xlane.f32.xlu0 %v9513_v39 }
0x10de   :  { %9517 = vmax.xlane.f32.xlu1 %v9516_v63 }
0x10ef   :  { %9329 = vrot.lane.b32.xlu1 %v23558_v50, %s18267_s27 }
0x10f2   :  { %9327 = vrot.lane.b32.xlu0 %v20685_v19, %s18267_s27 }
0x114d   :  { %v9242_v55 = vpop.xlane.xlu0 %9241 }
0x114e   :  { %v9260_v61 = vsub.f32 %v15925_v26, %v9242_v55  ;;  %v9236_v28 = vpop.xlane.xlu1 %9235 }
0x114f   :  { %v9258_v6 = vsub.f32 %v9203_v7, %v9236_v28 }
0x1150   :  { %v9270_v41 = vmul.f32 1.442695, %v9260_v61 }
0x1151   :  { %v9266_v48 = vmul.f32 1.442695, %v9258_v6  ;;  %v9239_v33 = vpop.xlane.xlu0 %9238 }
0x1152   :  { %18001 = vpow2.f32 %v9270_v41  ;;  %v9259_v31 = vsub.f32 %v9206_v58, %v9239_v33  ;;  %v9245_v57 = vpop.xlane.xlu1 %9244 }
0x1153   :  { %v9261_v45 = vsub.f32 %v15926_v44, %v9245_v57  ;;  %18003 = vpow2.f32 %v9266_v48 }
0x1154   :  { %v9268_v29 = vmul.f32 1.442695, %v9259_v31 }
0x1155   :  { %v9272_v21 = vmul.f32 1.442695, %v9261_v45  ;;  %v9254_v1 = vpop.xlane.xlu0 %9253 }
0x1156   :  { %v9264_v47 = vsub.f32 %v15929_v17, %v9254_v1 }
0x1157   :  { %18005 = vpow2.f32 %v9272_v21  ;;  %v9257_v54 = vpop.xlane.xlu1 %9256 }
0x1158   :  { %v9278_v56 = vmul.f32 1.442695, %v9264_v47  ;;  %v9265_v19 = vsub.f32 %v15930_v9, %v9257_v54  ;;  %18007 = vpow2.f32 %v9268_v29 }
0x1159   :  { %v9248_v10 = vpop.xlane.xlu0 %9247 }
0x115a   :  { %18009 = vpow2.f32 %v9278_v56  ;;  %v9280_v26 = vmul.f32 1.442695, %v9265_v19  ;;  %v9262_v7 = vsub.f32 %v21708_v38, %v9248_v10 }
0x115b   :  { %v9251_v43 = vpop.xlane.xlu1 %9250 }
0x115c   :  { %v21751_v4 = vpop.eup %18001  ;;  %v9274_v58 = vmul.f32 1.442695, %v9262_v7  ;;  %v9263_v44 = vsub.f32 %v21715_v25, %v9251_v43  ;;  %18011 = vpow2.f32 %v9280_v26 }
0x115d   :  { %v9509_v12 = vpop.xlane.xlu0 %9508  ;;  %v9288_v11 = vsel %vm5810_vm2, %v21751_v4, 0.0  ;;  %v21756_v17 = vpop.eup %18003 }
0x115e   :  { %18013 = vpow2.f32 %v9274_v58  ;;  %v9276_v62 = vmul.f32 1.442695, %v9263_v44  ;;  %v9527_v9 = vsub.f32 %v21704_v40, %v9509_v12  ;;  %9289 = vadd.xlane.f32.xlu0 %v9288_v11  ;;  %v9282_v20 = vsel %vm5810_vm2, %v21756_v17, 0.0 }
0x115f   :  { %v9512_v49 = vpop.xlane.xlu1 %9511 }
0x1160   :  { %v9537_v38 = vmul.f32 1.442695, %v9527_v9  ;;  %v9528_v30 = vsub.f32 %v21710_v42, %v9512_v49  ;;  %18015 = vpow2.f32 %v9276_v62 }
0x1161   :  { %v21760_v34 = vpop.eup %18005  ;;  %v9503_v25 = vpop.xlane.xlu0 %9502 }
0x1162   :  { %18017 = vpow2.f32 %v9537_v38  ;;  %v9539_v36 = vmul.f32 1.442695, %v9528_v30  ;;  %v9525_v0 = vsub.f32 %v21706_v16, %v9503_v25  ;;  %9283 = vadd.xlane.f32.xlu0 %v9282_v20  ;;  %v9291_v40 = vsel %vm5810_vm2, %v21760_v34, 0.0  ;;  %v21767_v23 = vpop.eup %18007 }
0x1163   :  { %v9506_v51 = vpop.xlane.xlu1 %9505  ;;  %9292 = vadd.xlane.f32.xlu1 %v9291_v40  ;;  %v9285_v28 = vsel %vm5810_vm2, %v21767_v23, 0.0  ;;  %v17579_v40 = vld [vmem:[%s23464_s8 + $0xf4] ss:$12 sps:$4 sm:$0xff]  }
0x1164   :  { %v21769_v42 = vpop.eup %18009  ;;  %v9533_v13 = vmul.f32 1.442695, %v9525_v0  ;;  %v9526_v39 = vsub.f32 %v21713_v15, %v9506_v51  ;;  %18019 = vpow2.f32 %v9539_v36  ;;  %v23559_v0 = vld [vmem:[#allocation26_spill] sm:$0xff]  ;;  %v17577_v51 = vld [vmem:[%s23464_s8 + $0xf0] ss:$12 sps:$4 sm:$0xff]   ;;  %9758 = vmatprep.subr.bf16.mxu0 %v17579_v40 }
0x1165   :  { %v9521_v63 = vpop.xlane.xlu0 %9520  ;;  %v9300_v55 = vsel %vm5810_vm2, %v21769_v42, 0.0  ;;  %9759 = vmatpush1.bf16.msra.mxu0 %v17577_v51 }
0x1166   :  { %18021 = vpow2.f32 %v9533_v13  ;;  %v9535_v16 = vmul.f32 1.442695, %v9526_v39  ;;  %v9531_v61 = vsub.f32 %v21720_v52, %v9521_v63  ;;  %9301 = vadd.xlane.f32.xlu0 %v9300_v55  ;;  %v21777_v6 = vpop.eup %18011  ;;  %v17582_v13 = vld [vmem:[%s23464_s8 + $0x10c] ss:$12 sps:$4 sm:$0xff]   ;;  %v17580_v39 = vld [vmem:[%s23464_s8 + $0x108] ss:$12 sps:$4 sm:$0xff]  }
0x1167   :  { %v9524_v41 = vpop.xlane.xlu1 %9523  ;;  %9286 = vadd.xlane.f32.xlu1 %v9285_v28  ;;  %v9303_v45 = vsel %vm5810_vm2, %v21777_v6, 0.0  ;;  %9760 = vmatprep.subr.bf16.mxu0 %v17582_v13  ;;  %v5684_v63 = vld [vmem:[%s23464_s8 + $0x120] sm:$0xff] }
0x1168   :  { %v21779_v48 = vpop.eup %18013  ;;  %v9532_v15 = vsub.f32 %v21726_v59, %v9524_v41  ;;  %18023 = vpow2.f32 %v9535_v16  ;;  %v9545_v33 = vmul.f32 1.442695, %v9531_v61  ;;  %v14749_v55 = vcombine.low %v5684_v63, %v5684_v63 }
0x1169   :  { %v9515_v31 = vpop.xlane.xlu0 %9514  ;;  %v9294_v57 = vsel %vm5810_vm2, %v21779_v48, 0.0  ;;  %9761 = vmatpush1.bf16.msra.mxu0 %v17580_v39 }
0x116a   :  { %v9529_v52 = vsub.f32 %v21724_v46, %v9515_v31  ;;  %9295 = vadd.xlane.f32.xlu0 %v9294_v57  ;;  %v21787_v29 = vpop.eup %18015  ;;  %v9547_v47 = vmul.f32 1.442695, %v9532_v15  ;;  %18025 = vpow2.f32 %v9545_v33  ;;  %v9750_v16 = vsel %vm6862_vm4, %v14749_v55, 0 }
0x116b   :  { %v9518_v21 = vpop.xlane.xlu1 %9517  ;;  %9304 = vadd.xlane.f32.xlu1 %v9303_v45  ;;  %v9297_v19 = vsel %vm5810_vm2, %v21787_v29, 0.0 }
0x116c   :  { %v21789_v1 = vpop.eup %18017  ;;  %v9541_v59 = vmul.f32 1.442695, %v9529_v52  ;;  %v9530_v54 = vsub.f32 %v21730_v2, %v9518_v21 }
0x116d   :  { %v9555_v56 = vsel %vm5810_vm2, %v21789_v1, 0.0  ;;  %v9328_v26 = vpop.permute.xlu0 %9327 }
0x116e   :  { %18027 = vpow2.f32 %v9541_v59  ;;  %v9543_v46 = vmul.f32 1.442695, %v9530_v54  ;;  %9556 = vadd.xlane.f32.xlu0 %v9555_v56  ;;  %v21796_v10 = vpop.eup %18019 }
0x116f   :  { %v9330_v7 = vpop.permute.xlu1 %9329  ;;  %9298 = vadd.xlane.f32.xlu1 %v9297_v19  ;;  %18029 = vpow2.f32 %v9547_v47  ;;  %v9558_v44 = vsel %vm5810_vm2, %v21796_v10, 0.0 }
0x1170   :  { %v21798_v43 = vpop.eup %18021  ;;  %v9332_v2 = vsel %vm9331_vm6, %v9328_v26, %v9330_v7  ;;  %18031 = vpow2.f32 %v9543_v46 }
0x1171   :  { %15931 = vmatprep.subr.bf16.mxu1 %v9332_v2  ;;  %v9549_v58 = vsel %vm5810_vm2, %v21798_v43, 0.0 }
0x1172   :  { %9550 = vadd.xlane.f32.xlu0 %v9549_v58  ;;  %15932 = vmatpush3.bf16.msra.mxu1 %v9332_v2  ;;  %v21805_v12 = vpop.eup %18023 }
0x1173   :  { %9559 = vadd.xlane.f32.xlu1 %v9558_v44  ;;  %v9552_v11 = vsel %vm5810_vm2, %v21805_v12, 0.0 }
0x1174   :  { %v21809_v62 = vpop.eup %18025 }
0x1175   :  { %v9567_v30 = vsel %vm5810_vm2, %v21809_v62, 0.0 }
0x1177   :  { %9553 = vadd.xlane.f32.xlu1 %v9552_v11 }
0x1178   :  { %v21811_v9 = vpop.eup %18027 }
0x1179   :  { %v9561_v49 = vsel %vm5810_vm2, %v21811_v9, 0.0  ;;  %v21815_v38 = vpop.eup %18029 }
0x117a   :  { %9562 = vadd.xlane.f32.xlu0 %v9561_v49  ;;  %v21819_v25 = vpop.eup %18031  ;;  %v9570_v20 = vsel %vm5810_vm2, %v21815_v38, 0.0 }
0x117b   :  { %9568 = vadd.xlane.f32.xlu1 %v9567_v30  ;;  %v9564_v36 = vsel %vm5810_vm2, %v21819_v25, 0.0 }
0x117e   :  { %9571 = vadd.xlane.f32.xlu0 %v9570_v20 }
0x117f   :  { %9565 = vadd.xlane.f32.xlu1 %v9564_v36 }
0x1190   :  { %9596 = vrot.lane.b32.xlu1 %v23559_v0, %s18267_s27 }
0x1194   :  { %10024 = vrot.lane.b32.xlu1 %v23548_v3, %s18268_s30  ;;  %9594 = vrot.lane.b32.xlu0 %v20701_v8, %s18267_s27  ;;  %v14750_v8 = vcombine.high %v5684_v63, %v5684_v63 }
0x1196   :  { %14752 = vmatprep.subr.msk.bf16.mxu0 %vm6862_vm4, %v14750_v8 }
0x1197   :  { %9763 = vmatpush1.bf16.msra.mxu0 %v9750_v16 }
0x1198   :  { %10018 = vrot.lane.b32.xlu1 %v23550_v22, %s18268_s30  ;;  %10016 = vrot.lane.b32.xlu0 %v23549_v18, %s18268_s30 }
0x119c   :  { %10022 = vrot.lane.b32.xlu1 %v23552_v35, %s18268_s30  ;;  %10020 = vrot.lane.b32.xlu0 %v23551_v32, %s18268_s30 }
0x11a0   :  { %10278 = vrot.lane.b32.xlu1 %v23554_v14, %s18268_s30  ;;  %10286 = vrot.lane.b32.xlu0 %v23553_v5, %s18268_s30 }
0x11a4   :  { %10282 = vrot.lane.b32.xlu1 %v23556_v60, %s18268_s30  ;;  %10280 = vrot.lane.b32.xlu0 %v23555_v37, %s18268_s30 }
0x11a8   :  { %10284 = vrot.lane.b32.xlu0 %v23557_v27, %s18268_s30 }
0x11eb   :  { %v9290_v61 = vpop.xlane.xlu0 %9289 }
0x11ef   :  { %v9284_v28 = vpop.xlane.xlu0 %9283 }
0x11f0   :  { %v9293_v41 = vpop.xlane.xlu1 %9292 }
0x11f1   :  { %18033 = vrcp.f32 %v9293_v41 }
0x11f2   :  { %18035 = vrcp.f32 %v9284_v28 }
0x11f3   :  { %v9302_v15 = vpop.xlane.xlu0 %9301  ;;  %18037 = vrcp.f32 %v9290_v61 }
0x11f4   :  { %v9287_v33 = vpop.xlane.xlu1 %9286 }
0x11f5   :  { %18039 = vrcp.f32 %v9287_v33 }
0x11f7   :  { %v9296_v31 = vpop.xlane.xlu0 %9295 }
0x11f8   :  { %v9305_v57 = vpop.xlane.xlu1 %9304 }
0x11f9   :  { %18041 = vrcp.f32 %v9305_v57 }
0x11fa   :  { %18043 = vrcp.f32 %v9296_v31 }
0x11fb   :  { %v9557_v52 = vpop.xlane.xlu0 %9556  ;;  %v18034_v45 = vpop.eup %18033  ;;  %18045 = vrcp.f32 %v9302_v15  ;;  %v17583_v15 = vld [vmem:[%s23464_s8 + $0xf8] ss:$12 sps:$4 sm:$0xff]  }
0x11fc   :  { %v9299_v21 = vpop.xlane.xlu1 %9298  ;;  %v18036_v47 = vpop.eup %18035  ;;  %v9317_v56 = vmul.f32 %v18034_v45, %v21760_v34 }
0x11fd   :  { %18047 = vrcp.f32 %v9299_v21  ;;  %v18038_v59 = vpop.eup %18037  ;;  %v9314_v26 = vmul.f32 %v18036_v47, %v21756_v17 }
0x11fe   :  { %v9316_v2 = vmul.f32 %v18038_v59, %v21751_v4 }
0x11ff   :  { %v18040_v54 = vpop.eup %18039  ;;  %v9551_v46 = vpop.xlane.xlu0 %9550 }
0x1200   :  { %v9560_v19 = vpop.xlane.xlu1 %9559  ;;  %v9315_v7 = vmul.f32 %v18040_v54, %v21767_v23  ;;  %18049 = vrcp.f32 %v9551_v46  ;;  %v9323_v44 = vpack.c.bf16 %v9317_v56, %v9316_v2  ;;  %v17587_v46 = vld [vmem:[%s23464_s8 + $0x128] ss:$0 sps:$4 sm:$0xff]  }
0x1201   :  { %18051 = vrcp.f32 %v9560_v19 }
0x1202   :  { %v9322_v58 = vpack.c.bf16 %v9315_v7, %v9314_v26  ;;  %18053 = vrcp.f32 %v9557_v52 }
0x1203   :  { %v18042_v11 = vpop.eup %18041 }
0x1204   :  { %v9554_v49 = vpop.xlane.xlu1 %9553  ;;  %15933 = vmatprep.mubr.msk.bf16.mxu1 %vm5810_vm2, %v9322_v58  ;;  %v18044_v30 = vpop.eup %18043  ;;  %v9321_v17 = vmul.f32 %v18042_v11, %v21777_v6 }
0x1205   :  { %18055 = vrcp.f32 %v9554_v49  ;;  %15934 = vmatmul.mubr.msk.bf16.vlgmr.msra.gmra.mrb[20].mxu1 %vm5810_vm2, %v9323_v44  ;;  %v18046_v34 = vpop.eup %18045  ;;  %v9318_v4 = vmul.f32 %v18044_v30, %v21779_v48 }
0x1206   :  { %v9320_v51 = vmul.f32 %v18046_v34, %v21769_v42 }
0x1207   :  { %v18048_v20 = vpop.eup %18047  ;;  %v9563_v23 = vpop.xlane.xlu0 %9562 }
0x1208   :  { %v9569_v36 = vpop.xlane.xlu1 %9568  ;;  %v9319_v40 = vmul.f32 %v18048_v20, %v21787_v29  ;;  %18057 = vrcp.f32 %v9563_v23  ;;  %v9325_v39 = vpack.c.bf16 %v9321_v17, %v9320_v51 }
0x1209   :  { %18059 = vrcp.f32 %v9569_v36 }
0x120a   :  { %v9324_v13 = vpack.c.bf16 %v9319_v40, %v9318_v4  ;;  %v18050_v8 = vpop.eup %18049 }
0x120b   :  { %v9572_v63 = vpop.xlane.xlu0 %9571  ;;  %v18052_v16 = vpop.eup %18051  ;;  %v9581_v28 = vmul.f32 %v18050_v8, %v21798_v43  ;;  %v17585_v43 = vld [vmem:[%s23464_s8 + $0x110] ss:$12 sps:$4 sm:$0xff]  }
0x120c   :  { %18061 = vrcp.f32 %v9572_v63  ;;  %v9566_v55 = vpop.xlane.xlu1 %9565  ;;  %15937 = vmatprep.mubr.msk.bf16.mxu1 %vm5810_vm2, %v9324_v13  ;;  %v18054_v6 = vpop.eup %18053  ;;  %v9584_v29 = vmul.f32 %v18052_v16, %v21796_v10 }
0x120d   :  { %18063 = vrcp.f32 %v9566_v55  ;;  %15938 = vmatmul.mubr.msk.bf16.gmra.mrb[24].mxu1 %vm5810_vm2, %v9325_v39  ;;  %v9583_v31 = vmul.f32 %v18054_v6, %v21789_v1 }
0x120f   :  { %v18056_v48 = vpop.eup %18055  ;;  %v9595_v61 = vpop.permute.xlu0 %9594  ;;  %v9590_v10 = vpack.c.bf16 %v9584_v29, %v9583_v31 }
0x1210   :  { %v9597_v42 = vpop.permute.xlu1 %9596  ;;  %v9582_v41 = vmul.f32 %v18056_v48, %v21805_v12 }
0x1211   :  { %v9598_v33 = vsel %vm9331_vm6, %v9595_v61, %v9597_v42 }
0x1212   :  { %15951 = vmatprep.subr.bf16.mxu1 %v9598_v33  ;;  %v9589_v57 = vpack.c.bf16 %v9582_v41, %v9581_v28  ;;  %v18058_v45 = vpop.eup %18057 }
0x1213   :  { %15952 = vmatpush3.bf16.msra.mxu1 %v9598_v33  ;;  %v21876_v52 = vpop.permute.xlu0 %10016  ;;  %v18060_v12 = vpop.eup %18059  ;;  %v9585_v54 = vmul.f32 %v18058_v45, %v21811_v9 }
0x1214   :  { %15953 = vmatprep.mubr.msk.bf16.mxu1 %vm5810_vm2, %v9589_v57  ;;  %15961 = vmatprep.subr.bf16.mxu1 %v17583_v15  ;;  %v9587_v19 = vmul.f32 %v18060_v12, %v21809_v62  ;;  %v10025_v9 = vpop.permute.xlu1 %10024 }
0x1215   :  { %v10039_v34 = vsel %vm5729_vm1, %v10025_v9, 0 }
0x1216   :  { %v18062_v21 = vpop.eup %18061  ;;  %15954 = vmatmul.mubr.msk.bf16.vlgmr.msra.gmra.mrb[28].mxu1 %vm5810_vm2, %v9590_v10 }
0x1217   :  { %v18064_v47 = vpop.eup %18063  ;;  %15962 = vmatpush3.bf16.msra.mxu1 %v17583_v15  ;;  %v21883_v1 = vpop.permute.xlu0 %10020  ;;  %v9588_v59 = vmul.f32 %v18062_v21, %v21815_v38  ;;  %v9756_v38 = vsel %vm6862_vm4, %v17587_v46, 0 }
0x1218   :  { %15963 = vmatprep.subr.bf16.mxu1 %v17585_v43  ;;  %v9586_v56 = vmul.f32 %v18064_v47, %v21819_v25  ;;  %v10019_v28 = vpop.permute.xlu1 %10018 }
0x1219   :  { %v9592_v2 = vpack.c.bf16 %v9588_v59, %v9587_v19 }
0x121a   :  { %v9591_v26 = vpack.c.bf16 %v9586_v56, %v9585_v54 }
0x121b   :  { %15964 = vmatpush3.bf16.msra.mxu1 %v17585_v43  ;;  %v10287_v7 = vpop.permute.xlu0 %10286 }
0x121c   :  { %15957 = vmatprep.mubr.msk.bf16.mxu1 %vm5810_vm2, %v9591_v26  ;;  %16745 = vmatprep.subr.msk.bf16.mxu0 %vm5729_vm1, %v10287_v7  ;;  %v10301_v30 = vsel %vm5729_vm1, %v10287_v7, 0  ;;  %v10023_v41 = vpop.permute.xlu1 %10022 }
0x121d   :  { %16743 = vmatprep.subr.msk.bf16.mxu1 %vm6862_vm4, %v17587_v46 }
0x121e   :  { %15958 = vmatmul.mubr.msk.bf16.gmra.mrb[32].mxu1 %vm5810_vm2, %v9592_v2 }
0x121f   :  { %15966 = vmatpush3.bf16.msra.mxu1 %v9756_v38  ;;  %v10281_v33 = vpop.permute.xlu0 %10280 }
0x1220   :  { %16744 = vmatprep.subr.msk.bf16.mxu1 %vm5729_vm1, %v10025_v9  ;;  %v10279_v15 = vpop.permute.xlu1 %10278 }
0x1223   :  { %v10285_v57 = vpop.permute.xlu0 %10284 }
0x1224   :  { %v10283_v31 = vpop.permute.xlu1 %10282 }
0x12d8   :  { %v15935_v25 = vpop.f32.mrb[20].mxu1 }
0x12d9   :  { %v9380_v62 = vpop.f32.mrb[21].mxu1 }
0x12da   :  { %v15936_v58 = vpop.f32.mrb[22].mxu1 }
0x12db   :  { %v9678_v44 = vpack.c.bf16 %v15936_v58, %v15935_v25  ;;  %v9383_v11 = vpop.f32.mrb[23].mxu1 }
0x12dc   :  { %v9677_v49 = vpack.c.bf16 %v9383_v11, %v9380_v62 }
0x12de   :  { %14753 = vmatmul.mubr.msk.bf16.vlgmr.msra.gmra.mrb[48].mxu0 %vm5729_vm1, %v9677_v49  ;;  %15967 = vmatprep.mubr.msk.bf16.mxu1 %vm5729_vm1, %v9677_v49 }
0x12df   :  { %16004 = vmatpush3.bf16.xpose.msra.mxu0 %v10301_v30  ;;  %15968 = vmatmul.mubr.msk.bf16.vlgmr.msra.gmra.mrb[196].mxu1 %vm5729_vm1, %v9678_v44 }
0x12e0   :  { %15984 = vmatpush3.bf16.xpose.msra.mxu1 %v10039_v34  ;;  %v15939_v20 = vpop.f32.mrb[24].mxu1  ;;  %9800 = vmatprep.mubr.bf16.mxu0 %v23546_v53 }
0x12e1   :  { %v9396_v17 = vpop.f32.mrb[25].mxu1 }
0x12e2   :  { %v15940_v23 = vpop.f32.mrb[26].mxu1 }
0x12e3   :  { %v9680_v36 = vpack.c.bf16 %v15940_v23, %v15939_v20  ;;  %v9399_v4 = vpop.f32.mrb[27].mxu1 }
0x12e4   :  { %v9679_v40 = vpack.c.bf16 %v9399_v4, %v9396_v17 }
0x12e6   :  { %14754 = vmatmul.mubr.msk.bf16.gmra.mrb[52].mxu0 %vm5729_vm1, %v9678_v44  ;;  %15971 = vmatprep.mubr.msk.bf16.mxu1 %vm5729_vm1, %v9679_v40 }
0x12e7   :  { %15972 = vmatmul.mubr.msk.bf16.gmra.mrb[200].mxu1 %vm5729_vm1, %v9680_v36  ;;  %9810 = vmatprep.mubr.bf16.mxu0 %v23546_v53 }
0x12e9   :  { %v15955_v51 = vpop.f32.mrb[28].mxu1 }
0x12ea   :  { %v9646_v13 = vpop.f32.mrb[29].mxu1 }
0x12eb   :  { %v15956_v39 = vpop.f32.mrb[30].mxu1 }
0x12ec   :  { %v9682_v63 = vpack.c.bf16 %v15956_v39, %v15955_v51  ;;  %v9649_v8 = vpop.f32.mrb[31].mxu1 }
0x12ed   :  { %v9681_v55 = vpack.c.bf16 %v9649_v8, %v9646_v13 }
0x12ee   :  { %14755 = vmatmul.mubr.msk.bf16.gmra.mrb[56].mxu0 %vm5729_vm1, %v9679_v40 }
0x12ef   :  { %15975 = vmatprep.mubr.msk.bf16.mxu1 %vm5729_vm1, %v9681_v55  ;;  %9820 = vmatprep.mubr.bf16.mxu0 %v23546_v53 }
0x12f0   :  { %15976 = vmatmul.mubr.msk.bf16.gmra.mrb[204].mxu1 %vm5729_vm1, %v9682_v63 }
0x12f1   :  { %v15959_v16 = vpop.f32.mrb[32].mxu1 }
0x12f2   :  { %v9662_v6 = vpop.f32.mrb[33].mxu1 }
0x12f3   :  { %v15960_v48 = vpop.f32.mrb[34].mxu1 }
0x12f4   :  { %v9684_v61 = vpack.c.bf16 %v15960_v48, %v15959_v16  ;;  %v9665_v29 = vpop.f32.mrb[35].mxu1 }
0x12f5   :  { %v9683_v42 = vpack.c.bf16 %v9665_v29, %v9662_v6 }
0x12f6   :  { %14756 = vmatmul.mubr.msk.bf16.gmra.mrb[60].mxu0 %vm5729_vm1, %v9680_v36 }
0x12f7   :  { %15979 = vmatprep.mubr.msk.bf16.mxu1 %vm5729_vm1, %v9683_v42  ;;  %9830 = vmatprep.mubr.bf16.mxu0 %v23546_v53 }
0x12f8   :  { %15980 = vmatmul.mubr.msk.bf16.gmra.mrb[208].mxu1 %vm5729_vm1, %v9684_v61 }
0x12f9   :  { %15985 = vmatprep.mubr.msk.bf16.mxu1 %vm5729_vm1, %v21876_v52 }
0x12fe   :  { %14757 = vmatmul.mubr.msk.bf16.gmra.mrb[64].mxu0 %vm5729_vm1, %v9681_v55 }
0x12ff   :  { %9840 = vmatprep.mubr.bf16.mxu0 %v23546_v53 }
0x1300   :  { %15986 = vmatmul.mubr.msk.bf16.vlgmr.msra.gmra.mrb[36].mxu1 %vm5729_vm1, %v10019_v28 }
0x1301   :  { %15989 = vmatprep.mubr.msk.bf16.mxu1 %vm5729_vm1, %v21883_v1 }
0x1306   :  { %14758 = vmatmul.mubr.msk.bf16.gmra.mrb[68].mxu0 %vm5729_vm1, %v9682_v63 }
0x1307   :  { %9850 = vmatprep.mubr.bf16.mxu0 %v23546_v53 }
0x1308   :  { %15990 = vmatmul.mubr.msk.bf16.gmra.mrb[40].mxu1 %vm5729_vm1, %v10023_v41 }
0x130e   :  { %14759 = vmatmul.mubr.msk.bf16.gmra.mrb[72].mxu0 %vm5729_vm1, %v9683_v42 }
0x130f   :  { %9860 = vmatprep.mubr.bf16.mxu0 %v23546_v53 }
0x1316   :  { %14760 = vmatmul.mubr.msk.bf16.gmra.mrb[76].mxu0 %vm5729_vm1, %v9684_v61 }
0x1317   :  { %16005 = vmatprep.mubr.msk.bf16.mxu0 %vm5729_vm1, %v10279_v15 }
0x131e   :  { %16006 = vmatmul.mubr.msk.bf16.vlgmr.msra.gmra.mrb[96].mxu0 %vm5729_vm1, %v10281_v33 }
0x131f   :  { %16009 = vmatprep.mubr.msk.bf16.mxu0 %vm5729_vm1, %v10283_v31 }
0x1326   :  { %16010 = vmatmul.mubr.msk.bf16.gmra.mrb[100].mxu0 %vm5729_vm1, %v10285_v57 }
0x1327   :  { %10653 = vmatprep.mubr.bf16.mxu0 %v23546_v53 }
0x13d3   :  { %v15987_v52 = vpop.f32.mrb[36].mxu1 }
0x13d4   :  { %v10075_v45 = vpop.f32.mrb[37].mxu1  ;;  %v10112_v59 = vsel %vm5810_vm2, %v15987_v52, -inf }
0x13d5   :  { %v15988_v10 = vpop.f32.mrb[38].mxu1  ;;  %v10106_v43 = vsel %vm5810_vm2, %v10075_v45, -inf }
0x13d6   :  { %10107 = vmax.xlane.f32.xlu1 %v10106_v43  ;;  %v10078_v12 = vpop.f32.mrb[39].mxu1  ;;  %v10115_v47 = vsel %vm5810_vm2, %v15988_v10, -inf }
0x13d7   :  { %v10109_v21 = vsel %vm5810_vm2, %v10078_v12, -inf }
0x13d8   :  { %10110 = vmax.xlane.f32.xlu0 %v10109_v21 }
0x13da   :  { %10116 = vmax.xlane.f32.xlu1 %v10115_v47 }
0x13db   :  { %v21937_v1 = vpop.f32.mrb[40].mxu1 }
0x13dc   :  { %10113 = vmax.xlane.f32.xlu0 %v10112_v59  ;;  %v10091_v54 = vpop.f32.mrb[41].mxu1  ;;  %v10124_v7 = vsel %vm5810_vm2, %v21937_v1, -inf }
0x13dd   :  { %v15992_v56 = vpop.f32.mrb[42].mxu1  ;;  %v10118_v19 = vsel %vm5810_vm2, %v10091_v54, -inf }
0x13de   :  { %v10094_v46 = vpop.f32.mrb[43].mxu1  ;;  %v10127_v2 = vsel %vm5810_vm2, %v15992_v56, -inf }
0x13df   :  { %v10121_v26 = vsel %vm5810_vm2, %v10094_v46, -inf }
0x13e0   :  { %10119 = vmax.xlane.f32.xlu0 %v10118_v19  ;;  %10122 = vmax.xlane.f32.xlu1 %v10121_v26 }
0x13e4   :  { %10125 = vmax.xlane.f32.xlu0 %v10124_v7  ;;  %10128 = vmax.xlane.f32.xlu1 %v10127_v2 }
0x13f1   :  { %v21945_v38 = vpop.f32.mrb[96].mxu0 }
0x13f2   :  { %v21947_v9 = vpop.f32.mrb[97].mxu0  ;;  %v10374_v11 = vsel %vm5810_vm2, %v21945_v38, -inf }
0x13f3   :  { %v21949_v25 = vpop.f32.mrb[98].mxu0  ;;  %v10368_v62 = vsel %vm5810_vm2, %v21947_v9, -inf }
0x13f4   :  { %10369 = vmax.xlane.f32.xlu0 %v10368_v62  ;;  %v21953_v58 = vpop.f32.mrb[99].mxu0  ;;  %v10377_v30 = vsel %vm5810_vm2, %v21949_v25, -inf }
0x13f5   :  { %v10371_v44 = vsel %vm5810_vm2, %v21953_v58, -inf }
0x13f6   :  { %10372 = vmax.xlane.f32.xlu1 %v10371_v44 }
0x13f8   :  { %10375 = vmax.xlane.f32.xlu0 %v10374_v11 }
0x13f9   :  { %v21959_v49 = vpop.f32.mrb[100].mxu0 }
0x13fa   :  { %10378 = vmax.xlane.f32.xlu1 %v10377_v30  ;;  %v21963_v34 = vpop.f32.mrb[101].mxu0  ;;  %v10386_v4 = vsel %vm5810_vm2, %v21959_v49, -inf }
0x13fb   :  { %v21965_v20 = vpop.f32.mrb[102].mxu0  ;;  %v10380_v17 = vsel %vm5810_vm2, %v21963_v34, -inf }
0x13fc   :  { %10381 = vmax.xlane.f32.xlu0 %v10380_v17  ;;  %v21969_v23 = vpop.f32.mrb[103].mxu0  ;;  %v10389_v40 = vsel %vm5810_vm2, %v21965_v20, -inf }
0x13fd   :  { %v10383_v36 = vsel %vm5810_vm2, %v21969_v23, -inf }
0x13fe   :  { %10384 = vmax.xlane.f32.xlu1 %v10383_v36 }
0x1400   :  { %10387 = vmax.xlane.f32.xlu0 %v10386_v4 }
0x1402   :  { %10390 = vmax.xlane.f32.xlu1 %v10389_v40 }
0x1463   :  { %v10108_v51 = vpop.xlane.xlu1 %10107 }
0x1464   :  { %v10130_v8 = vsub.f32 %v10075_v45, %v10108_v51 }
0x1465   :  { %v10111_v13 = vpop.xlane.xlu0 %10110 }
0x1466   :  { %v10131_v39 = vsub.f32 %v10078_v12, %v10111_v13  ;;  %v10138_v29 = vmul.f32 1.442695, %v10130_v8 }
0x1467   :  { %v10117_v63 = vpop.xlane.xlu1 %10116 }
0x1468   :  { %v10133_v55 = vsub.f32 %v15988_v10, %v10117_v63  ;;  %v10140_v16 = vmul.f32 1.442695, %v10131_v39 }
0x1469   :  { %v10114_v6 = vpop.xlane.xlu0 %10113 }
0x146a   :  { %v10144_v48 = vmul.f32 1.442695, %v10133_v55  ;;  %v10132_v61 = vsub.f32 %v15987_v52, %v10114_v6 }
0x146c   :  { %18065 = vpow2.f32 %v10144_v48  ;;  %v10142_v42 = vmul.f32 1.442695, %v10132_v61 }
0x146d   :  { %18067 = vpow2.f32 %v10140_v16  ;;  %v10123_v28 = vpop.xlane.xlu1 %10122  ;;  %v10120_v41 = vpop.xlane.xlu0 %10119 }
0x146e   :  { %18069 = vpow2.f32 %v10142_v42  ;;  %v10135_v15 = vsub.f32 %v10094_v46, %v10123_v28  ;;  %v10134_v33 = vsub.f32 %v10091_v54, %v10120_v41 }
0x146f   :  { %18071 = vpow2.f32 %v10138_v29 }
0x1470   :  { %v10148_v10 = vmul.f32 1.442695, %v10135_v15  ;;  %v10146_v47 = vmul.f32 1.442695, %v10134_v33 }
0x1471   :  { %v10129_v31 = vpop.xlane.xlu1 %10128  ;;  %v10126_v57 = vpop.xlane.xlu0 %10125 }
0x1472   :  { %v10137_v43 = vsub.f32 %v15992_v56, %v10129_v31  ;;  %v10136_v45 = vsub.f32 %v21937_v1, %v10126_v57 }
0x1474   :  { %v10152_v12 = vmul.f32 1.442695, %v10137_v43  ;;  %v10150_v21 = vmul.f32 1.442695, %v10136_v45 }
0x1476   :  { %v21978_v52 = vpop.eup %18065  ;;  %18073 = vpow2.f32 %v10152_v12 }
0x1477   :  { %v21980_v59 = vpop.eup %18067  ;;  %18075 = vpow2.f32 %v10150_v21  ;;  %v10163_v19 = vsel %vm5810_vm2, %v21978_v52, 0.0 }
0x1478   :  { %v21984_v46 = vpop.eup %18069  ;;  %18077 = vpow2.f32 %v10148_v10  ;;  %10164 = vadd.xlane.f32.xlu1 %v10163_v19  ;;  %v10157_v56 = vsel %vm5810_vm2, %v21980_v59, 0.0 }
0x1479   :  { %18079 = vpow2.f32 %v10146_v47  ;;  %v10160_v1 = vsel %vm5810_vm2, %v21984_v46, 0.0  ;;  %v21988_v54 = vpop.eup %18071 }
0x147a   :  { %10161 = vadd.xlane.f32.xlu0 %v10160_v1  ;;  %v10154_v26 = vsel %vm5810_vm2, %v21988_v54, 0.0 }
0x147c   :  { %10158 = vadd.xlane.f32.xlu1 %v10157_v56 }
0x147e   :  { %10155 = vadd.xlane.f32.xlu0 %v10154_v26 }
0x1480   :  { %v21994_v7 = vpop.eup %18073 }
0x1481   :  { %v21996_v2 = vpop.eup %18075  ;;  %v10370_v62 = vpop.xlane.xlu0 %10369  ;;  %v10175_v44 = vsel %vm5810_vm2, %v21994_v7, 0.0 }
0x1482   :  { %v22000_v11 = vpop.eup %18077  ;;  %10176 = vadd.xlane.f32.xlu1 %v10175_v44  ;;  %v10172_v30 = vsel %vm5810_vm2, %v21996_v2, 0.0  ;;  %v10392_v4 = vsub.f32 %v21947_v9, %v10370_v62 }
0x1483   :  { %v22004_v17 = vpop.eup %18079  ;;  %10173 = vadd.xlane.f32.xlu0 %v10172_v30  ;;  %v10373_v36 = vpop.xlane.xlu1 %10372  ;;  %v10169_v51 = vsel %vm5810_vm2, %v22000_v11, 0.0 }
0x1484   :  { %v10166_v39 = vsel %vm5810_vm2, %v22004_v17, 0.0  ;;  %v10400_v8 = vmul.f32 1.442695, %v10392_v4  ;;  %v10393_v9 = vsub.f32 %v21953_v58, %v10373_v36  ;;  %v23561_v36 = vld [vmem:[#allocation15_spill] sm:$0xff]  ;;  %v23562_v4 = vld [vmem:[#allocation14_spill] sm:$0xff] }
0x1485   :  { %v10376_v40 = vpop.xlane.xlu0 %10375 }
0x1486   :  { %v10394_v13 = vsub.f32 %v21945_v38, %v10376_v40  ;;  %10170 = vadd.xlane.f32.xlu1 %v10169_v51  ;;  %v10402_v29 = vmul.f32 1.442695, %v10393_v9  ;;  %v5694_v40 = vld [vmem:[%s23464_s8 + $0x15c] sm:$0xff] }
0x1487   :  { %10167 = vadd.xlane.f32.xlu0 %v10166_v39  ;;  %v10379_v63 = vpop.xlane.xlu1 %10378  ;;  %v14792_v51 = vcombine.high %v5694_v40, %v5694_v40  ;;  %v23565_v39 = vld [vmem:[#allocation19_spill] sm:$0xff] }
0x1488   :  { %v10404_v55 = vmul.f32 1.442695, %v10394_v13  ;;  %v10395_v16 = vsub.f32 %v21949_v25, %v10379_v63  ;;  %v14791_v13 = vcombine.low %v5694_v40, %v5694_v40  ;;  %v23567_v63 = vld [vmem:[#allocation21_spill] sm:$0xff] }
0x1489   :  { %v10382_v6 = vpop.xlane.xlu0 %10381 }
0x148a   :  { %18081 = vpow2.f32 %v10404_v55  ;;  %v10406_v48 = vmul.f32 1.442695, %v10395_v16  ;;  %v10396_v38 = vsub.f32 %v21963_v34, %v10382_v6 }
0x148b   :  { %18083 = vpow2.f32 %v10400_v8  ;;  %v10385_v61 = vpop.xlane.xlu1 %10384  ;;  %v23568_v8 = vld [vmem:[#allocation20_spill] sm:$0xff] }
0x148c   :  { %18085 = vpow2.f32 %v10406_v48  ;;  %v10408_v41 = vmul.f32 1.442695, %v10396_v38  ;;  %v10397_v19 = vsub.f32 %v21969_v23, %v10385_v61  ;;  %v23560_v23 = vld [vmem:[#allocation22_spill] sm:$0xff] }
0x148d   :  { %v10388_v42 = vpop.xlane.xlu0 %10387  ;;  %18087 = vpow2.f32 %v10402_v29 }
0x148e   :  { %v10398_v15 = vsub.f32 %v21959_v49, %v10388_v42  ;;  %18089 = vpow2.f32 %v10408_v41  ;;  %v10410_v26 = vmul.f32 1.442695, %v10397_v19 }
0x148f   :  { %v10391_v33 = vpop.xlane.xlu1 %10390 }
0x1490   :  { %v10412_v58 = vmul.f32 1.442695, %v10398_v15  ;;  %v10399_v57 = vsub.f32 %v21965_v20, %v10391_v33 }
0x1492   :  { %18091 = vpow2.f32 %v10412_v58  ;;  %v10414_v45 = vmul.f32 1.442695, %v10399_v57 }
0x1494   :  { %v22015_v28 = vpop.eup %18081  ;;  %18093 = vpow2.f32 %v10414_v45 }
0x1495   :  { %v10422_v25 = vsel %vm5810_vm2, %v22015_v28, 0.0  ;;  %v22020_v31 = vpop.eup %18083  ;;  %18095 = vpow2.f32 %v10410_v26 }
0x1496   :  { %10423 = vadd.xlane.f32.xlu1 %v10422_v25  ;;  %v10416_v34 = vsel %vm5810_vm2, %v22020_v31, 0.0  ;;  %v22025_v43 = vpop.eup %18085 }
0x1497   :  { %v10425_v49 = vsel %vm5810_vm2, %v22025_v43, 0.0  ;;  %v22030_v10 = vpop.eup %18087 }
0x1498   :  { %v10419_v20 = vsel %vm5810_vm2, %v22030_v10, 0.0  ;;  %v22034_v12 = vpop.eup %18089 }
0x1499   :  { %v10428_v21 = vsel %vm5810_vm2, %v22034_v12, 0.0 }
0x149a   :  { %10417 = vadd.xlane.f32.xlu1 %v10416_v34 }
0x149c   :  { %v22038_v47 = vpop.eup %18091 }
0x149d   :  { %10198 = vrot.lane.b32.xlu0 %v23558_v50, %s18269_s0  ;;  %v10434_v1 = vsel %vm5810_vm2, %v22038_v47, 0.0 }
0x149e   :  { %10426 = vadd.xlane.f32.xlu1 %v10425_v49  ;;  %v22043_v56 = vpop.eup %18093 }
0x149f   :  { %v10437_v62 = vsel %vm5810_vm2, %v22043_v56, 0.0  ;;  %v22047_v44 = vpop.eup %18095 }
0x14a0   :  { %v10431_v30 = vsel %vm5810_vm2, %v22047_v44, 0.0 }
0x14a2   :  { %10420 = vadd.xlane.f32.xlu1 %v10419_v20 }
0x14a6   :  { %10429 = vadd.xlane.f32.xlu1 %v10428_v21 }
0x14aa   :  { %10435 = vadd.xlane.f32.xlu1 %v10434_v1 }
0x14ae   :  { %10438 = vadd.xlane.f32.xlu1 %v10437_v62 }
0x14bc   :  { %10432 = vadd.xlane.f32.xlu0 %v10431_v30 }
0x14bf   :  { %10460 = vrot.lane.b32.xlu1 %v23559_v0, %s18269_s0 }
0x14c3   :  { %10912 = vrot.lane.b32.xlu1 %v23548_v3, %s18270_s24  ;;  %v17591_v3 = vld [vmem:[%s23464_s8 + $0x12c] ss:$12 sps:$4 sm:$0xff]  }
0x14c7   :  { %10914 = vrot.lane.b32.xlu1 %v23560_v23, %s18270_s24 }
0x14cb   :  { %10893 = vrot.lane.b32.xlu1 %v23561_v36, %s18270_s24 }
0x14cf   :  { %10895 = vrot.lane.b32.xlu1 %v23550_v22, %s18270_s24  ;;  %v23563_v22 = vld [vmem:[#allocation17_spill] sm:$0xff] }
0x14d2   :  { %10891 = vrot.lane.b32.xlu0 %v23549_v18, %s18270_s24  ;;  %v17593_v18 = vld [vmem:[%s23464_s8 + $0x130] ss:$12 sps:$4 sm:$0xff]  }
0x14d3   :  { %10897 = vrot.lane.b32.xlu1 %v23562_v4, %s18270_s24  ;;  %10621 = vmatprep.subr.bf16.mxu0 %v17593_v18 }
0x14d4   :  { %10622 = vmatpush1.bf16.msra.mxu0 %v17591_v3 }
0x14d6   :  { %10903 = vrot.lane.b32.xlu0 %v23552_v35, %s18270_s24  ;;  %v17596_v35 = vld [vmem:[%s23464_s8 + $0x148] ss:$12 sps:$4 sm:$0xff]  }
0x14d7   :  { %10899 = vrot.lane.b32.xlu1 %v23551_v32, %s18270_s24  ;;  %v17594_v32 = vld [vmem:[%s23464_s8 + $0x144] ss:$12 sps:$4 sm:$0xff]   ;;  %10623 = vmatprep.subr.bf16.mxu0 %v17596_v35 }
0x14d8   :  { %10624 = vmatpush1.bf16.msra.mxu0 %v17594_v32 }
0x14d9   :  { %14794 = vmatprep.subr.msk.bf16.mxu0 %vm6862_vm4, %v14792_v51 }
0x14da   :  { %11193 = vrot.lane.b32.xlu0 %v23553_v5, %s18270_s24  ;;  %v23564_v5 = vld [vmem:[#allocation16_spill] sm:$0xff] }
0x14db   :  { %10901 = vrot.lane.b32.xlu1 %v23563_v22, %s18270_s24 }
0x14de   :  { %11173 = vrot.lane.b32.xlu0 %v23554_v14, %s18270_s24  ;;  %v10613_v14 = vsel %vm6862_vm4, %v14791_v13, 0 }
0x14df   :  { %10905 = vrot.lane.b32.xlu1 %v23564_v5, %s18270_s24  ;;  %10626 = vmatpush1.bf16.msra.mxu0 %v10613_v14 }
0x14e2   :  { %11177 = vrot.lane.b32.xlu0 %v23555_v37, %s18270_s24  ;;  %v23566_v37 = vld [vmem:[#allocation18_spill] sm:$0xff] }
0x14e3   :  { %11195 = vrot.lane.b32.xlu1 %v20697_v24, %s18270_s24 }
0x14e6   :  { %11181 = vrot.lane.b32.xlu0 %v23556_v60, %s18270_s24 }
0x14e7   :  { %11175 = vrot.lane.b32.xlu1 %v23565_v39, %s18270_s24 }
0x14ea   :  { %11185 = vrot.lane.b32.xlu0 %v23557_v27, %s18270_s24 }
0x14eb   :  { %11179 = vrot.lane.b32.xlu1 %v23566_v37, %s18270_s24 }
0x14ef   :  { %11183 = vrot.lane.b32.xlu1 %v23567_v63, %s18270_s24 }
0x14f3   :  { %11187 = vrot.lane.b32.xlu1 %v23568_v8, %s18270_s24 }
0x1505   :  { %v10165_v55 = vpop.xlane.xlu1 %10164 }
0x1507   :  { %v10162_v16 = vpop.xlane.xlu0 %10161 }
0x1508   :  { %18097 = vrcp.f32 %v10162_v16  ;;  %v17588_v16 = vld [vmem:[%s23464_s8 + $0x134] ss:$12 sps:$4 sm:$0xff]  }
0x1509   :  { %v10159_v60 = vpop.xlane.xlu1 %10158 }
0x150a   :  { %18099 = vrcp.f32 %v10159_v60 }
0x150b   :  { %18101 = vrcp.f32 %v10165_v55  ;;  %v10156_v6 = vpop.xlane.xlu0 %10155 }
0x150c   :  { %18103 = vrcp.f32 %v10156_v6 }
0x150f   :  { %v10177_v9 = vpop.xlane.xlu1 %10176 }
0x1510   :  { %v10174_v48 = vpop.xlane.xlu0 %10173  ;;  %18105 = vrcp.f32 %v10177_v9 }
0x1511   :  { %18107 = vrcp.f32 %v10174_v48 }
0x1512   :  { %v18098_v27 = vpop.eup %18097 }
0x1513   :  { %v10171_v61 = vpop.xlane.xlu1 %10170  ;;  %v10188_v15 = vmul.f32 %v18098_v27, %v21984_v46 }
0x1514   :  { %v18100_v29 = vpop.eup %18099  ;;  %18109 = vrcp.f32 %v10171_v61  ;;  %v10168_v38 = vpop.xlane.xlu0 %10167 }
0x1515   :  { %v18102_v42 = vpop.eup %18101  ;;  %18111 = vrcp.f32 %v10168_v38  ;;  %v10187_v25 = vmul.f32 %v18100_v29, %v21980_v59 }
0x1516   :  { %v18104_v41 = vpop.eup %18103  ;;  %v10189_v57 = vmul.f32 %v18102_v42, %v21978_v52 }
0x1517   :  { %v10186_v33 = vmul.f32 %v18104_v41, %v21988_v54 }
0x1518   :  { %v10199_v58 = vpop.permute.xlu0 %10198  ;;  %v10195_v49 = vpack.c.bf16 %v10189_v57, %v10188_v15 }
0x1519   :  { %15993 = vmatprep.subr.bf16.mxu1 %v10199_v58  ;;  %v10194_v34 = vpack.c.bf16 %v10187_v25, %v10186_v33 }
0x151a   :  { %15994 = vmatpush3.bf16.msra.mxu1 %v10199_v58  ;;  %v18106_v45 = vpop.eup %18105 }
0x151b   :  { %15995 = vmatprep.mubr.msk.bf16.mxu1 %vm5810_vm2, %v10194_v34  ;;  %v18108_v20 = vpop.eup %18107  ;;  %v10193_v46 = vmul.f32 %v18106_v45, %v21994_v7 }
0x151c   :  { %v10192_v54 = vmul.f32 %v18108_v20, %v21996_v2 }
0x151d   :  { %15996 = vmatmul.mubr.msk.bf16.vlgmr.msra.gmra.mrb[44].mxu1 %vm5810_vm2, %v10195_v49 }
0x151e   :  { %v18110_v21 = vpop.eup %18109  ;;  %v10197_v26 = vpack.c.bf16 %v10193_v46, %v10192_v54 }
0x151f   :  { %v18112_v19 = vpop.eup %18111  ;;  %v10191_v59 = vmul.f32 %v18110_v21, %v22000_v11 }
0x1520   :  { %v10190_v52 = vmul.f32 %v18112_v19, %v22004_v17 }
0x1522   :  { %v10196_v1 = vpack.c.bf16 %v10191_v59, %v10190_v52 }
0x1523   :  { %v10424_v62 = vpop.xlane.xlu1 %10423 }
0x1524   :  { %15999 = vmatprep.mubr.msk.bf16.mxu1 %vm5810_vm2, %v10196_v1 }
0x1525   :  { %16000 = vmatmul.mubr.msk.bf16.gmra.mrb[48].mxu1 %vm5810_vm2, %v10197_v26 }
0x1527   :  { %v10418_v30 = vpop.xlane.xlu1 %10417 }
0x1528   :  { %18113 = vrcp.f32 %v10418_v30 }
0x152b   :  { %v10427_v3 = vpop.xlane.xlu1 %10426 }
0x152f   :  { %v10421_v18 = vpop.xlane.xlu1 %10420 }
0x1530   :  { %18115 = vrcp.f32 %v10421_v18 }
0x1531   :  { %18117 = vrcp.f32 %v10427_v3 }
0x1532   :  { %18119 = vrcp.f32 %v10424_v62  ;;  %v18114_v32 = vpop.eup %18113 }
0x1533   :  { %v10430_v7 = vpop.xlane.xlu1 %10429  ;;  %v10448_v40 = vmul.f32 %v18114_v32, %v22020_v31  ;;  %v17589_v31 = vld [vmem:[%s23464_s8 + $0x14c] ss:$12 sps:$4 sm:$0xff]  }
0x1537   :  { %v10436_v2 = vpop.xlane.xlu1 %10435 }
0x153a   :  { %v18116_v11 = vpop.eup %18115 }
0x153b   :  { %v18118_v35 = vpop.eup %18117  ;;  %v10439_v17 = vpop.xlane.xlu1 %10438  ;;  %v10449_v51 = vmul.f32 %v18116_v11, %v22030_v10 }
0x153c   :  { %v18120_v13 = vpop.eup %18119  ;;  %v10451_v55 = vmul.f32 %v18118_v35, %v22025_v43  ;;  %v17590_v43 = vld [vmem:[%s23464_s8 + $0x164] ss:$0 sps:$4 sm:$0xff]   ;;  %18121 = vrcp.f32 %v10439_v17 }
0x153d   :  { %v10456_v14 = vpack.c.bf16 %v10449_v51, %v10448_v40  ;;  %v10450_v6 = vmul.f32 %v18120_v13, %v22015_v28  ;;  %18123 = vrcp.f32 %v10430_v7  ;;  %v10619_v27 = vsel %vm6862_vm4, %v17590_v43, 0 }
0x153e   :  { %18125 = vrcp.f32 %v10436_v2 }
0x153f   :  { %v10461_v60 = vpop.permute.xlu1 %10460  ;;  %16015 = vmatprep.mubr.msk.bf16.mxu1 %vm5810_vm2, %v10456_v14  ;;  %v10457_v9 = vpack.c.bf16 %v10451_v55, %v10450_v6 }
0x1540   :  { %16013 = vmatprep.subr.bf16.mxu1 %v10461_v60 }
0x1541   :  { %16014 = vmatpush3.bf16.msra.mxu1 %v10461_v60 }
0x1542   :  { %16023 = vmatprep.subr.bf16.mxu1 %v17588_v16 }
0x1543   :  { %v10913_v10 = vpop.permute.xlu1 %10912 }
0x1544   :  { %16016 = vmatmul.mubr.msk.bf16.vlgmr.msra.gmra.mrb[52].mxu1 %vm5810_vm2, %v10457_v9 }
0x1545   :  { %16024 = vmatpush3.bf16.msra.mxu1 %v17588_v16 }
0x1546   :  { %16025 = vmatprep.subr.bf16.mxu1 %v17589_v31  ;;  %v18122_v42 = vpop.eup %18121 }
0x1547   :  { %v10915_v48 = vpop.permute.xlu1 %10914  ;;  %v18124_v41 = vpop.eup %18123  ;;  %v10455_v58 = vmul.f32 %v18122_v42, %v22043_v56 }
0x1548   :  { %v10916_v29 = vsel %vm5810_vm2, %v10913_v10, %v10915_v48  ;;  %v18126_v15 = vpop.eup %18125  ;;  %v10452_v34 = vmul.f32 %v18124_v41, %v22034_v12 }
0x1549   :  { %v10433_v28 = vpop.xlane.xlu0 %10432  ;;  %16026 = vmatpush3.bf16.msra.mxu1 %v17589_v31  ;;  %v10454_v49 = vmul.f32 %v18126_v15, %v22038_v47  ;;  %v10930_v32 = vsel %vm5729_vm1, %v10916_v29, 0 }
0x154a   :  { %18127 = vrcp.f32 %v10433_v28  ;;  %16746 = vmatprep.subr.msk.bf16.mxu1 %vm6862_vm4, %v17590_v43 }
0x154b   :  { %v22138_v61 = vpop.permute.xlu1 %10893  ;;  %v10459_v46 = vpack.c.bf16 %v10455_v58, %v10454_v49 }
0x154d   :  { %16028 = vmatpush3.bf16.msra.mxu1 %v10619_v27  ;;  %v22149_v20 = vpop.permute.xlu0 %10891 }
0x154e   :  { %16747 = vmatprep.subr.msk.bf16.mxu1 %vm5729_vm1, %v10916_v29  ;;  %v10908_v29 = vsel %vm5810_vm2, %v22149_v20, %v22138_v61 }
0x154f   :  { %v10896_v38 = vpop.permute.xlu1 %10895 }
0x1551   :  { %v10904_v59 = vpop.permute.xlu0 %10903 }
0x1553   :  { %v10898_v33 = vpop.permute.xlu1 %10897 }
0x1554   :  { %v18128_v25 = vpop.eup %18127  ;;  %v22144_v57 = vsel %vm5810_vm2, %v10896_v38, %v10898_v33 }
0x1555   :  { %v10453_v45 = vmul.f32 %v18128_v25, %v22047_v44  ;;  %v11194_v44 = vpop.permute.xlu0 %11193 }
0x1557   :  { %v10900_v21 = vpop.permute.xlu1 %10899  ;;  %v10458_v19 = vpack.c.bf16 %v10453_v45, %v10452_v34 }
0x1559   :  { %16019 = vmatprep.mubr.msk.bf16.mxu1 %vm5810_vm2, %v10458_v19  ;;  %v11174_v42 = vpop.permute.xlu0 %11173 }
0x155a   :  { %16020 = vmatmul.mubr.msk.bf16.gmra.mrb[56].mxu1 %vm5810_vm2, %v10459_v46 }
0x155b   :  { %v10902_v54 = vpop.permute.xlu1 %10901 }
0x155c   :  { %v22154_v56 = vsel %vm5810_vm2, %v10900_v21, %v10902_v54 }
0x155d   :  { %v11178_v33 = vpop.permute.xlu0 %11177 }
0x155f   :  { %v10906_v52 = vpop.permute.xlu1 %10905 }
0x1560   :  { %v22157_v12 = vsel %vm5810_vm2, %v10904_v59, %v10906_v52 }
0x1561   :  { %v11182_v25 = vpop.permute.xlu0 %11181 }
0x1563   :  { %v11196_v47 = vpop.permute.xlu1 %11195 }
0x1564   :  { %v11197_v1 = vsel %vm5810_vm2, %v11194_v44, %v11196_v47 }
0x1565   :  { %16748 = vmatprep.subr.msk.bf16.mxu0 %vm5729_vm1, %v11197_v1  ;;  %v11211_v2 = vsel %vm5729_vm1, %v11197_v1, 0 }
0x1567   :  { %v11176_v38 = vpop.permute.xlu1 %11175 }
0x1568   :  { %v11189_v15 = vsel %vm5810_vm2, %v11174_v42, %v11176_v38 }
0x156b   :  { %v11180_v41 = vpop.permute.xlu1 %11179 }
0x156c   :  { %v11190_v58 = vsel %vm5810_vm2, %v11178_v33, %v11180_v41 }
0x156f   :  { %v11184_v61 = vpop.permute.xlu1 %11183 }
0x1570   :  { %v11191_v34 = vsel %vm5810_vm2, %v11182_v25, %v11184_v61 }
0x1573   :  { %v11188_v45 = vpop.permute.xlu1 %11187 }
0x15f0   :  { %v15997_v26 = vpop.f32.mrb[44].mxu1 }
0x15f1   :  { %v10247_v62 = vpop.f32.mrb[45].mxu1 }
0x15f2   :  { %v15998_v30 = vpop.f32.mrb[46].mxu1 }
0x15f3   :  { %v10541_v3 = vpack.c.bf16 %v15998_v30, %v15997_v26  ;;  %v10250_v18 = vpop.f32.mrb[47].mxu1 }
0x15f4   :  { %v10540_v7 = vpack.c.bf16 %v10250_v18, %v10247_v62 }
0x15f6   :  { %14795 = vmatmul.mubr.msk.bf16.vlgmr.msra.gmra.mrb[48].mxu0 %vm5729_vm1, %v10540_v7  ;;  %16029 = vmatprep.mubr.msk.bf16.mxu1 %vm5729_vm1, %v10540_v7 }
0x15f7   :  { %16066 = vmatpush3.bf16.xpose.msra.mxu0 %v11211_v2  ;;  %16030 = vmatmul.mubr.msk.bf16.vlgmr.msra.gmra.mrb[196].mxu1 %vm5729_vm1, %v10541_v3 }
0x15f8   :  { %16046 = vmatpush3.bf16.xpose.msra.mxu1 %v10930_v32  ;;  %v16001_v11 = vpop.f32.mrb[48].mxu1  ;;  %10663 = vmatprep.mubr.bf16.mxu0 %v23546_v53 }
0x15f9   :  { %v10263_v35 = vpop.f32.mrb[49].mxu1 }
0x15fa   :  { %v16002_v17 = vpop.f32.mrb[50].mxu1 }
0x15fb   :  { %v10543_v40 = vpack.c.bf16 %v16002_v17, %v16001_v11  ;;  %v10266_v51 = vpop.f32.mrb[51].mxu1 }
0x15fc   :  { %v10542_v13 = vpack.c.bf16 %v10266_v51, %v10263_v35 }
0x15fe   :  { %14796 = vmatmul.mubr.msk.bf16.gmra.mrb[52].mxu0 %vm5729_vm1, %v10541_v3  ;;  %16033 = vmatprep.mubr.msk.bf16.mxu1 %vm5729_vm1, %v10542_v13 }
0x15ff   :  { %16034 = vmatmul.mubr.msk.bf16.gmra.mrb[200].mxu1 %vm5729_vm1, %v10543_v40  ;;  %10673 = vmatprep.mubr.bf16.mxu0 %v23546_v53 }
0x1606   :  { %14797 = vmatmul.mubr.msk.bf16.gmra.mrb[56].mxu0 %vm5729_vm1, %v10542_v13 }
0x1607   :  { %10683 = vmatprep.mubr.bf16.mxu0 %v23546_v53 }
0x160e   :  { %14798 = vmatmul.mubr.msk.bf16.gmra.mrb[60].mxu0 %vm5729_vm1, %v10543_v40 }
0x160f   :  { %10693 = vmatprep.mubr.bf16.mxu0 %v23546_v53 }
0x1617   :  { %v16017_v14 = vpop.f32.mrb[52].mxu1 }
0x1618   :  { %v10509_v55 = vpop.f32.mrb[53].mxu1 }
0x1619   :  { %v16018_v16 = vpop.f32.mrb[54].mxu1 }
0x161a   :  { %v10545_v60 = vpack.c.bf16 %v16018_v16, %v16017_v14  ;;  %v10512_v6 = vpop.f32.mrb[55].mxu1 }
0x161b   :  { %v10544_v9 = vpack.c.bf16 %v10512_v6, %v10509_v55 }
0x161d   :  { %14799 = vmatmul.mubr.msk.bf16.gmra.mrb[64].mxu0 %vm5729_vm1, %v10544_v9  ;;  %16037 = vmatprep.mubr.msk.bf16.mxu1 %vm5729_vm1, %v10544_v9 }
0x161e   :  { %16038 = vmatmul.mubr.msk.bf16.gmra.mrb[204].mxu1 %vm5729_vm1, %v10545_v60  ;;  %10703 = vmatprep.mubr.bf16.mxu0 %v23546_v53 }
0x1625   :  { %14800 = vmatmul.mubr.msk.bf16.gmra.mrb[68].mxu0 %vm5729_vm1, %v10545_v60 }
0x1626   :  { %10713 = vmatprep.mubr.bf16.mxu0 %v23546_v53 }
0x162d   :  { %v16021_v31 = vpop.f32.mrb[56].mxu1 }
0x162e   :  { %v10525_v10 = vpop.f32.mrb[57].mxu1 }
0x162f   :  { %v16022_v43 = vpop.f32.mrb[58].mxu1 }
0x1630   :  { %v10547_v48 = vpack.c.bf16 %v16022_v43, %v16021_v31  ;;  %v10528_v28 = vpop.f32.mrb[59].mxu1 }
0x1631   :  { %v10546_v27 = vpack.c.bf16 %v10528_v28, %v10525_v10 }
0x1633   :  { %14801 = vmatmul.mubr.msk.bf16.gmra.mrb[72].mxu0 %vm5729_vm1, %v10546_v27  ;;  %16041 = vmatprep.mubr.msk.bf16.mxu1 %vm5729_vm1, %v10546_v27 }
0x1634   :  { %16042 = vmatmul.mubr.msk.bf16.gmra.mrb[208].mxu1 %vm5729_vm1, %v10547_v48  ;;  %10723 = vmatprep.mubr.bf16.mxu0 %v23546_v53 }
0x1635   :  { %16047 = vmatprep.mubr.msk.bf16.mxu1 %vm5729_vm1, %v10908_v29 }
0x163b   :  { %14802 = vmatmul.mubr.msk.bf16.gmra.mrb[76].mxu0 %vm5729_vm1, %v10547_v48 }
0x163c   :  { %16048 = vmatmul.mubr.msk.bf16.vlgmr.msra.gmra.mrb[60].mxu1 %vm5729_vm1, %v22144_v57  ;;  %16067 = vmatprep.mubr.msk.bf16.mxu0 %vm5729_vm1, %v11189_v15  ;;  %v11186_v57 = vpop.permute.xlu0 %11185 }
0x163d   :  { %16051 = vmatprep.mubr.msk.bf16.mxu1 %vm5729_vm1, %v22154_v56  ;;  %v11192_v49 = vsel %vm5810_vm2, %v11186_v57, %v11188_v45 }
0x1643   :  { %16068 = vmatmul.mubr.msk.bf16.vlgmr.msra.gmra.mrb[104].mxu0 %vm5729_vm1, %v11190_v58 }
0x1644   :  { %16052 = vmatmul.mubr.msk.bf16.gmra.mrb[64].mxu1 %vm5729_vm1, %v22157_v12  ;;  %16071 = vmatprep.mubr.msk.bf16.mxu0 %vm5729_vm1, %v11191_v34 }
0x164b   :  { %16072 = vmatmul.mubr.msk.bf16.gmra.mrb[108].mxu0 %vm5729_vm1, %v11192_v49 }
0x164c   :  { %11563 = vmatprep.mubr.bf16.mxu0 %v23546_v53 }
0x170f   :  { %v16049_v20 = vpop.f32.mrb[60].mxu1 }
0x1710   :  { %v10966_v21 = vpop.f32.mrb[61].mxu1  ;;  %v11003_v59 = vsel %vm5810_vm2, %v16049_v20, -inf }
0x1711   :  { %v16050_v19 = vpop.f32.mrb[62].mxu1  ;;  %v10997_v46 = vsel %vm5810_vm2, %v10966_v21, -inf }
0x1712   :  { %10998 = vmax.xlane.f32.xlu0 %v10997_v46  ;;  %v10969_v54 = vpop.f32.mrb[63].mxu1  ;;  %v11006_v30 = vsel %vm5810_vm2, %v16050_v19, -inf }
0x1713   :  { %v11000_v56 = vsel %vm5810_vm2, %v10969_v54, -inf }
0x1714   :  { %11001 = vmax.xlane.f32.xlu1 %v11000_v56 }
0x1716   :  { %11004 = vmax.xlane.f32.xlu0 %v11003_v59  ;;  %v22208_v52 = vpop.f32.mrb[104].mxu0 }
0x1717   :  { %v16053_v12 = vpop.f32.mrb[64].mxu1  ;;  %v22210_v44 = vpop.f32.mrb[105].mxu0  ;;  %v11284_v13 = vsel %vm5810_vm2, %v22208_v52, -inf }
0x1718   :  { %v10982_v47 = vpop.f32.mrb[65].mxu1  ;;  %v22212_v1 = vpop.f32.mrb[106].mxu0  ;;  %v11015_v7 = vsel %vm5810_vm2, %v16053_v12, -inf  ;;  %v11278_v51 = vsel %vm5810_vm2, %v22210_v44, -inf }
0x1719   :  { %v22214_v26 = vpop.f32.mrb[66].mxu1  ;;  %v22216_v62 = vpop.f32.mrb[107].mxu0  ;;  %v11009_v3 = vsel %vm5810_vm2, %v10982_v47, -inf  ;;  %v11287_v55 = vsel %vm5810_vm2, %v22212_v1, -inf }
0x171a   :  { %11007 = vmax.xlane.f32.xlu0 %v11006_v30  ;;  %11010 = vmax.xlane.f32.xlu1 %v11009_v3  ;;  %v10985_v18 = vpop.f32.mrb[67].mxu1  ;;  %v11018_v40 = vsel %vm5810_vm2, %v22214_v26, -inf  ;;  %v11281_v14 = vsel %vm5810_vm2, %v22216_v62, -inf }
0x171b   :  { %v11012_v2 = vsel %vm5810_vm2, %v10985_v18, -inf }
0x171e   :  { %11016 = vmax.xlane.f32.xlu1 %v11015_v7  ;;  %11013 = vmax.xlane.f32.xlu0 %v11012_v2  ;;  %v22222_v32 = vpop.f32.mrb[108].mxu0 }
0x171f   :  { %v22224_v11 = vpop.f32.mrb[109].mxu0  ;;  %v11296_v60 = vsel %vm5810_vm2, %v22222_v32, -inf }
0x1720   :  { %v22226_v35 = vpop.f32.mrb[110].mxu0  ;;  %v11290_v16 = vsel %vm5810_vm2, %v22224_v11, -inf }
0x1721   :  { %v22228_v17 = vpop.f32.mrb[111].mxu0  ;;  %v11299_v9 = vsel %vm5810_vm2, %v22226_v35, -inf }
0x1722   :  { %11019 = vmax.xlane.f32.xlu0 %v11018_v40  ;;  %11279 = vmax.xlane.f32.xlu1 %v11278_v51  ;;  %v11293_v6 = vsel %vm5810_vm2, %v22228_v17, -inf }
0x1726   :  { %11285 = vmax.xlane.f32.xlu1 %v11284_v13  ;;  %11282 = vmax.xlane.f32.xlu0 %v11281_v14 }
0x172a   :  { %11288 = vmax.xlane.f32.xlu0 %v11287_v55  ;;  %11291 = vmax.xlane.f32.xlu1 %v11290_v16 }
0x172e   :  { %11297 = vmax.xlane.f32.xlu1 %v11296_v60  ;;  %11294 = vmax.xlane.f32.xlu0 %v11293_v6 }
0x1732   :  { %11300 = vmax.xlane.f32.xlu0 %v11299_v9 }
0x179f   :  { %v10999_v31 = vpop.xlane.xlu0 %10998 }
0x17a0   :  { %v11021_v10 = vsub.f32 %v10966_v21, %v10999_v31 }
0x17a1   :  { %v11002_v43 = vpop.xlane.xlu1 %11001 }
0x17a2   :  { %v11029_v27 = vmul.f32 1.442695, %v11021_v10  ;;  %v11022_v38 = vsub.f32 %v10969_v54, %v11002_v43 }
0x17a3   :  { %v11005_v48 = vpop.xlane.xlu0 %11004 }
0x17a4   :  { %v11023_v28 = vsub.f32 %v16049_v20, %v11005_v48  ;;  %v11031_v25 = vmul.f32 1.442695, %v11022_v38 }
0x17a6   :  { %v11033_v29 = vmul.f32 1.442695, %v11023_v28 }
0x17a7   :  { %v11011_v42 = vpop.xlane.xlu1 %11010  ;;  %v11008_v41 = vpop.xlane.xlu0 %11007 }
0x17a8   :  { %18129 = vpow2.f32 %v11033_v29  ;;  %v11024_v15 = vsub.f32 %v16050_v19, %v11008_v41  ;;  %v11025_v33 = vsub.f32 %v10982_v47, %v11011_v42 }
0x17a9   :  { %18131 = vpow2.f32 %v11029_v27 }
0x17aa   :  { %v11035_v61 = vmul.f32 1.442695, %v11024_v15  ;;  %v11037_v57 = vmul.f32 1.442695, %v11025_v33 }
0x17ab   :  { %v11017_v58 = vpop.xlane.xlu1 %11016  ;;  %v11014_v34 = vpop.xlane.xlu0 %11013 }
0x17ac   :  { %v11027_v45 = vsub.f32 %v16053_v12, %v11017_v58  ;;  %18133 = vpow2.f32 %v11035_v61  ;;  %v11026_v21 = vsub.f32 %v10985_v18, %v11014_v34 }
0x17ad   :  { %18135 = vpow2.f32 %v11031_v25 }
0x17ae   :  { %v11041_v49 = vmul.f32 1.442695, %v11027_v45  ;;  %v11039_v47 = vmul.f32 1.442695, %v11026_v21 }
0x17af   :  { %v11280_v20 = vpop.xlane.xlu1 %11279  ;;  %v11020_v46 = vpop.xlane.xlu0 %11019 }
0x17b0   :  { %18137 = vpow2.f32 %v11041_v49  ;;  %v11028_v54 = vsub.f32 %v22214_v26, %v11020_v46  ;;  %v11302_v19 = vsub.f32 %v22210_v44, %v11280_v20 }
0x17b1   :  { %18139 = vpow2.f32 %v11037_v57 }
0x17b2   :  { %v22249_v56 = vpop.eup %18129  ;;  %v11043_v59 = vmul.f32 1.442695, %v11028_v54  ;;  %v11310_v2 = vmul.f32 1.442695, %v11302_v19 }
0x17b3   :  { %v11286_v30 = vpop.xlane.xlu1 %11285  ;;  %v11283_v3 = vpop.xlane.xlu0 %11282  ;;  %v11051_v12 = vsel %vm5810_vm2, %v22249_v56, 0.0 }
0x17b4   :  { %v22254_v7 = vpop.eup %18131  ;;  %v11304_v18 = vsub.f32 %v22208_v52, %v11286_v30  ;;  %11052 = vadd.xlane.f32.xlu1 %v11051_v12  ;;  %18141 = vpow2.f32 %v11043_v59  ;;  %v11303_v44 = vsub.f32 %v22216_v62, %v11283_v3 }
0x17b5   :  { %18143 = vpow2.f32 %v11039_v47  ;;  %v11045_v14 = vsel %vm5810_vm2, %v22254_v7, 0.0 }
0x17b6   :  { %v11314_v26 = vmul.f32 1.442695, %v11304_v18  ;;  %v22257_v40 = vpop.eup %18133  ;;  %v11312_v9 = vmul.f32 1.442695, %v11303_v44  ;;  %v17601_v18 = vld [vmem:[%s23464_s8 + $0x16c] ss:$12 sps:$4 sm:$0xff]  }
0x17b7   :  { %v11292_v51 = vpop.xlane.xlu1 %11291  ;;  %v11289_v13 = vpop.xlane.xlu0 %11288  ;;  %v11054_v52 = vsel %vm5810_vm2, %v22257_v40, 0.0  ;;  %11531 = vmatprep.subr.bf16.mxu0 %v17601_v18 }
0x17b8   :  { %18145 = vpow2.f32 %v11314_v26  ;;  %v11305_v55 = vsub.f32 %v22212_v1, %v11289_v13  ;;  %11046 = vadd.xlane.f32.xlu1 %v11045_v14  ;;  %v22265_v16 = vpop.eup %18135  ;;  %11055 = vadd.xlane.f32.xlu0 %v11054_v52  ;;  %v11306_v62 = vsub.f32 %v22224_v11, %v11292_v51  ;;  %v17604_v26 = vld [vmem:[%s23464_s8 + $0x184] ss:$12 sps:$4 sm:$0xff]  }
0x17b9   :  { %18147 = vpow2.f32 %v11310_v2  ;;  %v11048_v28 = vsel %vm5810_vm2, %v22265_v16, 0.0  ;;  %v17599_v2 = vld [vmem:[%s23464_s8 + $0x168] ss:$12 sps:$4 sm:$0xff]  }
0x17ba   :  { %v22267_v60 = vpop.eup %18137  ;;  %v11316_v6 = vmul.f32 1.442695, %v11305_v55  ;;  %v11318_v27 = vmul.f32 1.442695, %v11306_v62  ;;  %11532 = vmatpush1.bf16.msra.mxu0 %v17599_v2 }
0x17bb   :  { %v11298_v31 = vpop.xlane.xlu1 %11297  ;;  %v11295_v10 = vpop.xlane.xlu0 %11294  ;;  %v11063_v43 = vsel %vm5810_vm2, %v22267_v60, 0.0  ;;  %11533 = vmatprep.subr.bf16.mxu0 %v17604_v26 }
0x17bc   :  { %v22272_v1 = vpop.eup %18139  ;;  %v11308_v48 = vsub.f32 %v22222_v32, %v11298_v31  ;;  %11064 = vadd.xlane.f32.xlu1 %v11063_v43  ;;  %18149 = vpow2.f32 %v11316_v6  ;;  %11049 = vadd.xlane.f32.xlu0 %v11048_v28  ;;  %v11307_v38 = vsub.f32 %v22228_v17, %v11295_v10 }
0x17bd   :  { %18151 = vpow2.f32 %v11312_v9  ;;  %v11057_v41 = vsel %vm5810_vm2, %v22272_v1, 0.0 }
0x17be   :  { %v11322_v29 = vmul.f32 1.442695, %v11308_v48  ;;  %v22277_v11 = vpop.eup %18141  ;;  %v11320_v58 = vmul.f32 1.442695, %v11307_v38 }
0x17bf   :  { %v11301_v42 = vpop.xlane.xlu0 %11300  ;;  %v11066_v15 = vsel %vm5810_vm2, %v22277_v11, 0.0  ;;  %v22285_v33 = vpop.eup %18143 }
0x17c0   :  { %18153 = vpow2.f32 %v11322_v29  ;;  %v11309_v32 = vsub.f32 %v22226_v35, %v11301_v42  ;;  %11058 = vadd.xlane.f32.xlu1 %v11057_v41  ;;  %11067 = vadd.xlane.f32.xlu0 %v11066_v15  ;;  %v11060_v35 = vsel %vm5810_vm2, %v22285_v33, 0.0 }
0x17c1   :  { %18155 = vpow2.f32 %v11318_v27 }
0x17c2   :  { %v22287_v61 = vpop.eup %18145  ;;  %v11324_v25 = vmul.f32 1.442695, %v11309_v32 }
0x17c3   :  { %v11332_v17 = vsel %vm5810_vm2, %v22287_v61, 0.0  ;;  %v22291_v34 = vpop.eup %18147 }
0x17c4   :  { %18157 = vpow2.f32 %v11324_v25  ;;  %11333 = vadd.xlane.f32.xlu1 %v11332_v17  ;;  %11061 = vadd.xlane.f32.xlu0 %v11060_v35  ;;  %v11326_v57 = vsel %vm5810_vm2, %v22291_v34, 0.0 }
0x17c5   :  { %18159 = vpow2.f32 %v11320_v58 }
0x17c6   :  { %v22295_v45 = vpop.eup %18149 }
0x17c7   :  { %v11335_v49 = vsel %vm5810_vm2, %v22295_v45, 0.0  ;;  %v22301_v21 = vpop.eup %18151 }
0x17c8   :  { %11327 = vadd.xlane.f32.xlu1 %v11326_v57  ;;  %11336 = vadd.xlane.f32.xlu0 %v11335_v49  ;;  %v11329_v19 = vsel %vm5810_vm2, %v22301_v21, 0.0 }
0x17ca   :  { %v22303_v20 = vpop.eup %18153 }
0x17cb   :  { %v11344_v46 = vsel %vm5810_vm2, %v22303_v20, 0.0  ;;  %v22307_v54 = vpop.eup %18155 }
0x17cc   :  { %11345 = vadd.xlane.f32.xlu1 %v11344_v46  ;;  %11330 = vadd.xlane.f32.xlu0 %v11329_v19  ;;  %v11338_v47 = vsel %vm5810_vm2, %v22307_v54, 0.0 }
0x17ce   :  { %v22311_v59 = vpop.eup %18157 }
0x17cf   :  { %v11347_v30 = vsel %vm5810_vm2, %v22311_v59, 0.0  ;;  %v22317_v3 = vpop.eup %18159 }
0x17d0   :  { %11339 = vadd.xlane.f32.xlu1 %v11338_v47  ;;  %11348 = vadd.xlane.f32.xlu0 %v11347_v30  ;;  %v11341_v12 = vsel %vm5810_vm2, %v22317_v3, 0.0 }
0x17d4   :  { %11342 = vadd.xlane.f32.xlu0 %v11341_v12 }
0x17e1   :  { %11089 = vrot.lane.b32.xlu1 %v23558_v50, %s18271_s20 }
0x17e5   :  { %11797 = vrot.lane.b32.xlu1 %v23560_v23, %s18272_s21  ;;  %v17602_v23 = vld [vmem:[%s23464_s8 + $0x180] ss:$12 sps:$4 sm:$0xff]  }
0x17e6   :  { %11534 = vmatpush1.bf16.msra.mxu0 %v17602_v23 }
0x17e9   :  { %11789 = vrot.lane.b32.xlu1 %v23561_v36, %s18272_s21  ;;  %v5704_v36 = vld [vmem:[%s23464_s8 + $0x198] sm:$0xff] }
0x17ea   :  { %11370 = vrot.lane.b32.xlu0 %v23559_v0, %s18271_s20  ;;  %v14834_v44 = vcombine.high %v5704_v36, %v5704_v36  ;;  %v14833_v51 = vcombine.low %v5704_v36, %v5704_v36 }
0x17ec   :  { %14836 = vmatprep.subr.msk.bf16.mxu0 %vm6862_vm4, %v14834_v44  ;;  %v11523_v13 = vsel %vm6862_vm4, %v14833_v51, 0 }
0x17ed   :  { %11793 = vrot.lane.b32.xlu1 %v23563_v22, %s18272_s21  ;;  %11536 = vmatpush1.bf16.msra.mxu0 %v11523_v13 }
0x17ee   :  { %11791 = vrot.lane.b32.xlu0 %v23562_v4, %s18272_s21 }
0x17f1   :  { %12059 = vrot.lane.b32.xlu1 %v20697_v24, %s18272_s21 }
0x17f2   :  { %11795 = vrot.lane.b32.xlu0 %v23564_v5, %s18272_s21 }
0x17f5   :  { %12053 = vrot.lane.b32.xlu1 %v23566_v37, %s18272_s21 }
0x17f6   :  { %12051 = vrot.lane.b32.xlu0 %v23565_v39, %s18272_s21 }
0x17f9   :  { %12057 = vrot.lane.b32.xlu1 %v23568_v8, %s18272_s21 }
0x17fa   :  { %12055 = vrot.lane.b32.xlu0 %v23567_v63, %s18272_s21 }
0x1841   :  { %v11053_v4 = vpop.xlane.xlu1 %11052 }
0x1845   :  { %v11047_v22 = vpop.xlane.xlu1 %11046  ;;  %v11056_v14 = vpop.xlane.xlu0 %11055 }
0x1846   :  { %18161 = vrcp.f32 %v11047_v22 }
0x1849   :  { %v11065_v24 = vpop.xlane.xlu1 %11064  ;;  %v11050_v55 = vpop.xlane.xlu0 %11049 }
0x184a   :  { %18163 = vrcp.f32 %v11050_v55 }
0x184b   :  { %18165 = vrcp.f32 %v11056_v14  ;;  %v17608_v14 = vld [vmem:[%s23464_s8 + $0x188] ss:$12 sps:$4 sm:$0xff]  }
0x184d   :  { %v11059_v52 = vpop.xlane.xlu1 %11058  ;;  %v11068_v62 = vpop.xlane.xlu0 %11067 }
0x1850   :  { %v18162_v5 = vpop.eup %18161 }
0x1851   :  { %v11334_v6 = vpop.xlane.xlu1 %11333  ;;  %v11062_v9 = vpop.xlane.xlu0 %11061  ;;  %v11077_v63 = vmul.f32 %v18162_v5, %v22254_v7 }
0x1852   :  { %18167 = vrcp.f32 %v11062_v9 }
0x1853   :  { %18169 = vrcp.f32 %v11053_v4 }
0x1854   :  { %v18164_v37 = vpop.eup %18163  ;;  %18171 = vrcp.f32 %v11059_v52 }
0x1855   :  { %v11328_v39 = vpop.xlane.xlu1 %11327  ;;  %v11337_v8 = vpop.xlane.xlu0 %11336  ;;  %v11078_v31 = vmul.f32 %v18164_v37, %v22265_v16  ;;  %18173 = vrcp.f32 %v11068_v62 }
0x1856   :  { %v18166_v28 = vpop.eup %18165 }
0x1857   :  { %v11085_v10 = vpack.c.bf16 %v11078_v31, %v11077_v63  ;;  %v11080_v32 = vmul.f32 %v18166_v28, %v22257_v40  ;;  %v17607_v40 = vld [vmem:[%s23464_s8 + $0x170] ss:$12 sps:$4 sm:$0xff]  }
0x1859   :  { %v11346_v43 = vpop.xlane.xlu1 %11345  ;;  %16057 = vmatprep.mubr.msk.bf16.mxu1 %vm5810_vm2, %v11085_v10  ;;  %v11331_v48 = vpop.xlane.xlu0 %11330 }
0x185a   :  { %18175 = vrcp.f32 %v11331_v48 }
0x185b   :  { %18177 = vrcp.f32 %v11065_v24 }
0x185c   :  { %v18168_v29 = vpop.eup %18167  ;;  %18179 = vrcp.f32 %v11328_v39 }
0x185d   :  { %v11340_v27 = vpop.xlane.xlu1 %11339  ;;  %v11349_v38 = vpop.xlane.xlu0 %11348  ;;  %v11082_v16 = vmul.f32 %v18168_v29, %v22285_v33  ;;  %18181 = vrcp.f32 %v11337_v8 }
0x185e   :  { %v18170_v42 = vpop.eup %18169 }
0x185f   :  { %v18172_v41 = vpop.eup %18171  ;;  %v11079_v15 = vmul.f32 %v18170_v42, %v22249_v56 }
0x1860   :  { %v11081_v58 = vmul.f32 %v18172_v41, %v22272_v1  ;;  %v18174_v35 = vpop.eup %18173 }
0x1861   :  { %v11090_v7 = vpop.permute.xlu1 %11089  ;;  %v11343_v25 = vpop.xlane.xlu0 %11342  ;;  %v11086_v17 = vpack.c.bf16 %v11080_v32, %v11079_v15  ;;  %v11084_v19 = vmul.f32 %v18174_v35, %v22277_v11 }
0x1862   :  { %16055 = vmatprep.subr.bf16.mxu1 %v11090_v7  ;;  %18183 = vrcp.f32 %v11343_v25  ;;  %v11087_v49 = vpack.c.bf16 %v11082_v16, %v11081_v58 }
0x1863   :  { %16056 = vmatpush3.bf16.msra.mxu1 %v11090_v7  ;;  %18185 = vrcp.f32 %v11334_v6 }
0x1864   :  { %v18176_v33 = vpop.eup %18175  ;;  %18187 = vrcp.f32 %v11340_v27 }
0x1865   :  { %v22357_v57 = vpop.permute.xlu1 %11797  ;;  %v11371_v56 = vpop.permute.xlu0 %11370  ;;  %v11359_v30 = vmul.f32 %v18176_v33, %v22301_v21  ;;  %18189 = vrcp.f32 %v11349_v38 }
0x1866   :  { %16058 = vmatmul.mubr.msk.bf16.vlgmr.msra.gmra.mrb[68].mxu1 %vm5810_vm2, %v11086_v17  ;;  %v18178_v46 = vpop.eup %18177  ;;  %16075 = vmatprep.subr.bf16.mxu1 %v11371_v56  ;;  %18191 = vrcp.f32 %v11346_v43  ;;  %v11812_v8 = vsel %vm5729_vm1, %v22357_v57, 0 }
0x1867   :  { %16061 = vmatprep.mubr.msk.bf16.mxu1 %vm5810_vm2, %v11087_v49  ;;  %v18180_v1 = vpop.eup %18179  ;;  %16076 = vmatpush3.bf16.msra.mxu1 %v11371_v56  ;;  %v11083_v12 = vmul.f32 %v18178_v46, %v22267_v60 }
0x1868   :  { %16085 = vmatprep.subr.bf16.mxu1 %v17607_v40  ;;  %v11358_v18 = vmul.f32 %v18180_v1, %v22291_v34  ;;  %v18182_v26 = vpop.eup %18181 }
0x1869   :  { %v22365_v47 = vpop.permute.xlu1 %11789  ;;  %v11088_v2 = vpack.c.bf16 %v11084_v19, %v11083_v12  ;;  %v11361_v21 = vmul.f32 %v18182_v26, %v22295_v45  ;;  %v11792_v35 = vpop.permute.xlu0 %11791 }
0x186a   :  { %v11366_v36 = vpack.c.bf16 %v11359_v30, %v11358_v18 }
0x186c   :  { %v18184_v44 = vpop.eup %18183 }
0x186d   :  { %v22370_v23 = vpop.permute.xlu1 %11793  ;;  %v18186_v11 = vpop.eup %18185  ;;  %v11363_v60 = vmul.f32 %v18184_v44, %v22317_v3 }
0x186e   :  { %16062 = vmatmul.mubr.msk.bf16.gmra.mrb[72].mxu1 %vm5810_vm2, %v11088_v2  ;;  %v18188_v51 = vpop.eup %18187  ;;  %v11360_v34 = vmul.f32 %v18186_v11, %v22287_v61  ;;  %v17609_v61 = vld [vmem:[%s23464_s8 + $0x1a0] ss:$0 sps:$4 sm:$0xff]  }
0x186f   :  { %16077 = vmatprep.mubr.msk.bf16.mxu1 %vm5810_vm2, %v11366_v36  ;;  %v11362_v4 = vmul.f32 %v18188_v51, %v22307_v54  ;;  %v18190_v24 = vpop.eup %18189  ;;  %v11529_v62 = vsel %vm6862_vm4, %v17609_v61, 0 }
0x1870   :  { %v11367_v22 = vpack.c.bf16 %v11361_v21, %v11360_v34  ;;  %v18192_v52 = vpop.eup %18191  ;;  %v11365_v45 = vmul.f32 %v18190_v24, %v22311_v59 }
0x1871   :  { %v12060_v13 = vpop.permute.xlu1 %12059  ;;  %v11368_v55 = vpack.c.bf16 %v11363_v60, %v11362_v4  ;;  %v11364_v54 = vmul.f32 %v18192_v52, %v22303_v20 }
0x1872   :  { %16751 = vmatprep.subr.msk.bf16.mxu0 %vm5729_vm1, %v12060_v13  ;;  %v12074_v20 = vsel %vm5729_vm1, %v12060_v13, 0 }
0x1873   :  { %v11369_v3 = vpack.c.bf16 %v11365_v45, %v11364_v54 }
0x1876   :  { %16078 = vmatmul.mubr.msk.bf16.vlgmr.msra.gmra.mrb[76].mxu1 %vm5810_vm2, %v11367_v22 }
0x1877   :  { %16086 = vmatpush3.bf16.msra.mxu1 %v17607_v40  ;;  %16081 = vmatprep.mubr.msk.bf16.mxu1 %vm5810_vm2, %v11368_v55  ;;  %v12054_v40 = vpop.permute.xlu1 %12053 }
0x1878   :  { %16087 = vmatprep.subr.bf16.mxu1 %v17608_v14 }
0x187b   :  { %16088 = vmatpush3.bf16.msra.mxu1 %v17608_v14  ;;  %v12058_v56 = vpop.permute.xlu1 %12057 }
0x187c   :  { %16749 = vmatprep.subr.msk.bf16.mxu1 %vm6862_vm4, %v17609_v61 }
0x187e   :  { %16082 = vmatmul.mubr.msk.bf16.gmra.mrb[80].mxu1 %vm5810_vm2, %v11369_v3 }
0x187f   :  { %16090 = vmatpush3.bf16.msra.mxu1 %v11529_v62 }
0x1880   :  { %16750 = vmatprep.subr.msk.bf16.mxu1 %vm5729_vm1, %v22357_v57  ;;  %v11796_v57 = vpop.permute.xlu0 %11795 }
0x1884   :  { %v12052_v49 = vpop.permute.xlu0 %12051 }
0x1888   :  { %v12056_v33 = vpop.permute.xlu0 %12055 }
0x1939   :  { %v16059_v59 = vpop.f32.mrb[68].mxu1 }
0x193a   :  { %v11138_v6 = vpop.f32.mrb[69].mxu1 }
0x193b   :  { %v16060_v9 = vpop.f32.mrb[70].mxu1 }
0x193c   :  { %v11451_v5 = vpack.c.bf16 %v16060_v9, %v16059_v59  ;;  %v11141_v37 = vpop.f32.mrb[71].mxu1 }
0x193d   :  { %v11450_v39 = vpack.c.bf16 %v11141_v37, %v11138_v6 }
0x193f   :  { %14837 = vmatmul.mubr.msk.bf16.vlgmr.msra.gmra.mrb[48].mxu0 %vm5729_vm1, %v11450_v39  ;;  %16091 = vmatprep.mubr.msk.bf16.mxu1 %vm5729_vm1, %v11450_v39 }
0x1940   :  { %16128 = vmatpush3.bf16.xpose.msra.mxu0 %v12074_v20  ;;  %16092 = vmatmul.mubr.msk.bf16.vlgmr.msra.gmra.mrb[196].mxu1 %vm5729_vm1, %v11451_v5 }
0x1941   :  { %16108 = vmatpush3.bf16.xpose.msra.mxu1 %v11812_v8  ;;  %v16063_v63 = vpop.f32.mrb[72].mxu1  ;;  %11573 = vmatprep.mubr.bf16.mxu0 %v23546_v53 }
0x1942   :  { %v11154_v31 = vpop.f32.mrb[73].mxu1 }
0x1943   :  { %v16064_v10 = vpop.f32.mrb[74].mxu1 }
0x1944   :  { %v11453_v43 = vpack.c.bf16 %v16064_v10, %v16063_v63  ;;  %v11157_v48 = vpop.f32.mrb[75].mxu1 }
0x1945   :  { %v11452_v28 = vpack.c.bf16 %v11157_v48, %v11154_v31 }
0x1947   :  { %14838 = vmatmul.mubr.msk.bf16.gmra.mrb[52].mxu0 %vm5729_vm1, %v11451_v5  ;;  %16095 = vmatprep.mubr.msk.bf16.mxu1 %vm5729_vm1, %v11452_v28 }
0x1948   :  { %16096 = vmatmul.mubr.msk.bf16.gmra.mrb[200].mxu1 %vm5729_vm1, %v11453_v43  ;;  %11583 = vmatprep.mubr.bf16.mxu0 %v23546_v53 }
0x1949   :  { %v16079_v27 = vpop.f32.mrb[76].mxu1 }
0x194a   :  { %v11419_v29 = vpop.f32.mrb[77].mxu1 }
0x194b   :  { %v16080_v38 = vpop.f32.mrb[78].mxu1 }
0x194c   :  { %v11455_v42 = vpack.c.bf16 %v16080_v38, %v16079_v27  ;;  %v11422_v41 = vpop.f32.mrb[79].mxu1 }
0x194d   :  { %v11454_v32 = vpack.c.bf16 %v11422_v41, %v11419_v29 }
0x194f   :  { %14839 = vmatmul.mubr.msk.bf16.gmra.mrb[56].mxu0 %vm5729_vm1, %v11452_v28  ;;  %16099 = vmatprep.mubr.msk.bf16.mxu1 %vm5729_vm1, %v11454_v32 }
0x1950   :  { %16100 = vmatmul.mubr.msk.bf16.gmra.mrb[204].mxu1 %vm5729_vm1, %v11455_v42  ;;  %11593 = vmatprep.mubr.bf16.mxu0 %v23546_v53 }
0x1951   :  { %v16083_v7 = vpop.f32.mrb[80].mxu1 }
0x1952   :  { %v11435_v16 = vpop.f32.mrb[81].mxu1 }
0x1953   :  { %v16084_v15 = vpop.f32.mrb[82].mxu1 }
0x1954   :  { %v11457_v25 = vpack.c.bf16 %v16084_v15, %v16083_v7  ;;  %v11438_v58 = vpop.f32.mrb[83].mxu1 }
0x1955   :  { %v11456_v17 = vpack.c.bf16 %v11438_v58, %v11435_v16 }
0x1957   :  { %14840 = vmatmul.mubr.msk.bf16.gmra.mrb[60].mxu0 %vm5729_vm1, %v11453_v43  ;;  %16103 = vmatprep.mubr.msk.bf16.mxu1 %vm5729_vm1, %v11456_v17 }
0x1958   :  { %16104 = vmatmul.mubr.msk.bf16.gmra.mrb[208].mxu1 %vm5729_vm1, %v11457_v25  ;;  %11603 = vmatprep.mubr.bf16.mxu0 %v23546_v53 }
0x1959   :  { %16109 = vmatprep.mubr.msk.bf16.mxu1 %vm5729_vm1, %v22365_v47 }
0x195f   :  { %14841 = vmatmul.mubr.msk.bf16.gmra.mrb[64].mxu0 %vm5729_vm1, %v11454_v32 }
0x1960   :  { %16110 = vmatmul.mubr.msk.bf16.vlgmr.msra.gmra.mrb[84].mxu1 %vm5729_vm1, %v11792_v35  ;;  %11613 = vmatprep.mubr.bf16.mxu0 %v23546_v53 }
0x1961   :  { %16113 = vmatprep.mubr.msk.bf16.mxu1 %vm5729_vm1, %v22370_v23 }
0x1967   :  { %14842 = vmatmul.mubr.msk.bf16.gmra.mrb[68].mxu0 %vm5729_vm1, %v11455_v42 }
0x1968   :  { %16114 = vmatmul.mubr.msk.bf16.gmra.mrb[88].mxu1 %vm5729_vm1, %v11796_v57  ;;  %11623 = vmatprep.mubr.bf16.mxu0 %v23546_v53 }
0x196f   :  { %14843 = vmatmul.mubr.msk.bf16.gmra.mrb[72].mxu0 %vm5729_vm1, %v11456_v17 }
0x1970   :  { %11633 = vmatprep.mubr.bf16.mxu0 %v23546_v53 }
0x1977   :  { %14844 = vmatmul.mubr.msk.bf16.gmra.mrb[76].mxu0 %vm5729_vm1, %v11457_v25 }
0x1978   :  { %16129 = vmatprep.mubr.msk.bf16.mxu0 %vm5729_vm1, %v12052_v49 }
0x197f   :  { %16130 = vmatmul.mubr.msk.bf16.vlgmr.msra.gmra.mrb[112].mxu0 %vm5729_vm1, %v12054_v40 }
0x1980   :  { %16133 = vmatprep.mubr.msk.bf16.mxu0 %vm5729_vm1, %v12056_v33 }
0x1987   :  { %16134 = vmatmul.mubr.msk.bf16.gmra.mrb[116].mxu0 %vm5729_vm1, %v12058_v56 }
0x1988   :  { %12426 = vmatprep.mubr.bf16.mxu0 %v23546_v53 }
0x1a33   :  { %v16111_v46 = vpop.f32.mrb[84].mxu1 }
0x1a34   :  { %v11848_v1 = vpop.f32.mrb[85].mxu1  ;;  %v11885_v18 = vsel %vm5810_vm2, %v16111_v46, -inf }
0x1a35   :  { %v16112_v19 = vpop.f32.mrb[86].mxu1  ;;  %v11879_v47 = vsel %vm5810_vm2, %v11848_v1, -inf }
0x1a36   :  { %11880 = vmax.xlane.f32.xlu0 %v11879_v47  ;;  %v11851_v30 = vpop.f32.mrb[87].mxu1  ;;  %v11888_v36 = vsel %vm5810_vm2, %v16112_v19, -inf }
0x1a37   :  { %v11882_v12 = vsel %vm5810_vm2, %v11851_v30, -inf }
0x1a38   :  { %11883 = vmax.xlane.f32.xlu1 %v11882_v12 }
0x1a3a   :  { %11886 = vmax.xlane.f32.xlu0 %v11885_v18 }
0x1a3b   :  { %v16115_v2 = vpop.f32.mrb[88].mxu1 }
0x1a3c   :  { %v11864_v26 = vpop.f32.mrb[89].mxu1  ;;  %v11897_v51 = vsel %vm5810_vm2, %v16115_v2, -inf }
0x1a3d   :  { %v22434_v23 = vpop.f32.mrb[90].mxu1  ;;  %v11891_v44 = vsel %vm5810_vm2, %v11864_v26, -inf }
0x1a3e   :  { %11889 = vmax.xlane.f32.xlu0 %v11888_v36  ;;  %11892 = vmax.xlane.f32.xlu1 %v11891_v44  ;;  %v11867_v11 = vpop.f32.mrb[91].mxu1  ;;  %v11900_v13 = vsel %vm5810_vm2, %v22434_v23, -inf }
0x1a3f   :  { %v11894_v21 = vsel %vm5810_vm2, %v11867_v11, -inf }
0x1a42   :  { %11898 = vmax.xlane.f32.xlu1 %v11897_v51  ;;  %11895 = vmax.xlane.f32.xlu0 %v11894_v21 }
0x1a46   :  { %11901 = vmax.xlane.f32.xlu0 %v11900_v13 }
0x1a52   :  { %v22442_v60 = vpop.f32.mrb[112].mxu0 }
0x1a53   :  { %v22444_v34 = vpop.f32.mrb[113].mxu0  ;;  %v12147_v55 = vsel %vm5810_vm2, %v22442_v60, -inf }
0x1a54   :  { %v22446_v4 = vpop.f32.mrb[114].mxu0  ;;  %v12141_v22 = vsel %vm5810_vm2, %v22444_v34, -inf }
0x1a55   :  { %12142 = vmax.xlane.f32.xlu1 %v12141_v22  ;;  %v22450_v14 = vpop.f32.mrb[115].mxu0  ;;  %v12150_v45 = vsel %vm5810_vm2, %v22446_v4, -inf }
0x1a56   :  { %v12144_v24 = vsel %vm5810_vm2, %v22450_v14, -inf }
0x1a57   :  { %12145 = vmax.xlane.f32.xlu0 %v12144_v24 }
0x1a59   :  { %12148 = vmax.xlane.f32.xlu1 %v12147_v55 }
0x1a5a   :  { %v22456_v52 = vpop.f32.mrb[116].mxu0 }
0x1a5b   :  { %12151 = vmax.xlane.f32.xlu0 %v12150_v45  ;;  %v22460_v61 = vpop.f32.mrb[117].mxu0  ;;  %v12159_v6 = vsel %vm5810_vm2, %v22456_v52, -inf }
0x1a5c   :  { %v22462_v54 = vpop.f32.mrb[118].mxu0  ;;  %v12153_v3 = vsel %vm5810_vm2, %v22460_v61, -inf }
0x1a5d   :  { %12154 = vmax.xlane.f32.xlu1 %v12153_v3  ;;  %v22466_v62 = vpop.f32.mrb[119].mxu0  ;;  %v12162_v9 = vsel %vm5810_vm2, %v22462_v54, -inf }
0x1a5e   :  { %v12156_v59 = vsel %vm5810_vm2, %v22466_v62, -inf }
0x1a5f   :  { %12157 = vmax.xlane.f32.xlu0 %v12156_v59 }
0x1a61   :  { %12160 = vmax.xlane.f32.xlu1 %v12159_v6 }
0x1a63   :  { %12163 = vmax.xlane.f32.xlu0 %v12162_v9 }
0x1ac3   :  { %v11881_v5 = vpop.xlane.xlu0 %11880 }
0x1ac4   :  { %v11903_v37 = vsub.f32 %v11848_v1, %v11881_v5 }
0x1ac5   :  { %v11884_v39 = vpop.xlane.xlu1 %11883 }
0x1ac6   :  { %v11911_v63 = vmul.f32 1.442695, %v11903_v37  ;;  %v11904_v10 = vsub.f32 %v11851_v30, %v11884_v39 }
0x1ac7   :  { %v11887_v20 = vpop.xlane.xlu0 %11886 }
0x1ac8   :  { %v11905_v8 = vsub.f32 %v16111_v46, %v11887_v20  ;;  %v11913_v38 = vmul.f32 1.442695, %v11904_v10 }
0x1aca   :  { %v11915_v31 = vmul.f32 1.442695, %v11905_v8 }
0x1acb   :  { %v11893_v43 = vpop.xlane.xlu1 %11892  ;;  %v11890_v48 = vpop.xlane.xlu0 %11889 }
0x1acc   :  { %18193 = vpow2.f32 %v11915_v31  ;;  %v11906_v28 = vsub.f32 %v16112_v19, %v11890_v48  ;;  %v11907_v27 = vsub.f32 %v11864_v26, %v11893_v43 }
0x1acd   :  { %18195 = vpow2.f32 %v11911_v63 }
0x1ace   :  { %v11917_v29 = vmul.f32 1.442695, %v11906_v28  ;;  %v11919_v7 = vmul.f32 1.442695, %v11907_v27 }
0x1acf   :  { %v11899_v42 = vpop.xlane.xlu1 %11898  ;;  %v11896_v41 = vpop.xlane.xlu0 %11895 }
0x1ad0   :  { %v11909_v32 = vsub.f32 %v16115_v2, %v11899_v42  ;;  %18197 = vpow2.f32 %v11917_v29  ;;  %v11908_v15 = vsub.f32 %v11867_v11, %v11896_v41 }
0x1ad1   :  { %18199 = vpow2.f32 %v11913_v38 }
0x1ad2   :  { %v11923_v16 = vmul.f32 1.442695, %v11909_v32  ;;  %v11921_v57 = vmul.f32 1.442695, %v11908_v15  ;;  %v17612_v15 = vld [vmem:[%s23464_s8 + $0x1a8] ss:$12 sps:$4 sm:$0xff]  }
0x1ad3   :  { %v11902_v25 = vpop.xlane.xlu0 %11901  ;;  %12394 = vmatprep.subr.bf16.mxu0 %v17612_v15 }
0x1ad4   :  { %18201 = vpow2.f32 %v11923_v16  ;;  %v11910_v58 = vsub.f32 %v22434_v23, %v11902_v25  ;;  %v17610_v16 = vld [vmem:[%s23464_s8 + $0x1a4] ss:$12 sps:$4 sm:$0xff]   ;;  %v17616_v25 = vld [vmem:[%s23464_s8 + $0x1c0] ss:$12 sps:$4 sm:$0xff]  }
0x1ad5   :  { %18203 = vpow2.f32 %v11919_v7  ;;  %12395 = vmatpush1.bf16.msra.mxu0 %v17610_v16 }
0x1ad6   :  { %v22475_v17 = vpop.eup %18193  ;;  %v11925_v35 = vmul.f32 1.442695, %v11910_v58  ;;  %v17614_v58 = vld [vmem:[%s23464_s8 + $0x1bc] ss:$12 sps:$4 sm:$0xff]   ;;  %12396 = vmatprep.subr.bf16.mxu0 %v17616_v25 }
0x1ad7   :  { %v11933_v49 = vsel %vm5810_vm2, %v22475_v17, 0.0  ;;  %v22479_v40 = vpop.eup %18195 }
0x1ad8   :  { %18205 = vpow2.f32 %v11925_v35  ;;  %11934 = vadd.xlane.f32.xlu1 %v11933_v49  ;;  %v11927_v56 = vsel %vm5810_vm2, %v22479_v40, 0.0 }
0x1ad9   :  { %18207 = vpow2.f32 %v11921_v57  ;;  %12397 = vmatpush1.bf16.msra.mxu0 %v17614_v58 }
0x1ada   :  { %v22481_v33 = vpop.eup %18197 }
0x1adb   :  { %v11936_v46 = vsel %vm5810_vm2, %v22481_v33, 0.0  ;;  %v22487_v1 = vpop.eup %18199 }
0x1adc   :  { %11928 = vadd.xlane.f32.xlu1 %v11927_v56  ;;  %11937 = vadd.xlane.f32.xlu0 %v11936_v46  ;;  %v11930_v12 = vsel %vm5810_vm2, %v22487_v1, 0.0 }
0x1ade   :  { %v22489_v19 = vpop.eup %18201 }
0x1adf   :  { %v11945_v47 = vsel %vm5810_vm2, %v22489_v19, 0.0  ;;  %v22493_v30 = vpop.eup %18203 }
0x1ae0   :  { %11946 = vadd.xlane.f32.xlu1 %v11945_v47  ;;  %11931 = vadd.xlane.f32.xlu0 %v11930_v12  ;;  %v11939_v26 = vsel %vm5810_vm2, %v22493_v30, 0.0 }
0x1ae2   :  { %v22497_v18 = vpop.eup %18205  ;;  %v12143_v2 = vpop.xlane.xlu1 %12142 }
0x1ae3   :  { %v11948_v23 = vsel %vm5810_vm2, %v22497_v18, 0.0  ;;  %v22503_v44 = vpop.eup %18207  ;;  %v12165_v11 = vsub.f32 %v22444_v34, %v12143_v2 }
0x1ae4   :  { %11940 = vadd.xlane.f32.xlu1 %v11939_v26  ;;  %v12146_v36 = vpop.xlane.xlu0 %12145  ;;  %11949 = vadd.xlane.f32.xlu0 %v11948_v23  ;;  %v11942_v13 = vsel %vm5810_vm2, %v22503_v44, 0.0 }
0x1ae5   :  { %v12173_v24 = vmul.f32 1.442695, %v12165_v11  ;;  %v12166_v6 = vsub.f32 %v22450_v14, %v12146_v36 }
0x1ae6   :  { %v12149_v51 = vpop.xlane.xlu1 %12148 }
0x1ae7   :  { %v12167_v21 = vsub.f32 %v22442_v60, %v12149_v51  ;;  %v12175_v5 = vmul.f32 1.442695, %v12166_v6 }
0x1ae8   :  { %v12152_v22 = vpop.xlane.xlu0 %12151  ;;  %11943 = vadd.xlane.f32.xlu0 %v11942_v13 }
0x1ae9   :  { %v12177_v55 = vmul.f32 1.442695, %v12167_v21  ;;  %v12168_v45 = vsub.f32 %v22446_v4, %v12152_v22 }
0x1aea   :  { %v12155_v3 = vpop.xlane.xlu1 %12154 }
0x1aeb   :  { %18209 = vpow2.f32 %v12177_v55  ;;  %v12179_v34 = vmul.f32 1.442695, %v12168_v45  ;;  %v12169_v28 = vsub.f32 %v22460_v61, %v12155_v3 }
0x1aec   :  { %v12158_v59 = vpop.xlane.xlu0 %12157  ;;  %18211 = vpow2.f32 %v12173_v24 }
0x1aed   :  { %18213 = vpow2.f32 %v12179_v34  ;;  %v12170_v63 = vsub.f32 %v22466_v62, %v12158_v59  ;;  %v12181_v38 = vmul.f32 1.442695, %v12169_v28 }
0x1aee   :  { %v12161_v9 = vpop.xlane.xlu1 %12160  ;;  %18215 = vpow2.f32 %v12175_v5 }
0x1aef   :  { %v12171_v60 = vsub.f32 %v22456_v52, %v12161_v9 }
0x1af0   :  { %v12164_v37 = vpop.xlane.xlu0 %12163 }
0x1af1   :  { %v12185_v20 = vmul.f32 1.442695, %v12171_v60  ;;  %v12172_v8 = vsub.f32 %v22462_v54, %v12164_v37  ;;  %v12183_v54 = vmul.f32 1.442695, %v12170_v63 }
0x1af3   :  { %18217 = vpow2.f32 %v12185_v20  ;;  %v12187_v52 = vmul.f32 1.442695, %v12172_v8 }
0x1af5   :  { %v22512_v39 = vpop.eup %18209  ;;  %11971 = vrot.lane.b32.xlu1 %v23558_v50, %s18273_s15  ;;  %18219 = vpow2.f32 %v12187_v52 }
0x1af6   :  { %v12195_v4 = vsel %vm5810_vm2, %v22512_v39, 0.0  ;;  %v22519_v14 = vpop.eup %18211  ;;  %18221 = vpow2.f32 %v12183_v54 }
0x1af7   :  { %12196 = vadd.xlane.f32.xlu0 %v12195_v4  ;;  %v12189_v31 = vsel %vm5810_vm2, %v22519_v14, 0.0  ;;  %v22524_v10 = vpop.eup %18213  ;;  %18223 = vpow2.f32 %v12181_v38 }
0x1af8   :  { %v12198_v50 = vsel %vm5810_vm2, %v22524_v10, 0.0  ;;  %v22528_v43 = vpop.eup %18215 }
0x1af9   :  { %v12192_v62 = vsel %vm5810_vm2, %v22528_v43, 0.0 }
0x1afb   :  { %12190 = vadd.xlane.f32.xlu0 %v12189_v31 }
0x1afd   :  { %v22532_v48 = vpop.eup %18217 }
0x1afe   :  { %v12207_v27 = vsel %vm5810_vm2, %v22532_v48, 0.0 }
0x1aff   :  { %12199 = vadd.xlane.f32.xlu0 %v12198_v50  ;;  %v22537_v29 = vpop.eup %18219 }
0x1b00   :  { %v12210_v42 = vsel %vm5810_vm2, %v22537_v29, 0.0  ;;  %v22541_v41 = vpop.eup %18221 }
0x1b01   :  { %v12204_v32 = vsel %vm5810_vm2, %v22541_v41, 0.0  ;;  %v22545_v61 = vpop.eup %18223 }
0x1b02   :  { %v12201_v7 = vsel %vm5810_vm2, %v22545_v61, 0.0 }
0x1b03   :  { %12193 = vadd.xlane.f32.xlu0 %v12192_v62  ;;  %v17613_v62 = vld [vmem:[%s23464_s8 + $0x1ac] ss:$12 sps:$4 sm:$0xff]  }
0x1b07   :  { %12208 = vadd.xlane.f32.xlu0 %v12207_v27 }
0x1b0b   :  { %12211 = vadd.xlane.f32.xlu0 %v12210_v42 }
0x1b0f   :  { %12205 = vadd.xlane.f32.xlu0 %v12204_v32 }
0x1b19   :  { %12202 = vadd.xlane.f32.xlu1 %v12201_v7 }
0x1b25   :  { %12233 = vrot.lane.b32.xlu0 %v23559_v0, %s18273_s15 }
0x1b65   :  { %v11935_v0 = vpop.xlane.xlu1 %11934 }
0x1b69   :  { %v11929_v35 = vpop.xlane.xlu1 %11928  ;;  %v11938_v57 = vpop.xlane.xlu0 %11937 }
0x1b6a   :  { %18225 = vrcp.f32 %v11938_v57 }
0x1b6b   :  { %18227 = vrcp.f32 %v11929_v35  ;;  %v5714_v35 = vld [vmem:[%s23464_s8 + $0x1d4] sm:$0xff] }
0x1b6c   :  { %18229 = vrcp.f32 %v11935_v0  ;;  %v14876_v57 = vcombine.high %v5714_v35, %v5714_v35 }
0x1b6d   :  { %v11947_v49 = vpop.xlane.xlu1 %11946  ;;  %v11932_v56 = vpop.xlane.xlu0 %11931 }
0x1b6e   :  { %18231 = vrcp.f32 %v11932_v56  ;;  %14878 = vmatprep.subr.msk.bf16.mxu0 %vm6862_vm4, %v14876_v57  ;;  %v23569_v57 = vld [vmem:[#allocation2_spill] sm:$0xff] }
0x1b71   :  { %v11941_v46 = vpop.xlane.xlu1 %11940  ;;  %v11950_v47 = vpop.xlane.xlu0 %11949 }
0x1b72   :  { %18233 = vrcp.f32 %v11950_v47 }
0x1b73   :  { %18235 = vrcp.f32 %v11941_v46 }
0x1b74   :  { %v18226_v2 = vpop.eup %18225  ;;  %18237 = vrcp.f32 %v11947_v49  ;;  %v14875_v49 = vcombine.low %v5714_v35, %v5714_v35  ;;  %v5716_v35 = vld [vmem:[%s23466_s9] sm:$0x7] }
0x1b75   :  { %v11972_v12 = vpop.permute.xlu1 %11971  ;;  %v11944_v26 = vpop.xlane.xlu0 %11943  ;;  %v11962_v51 = vmul.f32 %v18226_v2, %v22481_v33 }
0x1b76   :  { %16117 = vmatprep.subr.bf16.mxu1 %v11972_v12  ;;  %v18228_v23 = vpop.eup %18227  ;;  %18239 = vrcp.f32 %v11944_v26 }
0x1b77   :  { %16118 = vmatpush3.bf16.msra.mxu1 %v11972_v12  ;;  %v18230_v36 = vpop.eup %18229  ;;  %v11959_v21 = vmul.f32 %v18228_v23, %v22479_v40  ;;  %v17621_v23 = vld [vmem:[%s23465_s10] ss:$8 sps:$4 sm:$0xff]  }
0x1b78   :  { %v18232_v11 = vpop.eup %18231  ;;  %v11961_v22 = vmul.f32 %v18230_v36, %v22475_v17  ;;  %v17626_v36 = vld [vmem:[%s23465_s10 + $0x14] ss:$8 sps:$4 sm:$0xff]  }
0x1b79   :  { %v11960_v13 = vmul.f32 %v18232_v11, %v22487_v1 }
0x1b7a   :  { %v11968_v55 = vpack.c.bf16 %v11962_v51, %v11961_v22  ;;  %v17624_v51 = vld [vmem:[%s23465_s10 + $0x10] ss:$8 sps:$4 sm:$0xff]  }
0x1b7b   :  { %v11967_v24 = vpack.c.bf16 %v11960_v13, %v11959_v21  ;;  %v17629_v13 = vld [vmem:[%s23465_s10 + $0x24] ss:$8 sps:$4 sm:$0xff]  }
0x1b7c   :  { %v18234_v45 = vpop.eup %18233 }
0x1b7d   :  { %16119 = vmatprep.mubr.msk.bf16.mxu1 %vm5810_vm2, %v11967_v24  ;;  %v18236_v3 = vpop.eup %18235  ;;  %v11966_v34 = vmul.f32 %v18234_v45, %v22497_v18 }
0x1b7e   :  { %16120 = vmatmul.mubr.msk.bf16.vlgmr.msra.gmra.mrb[92].mxu1 %vm5810_vm2, %v11968_v55  ;;  %v18238_v59 = vpop.eup %18237  ;;  %v11963_v33 = vmul.f32 %v18236_v3, %v22493_v30  ;;  %v17627_v3 = vld [vmem:[%s23465_s10 + $0x20] ss:$8 sps:$4 sm:$0xff]  }
0x1b7f   :  { %v11965_v1 = vmul.f32 %v18238_v59, %v22489_v19  ;;  %v17632_v59 = vld [vmem:[%s23465_s10 + $0x34] ss:$8 sps:$4 sm:$0xff]  }
0x1b80   :  { %v18240_v6 = vpop.eup %18239 }
0x1b81   :  { %v11964_v40 = vmul.f32 %v18240_v6, %v22503_v44  ;;  %v11970_v5 = vpack.c.bf16 %v11966_v34, %v11965_v1  ;;  %v17630_v6 = vld [vmem:[%s23465_s10 + $0x30] ss:$8 sps:$4 sm:$0xff]   ;;  %v17635_v34 = vld [vmem:[%s23465_s10 + $0x44] ss:$8 sps:$4 sm:$0xff]  }
0x1b82   :  { %v17636_v1 = vld [vmem:[%s23465_s10 + $0x50] ss:$8 sps:$4 sm:$0xff]  }
0x1b83   :  { %v11969_v17 = vpack.c.bf16 %v11964_v40, %v11963_v33  ;;  %v17633_v33 = vld [vmem:[%s23465_s10 + $0x40] ss:$8 sps:$4 sm:$0xff]   ;;  %v17638_v40 = vld [vmem:[%s23465_s10 + $0x54] ss:$8 sps:$4 sm:$0xff]  }
0x1b84   :  { %v12197_v9 = vpop.xlane.xlu0 %12196 }
0x1b85   :  { %16123 = vmatprep.mubr.msk.bf16.mxu1 %vm5810_vm2, %v11969_v17  ;;  %v17639_v17 = vld [vmem:[%s23465_s10 + $0x60] ss:$8 sps:$4 sm:$0xff]  }
0x1b86   :  { %16124 = vmatmul.mubr.msk.bf16.gmra.mrb[96].mxu1 %vm5810_vm2, %v11970_v5  ;;  %v17644_v5 = vld [vmem:[%s23465_s10 + $0x74] ss:$8 sps:$4 sm:$0xff]  }
0x1b88   :  { %v12191_v60 = vpop.xlane.xlu0 %12190 }
0x1b89   :  { %18241 = vrcp.f32 %v12191_v60  ;;  %v17642_v60 = vld [vmem:[%s23465_s10 + $0x70] ss:$8 sps:$4 sm:$0xff]  }
0x1b8c   :  { %v12200_v37 = vpop.xlane.xlu0 %12199 }
0x1b90   :  { %v12194_v20 = vpop.xlane.xlu0 %12193 }
0x1b91   :  { %18243 = vrcp.f32 %v12194_v20  ;;  %v17645_v20 = vld [vmem:[%s23465_s10 + $0x80] ss:$8 sps:$4 sm:$0xff]  }
0x1b92   :  { %18245 = vrcp.f32 %v12200_v37  ;;  %v17647_v37 = vld [vmem:[%s23465_s10 + $0x84] ss:$8 sps:$4 sm:$0xff]  }
0x1b93   :  { %18247 = vrcp.f32 %v12197_v9  ;;  %v18242_v8 = vpop.eup %18241  ;;  %v17641_v9 = vld [vmem:[%s23465_s10 + $0x64] ss:$8 sps:$4 sm:$0xff]  }
0x1b94   :  { %v12209_v18 = vpop.xlane.xlu0 %12208  ;;  %v12221_v63 = vmul.f32 %v18242_v8, %v22519_v14  ;;  %v17617_v14 = vld [vmem:[%s23464_s8 + $0x1c4] ss:$12 sps:$4 sm:$0xff]  }
0x1b98   :  { %v12212_v30 = vpop.xlane.xlu0 %12211 }
0x1b99   :  { %18249 = vrcp.f32 %v12212_v30 }
0x1b9b   :  { %v18244_v44 = vpop.eup %18243 }
0x1b9c   :  { %v18246_v4 = vpop.eup %18245  ;;  %v12206_v19 = vpop.xlane.xlu0 %12205  ;;  %v12222_v52 = vmul.f32 %v18244_v44, %v22528_v43 }
0x1b9d   :  { %v18248_v31 = vpop.eup %18247  ;;  %v12224_v50 = vmul.f32 %v18246_v4, %v22524_v10  ;;  %18251 = vrcp.f32 %v12206_v19 }
0x1b9e   :  { %v12229_v54 = vpack.c.bf16 %v12222_v52, %v12221_v63  ;;  %v12223_v27 = vmul.f32 %v18248_v31, %v22512_v39  ;;  %18253 = vrcp.f32 %v12209_v18  ;;  %v17650_v18 = vld [vmem:[%s23465_s10 + $0x94] ss:$8 sps:$4 sm:$0xff]   ;;  %v17648_v52 = vld [vmem:[%s23465_s10 + $0x90] ss:$8 sps:$4 sm:$0xff]   ;;  %v17653_v31 = vld [vmem:[%s23465_s10 + $0xa4] ss:$8 sps:$4 sm:$0xff]  }
0x1ba0   :  { %16139 = vmatprep.mubr.msk.bf16.mxu1 %vm5810_vm2, %v12229_v54  ;;  %v12234_v28 = vpop.permute.xlu0 %12233  ;;  %v12230_v38 = vpack.c.bf16 %v12224_v50, %v12223_v27  ;;  %v17651_v54 = vld [vmem:[%s23465_s10 + $0xa0] ss:$8 sps:$4 sm:$0xff]   ;;  %v17656_v50 = vld [vmem:[%s23465_s10 + $0xb4] ss:$8 sps:$4 sm:$0xff]  }
0x1ba1   :  { %16137 = vmatprep.subr.bf16.mxu1 %v12234_v28  ;;  %v17657_v27 = vld [vmem:[%s23465_s10 + $0xc0] ss:$8 sps:$4 sm:$0xff]  }
0x1ba2   :  { %16138 = vmatpush3.bf16.msra.mxu1 %v12234_v28  ;;  %v17659_v28 = vld [vmem:[%s23465_s10 + $0xc4] ss:$8 sps:$4 sm:$0xff]  }
0x1ba3   :  { %16147 = vmatprep.subr.bf16.mxu1 %v17613_v62  ;;  %v18250_v43 = vpop.eup %18249 }
0x1ba4   :  { %v12228_v7 = vmul.f32 %v18250_v43, %v22537_v29  ;;  %v17620_v29 = vld [vmem:[%s23464_s8 + $0x1dc] ss:$0 sps:$4 sm:$0xff]  }
0x1ba5   :  { %16140 = vmatmul.mubr.msk.bf16.vlgmr.msra.gmra.mrb[100].mxu1 %vm5810_vm2, %v12230_v38  ;;  %v17662_v38 = vld [vmem:[%s23465_s10 + $0xd4] ss:$8 sps:$4 sm:$0xff]  }
0x1ba6   :  { %v12203_v10 = vpop.xlane.xlu1 %12202  ;;  %16148 = vmatpush3.bf16.msra.mxu1 %v17613_v62  ;;  %v17654_v62 = vld [vmem:[%s23465_s10 + $0xb0] ss:$8 sps:$4 sm:$0xff]  }
0x1ba7   :  { %18255 = vrcp.f32 %v12203_v10  ;;  %16149 = vmatprep.subr.bf16.mxu1 %v17617_v14  ;;  %v18252_v39 = vpop.eup %18251 }
0x1ba8   :  { %v18254_v42 = vpop.eup %18253  ;;  %v12226_v15 = vmul.f32 %v18252_v39, %v22541_v41  ;;  %v12392_v41 = vsel %vm6862_vm4, %v17620_v29, 0 }
0x1ba9   :  { %v12227_v25 = vmul.f32 %v18254_v42, %v22532_v48  ;;  %v12386_v48 = vsel %vm6862_vm4, %v14875_v49, 0  ;;  %v22729_v49 = vrot.slane %v5716_v35, %v23569_v57 }
0x1baa   :  { %16150 = vmatpush3.bf16.msra.mxu1 %v17617_v14  ;;  %12399 = vmatpush1.bf16.msra.mxu0 %v12386_v48  ;;  %v23570_v48 = vld [vmem:[#allocation4_spill] sm:$0xff] }
0x1bab   :  { %v12232_v0 = vpack.c.bf16 %v12228_v7, %v12227_v25  ;;  %16752 = vmatprep.subr.msk.bf16.mxu1 %vm6862_vm4, %v17620_v29  ;;  %v17660_v7 = vld [vmem:[%s23465_s10 + $0xd0] ss:$8 sps:$4 sm:$0xff]   ;;  %v17668_v25 = vld [vmem:[%s23465_s10 + $0xf4] ss:$8 sps:$4 sm:$0xff]  }
0x1bae   :  { %16152 = vmatpush3.bf16.msra.mxu1 %v12392_v41  ;;  %v22732_v41 = vrot.slane %v5716_v35, %v23570_v48 }
0x1bb1   :  { %v18256_v32 = vpop.eup %18255 }
0x1bb2   :  { %v12225_v16 = vmul.f32 %v18256_v32, %v22545_v61  ;;  %v17623_v61 = vld [vmem:[%s23465_s10 + $0x4] ss:$8 sps:$4 sm:$0xff]  }
0x1bb3   :  { %13016 = vmatprep.subr.bf16.mxu0 %v17623_v61  ;;  %v23571_v61 = vld [vmem:[#allocation3_spill] sm:$0xff] }
0x1bb4   :  { %v12231_v58 = vpack.c.bf16 %v12226_v15, %v12225_v16  ;;  %v17665_v16 = vld [vmem:[%s23465_s10 + $0xe4] ss:$8 sps:$4 sm:$0xff]   ;;  %v17663_v15 = vld [vmem:[%s23465_s10 + $0xe0] ss:$8 sps:$4 sm:$0xff]  }
0x1bb6   :  { %16143 = vmatprep.mubr.msk.bf16.mxu1 %vm5810_vm2, %v12231_v58  ;;  %v17666_v58 = vld [vmem:[%s23465_s10 + $0xf0] ss:$8 sps:$4 sm:$0xff]  }
0x1bb7   :  { %16144 = vmatmul.mubr.msk.bf16.gmra.mrb[104].mxu1 %vm5810_vm2, %v12232_v0  ;;  %v17671_v0 = vld [vmem:[%s23465_s10 + $0x104] ss:$8 sps:$4 sm:$0xff]  }
0x1c51   :  { %v16121_v56 = vpop.f32.mrb[92].mxu1 }
0x1c52   :  { %v12020_v46 = vpop.f32.mrb[93].mxu1 }
0x1c53   :  { %v16122_v47 = vpop.f32.mrb[94].mxu1 }
0x1c54   :  { %v12314_v12 = vpack.c.bf16 %v16122_v47, %v16121_v56  ;;  %v12023_v2 = vpop.f32.mrb[95].mxu1  ;;  %v22735_v56 = vrot.slane %v5716_v35, %v23571_v61 }
0x1c55   :  { %v12313_v26 = vpack.c.bf16 %v12023_v2, %v12020_v46 }
0x1c57   :  { %14879 = vmatmul.mubr.msk.bf16.vlgmr.msra.gmra.mrb[48].mxu0 %vm5729_vm1, %v12313_v26  ;;  %16153 = vmatprep.mubr.msk.bf16.mxu1 %vm5729_vm1, %v12313_v26 }
0x1c58   :  { %16154 = vmatmul.mubr.msk.bf16.vlgmr.msra.gmra.mrb[196].mxu1 %vm5729_vm1, %v12314_v12  ;;  %12436 = vmatprep.mubr.bf16.mxu0 %v23546_v53 }
0x1c59   :  { %v16125_v11 = vpop.f32.mrb[96].mxu1  ;;  %13017 = vmatpush1.bf16.msra.mxu0 %v17621_v23 }
0x1c5a   :  { %v12036_v21 = vpop.f32.mrb[97].mxu1  ;;  %13018 = vmatprep.subr.bf16.mxu0 %v17626_v36 }
0x1c5b   :  { %v16126_v22 = vpop.f32.mrb[98].mxu1 }
0x1c5c   :  { %v12316_v24 = vpack.c.bf16 %v16126_v22, %v16125_v11  ;;  %v12039_v55 = vpop.f32.mrb[99].mxu1 }
0x1c5d   :  { %v12315_v45 = vpack.c.bf16 %v12039_v55, %v12036_v21  ;;  %13019 = vmatpush1.bf16.msra.mxu0 %v17624_v51 }
0x1c5e   :  { %13020 = vmatprep.subr.bf16.mxu0 %v17629_v13 }
0x1c5f   :  { %14880 = vmatmul.mubr.msk.bf16.gmra.mrb[52].mxu0 %vm5729_vm1, %v12314_v12  ;;  %16157 = vmatprep.mubr.msk.bf16.mxu1 %vm5729_vm1, %v12315_v45 }
0x1c60   :  { %16158 = vmatmul.mubr.msk.bf16.gmra.mrb[200].mxu1 %vm5729_vm1, %v12316_v24  ;;  %12446 = vmatprep.mubr.bf16.mxu0 %v23546_v53 }
0x1c61   :  { %13021 = vmatpush1.bf16.msra.mxu0 %v17627_v3 }
0x1c62   :  { %13022 = vmatprep.subr.bf16.mxu0 %v17632_v59  ;;  %v17669_v59 = vld [vmem:[%s23465_s10 + $0x100] ss:$8 sps:$4 sm:$0xff]  }
0x1c65   :  { %13023 = vmatpush1.bf16.msra.mxu0 %v17630_v6 }
0x1c66   :  { %13024 = vmatprep.subr.bf16.mxu0 %v17635_v34  ;;  %v17674_v34 = vld [vmem:[%s23465_s10 + $0x114] ss:$8 sps:$4 sm:$0xff]  }
0x1c67   :  { %14881 = vmatmul.mubr.msk.bf16.gmra.mrb[56].mxu0 %vm5729_vm1, %v12315_v45 }
0x1c68   :  { %12456 = vmatprep.mubr.bf16.mxu0 %v23546_v53 }
0x1c69   :  { %13025 = vmatpush1.bf16.msra.mxu0 %v17633_v33 }
0x1c6a   :  { %13026 = vmatprep.subr.bf16.mxu0 %v17638_v40 }
0x1c6d   :  { %13027 = vmatpush1.bf16.msra.mxu0 %v17636_v1 }
0x1c6e   :  { %13028 = vmatprep.subr.bf16.mxu0 %v17641_v9  ;;  %v17672_v9 = vld [vmem:[%s23465_s10 + $0x110] ss:$8 sps:$4 sm:$0xff]  }
0x1c6f   :  { %14882 = vmatmul.mubr.msk.bf16.gmra.mrb[60].mxu0 %vm5729_vm1, %v12316_v24 }
0x1c70   :  { %12466 = vmatprep.mubr.bf16.mxu0 %v23546_v53 }
0x1c71   :  { %13029 = vmatpush1.bf16.msra.mxu0 %v17639_v17  ;;  %v17677_v17 = vld [vmem:[%s23465_s10 + $0x124] ss:$8 sps:$4 sm:$0xff]  }
0x1c72   :  { %13030 = vmatprep.subr.bf16.mxu0 %v17644_v5 }
0x1c75   :  { %13031 = vmatpush1.bf16.msra.mxu0 %v17642_v60 }
0x1c76   :  { %13032 = vmatprep.subr.bf16.mxu0 %v17647_v37 }
0x1c78   :  { %v16141_v30 = vpop.f32.mrb[100].mxu1 }
0x1c79   :  { %v12282_v8 = vpop.f32.mrb[101].mxu1  ;;  %13033 = vmatpush1.bf16.msra.mxu0 %v17645_v20  ;;  %v17681_v20 = vld [vmem:[%s23467_s12] ss:$12 sps:$4 sm:$0xff]  }
0x1c7a   :  { %v16142_v44 = vpop.f32.mrb[102].mxu1  ;;  %13034 = vmatprep.subr.bf16.mxu0 %v17650_v18 }
0x1c7b   :  { %v12318_v4 = vpack.c.bf16 %v16142_v44, %v16141_v30  ;;  %v12285_v19 = vpop.f32.mrb[103].mxu1 }
0x1c7c   :  { %v12317_v63 = vpack.c.bf16 %v12285_v19, %v12282_v8 }
0x1c7d   :  { %13035 = vmatpush1.bf16.msra.mxu0 %v17648_v52 }
0x1c7e   :  { %14883 = vmatmul.mubr.msk.bf16.gmra.mrb[64].mxu0 %vm5729_vm1, %v12317_v63  ;;  %16161 = vmatprep.mubr.msk.bf16.mxu1 %vm5729_vm1, %v12317_v63 }
0x1c7f   :  { %16162 = vmatmul.mubr.msk.bf16.gmra.mrb[204].mxu1 %vm5729_vm1, %v12318_v4  ;;  %12476 = vmatprep.mubr.bf16.mxu0 %v23546_v53 }
0x1c80   :  { %13036 = vmatprep.subr.bf16.mxu0 %v17653_v31 }
0x1c81   :  { %13037 = vmatpush1.bf16.msra.mxu0 %v17651_v54  ;;  %v17686_v54 = vld [vmem:[%s23467_s12 + $0x1c] ss:$12 sps:$4 sm:$0xff]  }
0x1c82   :  { %13038 = vmatprep.subr.bf16.mxu0 %v17656_v50 }
0x1c85   :  { %13039 = vmatpush1.bf16.msra.mxu0 %v17654_v62 }
0x1c86   :  { %14884 = vmatmul.mubr.msk.bf16.gmra.mrb[68].mxu0 %vm5729_vm1, %v12318_v4  ;;  %13040 = vmatprep.subr.bf16.mxu0 %v17659_v28  ;;  %v17683_v4 = vld [vmem:[%s23467_s12 + $0x4] ss:$12 sps:$4 sm:$0xff]   ;;  %v17675_v28 = vld [vmem:[%s23465_s10 + $0x120] ss:$8 sps:$4 sm:$0xff]  }
0x1c87   :  { %12486 = vmatprep.mubr.bf16.mxu0 %v23546_v53  ;;  %13627 = vmatprep.subr.bf16.mxu1 %v17683_v4  ;;  %v17707_v4 = vld [vmem:[%s23467_s12 + $0xc4] ss:$12 sps:$4 sm:$0xff]  }
0x1c88   :  { %13628 = vmatpush1.bf16.msra.mxu1 %v17681_v20  ;;  %v17699_v20 = vld [vmem:[%s23467_s12 + $0x90] ss:$12 sps:$4 sm:$0xff]  }
0x1c89   :  { %13041 = vmatpush1.bf16.msra.mxu0 %v17657_v27  ;;  %v17680_v27 = vld [vmem:[%s23465_s10 + $0x134] ss:$8 sps:$4 sm:$0xff]   ;;  %13629 = vmatprep.subr.bf16.mxu1 %v17686_v54 }
0x1c8a   :  { %v16145_v14 = vpop.f32.mrb[104].mxu1  ;;  %13042 = vmatprep.subr.bf16.mxu0 %v17662_v38 }
0x1c8b   :  { %v12298_v10 = vpop.f32.mrb[105].mxu1 }
0x1c8c   :  { %v16146_v43 = vpop.f32.mrb[106].mxu1 }
0x1c8d   :  { %v12320_v39 = vpack.c.bf16 %v16146_v43, %v16145_v14  ;;  %v12301_v42 = vpop.f32.mrb[107].mxu1  ;;  %13043 = vmatpush1.bf16.msra.mxu0 %v17660_v7  ;;  %v17684_v14 = vld [vmem:[%s23467_s12 + $0x18] ss:$12 sps:$4 sm:$0xff]   ;;  %v17689_v43 = vld [vmem:[%s23467_s12 + $0x34] ss:$12 sps:$4 sm:$0xff]  }
0x1c8e   :  { %v12319_v32 = vpack.c.bf16 %v12301_v42, %v12298_v10  ;;  %13044 = vmatprep.subr.bf16.mxu0 %v17665_v16  ;;  %13630 = vmatpush1.bf16.msra.mxu1 %v17684_v14  ;;  %v17687_v16 = vld [vmem:[%s23467_s12 + $0x30] ss:$12 sps:$4 sm:$0xff]  }
0x1c8f   :  { %13631 = vmatprep.subr.bf16.mxu1 %v17689_v43 }
0x1c90   :  { %14885 = vmatmul.mubr.msk.bf16.gmra.mrb[72].mxu0 %vm5729_vm1, %v12319_v32  ;;  %16165 = vmatprep.mubr.msk.bf16.mxu1 %vm5729_vm1, %v12319_v32  ;;  %v17678_v32 = vld [vmem:[%s23465_s10 + $0x130] ss:$8 sps:$4 sm:$0xff]  }
0x1c91   :  { %16166 = vmatmul.mubr.msk.bf16.gmra.mrb[208].mxu1 %vm5729_vm1, %v12320_v39  ;;  %12496 = vmatprep.mubr.bf16.mxu0 %v23546_v53 }
0x1c92   :  { %13045 = vmatpush1.bf16.msra.mxu0 %v17663_v15  ;;  %13632 = vmatpush1.bf16.msra.mxu1 %v17687_v16 }
0x1c93   :  { %13046 = vmatprep.subr.bf16.mxu0 %v17668_v25 }
0x1c96   :  { %13047 = vmatpush1.bf16.msra.mxu0 %v17666_v58  ;;  %v17692_v58 = vld [vmem:[%s23467_s12 + $0x4c] ss:$12 sps:$4 sm:$0xff]  }
0x1c97   :  { %13129 = vmatprep.subr.bf16.mxu0 %v17671_v0  ;;  %13633 = vmatprep.subr.bf16.mxu1 %v17692_v58  ;;  %v17705_v58 = vld [vmem:[%s23467_s12 + $0xc0] ss:$12 sps:$4 sm:$0xff]  }
0x1c98   :  { %14886 = vmatmul.mubr.msk.bf16.gmra.mrb[76].mxu0 %vm5729_vm1, %v12320_v39 }
0x1d2a   :  { %v12428_v29 = vpop.f32.mrb[48].mxu0 }
0x1d2b   :  { %v12430_v46 = vpop.f32.mrb[49].mxu0  ;;  %v16155_v47 = vpop.f32.mrb[196].mxu1  ;;  %v22756_v55 = vadd.f32 %v22735_v56, %v12428_v29 }
0x1d2c   :  { %v22738_v12 = vadd.f32 %v16155_v47, %v22729_v49  ;;  %v12432_v2 = vpop.f32.mrb[50].mxu0  ;;  %v12541_v26 = vpop.f32.mrb[197].mxu1  ;;  %v22747_v21 = vadd.f32 %v22732_v41, %v12430_v46  ;;  %v17690_v47 = vld [vmem:[%s23467_s12 + $0x48] ss:$12 sps:$4 sm:$0xff]  }
0x1d2d   :  { %v22741_v23 = vadd.f32 %v22735_v56, %v12432_v2  ;;  %v22744_v36 = vadd.f32 %v22729_v49, %v12541_v26  ;;  %v12434_v11 = vpop.f32.mrb[51].mxu0  ;;  %v16156_v51 = vpop.f32.mrb[198].mxu1  ;;  %v17695_v26 = vld [vmem:[%s23467_s12 + $0x64] ss:$12 sps:$4 sm:$0xff]   ;;  %13634 = vmatpush1.bf16.msra.mxu1 %v17690_v47 }
0x1d2e   :  { %23572 = vst [vmem:[#allocation12_spill] sm:$0xff] %v22738_v12  ;;  %v22750_v13 = vadd.f32 %v22732_v41, %v12434_v11  ;;  %v22753_v22 = vadd.f32 %v16156_v51, %v22729_v49  ;;  %v12544_v24 = vpop.f32.mrb[199].mxu1  ;;  %13635 = vmatprep.subr.bf16.mxu1 %v17695_v26 }
0x1d2f   :  { %23573 = vst [vmem:[#allocation23_spill] sm:$0xff] %v22744_v36  ;;  %v22759_v45 = vadd.f32 %v22729_v49, %v12544_v24  ;;  %v12716_v6 = vpack.c.bf16 %v22741_v23, %v22756_v55 }
0x1d30   :  { %23574 = vst [vmem:[#allocation5_spill] sm:$0xff] %v22753_v22  ;;  %v12717_v3 = vpack.c.bf16 %v22750_v13, %v22747_v21 }
0x1d31   :  { %23575 = vst [vmem:[#allocation6_spill] sm:$0xff] %v22759_v45 }
0x1d32   :  { %v12438_v33 = vpop.f32.mrb[52].mxu0  ;;  %13048 = vmatprep.mubr.bf16.mxu0 %v12717_v3  ;;  %v17693_v3 = vld [vmem:[%s23467_s12 + $0x60] ss:$12 sps:$4 sm:$0xff]  }
0x1d33   :  { %v12440_v40 = vpop.f32.mrb[53].mxu0  ;;  %v16159_v1 = vpop.f32.mrb[200].mxu1  ;;  %13049 = vmatmul.mubr.bf16.vlgmr.msra.gmra.mrb[120].mxu0 %v12716_v6  ;;  %v22805_v50 = vadd.f32 %v22735_v56, %v12438_v33  ;;  %13636 = vmatpush1.bf16.msra.mxu1 %v17693_v3 }
0x1d34   :  { %v22778_v5 = vadd.f32 %v16159_v1, %v22729_v49  ;;  %v12442_v60 = vpop.f32.mrb[54].mxu0  ;;  %v12557_v37 = vpop.f32.mrb[201].mxu1  ;;  %13130 = vmatpush1.bf16.msra.mxu0 %v17669_v59  ;;  %v22793_v19 = vadd.f32 %v22732_v41, %v12440_v40  ;;  %v17696_v1 = vld [vmem:[%s23467_s12 + $0x78] ss:$12 sps:$4 sm:$0xff]  }
0x1d35   :  { %v22784_v18 = vadd.f32 %v22735_v56, %v12442_v60  ;;  %v22787_v30 = vadd.f32 %v22729_v49, %v12557_v37  ;;  %v12444_v8 = vpop.f32.mrb[55].mxu0  ;;  %v16160_v44 = vpop.f32.mrb[202].mxu1  ;;  %13131 = vmatprep.subr.bf16.mxu0 %v17674_v34  ;;  %v17698_v34 = vld [vmem:[%s23467_s12 + $0x7c] ss:$12 sps:$4 sm:$0xff]  }
0x1d36   :  { %23576 = vst [vmem:[#allocation7_spill] sm:$0xff] %v22778_v5  ;;  %v22796_v63 = vadd.f32 %v22732_v41, %v12444_v8  ;;  %v22799_v52 = vadd.f32 %v16160_v44, %v22729_v49  ;;  %v12560_v31 = vpop.f32.mrb[203].mxu1  ;;  %13637 = vmatprep.subr.bf16.mxu1 %v17698_v34  ;;  %v17704_v8 = vld [vmem:[%s23467_s12 + $0xac] ss:$12 sps:$4 sm:$0xff]   ;;  %v17702_v44 = vld [vmem:[%s23467_s12 + $0xa8] ss:$12 sps:$4 sm:$0xff]  }
0x1d37   :  { %23577 = vst [vmem:[#allocation8_spill] sm:$0xff] %v22787_v30  ;;  %v22808_v62 = vadd.f32 %v22729_v49, %v12560_v31  ;;  %v12719_v10 = vpack.c.bf16 %v22784_v18, %v22805_v50  ;;  %13638 = vmatpush1.bf16.msra.mxu1 %v17696_v1 }
0x1d38   :  { %23578 = vst [vmem:[#allocation24_spill] sm:$0xff] %v22799_v52  ;;  %v12720_v38 = vpack.c.bf16 %v22796_v63, %v22793_v19  ;;  %13132 = vmatpush1.bf16.msra.mxu0 %v17672_v9 }
0x1d39   :  { %23579 = vst [vmem:[#allocation9_spill] sm:$0xff] %v22808_v62  ;;  %13133 = vmatprep.subr.bf16.mxu0 %v17677_v17  ;;  %v17701_v17 = vld [vmem:[%s23467_s12 + $0x94] ss:$12 sps:$4 sm:$0xff]  }
0x1d3a   :  { %v12448_v39 = vpop.f32.mrb[56].mxu0  ;;  %13058 = vmatprep.mubr.bf16.mxu0 %v12720_v38  ;;  %13639 = vmatprep.subr.bf16.mxu1 %v17701_v17 }
0x1d3b   :  { %v12450_v42 = vpop.f32.mrb[57].mxu0  ;;  %13059 = vmatmul.mubr.bf16.gmra.mrb[124].mxu0 %v12719_v10  ;;  %v22845_v29 = vadd.f32 %v22735_v56, %v12448_v39  ;;  %13640 = vmatpush1.bf16.msra.mxu1 %v17699_v20  ;;  %v17711_v20 = vld [vmem:[%s23467_s12 + $0xf0] ss:$12 sps:$4 sm:$0xff]  }
0x1d3c   :  { %v12452_v7 = vpop.f32.mrb[58].mxu0  ;;  %13134 = vmatpush1.bf16.msra.mxu0 %v17675_v28  ;;  %v22839_v0 = vadd.f32 %v22732_v41, %v12450_v42  ;;  %13641 = vmatprep.subr.bf16.mxu1 %v17704_v8 }
0x1d3d   :  { %v22833_v15 = vadd.f32 %v22735_v56, %v12452_v7  ;;  %v12454_v25 = vpop.f32.mrb[59].mxu0  ;;  %13135 = vmatprep.subr.bf16.mxu0 %v17680_v27 }
0x1d3e   :  { %v22842_v35 = vadd.f32 %v22732_v41, %v12454_v25 }
0x1d3f   :  { %v12722_v2 = vpack.c.bf16 %v22833_v15, %v22845_v29  ;;  %13642 = vmatpush1.bf16.msra.mxu1 %v17702_v44  ;;  %v17716_v44 = vld [vmem:[%s23467_s12 + $0x10c] ss:$12 sps:$4 sm:$0xff]  }
0x1d40   :  { %v12723_v46 = vpack.c.bf16 %v22842_v35, %v22839_v0  ;;  %13136 = vmatpush1.bf16.msra.mxu0 %v17678_v32  ;;  %13643 = vmatprep.subr.bf16.mxu1 %v17707_v4 }
0x1d42   :  { %v12458_v11 = vpop.f32.mrb[60].mxu0  ;;  %13068 = vmatprep.mubr.bf16.mxu0 %v12723_v46 }
0x1d43   :  { %v12460_v51 = vpop.f32.mrb[61].mxu0  ;;  %13069 = vmatmul.mubr.bf16.gmra.mrb[128].mxu0 %v12722_v2  ;;  %v22876_v9 = vadd.f32 %v22735_v56, %v12458_v11  ;;  %v17710_v2 = vld [vmem:[%s23467_s12 + $0xdc] ss:$12 sps:$4 sm:$0xff]   ;;  %13644 = vmatpush1.bf16.msra.mxu1 %v17705_v58 }
0x1d44   :  { %v12462_v24 = vpop.f32.mrb[62].mxu0  ;;  %v22867_v33 = vadd.f32 %v22732_v41, %v12460_v51  ;;  %13645 = vmatprep.subr.bf16.mxu1 %v17710_v2  ;;  %v17717_v2 = vld [vmem:[%s23467_s12 + $0x120] ss:$12 sps:$4 sm:$0xff]  }
0x1d45   :  { %v22861_v59 = vadd.f32 %v22735_v56, %v12462_v24  ;;  %v12464_v6 = vpop.f32.mrb[63].mxu0  ;;  %v17708_v24 = vld [vmem:[%s23467_s12 + $0xd8] ss:$12 sps:$4 sm:$0xff]  }
0x1d46   :  { %v22870_v40 = vadd.f32 %v22732_v41, %v12464_v6  ;;  %v17713_v6 = vld [vmem:[%s23467_s12 + $0xf4] ss:$12 sps:$4 sm:$0xff]  }
0x1d47   :  { %v12725_v37 = vpack.c.bf16 %v22861_v59, %v22876_v9  ;;  %13646 = vmatpush1.bf16.msra.mxu1 %v17708_v24 }
0x1d48   :  { %v12726_v60 = vpack.c.bf16 %v22870_v40, %v22867_v33  ;;  %13647 = vmatprep.subr.bf16.mxu1 %v17713_v6 }
0x1d4a   :  { %13078 = vmatprep.mubr.bf16.mxu0 %v12726_v60 }
0x1d4b   :  { %13079 = vmatmul.mubr.bf16.gmra.mrb[132].mxu0 %v12725_v37  ;;  %13648 = vmatpush1.bf16.msra.mxu1 %v17711_v20 }
0x1d4c   :  { %13649 = vmatprep.subr.bf16.mxu1 %v17716_v44 }
0x1d51   :  { %v12468_v31 = vpop.f32.mrb[64].mxu0 }
0x1d52   :  { %v12470_v54 = vpop.f32.mrb[65].mxu0  ;;  %v16163_v28 = vpop.f32.mrb[204].mxu1  ;;  %v22919_v46 = vadd.f32 %v22735_v56, %v12468_v31 }
0x1d53   :  { %v22898_v27 = vadd.f32 %v16163_v28, %v22729_v49  ;;  %v12472_v38 = vpop.f32.mrb[66].mxu0  ;;  %v12573_v14 = vpop.f32.mrb[205].mxu1  ;;  %v22907_v32 = vadd.f32 %v22732_v41, %v12470_v54  ;;  %v17714_v54 = vld [vmem:[%s23467_s12 + $0x108] ss:$12 sps:$4 sm:$0xff]   ;;  %v17719_v28 = vld [vmem:[%s23467_s12 + $0x124] ss:$12 sps:$4 sm:$0xff]  }
0x1d54   :  { %v22901_v10 = vadd.f32 %v22735_v56, %v12472_v38  ;;  %v22904_v43 = vadd.f32 %v22729_v49, %v12573_v14  ;;  %v12474_v39 = vpop.f32.mrb[67].mxu0  ;;  %v16164_v42 = vpop.f32.mrb[206].mxu1  ;;  %13650 = vmatpush1.bf16.msra.mxu1 %v17714_v54  ;;  %v17720_v54 = vld [vmem:[%s23467_s12 + $0x138] ss:$12 sps:$4 sm:$0xff]  }
0x1d55   :  { %23580 = vst [vmem:[#allocation10_spill] sm:$0xff] %v22898_v27  ;;  %v22910_v7 = vadd.f32 %v22732_v41, %v12474_v39  ;;  %v22913_v16 = vadd.f32 %v16164_v42, %v22729_v49  ;;  %v12576_v25 = vpop.f32.mrb[207].mxu1  ;;  %13651 = vmatprep.subr.bf16.mxu1 %v17719_v28 }
0x1d56   :  { %23581 = vst [vmem:[#allocation11_spill] sm:$0xff] %v22904_v43  ;;  %v22922_v47 = vadd.f32 %v22729_v49, %v12576_v25  ;;  %v12728_v11 = vpack.c.bf16 %v22901_v10, %v22919_v46 }
0x1d57   :  { %23582 = vst [vmem:[#allocation13_spill] sm:$0xff] %v22913_v16  ;;  %v12729_v26 = vpack.c.bf16 %v22910_v7, %v22907_v32 }
0x1d58   :  { %23583 = vst [vmem:[#allocation25_spill] sm:$0xff] %v22922_v47  ;;  %13652 = vmatpush1.bf16.msra.mxu1 %v17717_v2 }
0x1d59   :  { %v12478_v51 = vpop.f32.mrb[68].mxu0  ;;  %13088 = vmatprep.mubr.bf16.mxu0 %v12729_v26 }
0x1d5a   :  { %v12480_v3 = vpop.f32.mrb[69].mxu0  ;;  %13089 = vmatmul.mubr.bf16.gmra.mrb[136].mxu0 %v12728_v11  ;;  %v22950_v8 = vadd.f32 %v22735_v56, %v12478_v51 }
0x1d5b   :  { %v12482_v34 = vpop.f32.mrb[70].mxu0  ;;  %v22941_v60 = vadd.f32 %v22732_v41, %v12480_v3  ;;  %v17722_v3 = vld [vmem:[%s23467_s12 + $0x13c] ss:$12 sps:$4 sm:$0xff]  }
0x1d5c   :  { %v22938_v1 = vadd.f32 %v22735_v56, %v12482_v34  ;;  %v12484_v17 = vpop.f32.mrb[71].mxu0  ;;  %13653 = vmatprep.subr.bf16.mxu1 %v17722_v3 }
0x1d5d   :  { %v22944_v37 = vadd.f32 %v22732_v41, %v12484_v17  ;;  %13654 = vmatpush1.bf16.msra.mxu1 %v17720_v54  ;;  %v12730_v54 = vpack.c.bf16 %v22922_v47, %v22904_v43 }
0x1d5e   :  { %v12731_v31 = vpack.c.bf16 %v22938_v1, %v22950_v8 }
0x1d5f   :  { %v12732_v4 = vpack.c.bf16 %v22944_v37, %v22941_v60 }
0x1d61   :  { %13098 = vmatprep.mubr.bf16.mxu0 %v12732_v4 }
0x1d62   :  { %13099 = vmatmul.mubr.bf16.gmra.mrb[140].mxu0 %v12731_v31 }
0x1d63   :  { %v12488_v38 = vpop.f32.mrb[72].mxu0 }
0x1d64   :  { %v12490_v14 = vpop.f32.mrb[73].mxu0  ;;  %v16167_v39 = vpop.f32.mrb[208].mxu1  ;;  %v22990_v44 = vadd.f32 %v22735_v56, %v12488_v38 }
0x1d65   :  { %v22966_v42 = vadd.f32 %v16167_v39, %v22729_v49  ;;  %v12492_v25 = vpop.f32.mrb[74].mxu0  ;;  %v12589_v58 = vpop.f32.mrb[209].mxu1  ;;  %v22981_v6 = vadd.f32 %v22732_v41, %v12490_v14 }
0x1d66   :  { %v22972_v26 = vadd.f32 %v22735_v56, %v12492_v25  ;;  %v22975_v11 = vadd.f32 %v22729_v49, %v12589_v58  ;;  %v12494_v51 = vpop.f32.mrb[75].mxu0  ;;  %v16168_v24 = vpop.f32.mrb[210].mxu1 }
0x1d67   :  { %23584 = vst [vmem:[#allocation26_spill] sm:$0xff] %v22966_v42  ;;  %v22984_v34 = vadd.f32 %v22732_v41, %v12494_v51  ;;  %v22987_v17 = vadd.f32 %v16168_v24, %v22729_v49  ;;  %v12592_v20 = vpop.f32.mrb[211].mxu1 }
0x1d68   :  { %23585 = vst [vmem:[#allocation22_spill] sm:$0xff] %v22975_v11  ;;  %v22993_v4 = vadd.f32 %v22729_v49, %v12592_v20  ;;  %v12734_v28 = vpack.c.bf16 %v22972_v26, %v22990_v44  ;;  %v12718_v20 = vpack.c.bf16 %v22759_v45, %v22744_v36 }
0x1d69   :  { %23586 = vst [vmem:[#allocation15_spill] sm:$0xff] %v22987_v17  ;;  %v12735_v31 = vpack.c.bf16 %v22984_v34, %v22981_v6 }
0x1d6a   :  { %23587 = vst [vmem:[#allocation14_spill] sm:$0xff] %v22993_v4 }
0x1d6b   :  { %v12498_v14 = vpop.f32.mrb[76].mxu0  ;;  %13108 = vmatprep.mubr.bf16.mxu0 %v12735_v31  ;;  %v12727_v31 = vpack.c.bf16 %v22799_v52, %v22778_v5 }
0x1d6c   :  { %v23003_v38 = vadd.f32 %v22735_v56, %v12498_v14  ;;  %v12500_v39 = vpop.f32.mrb[77].mxu0  ;;  %13109 = vmatmul.mubr.bf16.gmra.mrb[144].mxu0 %v12734_v28  ;;  %v12733_v28 = vpack.c.bf16 %v22913_v16, %v22898_v27  ;;  %v12736_v14 = vpack.c.bf16 %v22993_v4, %v22975_v11 }
0x1d6d   :  { %v23006_v49 = vadd.f32 %v22732_v41, %v12500_v39  ;;  %v12502_v25 = vpop.f32.mrb[78].mxu0  ;;  %v12739_v39 = vpack.c.bf16 %v22987_v17, %v22966_v42 }
0x1d6e   :  { %v23009_v58 = vadd.f32 %v22735_v56, %v12502_v25  ;;  %v12504_v2 = vpop.f32.mrb[79].mxu0  ;;  %v12724_v56 = vpack.c.bf16 %v22808_v62, %v22787_v30  ;;  %v17725_v25 = vld [vmem:[%s23467_s12 + $0x154] ss:$12 sps:$4 sm:$0xff]  }
0x1d6f   :  { %v23012_v51 = vadd.f32 %v22732_v41, %v12504_v2  ;;  %v12721_v41 = vpack.c.bf16 %v22753_v22, %v22738_v12  ;;  %v17723_v2 = vld [vmem:[%s23467_s12 + $0x150] ss:$12 sps:$4 sm:$0xff]   ;;  %13655 = vmatprep.subr.bf16.mxu1 %v17725_v25 }
0x1d70   :  { %23588 = vst [vmem:[#allocation17_spill] sm:$0xff] %v23009_v58  ;;  %v12737_v3 = vpack.c.bf16 %v23009_v58, %v23003_v38  ;;  %13656 = vmatpush1.bf16.msra.mxu1 %v17723_v2 }
0x1d71   :  { %23589 = vst [vmem:[#allocation16_spill] sm:$0xff] %v23012_v51  ;;  %v12738_v24 = vpack.c.bf16 %v23012_v51, %v23006_v49 }
0x1d73   :  { %13118 = vmatprep.mubr.bf16.mxu0 %v12738_v24  ;;  %v17728_v24 = vld [vmem:[%s23467_s12 + $0x16c] ss:$12 sps:$4 sm:$0xff]  }
0x1d74   :  { %13119 = vmatmul.mubr.bf16.gmra.mrb[148].mxu0 %v12737_v3  ;;  %13657 = vmatprep.subr.bf16.mxu1 %v17728_v24  ;;  %v17729_v3 = vld [vmem:[%s23467_s12 + $0xc8] ss:$12 sps:$4 sm:$0xff]  }
0x1d75   :  { %13161 = vmatprep.mubr.bf16.mxu0 %v23546_v53 }
0x1d7c   :  { %14935 = vmatmul.mubr.msk.bf16.vlgmr.msra.gmra.mrb[120].mxu0 %vm4208_vm0, %v12718_v20  ;;  %v12780_v20 = vld [vmem:[%s23468_s11] sm:$0x3] }
0x1d7d   :  { %13171 = vmatprep.mubr.bf16.mxu0 %v23546_v53 }
0x1d84   :  { %14936 = vmatmul.mubr.msk.bf16.gmra.mrb[124].mxu0 %vm4208_vm0, %v12721_v41  ;;  %v23069_v41 = vrot.slane %v12780_v20, %v23571_v61 }
0x1d85   :  { %13181 = vmatprep.mubr.bf16.mxu0 %v23546_v53 }
0x1d8c   :  { %14937 = vmatmul.mubr.msk.bf16.gmra.mrb[128].mxu0 %vm4208_vm0, %v12724_v56  ;;  %v23072_v56 = vrot.slane %v12780_v20, %v23570_v48 }
0x1d8d   :  { %13191 = vmatprep.mubr.bf16.mxu0 %v23546_v53 }
0x1d94   :  { %14938 = vmatmul.mubr.msk.bf16.gmra.mrb[132].mxu0 %vm4208_vm0, %v12727_v31 }
0x1d95   :  { %13201 = vmatprep.mubr.bf16.mxu0 %v23546_v53 }
0x1d9c   :  { %14939 = vmatmul.mubr.msk.bf16.gmra.mrb[136].mxu0 %vm4208_vm0, %v12730_v54 }
0x1d9d   :  { %13211 = vmatprep.mubr.bf16.mxu0 %v23546_v53 }
0x1da4   :  { %14940 = vmatmul.mubr.msk.bf16.gmra.mrb[140].mxu0 %vm4208_vm0, %v12733_v28 }
0x1da5   :  { %13221 = vmatprep.mubr.bf16.mxu0 %v23546_v53 }
0x1dac   :  { %14941 = vmatmul.mubr.msk.bf16.gmra.mrb[144].mxu0 %vm4208_vm0, %v12736_v14 }
0x1dad   :  { %13231 = vmatprep.mubr.bf16.mxu0 %v23546_v53  ;;  %v17726_v53 = vld [vmem:[%s23467_s12 + $0x168] ss:$12 sps:$4 sm:$0xff]  }
0x1dae   :  { %13658 = vmatpush1.bf16.msra.mxu1 %v17726_v53 }
0x1daf   :  { %15573 = vmatprep.subr.bf16.mxu1 %v17729_v3 }
0x1db4   :  { %14942 = vmatmul.mubr.msk.bf16.gmra.mrb[148].mxu0 %vm4208_vm0, %v12739_v39 }
0x1e4f   :  { %v13163_v31 = vpop.f32.mrb[120].mxu0 }
0x1e50   :  { %v16225_v54 = vadd.f32 %v13163_v31, %v23069_v41  ;;  %v13165_v28 = vpop.f32.mrb[121].mxu0  ;;  %v17730_v31 = vld [vmem:[%s23467_s12 + $0x8] ss:$12 sps:$4 sm:$0xff]  }
0x1e51   :  { %v16226_v14 = vadd.f32 %v13165_v28, %v23072_v56  ;;  %v13167_v39 = vpop.f32.mrb[122].mxu0 }
0x1e52   :  { %v16227_v25 = vadd.f32 %v13167_v39, %v23069_v41  ;;  %v13169_v2 = vpop.f32.mrb[123].mxu0  ;;  %v13242_v53 = vmax.f32 %v16225_v54, 0.0  ;;  %v17731_v39 = vld [vmem:[%s23467_s12 + $0xe0] ss:$12 sps:$4 sm:$0xff]  }
0x1e53   :  { %v16228_v24 = vadd.f32 %v13169_v2, %v23072_v56  ;;  %v13243_v17 = vmax.f32 %v16226_v14, 0.0 }
0x1e54   :  { %v13244_v3 = vmax.f32 %v16227_v25, 0.0 }
0x1e55   :  { %v13245_v42 = vmax.f32 %v16228_v24, 0.0 }
0x1e56   :  { %v23078_v4 = vpack.c.bf16 %v13244_v3, %v13242_v53 }
0x1e57   :  { %v23080_v20 = vpack.c.bf16 %v13245_v42, %v13243_v17  ;;  %v13173_v11 = vpop.f32.mrb[124].mxu0 }
0x1e58   :  { %v16229_v28 = vadd.f32 %v13173_v11, %v23069_v41  ;;  %v13175_v16 = vpop.f32.mrb[125].mxu0  ;;  %v17732_v11 = vld [vmem:[%s23467_s12 + $0x20] ss:$12 sps:$4 sm:$0xff]  }
0x1e59   :  { %v16230_v54 = vadd.f32 %v13175_v16, %v23072_v56  ;;  %v13177_v14 = vpop.f32.mrb[126].mxu0  ;;  %13659 = vmatprep.mubr.bf16.mxu1 %v23080_v20  ;;  %v17733_v16 = vld [vmem:[%s23467_s12 + $0xf8] ss:$12 sps:$4 sm:$0xff]  }
0x1e5a   :  { %v16231_v42 = vadd.f32 %v13177_v14, %v23069_v41  ;;  %v13179_v17 = vpop.f32.mrb[127].mxu0  ;;  %13660 = vmatmul.mubr.bf16.vlgmr.msra.gmra.mrb[108].mxu1 %v23078_v4  ;;  %v13246_v2 = vmax.f32 %v16229_v28, 0.0 }
0x1e5b   :  { %v16232_v25 = vadd.f32 %v13179_v17, %v23072_v56  ;;  %15574 = vmatpush3.bf16.msra.mxu1 %v17730_v31  ;;  %v13247_v53 = vmax.f32 %v16230_v54, 0.0  ;;  %v17734_v31 = vld [vmem:[%s23467_s12 + $0x38] ss:$12 sps:$4 sm:$0xff]  }
0x1e5c   :  { %v13248_v24 = vmax.f32 %v16231_v42, 0.0  ;;  %15575 = vmatprep.subr.bf16.mxu1 %v17731_v39  ;;  %v17735_v39 = vld [vmem:[%s23467_s12 + $0x110] ss:$12 sps:$4 sm:$0xff]  }
0x1e5d   :  { %v13249_v3 = vmax.f32 %v16232_v25, 0.0 }
0x1e5e   :  { %v23100_v14 = vpack.c.bf16 %v13248_v24, %v13246_v2 }
0x1e5f   :  { %v23102_v27 = vpack.c.bf16 %v13249_v3, %v13247_v53  ;;  %v13183_v47 = vpop.f32.mrb[128].mxu0  ;;  %15576 = vmatpush3.bf16.msra.mxu1 %v17732_v11  ;;  %v17737_v53 = vld [vmem:[%s23467_s12 + $0x128] ss:$12 sps:$4 sm:$0xff]  }
0x1e60   :  { %v16233_v28 = vadd.f32 %v13183_v47, %v23069_v41  ;;  %v13185_v42 = vpop.f32.mrb[129].mxu0  ;;  %15577 = vmatprep.subr.bf16.mxu1 %v17733_v16  ;;  %v17736_v47 = vld [vmem:[%s23467_s12 + $0x50] ss:$12 sps:$4 sm:$0xff]  }
0x1e61   :  { %v16234_v54 = vadd.f32 %v13185_v42, %v23072_v56  ;;  %v13187_v17 = vpop.f32.mrb[130].mxu0  ;;  %13669 = vmatprep.mubr.bf16.mxu1 %v23102_v27 }
0x1e62   :  { %v16235_v25 = vadd.f32 %v13187_v17, %v23069_v41  ;;  %v13189_v11 = vpop.f32.mrb[131].mxu0  ;;  %13670 = vmatmul.mubr.bf16.gmra.mrb[112].mxu1 %v23100_v14  ;;  %v13250_v24 = vmax.f32 %v16233_v28, 0.0 }
0x1e63   :  { %v16236_v2 = vadd.f32 %v13189_v11, %v23072_v56  ;;  %15578 = vmatpush3.bf16.msra.mxu1 %v17734_v31  ;;  %v13251_v3 = vmax.f32 %v16234_v54, 0.0  ;;  %v17738_v31 = vld [vmem:[%s23467_s12 + $0x68] ss:$12 sps:$4 sm:$0xff]  }
0x1e64   :  { %v13252_v16 = vmax.f32 %v16235_v25, 0.0  ;;  %15579 = vmatprep.subr.bf16.mxu1 %v17735_v39  ;;  %v17739_v39 = vld [vmem:[%s23467_s12 + $0x140] ss:$12 sps:$4 sm:$0xff]  }
0x1e65   :  { %v13253_v42 = vmax.f32 %v16236_v2, 0.0 }
0x1e66   :  { %v23122_v17 = vpack.c.bf16 %v13252_v16, %v13250_v24 }
0x1e67   :  { %v23124_v43 = vpack.c.bf16 %v13253_v42, %v13251_v3  ;;  %v13193_v52 = vpop.f32.mrb[132].mxu0  ;;  %15580 = vmatpush3.bf16.msra.mxu1 %v17736_v47  ;;  %v17741_v3 = vld [vmem:[%s23467_s12 + $0x158] ss:$12 sps:$4 sm:$0xff]  }
0x1e68   :  { %v16237_v28 = vadd.f32 %v13193_v52, %v23069_v41  ;;  %v13195_v25 = vpop.f32.mrb[133].mxu0  ;;  %15581 = vmatprep.subr.bf16.mxu1 %v17737_v53  ;;  %v17740_v52 = vld [vmem:[%s23467_s12 + $0x80] ss:$12 sps:$4 sm:$0xff]  }
0x1e69   :  { %v16238_v54 = vadd.f32 %v13195_v25, %v23072_v56  ;;  %v13197_v11 = vpop.f32.mrb[134].mxu0  ;;  %13679 = vmatprep.mubr.bf16.mxu1 %v23124_v43 }
0x1e6a   :  { %v16239_v2 = vadd.f32 %v13197_v11, %v23069_v41  ;;  %v13199_v47 = vpop.f32.mrb[135].mxu0  ;;  %13680 = vmatmul.mubr.bf16.gmra.mrb[116].mxu1 %v23122_v17  ;;  %v13254_v16 = vmax.f32 %v16237_v28, 0.0 }
0x1e6b   :  { %v16240_v24 = vadd.f32 %v13199_v47, %v23072_v56  ;;  %15582 = vmatpush3.bf16.msra.mxu1 %v17738_v31  ;;  %v13255_v42 = vmax.f32 %v16238_v54, 0.0  ;;  %v17742_v31 = vld [vmem:[%s23467_s12 + $0x98] ss:$12 sps:$4 sm:$0xff]  }
0x1e6c   :  { %v13256_v53 = vmax.f32 %v16239_v2, 0.0  ;;  %15583 = vmatprep.subr.bf16.mxu1 %v17739_v39  ;;  %v17743_v39 = vld [vmem:[%s23467_s12 + $0x170] ss:$12 sps:$4 sm:$0xff]  }
0x1e6d   :  { %v13257_v25 = vmax.f32 %v16240_v24, 0.0 }
0x1e6e   :  { %v23144_v11 = vpack.c.bf16 %v13256_v53, %v13254_v16 }
0x1e6f   :  { %v23146_v5 = vpack.c.bf16 %v13257_v25, %v13255_v42  ;;  %v13203_v62 = vpop.f32.mrb[136].mxu0  ;;  %15584 = vmatpush3.bf16.msra.mxu1 %v17740_v52 }
0x1e70   :  { %v16241_v28 = vadd.f32 %v13203_v62, %v23069_v41  ;;  %v13205_v2 = vpop.f32.mrb[137].mxu0  ;;  %15585 = vmatprep.subr.bf16.mxu1 %v17741_v3  ;;  %v17744_v62 = vld [vmem:[%s23467_s12 + $0xb0] ss:$12 sps:$4 sm:$0xff]  }
0x1e71   :  { %v16242_v54 = vadd.f32 %v13205_v2, %v23072_v56  ;;  %v13207_v47 = vpop.f32.mrb[138].mxu0  ;;  %13689 = vmatprep.mubr.bf16.mxu1 %v23146_v5 }
0x1e72   :  { %v16243_v24 = vadd.f32 %v13207_v47, %v23069_v41  ;;  %v13209_v52 = vpop.f32.mrb[139].mxu0  ;;  %13690 = vmatmul.mubr.bf16.gmra.mrb[120].mxu1 %v23144_v11  ;;  %v13258_v53 = vmax.f32 %v16241_v28, 0.0 }
0x1e73   :  { %v16244_v16 = vadd.f32 %v13209_v52, %v23072_v56  ;;  %15586 = vmatpush3.bf16.msra.mxu1 %v17742_v31  ;;  %v13259_v42 = vmax.f32 %v16242_v54, 0.0 }
0x1e74   :  { %v13260_v3 = vmax.f32 %v16243_v24, 0.0  ;;  %15587 = vmatprep.subr.bf16.mxu1 %v17743_v39 }
0x1e75   :  { %v13261_v25 = vmax.f32 %v16244_v16, 0.0 }
0x1e76   :  { %v13282_v2 = vpack.c.bf16 %v13260_v3, %v13258_v53 }
0x1e77   :  { %v13283_v30 = vpack.c.bf16 %v13261_v25, %v13259_v42  ;;  %v13213_v22 = vpop.f32.mrb[140].mxu0  ;;  %15588 = vmatpush3.bf16.msra.mxu1 %v17744_v62 }
0x1e78   :  { %v16245_v47 = vadd.f32 %v13213_v22, %v23069_v41  ;;  %v13215_v12 = vpop.f32.mrb[141].mxu0 }
0x1e79   :  { %v16246_v45 = vadd.f32 %v13215_v12, %v23072_v56  ;;  %v13217_v52 = vpop.f32.mrb[142].mxu0  ;;  %13699 = vmatprep.mubr.bf16.mxu1 %v13283_v30 }
0x1e7a   :  { %v16247_v31 = vadd.f32 %v13217_v52, %v23069_v41  ;;  %v13219_v36 = vpop.f32.mrb[143].mxu0  ;;  %13700 = vmatmul.mubr.bf16.gmra.mrb[124].mxu1 %v13282_v2  ;;  %v13262_v39 = vmax.f32 %v16245_v47, 0.0 }
0x1e7b   :  { %v16248_v28 = vadd.f32 %v13219_v36, %v23072_v56  ;;  %v13263_v24 = vmax.f32 %v16246_v45, 0.0 }
0x1e7c   :  { %v13264_v54 = vmax.f32 %v16247_v31, 0.0 }
0x1e7d   :  { %v13265_v16 = vmax.f32 %v16248_v28, 0.0 }
0x1e7e   :  { %v13284_v53 = vpack.c.bf16 %v13264_v54, %v13262_v39 }
0x1e7f   :  { %v13285_v3 = vpack.c.bf16 %v13265_v16, %v13263_v24  ;;  %v13223_v62 = vpop.f32.mrb[144].mxu0 }
0x1e80   :  { %v16249_v22 = vadd.f32 %v13223_v62, %v23069_v41  ;;  %v13225_v42 = vpop.f32.mrb[145].mxu0 }
0x1e81   :  { %v16250_v12 = vadd.f32 %v13225_v42, %v23072_v56  ;;  %v13227_v25 = vpop.f32.mrb[146].mxu0  ;;  %13709 = vmatprep.mubr.bf16.mxu1 %v13285_v3 }
0x1e82   :  { %v16251_v52 = vadd.f32 %v13227_v25, %v23069_v41  ;;  %v13229_v57 = vpop.f32.mrb[147].mxu0  ;;  %13710 = vmatmul.mubr.bf16.gmra.mrb[128].mxu1 %v13284_v53  ;;  %v13266_v47 = vmax.f32 %v16249_v22, 0.0 }
0x1e83   :  { %v16252_v36 = vadd.f32 %v13229_v57, %v23072_v56  ;;  %v13267_v45 = vmax.f32 %v16250_v12, 0.0 }
0x1e84   :  { %v13268_v31 = vmax.f32 %v16251_v52, 0.0 }
0x1e85   :  { %v13269_v28 = vmax.f32 %v16252_v36, 0.0 }
0x1e86   :  { %v13286_v39 = vpack.c.bf16 %v13268_v31, %v13266_v47 }
0x1e87   :  { %v13287_v54 = vpack.c.bf16 %v13269_v28, %v13267_v45  ;;  %v13233_v24 = vpop.f32.mrb[148].mxu0 }
0x1e88   :  { %v16253_v16 = vadd.f32 %v13233_v24, %v23069_v41  ;;  %v13235_v62 = vpop.f32.mrb[149].mxu0 }
0x1e89   :  { %v16254_v42 = vadd.f32 %v13235_v62, %v23072_v56  ;;  %v13237_v51 = vpop.f32.mrb[150].mxu0  ;;  %13719 = vmatprep.mubr.bf16.mxu1 %v13287_v54 }
0x1e8a   :  { %v16255_v25 = vadd.f32 %v13237_v51, %v23069_v41  ;;  %v13239_v58 = vpop.f32.mrb[151].mxu0  ;;  %13720 = vmatmul.mubr.bf16.gmra.mrb[132].mxu1 %v13286_v39  ;;  %v13270_v22 = vmax.f32 %v16253_v16, 0.0 }
0x1e8b   :  { %v16256_v57 = vadd.f32 %v13239_v58, %v23072_v56  ;;  %v13271_v12 = vmax.f32 %v16254_v42, 0.0 }
0x1e8c   :  { %v13272_v52 = vmax.f32 %v16255_v25, 0.0 }
0x1e8d   :  { %v13273_v36 = vmax.f32 %v16256_v57, 0.0 }
0x1e8e   :  { %v13288_v47 = vpack.c.bf16 %v13272_v52, %v13270_v22 }
0x1e8f   :  { %v13289_v31 = vpack.c.bf16 %v13273_v36, %v13271_v12 }
0x1e91   :  { %13729 = vmatprep.mubr.bf16.mxu1 %v13289_v31 }
0x1e92   :  { %13730 = vmatmul.mubr.bf16.gmra.mrb[136].mxu1 %v13288_v47 }
0x1e93   :  { %13772 = vmatprep.mubr.bf16.mxu1 %v23080_v20 }
0x1e9a   :  { %13773 = vmatmul.mubr.bf16.vlgmr.msra.gmra.mrb[140].mxu1 %v23078_v4 }
0x1e9b   :  { %13780 = vmatprep.mubr.bf16.mxu1 %v23102_v27  ;;  %v23186_v27 = vld [vmem:[%s23469_s13] sm:$0x7] }
0x1ea2   :  { %13781 = vmatmul.mubr.bf16.gmra.mrb[144].mxu1 %v23100_v14 }
0x1ea3   :  { %13788 = vmatprep.mubr.bf16.mxu1 %v23124_v43  ;;  %v23190_v43 = vrot.slane %v23186_v27, %v23571_v61 }
0x1eaa   :  { %13789 = vmatmul.mubr.bf16.gmra.mrb[148].mxu1 %v23122_v17 }
0x1eab   :  { %13796 = vmatprep.mubr.bf16.mxu1 %v23146_v5  ;;  %v23194_v5 = vrot.slane %v23186_v27, %v23570_v48 }
0x1eb2   :  { %13797 = vmatmul.mubr.bf16.gmra.mrb[152].mxu1 %v23144_v11 }
0x1eb3   :  { %13804 = vmatprep.mubr.bf16.mxu1 %v13283_v30 }
0x1eba   :  { %13805 = vmatmul.mubr.bf16.gmra.mrb[156].mxu1 %v13282_v2 }
0x1ebb   :  { %13812 = vmatprep.mubr.bf16.mxu1 %v13285_v3 }
0x1ec2   :  { %13813 = vmatmul.mubr.bf16.gmra.mrb[160].mxu1 %v13284_v53 }
0x1ec3   :  { %13820 = vmatprep.mubr.bf16.mxu1 %v13287_v54 }
0x1eca   :  { %13821 = vmatmul.mubr.bf16.gmra.mrb[164].mxu1 %v13286_v39 }
0x1ecb   :  { %13828 = vmatprep.mubr.bf16.mxu1 %v13289_v31 }
0x1ed2   :  { %13829 = vmatmul.mubr.bf16.gmra.mrb[168].mxu1 %v13288_v47 }
0x1f2d   :  { %v13661_v30 = vpop.f32.mrb[108].mxu1 }
0x1f2e   :  { %v13662_v4 = vadd.f32 %v13661_v30, %v23190_v43  ;;  %v13663_v58 = vpop.f32.mrb[109].mxu1 }
0x1f2f   :  { %v13664_v51 = vadd.f32 %v13663_v58, %v23194_v5  ;;  %v13665_v41 = vpop.f32.mrb[110].mxu1 }
0x1f30   :  { %v13837_v56 = vadd.f32 %v13662_v4, %v22756_v55  ;;  %v13666_v20 = vadd.f32 %v13665_v41, %v23190_v43  ;;  %v13667_v14 = vpop.f32.mrb[111].mxu1 }
0x1f31   :  { %v13838_v17 = vadd.f32 %v13664_v51, %v22747_v21  ;;  %v13668_v61 = vadd.f32 %v13667_v14, %v23194_v5 }
0x1f32   :  { %13885 = vst [vmem:[%s23470_s14] sm:$0xff] %v13837_v56  ;;  %v13840_v48 = vadd.f32 %v13666_v20, %v22741_v23 }
0x1f33   :  { %13886 = vst [vmem:[%s23470_s14 + $0x8] sm:$0xff] %v13838_v17  ;;  %v13841_v11 = vadd.f32 %v13668_v61, %v22750_v13 }
0x1f34   :  { %13888 = vst [vmem:[%s23470_s14 + $0x18] sm:$0xff] %v13840_v48 }
0x1f35   :  { %13889 = vst [vmem:[%s23470_s14 + $0x20] sm:$0xff] %v13841_v11  ;;  %v13671_v21 = vpop.f32.mrb[112].mxu1 }
0x1f36   :  { %v13672_v55 = vadd.f32 %v13671_v21, %v23190_v43  ;;  %v13673_v2 = vpop.f32.mrb[113].mxu1 }
0x1f37   :  { %v13674_v23 = vadd.f32 %v13673_v2, %v23194_v5  ;;  %v13675_v53 = vpop.f32.mrb[114].mxu1 }
0x1f38   :  { %v13843_v3 = vadd.f32 %v13672_v55, %v22805_v50  ;;  %v13676_v45 = vadd.f32 %v13675_v53, %v23190_v43  ;;  %v13677_v13 = vpop.f32.mrb[115].mxu1 }
0x1f39   :  { %v13844_v28 = vadd.f32 %v13674_v23, %v22793_v19  ;;  %v13678_v39 = vadd.f32 %v13677_v13, %v23194_v5 }
0x1f3a   :  { %13891 = vst [vmem:[%s23470_s14 + $0x30] sm:$0xff] %v13843_v3  ;;  %v13846_v54 = vadd.f32 %v13676_v45, %v22784_v18 }
0x1f3b   :  { %13892 = vst [vmem:[%s23470_s14 + $0x38] sm:$0xff] %v13844_v28  ;;  %v13847_v24 = vadd.f32 %v13678_v39, %v22796_v63 }
0x1f3c   :  { %13894 = vst [vmem:[%s23470_s14 + $0x48] sm:$0xff] %v13846_v54 }
0x1f3d   :  { %13895 = vst [vmem:[%s23470_s14 + $0x50] sm:$0xff] %v13847_v24  ;;  %v13681_v19 = vpop.f32.mrb[116].mxu1 }
0x1f3e   :  { %v13682_v50 = vadd.f32 %v13681_v19, %v23190_v43  ;;  %v13683_v16 = vpop.f32.mrb[117].mxu1 }
0x1f3f   :  { %v13684_v18 = vadd.f32 %v13683_v16, %v23194_v5  ;;  %v13685_v62 = vpop.f32.mrb[118].mxu1 }
0x1f40   :  { %v13849_v42 = vadd.f32 %v13682_v50, %v22845_v29  ;;  %v13686_v25 = vadd.f32 %v13685_v62, %v23190_v43  ;;  %v13687_v63 = vpop.f32.mrb[119].mxu1 }
0x1f41   :  { %v13850_v57 = vadd.f32 %v13684_v18, %v22839_v0  ;;  %v13688_v22 = vadd.f32 %v13687_v63, %v23194_v5 }
0x1f42   :  { %13897 = vst [vmem:[%s23470_s14 + $0x60] sm:$0xff] %v13849_v42  ;;  %v13852_v52 = vadd.f32 %v13686_v25, %v22833_v15 }
0x1f43   :  { %13898 = vst [vmem:[%s23470_s14 + $0x68] sm:$0xff] %v13850_v57  ;;  %v13853_v12 = vadd.f32 %v13688_v22, %v22842_v35 }
0x1f44   :  { %13900 = vst [vmem:[%s23470_s14 + $0x78] sm:$0xff] %v13852_v52 }
0x1f45   :  { %13901 = vst [vmem:[%s23470_s14 + $0x80] sm:$0xff] %v13853_v12  ;;  %v13691_v0 = vpop.f32.mrb[120].mxu1  ;;  %v23590_v12 = vld [vmem:[#allocation17_spill] sm:$0xff] }
0x1f46   :  { %v13692_v29 = vadd.f32 %v13691_v0, %v23190_v43  ;;  %v13693_v36 = vpop.f32.mrb[121].mxu1 }
0x1f47   :  { %v13694_v15 = vadd.f32 %v13693_v36, %v23194_v5  ;;  %v13695_v47 = vpop.f32.mrb[122].mxu1 }
0x1f48   :  { %v13855_v31 = vadd.f32 %v13692_v29, %v22876_v9  ;;  %v13696_v30 = vadd.f32 %v13695_v47, %v23190_v43  ;;  %v13697_v35 = vpop.f32.mrb[123].mxu1  ;;  %v23591_v29 = vld [vmem:[#allocation16_spill] sm:$0xff] }
0x1f49   :  { %v13856_v4 = vadd.f32 %v13694_v15, %v22867_v33  ;;  %v13698_v58 = vadd.f32 %v13697_v35, %v23194_v5 }
0x1f4a   :  { %13903 = vst [vmem:[%s23470_s14 + $0x90] sm:$0xff] %v13855_v31  ;;  %v13858_v51 = vadd.f32 %v13696_v30, %v22861_v59 }
0x1f4b   :  { %13904 = vst [vmem:[%s23470_s14 + $0x98] sm:$0xff] %v13856_v4  ;;  %v13859_v41 = vadd.f32 %v13698_v58, %v22870_v40  ;;  %v23593_v4 = vld [vmem:[#allocation23_spill] sm:$0xff] }
0x1f4c   :  { %13906 = vst [vmem:[%s23470_s14 + $0xa8] sm:$0xff] %v13858_v51 }
0x1f4d   :  { %13907 = vst [vmem:[%s23470_s14 + $0xb0] sm:$0xff] %v13859_v41  ;;  %v13701_v33 = vpop.f32.mrb[124].mxu1  ;;  %v23594_v41 = vld [vmem:[#allocation6_spill] sm:$0xff] }
0x1f4e   :  { %v13702_v9 = vadd.f32 %v13701_v33, %v23190_v43  ;;  %v13703_v56 = vpop.f32.mrb[125].mxu1 }
0x1f4f   :  { %v13704_v59 = vadd.f32 %v13703_v56, %v23194_v5  ;;  %v13705_v20 = vpop.f32.mrb[126].mxu1 }
0x1f50   :  { %v13861_v14 = vadd.f32 %v13702_v9, %v22919_v46  ;;  %v13706_v17 = vadd.f32 %v13705_v20, %v23190_v43  ;;  %v13707_v40 = vpop.f32.mrb[127].mxu1 }
0x1f51   :  { %v13862_v61 = vadd.f32 %v13704_v59, %v22907_v32  ;;  %v13708_v48 = vadd.f32 %v13707_v40, %v23194_v5  ;;  %v23595_v40 = vld [vmem:[#allocation12_spill] sm:$0xff] }
0x1f52   :  { %13909 = vst [vmem:[%s23470_s14 + $0xc0] sm:$0xff] %v13861_v14  ;;  %v13864_v11 = vadd.f32 %v13706_v17, %v22901_v10 }
0x1f53   :  { %13910 = vst [vmem:[%s23470_s14 + $0xc8] sm:$0xff] %v13862_v61  ;;  %v13865_v21 = vadd.f32 %v13708_v48, %v22910_v7 }
0x1f54   :  { %13912 = vst [vmem:[%s23470_s14 + $0xd8] sm:$0xff] %v13864_v11  ;;  %v23596_v11 = vld [vmem:[#allocation5_spill] sm:$0xff] }
0x1f55   :  { %13913 = vst [vmem:[%s23470_s14 + $0xe0] sm:$0xff] %v13865_v21  ;;  %v13711_v32 = vpop.f32.mrb[128].mxu1 }
0x1f56   :  { %v13712_v46 = vadd.f32 %v13711_v32, %v23190_v43  ;;  %v13713_v55 = vpop.f32.mrb[129].mxu1 }
0x1f57   :  { %v13714_v10 = vadd.f32 %v13713_v55, %v23194_v5  ;;  %v13715_v2 = vpop.f32.mrb[130].mxu1 }
0x1f58   :  { %v13867_v23 = vadd.f32 %v13712_v46, %v22950_v8  ;;  %v13716_v53 = vadd.f32 %v13715_v2, %v23190_v43  ;;  %v13717_v7 = vpop.f32.mrb[131].mxu1 }
0x1f59   :  { %v13868_v3 = vadd.f32 %v13714_v10, %v22941_v60  ;;  %v13718_v45 = vadd.f32 %v13717_v7, %v23194_v5  ;;  %v23597_v7 = vld [vmem:[#allocation8_spill] sm:$0xff] }
0x1f5a   :  { %13915 = vst [vmem:[%s23470_s14 + $0xf0] sm:$0xff] %v13867_v23  ;;  %v13870_v13 = vadd.f32 %v13716_v53, %v22938_v1 }
0x1f5b   :  { %13916 = vst [vmem:[%s23470_s14 + $0xf8] sm:$0xff] %v13868_v3  ;;  %v13871_v28 = vadd.f32 %v13718_v45, %v22944_v37 }
0x1f5c   :  { %13918 = vst [vmem:[%s23470_s14 + $0x108] sm:$0xff] %v13870_v13  ;;  %v23598_v13 = vld [vmem:[#allocation9_spill] sm:$0xff] }
0x1f5d   :  { %13919 = vst [vmem:[%s23470_s14 + $0x110] sm:$0xff] %v13871_v28  ;;  %v13721_v60 = vpop.f32.mrb[132].mxu1 }
0x1f5e   :  { %v13722_v8 = vadd.f32 %v13721_v60, %v23190_v43  ;;  %v13723_v39 = vpop.f32.mrb[133].mxu1 }
0x1f5f   :  { %v13724_v1 = vadd.f32 %v13723_v39, %v23194_v5  ;;  %v13725_v54 = vpop.f32.mrb[134].mxu1 }
0x1f60   :  { %v13873_v24 = vadd.f32 %v13722_v8, %v22990_v44  ;;  %v13726_v19 = vadd.f32 %v13725_v54, %v23190_v43  ;;  %v13727_v37 = vpop.f32.mrb[135].mxu1 }
0x1f61   :  { %v13874_v50 = vadd.f32 %v13724_v1, %v22981_v6  ;;  %v13728_v16 = vadd.f32 %v13727_v37, %v23194_v5  ;;  %v23599_v37 = vld [vmem:[#allocation7_spill] sm:$0xff] }
0x1f62   :  { %13921 = vst [vmem:[%s23470_s14 + $0x120] sm:$0xff] %v13873_v24  ;;  %v13876_v18 = vadd.f32 %v13726_v19, %v22972_v26 }
0x1f63   :  { %13922 = vst [vmem:[%s23470_s14 + $0x128] sm:$0xff] %v13874_v50  ;;  %v13877_v62 = vadd.f32 %v13728_v16, %v22984_v34 }
0x1f64   :  { %13924 = vst [vmem:[%s23470_s14 + $0x138] sm:$0xff] %v13876_v18  ;;  %v23600_v18 = vld [vmem:[#allocation24_spill] sm:$0xff] }
0x1f65   :  { %13925 = vst [vmem:[%s23470_s14 + $0x140] sm:$0xff] %v13877_v62  ;;  %v13731_v6 = vpop.f32.mrb[136].mxu1 }
0x1f66   :  { %v13732_v44 = vadd.f32 %v13731_v6, %v23190_v43  ;;  %v13733_v42 = vpop.f32.mrb[137].mxu1 }
0x1f67   :  { %v13734_v26 = vadd.f32 %v13733_v42, %v23194_v5  ;;  %v13735_v25 = vpop.f32.mrb[138].mxu1 }
0x1f68   :  { %v13879_v63 = vadd.f32 %v13732_v44, %v23003_v38  ;;  %v13736_v57 = vadd.f32 %v13735_v25, %v23190_v43  ;;  %v13737_v34 = vpop.f32.mrb[139].mxu1 }
0x1f69   :  { %v13880_v22 = vadd.f32 %v13734_v26, %v23006_v49  ;;  %v13738_v52 = vadd.f32 %v13737_v34, %v23194_v5  ;;  %v23592_v49 = vld [vmem:[#allocation2_spill] sm:$0xff]  ;;  %v23601_v34 = vld [vmem:[#allocation11_spill] sm:$0xff] }
0x1f6a   :  { %13927 = vst [vmem:[%s23470_s14 + $0x150] sm:$0xff] %v13879_v63  ;;  %v13882_v0 = vadd.f32 %v13736_v57, %v23590_v12  ;;  %v23358_v43 = vrot.slane %v23186_v27, %v23592_v49  ;;  %v23602_v12 = vld [vmem:[#allocation25_spill] sm:$0xff] }
0x1f6b   :  { %13928 = vst [vmem:[%s23470_s14 + $0x158] sm:$0xff] %v13880_v22  ;;  %v13883_v36 = vadd.f32 %v13738_v52, %v23591_v29 }
0x1f6c   :  { %13930 = vst [vmem:[%s23470_s14 + $0x168] sm:$0xff] %v13882_v0 }
0x1f6d   :  { %13931 = vst [vmem:[%s23470_s14 + $0x170] sm:$0xff] %v13883_v36  ;;  %v15589_v38 = vpop.f32.mrb[140].mxu1 }
0x1f6e   :  { %v15590_v5 = vpop.f32.mrb[141].mxu1 }
0x1f6f   :  { %v15591_v15 = vadd.f32 %v15590_v5, %v15589_v38  ;;  %v15592_v47 = vpop.f32.mrb[142].mxu1 }
0x1f70   :  { %v15593_v31 = vpop.f32.mrb[143].mxu1 }
0x1f71   :  { %v13775_v30 = vadd.f32 %v15591_v15, %v23358_v43  ;;  %v15594_v35 = vadd.f32 %v15593_v31, %v15592_v47  ;;  %v23603_v31 = vld [vmem:[#allocation10_spill] sm:$0xff] }
0x1f73   :  { %v13839_v58 = vadd.f32 %v13775_v30, %v23593_v4  ;;  %v13778_v51 = vadd.f32 %v15594_v35, %v23358_v43  ;;  %v23604_v4 = vld [vmem:[#allocation13_spill] sm:$0xff] }
0x1f75   :  { %13887 = vst.msk [vmem:[%s23470_s14 + $0x10] sm:$0xff] %vm4208_vm0, %v13839_v58  ;;  %v13842_v33 = vadd.f32 %v13778_v51, %v23594_v41  ;;  %v15595_v27 = vpop.f32.mrb[144].mxu1 }
0x1f76   :  { %v15596_v9 = vpop.f32.mrb[145].mxu1 }
0x1f77   :  { %13890 = vst.msk [vmem:[%s23470_s14 + $0x28] sm:$0xff] %vm4208_vm0, %v13842_v33  ;;  %v15597_v56 = vadd.f32 %v15596_v9, %v15595_v27  ;;  %v15598_v59 = vpop.f32.mrb[146].mxu1 }
0x1f78   :  { %v15599_v20 = vpop.f32.mrb[147].mxu1 }
0x1f79   :  { %v13783_v14 = vadd.f32 %v15597_v56, %v23358_v43  ;;  %v15600_v17 = vadd.f32 %v15599_v20, %v15598_v59  ;;  %v23605_v20 = vld [vmem:[#allocation22_spill] sm:$0xff] }
0x1f7b   :  { %v13845_v61 = vadd.f32 %v13783_v14, %v23595_v40  ;;  %v13786_v48 = vadd.f32 %v15600_v17, %v23358_v43  ;;  %v23606_v40 = vld [vmem:[#allocation14_spill] sm:$0xff] }
0x1f7d   :  { %13893 = vst.msk [vmem:[%s23470_s14 + $0x40] sm:$0xff] %vm4208_vm0, %v13845_v61  ;;  %v13848_v21 = vadd.f32 %v13786_v48, %v23596_v11  ;;  %v15601_v32 = vpop.f32.mrb[148].mxu1 }
0x1f7e   :  { %v15602_v46 = vpop.f32.mrb[149].mxu1 }
0x1f7f   :  { %13896 = vst.msk [vmem:[%s23470_s14 + $0x58] sm:$0xff] %vm4208_vm0, %v13848_v21  ;;  %v15603_v55 = vadd.f32 %v15602_v46, %v15601_v32  ;;  %v15604_v10 = vpop.f32.mrb[150].mxu1 }
0x1f80   :  { %v15605_v2 = vpop.f32.mrb[151].mxu1 }
0x1f81   :  { %v13791_v23 = vadd.f32 %v15603_v55, %v23358_v43  ;;  %v15606_v53 = vadd.f32 %v15605_v2, %v15604_v10  ;;  %v23607_v2 = vld [vmem:[#allocation26_spill] sm:$0xff] }
0x1f83   :  { %v13851_v3 = vadd.f32 %v13791_v23, %v23597_v7  ;;  %v13794_v45 = vadd.f32 %v15606_v53, %v23358_v43  ;;  %v23608_v7 = vld [vmem:[#allocation15_spill] sm:$0xff] }
0x1f85   :  { %13899 = vst.msk [vmem:[%s23470_s14 + $0x70] sm:$0xff] %vm4208_vm0, %v13851_v3  ;;  %v13854_v28 = vadd.f32 %v13794_v45, %v23598_v13  ;;  %v15607_v60 = vpop.f32.mrb[152].mxu1 }
0x1f86   :  { %v15608_v8 = vpop.f32.mrb[153].mxu1 }
0x1f87   :  { %13902 = vst.msk [vmem:[%s23470_s14 + $0x88] sm:$0xff] %vm4208_vm0, %v13854_v28  ;;  %v15609_v39 = vadd.f32 %v15608_v8, %v15607_v60  ;;  %v15610_v1 = vpop.f32.mrb[154].mxu1 }
0x1f88   :  { %v15611_v54 = vpop.f32.mrb[155].mxu1 }
0x1f89   :  { %v13799_v24 = vadd.f32 %v15609_v39, %v23358_v43  ;;  %v15612_v19 = vadd.f32 %v15611_v54, %v15610_v1 }
0x1f8b   :  { %v13857_v50 = vadd.f32 %v13799_v24, %v23599_v37  ;;  %v13802_v16 = vadd.f32 %v15612_v19, %v23358_v43 }
0x1f8d   :  { %13905 = vst.msk [vmem:[%s23470_s14 + $0xa0] sm:$0xff] %vm4208_vm0, %v13857_v50  ;;  %v13860_v62 = vadd.f32 %v13802_v16, %v23600_v18  ;;  %v15613_v6 = vpop.f32.mrb[156].mxu1 }
0x1f8e   :  { %v15614_v44 = vpop.f32.mrb[157].mxu1 }
0x1f8f   :  { %13908 = vst.msk [vmem:[%s23470_s14 + $0xb8] sm:$0xff] %vm4208_vm0, %v13860_v62  ;;  %v15615_v42 = vadd.f32 %v15614_v44, %v15613_v6  ;;  %v15616_v26 = vpop.f32.mrb[158].mxu1 }
0x1f90   :  { %v15617_v25 = vpop.f32.mrb[159].mxu1 }
0x1f91   :  { %v13807_v63 = vadd.f32 %v15615_v42, %v23358_v43  ;;  %v15618_v57 = vadd.f32 %v15617_v25, %v15616_v26 }
0x1f93   :  { %v13863_v22 = vadd.f32 %v13807_v63, %v23601_v34  ;;  %v13810_v52 = vadd.f32 %v15618_v57, %v23358_v43 }
0x1f95   :  { %13911 = vst.msk [vmem:[%s23470_s14 + $0xd0] sm:$0xff] %vm4208_vm0, %v13863_v22  ;;  %v13866_v0 = vadd.f32 %v13810_v52, %v23602_v12  ;;  %v15619_v29 = vpop.f32.mrb[160].mxu1 }
0x1f96   :  { %v15620_v36 = vpop.f32.mrb[161].mxu1 }
0x1f97   :  { %13914 = vst.msk [vmem:[%s23470_s14 + $0xe8] sm:$0xff] %vm4208_vm0, %v13866_v0  ;;  %v15621_v38 = vadd.f32 %v15620_v36, %v15619_v29  ;;  %v15622_v49 = vpop.f32.mrb[162].mxu1 }
0x1f98   :  { %v15623_v5 = vpop.f32.mrb[163].mxu1 }
0x1f99   :  { %v13815_v15 = vadd.f32 %v15621_v38, %v23358_v43  ;;  %v15624_v47 = vadd.f32 %v15623_v5, %v15622_v49 }
0x1f9b   :  { %v13869_v30 = vadd.f32 %v13815_v15, %v23603_v31  ;;  %v13818_v35 = vadd.f32 %v15624_v47, %v23358_v43 }
0x1f9d   :  { %13917 = vst.msk [vmem:[%s23470_s14 + $0x100] sm:$0xff] %vm4208_vm0, %v13869_v30  ;;  %v13872_v58 = vadd.f32 %v13818_v35, %v23604_v4  ;;  %v15625_v51 = vpop.f32.mrb[164].mxu1 }
0x1f9e   :  { %v15626_v41 = vpop.f32.mrb[165].mxu1 }
0x1f9f   :  { %13920 = vst.msk [vmem:[%s23470_s14 + $0x118] sm:$0xff] %vm4208_vm0, %v13872_v58  ;;  %v15627_v33 = vadd.f32 %v15626_v41, %v15625_v51  ;;  %v15628_v27 = vpop.f32.mrb[166].mxu1 }
0x1fa0   :  { %v15629_v9 = vpop.f32.mrb[167].mxu1 }
0x1fa1   :  { %v13823_v56 = vadd.f32 %v15627_v33, %v23358_v43  ;;  %v15630_v59 = vadd.f32 %v15629_v9, %v15628_v27 }
0x1fa3   :  { %v13875_v14 = vadd.f32 %v13823_v56, %v23605_v20  ;;  %v13826_v17 = vadd.f32 %v15630_v59, %v23358_v43 }
0x1fa5   :  { %13923 = vst.msk [vmem:[%s23470_s14 + $0x130] sm:$0xff] %vm4208_vm0, %v13875_v14  ;;  %v13878_v61 = vadd.f32 %v13826_v17, %v23606_v40  ;;  %v15631_v48 = vpop.f32.mrb[168].mxu1 }
0x1fa6   :  { %v15632_v11 = vpop.f32.mrb[169].mxu1 }
0x1fa7   :  { %13926 = vst.msk [vmem:[%s23470_s14 + $0x148] sm:$0xff] %vm4208_vm0, %v13878_v61  ;;  %v15633_v21 = vadd.f32 %v15632_v11, %v15631_v48  ;;  %v15634_v32 = vpop.f32.mrb[170].mxu1 }
0x1fa8   :  { %v15635_v46 = vpop.f32.mrb[171].mxu1 }
0x1fa9   :  { %v13831_v55 = vadd.f32 %v15633_v21, %v23358_v43  ;;  %v15636_v10 = vadd.f32 %v15635_v46, %v15634_v32 }
0x1fab   :  { %v13881_v23 = vadd.f32 %v13831_v55, %v23607_v2  ;;  %v13834_v53 = vadd.f32 %v15636_v10, %v23358_v43 }
0x1fad   :  { %13929 = vst.msk [vmem:[%s23470_s14 + $0x160] sm:$0xff] %vm4208_vm0, %v13881_v23  ;;  %v13884_v3 = vadd.f32 %v13834_v53, %v23608_v7 }
0x1faf   :  { %13932 = vst.msk [vmem:[%s23470_s14 + $0x178] sm:$0xff] %vm4208_vm0, %v13884_v3 }

</bundles_post_ra>
